<compile_context>
chip_gen: v6e
topology: v6e:2x2x1
jax: 0.10.0
libtpu: 0.0.40
codegen_flags: <defaults>
</compile_context>

<pallas_src>
import functools

import jax
import jax.numpy as jnp
from jax.experimental import pallas as pl
from jax.experimental.pallas import tpu as pltpu


# ----------------------------------------------------------------------------
# helpers
# ----------------------------------------------------------------------------
def _round_up(x, m):
    return ((x + m - 1) // m) * m


def _vmem_capacity_bytes():
    try:
        return int(pltpu.get_tpu_info().vmem_capacity_bytes)
    except Exception:  # conservative fallback (v5e/v6e physical VMEM)
        return 128 * 1024 * 1024


def _choose_tile(n, max_tile=4096):
    """Lane-axis tile for the flattened spatial dim.

    Prefer the largest tile <= max_tile that divides n exactly and yields
    >= 4 grid steps (>= 2 buffered steps per TensorCore on v7x), then >= 2,
    then any exact divisor.  Fallback: largest tile with minimal padding.
    """
    candidates = [t for t in (4096, 2048, 1024, 512, 256, 128) if t <= max_tile]
    for min_steps in (4, 2, 1):
        for t in candidates:
            if n % t == 0 and n // t >= min_steps:
                return t, n
    best = None
    for t in candidates:
        n_pad = pl.cdiv(n, t) * t
        waste = n_pad - n
        if best is None or waste < best[2] or (waste == best[2] and t > best[0]):
            best = (t, n_pad, waste)
    return best[0], best[1]


# ----------------------------------------------------------------------------
# Pallas kernel 1: fused 2-layer pointwise MLP, channels-first
#   y = W2 @ gelu(W1 @ x + b1) + b2    with x: (Cin, Nt)
# ----------------------------------------------------------------------------
def _mlp2_kernel(x_ref, w1_ref, b1_ref, w2_ref, b2_ref, o_ref):
    h = jnp.dot(w1_ref[...], x_ref[...], preferred_element_type=jnp.float32)
    h = jax.nn.gelu(h + b1_ref[...])
    y = jnp.dot(w2_ref[...], h, preferred_element_type=jnp.float32)
    o_ref[...] = (y + b2_ref[...]).astype(o_ref.dtype)


def fused_mlp2(x_cf, w1t, b1, w2t, b2):
    """x_cf: (Cin, N); w1t: (Cmid, Cin); b1: (Cmid, 1); w2t: (Cout, Cmid)."""
    c_in, n = x_cf.shape
    c_mid = w1t.shape[0]
    c_out = w2t.shape[0]
    # nt capped at 512: the GELU intermediate h is (c_mid, nt) f32 and must
    # stay vreg-resident (nt=1024 would fill the whole 64-vreg file -> spill).
    nt, n_pad = _choose_tile(n, max_tile=512)
    if n_pad != n:
        x_cf = jnp.pad(x_cf, ((0, 0), (0, n_pad - n)))
    out = pl.pallas_call(
        _mlp2_kernel,
        out_shape=jax.ShapeDtypeStruct((c_out, n_pad), jnp.float32),
        grid_spec=pltpu.PrefetchScalarGridSpec(
            num_scalar_prefetch=0,
            grid=(n_pad // nt,),
            in_specs=[
                pl.BlockSpec((c_in, nt), lambda i: (0, i)),
                pl.BlockSpec((c_mid, c_in), lambda i: (0, 0)),
                pl.BlockSpec((c_mid, 1), lambda i: (0, 0)),
                pl.BlockSpec((c_out, c_mid), lambda i: (0, 0)),
                pl.BlockSpec((c_out, 1), lambda i: (0, 0)),
            ],
            out_specs=pl.BlockSpec((c_out, nt), lambda i: (0, i)),
        ),
        compiler_params=pltpu.CompilerParams(
            dimension_semantics=("parallel",)),
    )(x_cf, w1t, b1, w2t, b2)
    return out[:, :n] if n_pad != n else out


# ----------------------------------------------------------------------------
# Pallas kernel 2: fused skip conv1x1 + residual add (+ GELU), channels-first
#   y = gelu?(spec + W @ x + b)        with x, spec: (C, Nt)
# ----------------------------------------------------------------------------
def _skip_res_kernel(x_ref, s_ref, w_ref, b_ref, o_ref, *, apply_gelu):
    y = jnp.dot(w_ref[...], x_ref[...], preferred_element_type=jnp.float32)
    y = y + b_ref[...] + s_ref[...]
    if apply_gelu:
        y = jax.nn.gelu(y)
    o_ref[...] = y.astype(o_ref.dtype)


def fused_skip_residual(x_cf, spec_cf, wt, b, *, apply_gelu):
    c_in, n = x_cf.shape
    c_out = wt.shape[0]
    nt, n_pad = _choose_tile(n, max_tile=2048)
    if n_pad != n:
        x_cf = jnp.pad(x_cf, ((0, 0), (0, n_pad - n)))
        spec_cf = jnp.pad(spec_cf, ((0, 0), (0, n_pad - n)))
    extra = {}
    if c_in == c_out and x_cf.dtype == jnp.float32:
        # donate the activation buffer into the output (same shape/dtype,
        # same per-step block index -> safe read-then-write per tile).
        extra["input_output_aliases"] = {0: 0}
    out = pl.pallas_call(
        functools.partial(_skip_res_kernel, apply_gelu=apply_gelu),
        out_shape=jax.ShapeDtypeStruct((c_out, n_pad), jnp.float32),
        grid_spec=pltpu.PrefetchScalarGridSpec(
            num_scalar_prefetch=0,
            grid=(n_pad // nt,),
            in_specs=[
                pl.BlockSpec((c_in, nt), lambda i: (0, i)),
                pl.BlockSpec((c_out, nt), lambda i: (0, i)),
                pl.BlockSpec((c_out, c_in), lambda i: (0, 0)),
                pl.BlockSpec((c_out, 1), lambda i: (0, 0)),
            ],
            out_specs=pl.BlockSpec((c_out, nt), lambda i: (0, i)),
        ),
        compiler_params=pltpu.CompilerParams(
            dimension_semantics=("parallel",)),
        **extra,
    )(x_cf, spec_cf, wt, b)
    return out[:, :n] if n_pad != n else out


# ----------------------------------------------------------------------------
# Pallas kernel 3: mode-batched complex spectral channel mixing
#   yr[m] = xr[m] @ wr[m] - xi[m] @ wi[m]
#   yi[m] = xr[m] @ wi[m] + xi[m] @ wr[m]
# Weights arrive in bfloat16 (HBM-bound kernel); accumulate in f32.
# ----------------------------------------------------------------------------
def _spectral_mix_kernel(xr_ref, xi_ref, wr_ref, wi_ref, yr_ref, yi_ref):
    xr = xr_ref[...]
    xi = xi_ref[...]
    wr = wr_ref[...].astype(jnp.float32)
    wi = wi_ref[...].astype(jnp.float32)
    yr_ref[...] = (
        jnp.einsum("mbc,mcd->mbd", xr, wr, preferred_element_type=jnp.float32)
        - jnp.einsum("mbc,mcd->mbd", xi, wi, preferred_element_type=jnp.float32))
    yi_ref[...] = (
        jnp.einsum("mbc,mcd->mbd", xr, wi, preferred_element_type=jnp.float32)
        + jnp.einsum("mbc,mcd->mbd", xi, wr, preferred_element_type=jnp.float32))


def spectral_mix(xr, xi, wr, wi):
    """xr, xi: (M, B, C) f32; wr, wi: (M, C, Cout) bf16 -> yr, yi (M, B, Cout)."""
    m_total, b, c = xr.shape
    c_out = wr.shape[-1]
    w_itemsize = jnp.dtype(wr.dtype).itemsize

    # VMEM-aware mode tile: a (mt, C, Cout) weight block is lane-padded
    # Cout -> round_up(Cout, 128) in VMEM; budget ~1/16 of physical VMEM for
    # one (wr, wi) buffer pair (double-buffering covered in the limit below).
    vmem_cap = _vmem_capacity_bytes()
    w_bytes_per_mode = 2 * c * _round_up(c_out, 128) * w_itemsize
    budget = vmem_cap // 16
    mt = int(max(1, min(m_total, budget // max(w_bytes_per_mode, 1))))

    # Pad M to a multiple of mt (no divisor hunting -> no mt=1 pathology).
    m_pad = pl.cdiv(m_total, mt) * mt
    if m_pad != m_total:
        pad = ((0, m_pad - m_total), (0, 0), (0, 0))
        xr = jnp.pad(xr, pad)
        xi = jnp.pad(xi, pad)
        wr = jnp.pad(wr, pad)
        wi = jnp.pad(wi, pad)

    b_pad = _round_up(b, 8)
    act_bytes = mt * b_pad * _round_up(c, 128) * 4
    out_bytes = mt * b_pad * _round_up(c_out, 128) * 4
    est = 2 * (mt * w_bytes_per_mode + 2 * act_bytes + 2 * out_bytes) + (8 << 20)
    vmem_limit = int(min(int(0.85 * vmem_cap), max(32 << 20, est)))

    yr, yi = pl.pallas_call(
        _spectral_mix_kernel,
        out_shape=(jax.ShapeDtypeStruct((m_pad, b, c_out), jnp.float32),
                   jax.ShapeDtypeStruct((m_pad, b, c_out), jnp.float32)),
        grid_spec=pltpu.PrefetchScalarGridSpec(
            num_scalar_prefetch=0,
            grid=(m_pad // mt,),
            in_specs=[
                pl.BlockSpec((mt, b, c), lambda i: (i, 0, 0)),
                pl.BlockSpec((mt, b, c), lambda i: (i, 0, 0)),
                pl.BlockSpec((mt, c, c_out), lambda i: (i, 0, 0)),
                pl.BlockSpec((mt, c, c_out), lambda i: (i, 0, 0)),
            ],
            out_specs=[pl.BlockSpec((mt, b, c_out), lambda i: (i, 0, 0)),
                       pl.BlockSpec((mt, b, c_out), lambda i: (i, 0, 0))],
        ),
        compiler_params=pltpu.CompilerParams(
            dimension_semantics=("parallel",),
            vmem_limit_bytes=vmem_limit),
    )(xr, xi, wr, wi)
    if m_pad != m_total:
        yr = yr[:m_total]
        yi = yi[:m_total]
    return yr, yi


# ----------------------------------------------------------------------------
# Spectral convolution (3D), channels-first:
#   rFFT -> 4 contiguous corner slices -> Pallas complex mixing
#   -> slice-update into zero spectrum -> irFFT.
# TODO(synk): FFT/IFFT have no Pallas equivalent; they run in plain JAX.
# ----------------------------------------------------------------------------
def spectral_conv3d(x_cf, wr, wi, modes):
    # x_cf: (C, B, D1, D2, D3) float32 ; wr, wi: (M, C, Cout) bf16
    c, b, d1, d2, d3 = x_cf.shape
    m1, m2, m3 = modes
    assert m1 % 2 == 0 and m2 % 2 == 0, "even modes expected along dims 1,2"
    h1, h2 = m1 // 2, m2 // 2
    assert 2 * h1 <= d1 and 2 * h2 <= d2, "modes exceed grid size"
    c_out = wr.shape[-1]

    x_ft = jnp.fft.rfftn(x_cf, axes=(2, 3, 4))        # (C, B, D1, D2, D3r)
    d3r = x_ft.shape[4]
    assert m3 <= d3r, "m3 exceeds rfft length"

    corners = [
        x_ft[:, :, :h1, :h2, :m3],
        x_ft[:, :, :h1, d2 - h2:, :m3],
        x_ft[:, :, d1 - h1:, :h2, :m3],
        x_ft[:, :, d1 - h1:, d2 - h2:, :m3],
    ]
    xs = jnp.stack(corners, axis=0)                    # (4, C, B, h1, h2, m3)
    # TODO(synk): this channels-to-last transpose (and the reverse below) is a
    # plain-XLA copy; second-order next to the spectral weight stream.
    xs = jnp.transpose(xs, (0, 3, 4, 5, 2, 1))         # (4, h1, h2, m3, B, C)
    m_total = 4 * h1 * h2 * m3
    xs = xs.reshape(m_total, b, c)
    xr = jnp.real(xs).astype(jnp.float32)
    xi = jnp.imag(xs).astype(jnp.float32)

    yr, yi = spectral_mix(xr, xi, wr, wi)              # (M, B, Cout) x 2
    y = jax.lax.complex(yr, yi)                        # complex64

    y = y.reshape(4, h1, h2, m3, b, c_out)
    y = jnp.transpose(y, (0, 5, 4, 1, 2, 3))           # (4, Cout, B, h1, h2, m3)

    out_ft = jnp.zeros((c_out, b, d1, d2, d3r), dtype=jnp.complex64)
    out_ft = out_ft.at[:, :, :h1, :h2, :m3].set(y[0])
    out_ft = out_ft.at[:, :, :h1, d2 - h2:, :m3].set(y[1])
    out_ft = out_ft.at[:, :, d1 - h1:, :h2, :m3].set(y[2])
    out_ft = out_ft.at[:, :, d1 - h1:, d2 - h2:, :m3].set(y[3])

    out = jnp.fft.irfftn(out_ft, s=(d1, d2, d3), axes=(2, 3, 4))
    return out.astype(jnp.float32)                     # (Cout, B, D1, D2, D3)


# ----------------------------------------------------------------------------
# Full TFNO forward (channels-first internally)
# ----------------------------------------------------------------------------
def tfno_forward(x, params, modes):
    # x: (B, Cin, D1, D2, D3) -> (B, 1, D1, D2, D3)
    b, c_in, d1, d2, d3 = x.shape
    n = b * d1 * d2 * d3
    x_cf = jnp.transpose(x, (1, 0, 2, 3, 4)).astype(jnp.float32)
    h = x_cf.reshape(c_in, n)

    # lifting MLP (fused): Cin -> lifting (GELU) -> hidden
    h = fused_mlp2(h, params["lift_w1"], params["lift_b1"],
                   params["lift_w2"], params["lift_b2"])
    hidden = h.shape[0]

    n_layers = params["skip_w"].shape[0]
    for layer in range(n_layers):
        h_grid = h.reshape(hidden, b, d1, d2, d3)
        spec = spectral_conv3d(h_grid, params["spec_wr"][layer],
                               params["spec_wi"][layer], modes)
        spec = spec.reshape(hidden, n)
        # fused: gelu?(spec + W_skip @ h + b_skip)
        h = fused_skip_residual(h, spec, params["skip_w"][layer],
                                params["skip_b"][layer],
                                apply_gelu=(layer < n_layers - 1))

    # projection MLP (fused): hidden -> projection (GELU) -> out_channels
    h = fused_mlp2(h, params["proj_w1"], params["proj_b1"],
                   params["proj_w2"], params["proj_b2"])

    out = h.reshape(-1, b, d1, d2, d3)                 # (Cout, B, D1, D2, D3)
    return jnp.transpose(out, (1, 0, 2, 3, 4))


# ----------------------------------------------------------------------------
# Deterministic synthetic parameters (weights stored channels-first; spectral
# weights kept as separate real/imag bf16 tensors)
# ----------------------------------------------------------------------------
def init_params(key, *, in_channels=2, hidden=32, out_channels=1,
                lifting_channels=64, projection_channels=64,
                n_layers=4, modes=(4, 4, 4)):
    m1, m2, m3 = modes
    assert m1 % 2 == 0 and m2 % 2 == 0
    m_total = m1 * m2 * m3
    keys = jax.random.split(key, 6 + n_layers)

    def lin_t(k, cin, cout):
        scale = 1.0 / jnp.sqrt(cin)
        kw, kb = jax.random.split(k)
        w = jax.random.uniform(kw, (cout, cin), jnp.float32, -scale, scale)
        b = jax.random.uniform(kb, (cout, 1), jnp.float32, -scale, scale)
        return w, b

    lift_w1, lift_b1 = lin_t(keys[0], in_channels, lifting_channels)
    lift_w2, lift_b2 = lin_t(keys[1], lifting_channels, hidden)
    proj_w1, proj_b1 = lin_t(keys[2], hidden, projection_channels)
    proj_w2, proj_b2 = lin_t(keys[3], projection_channels, out_channels)

    spec_scale = 1.0 / (hidden * hidden)
    wr = spec_scale * jax.random.normal(
        keys[4], (n_layers, m_total, hidden, hidden), jnp.float32)
    wi = spec_scale * jax.random.normal(
        keys[5], (n_layers, m_total, hidden, hidden), jnp.float32)
    # bf16 storage: spectral_mix is weight-HBM-bound; accumulation stays f32.
    spec_wr = wr.astype(jnp.bfloat16)
    spec_wi = wi.astype(jnp.bfloat16)

    skip_w, skip_b = [], []
    for layer in range(n_layers):
        w, bb = lin_t(keys[6 + layer], hidden, hidden)
        skip_w.append(w)
        skip_b.append(bb)

    return dict(
        lift_w1=lift_w1, lift_b1=lift_b1,
        lift_w2=lift_w2, lift_b2=lift_b2,
        proj_w1=proj_w1, proj_b1=proj_b1,
        proj_w2=proj_w2, proj_b2=proj_b2,
        spec_wr=spec_wr, spec_wi=spec_wi,
        skip_w=jnp.stack(skip_w), skip_b=jnp.stack(skip_b),
    )


if __name__ == "__main__":
    key = jax.random.PRNGKey(0)
    kx, kp = jax.random.split(key)

    # Small 3D problem consistent with TFNO(in_channels=2, out_channels=1).
    B, Cin, D = 2, 2, 8
    modes = (4, 4, 4)   # retained Fourier modes, capped for the small grid

    x = jax.random.normal(kx, (B, Cin, D, D, D), dtype=jnp.float32)
    params = init_params(kp, in_channels=Cin, hidden=32, out_channels=1,
                         modes=modes)

    fwd = jax.jit(functools.partial(tfno_forward, modes=modes))
    out = fwd(x, params)
    out = jax.block_until_ready(out)
    assert out.shape == (B, 1, D, D, D), out.shape
    assert jnp.all(jnp.isfinite(out))
    print("KERNEL_OK")
</pallas_src>

<mosaic_0001>
module attributes {stable_mosaic.version = 11 : i64} {
  func.func @_mlp2_kernel(%arg0: i32, %arg1: memref<2x256xf32, #tpu.memory_space<vmem>>, %arg2: memref<64x2xf32, #tpu.memory_space<vmem>>, %arg3: memref<64x1xf32, #tpu.memory_space<vmem>>, %arg4: memref<32x64xf32, #tpu.memory_space<vmem>>, %arg5: memref<32x1xf32, #tpu.memory_space<vmem>>, %arg6: memref<32x256xf32, #tpu.memory_space<vmem>>) attributes {dimension_semantics = [#tpu.dimension_semantics<parallel>], iteration_bounds = array<i64: 4>, scalar_prefetch = 0 : i64, scratch_operands = 0 : i64, tpu.core_type = #tpu.core_type<tc>, window_params = [{transform_indices = @transform_0, window_bounds = array<i64: 2, 256>}, {pipeline_mode = #tpu.pipeline_mode<synchronous>, transform_indices = @transform_1, window_bounds = array<i64: 64, 2>}, {pipeline_mode = #tpu.pipeline_mode<synchronous>, transform_indices = @transform_2, window_bounds = array<i64: 64, 1>}, {pipeline_mode = #tpu.pipeline_mode<synchronous>, transform_indices = @transform_3, window_bounds = array<i64: 32, 64>}, {pipeline_mode = #tpu.pipeline_mode<synchronous>, transform_indices = @transform_4, window_bounds = array<i64: 32, 1>}, {transform_indices = @transform_5, window_bounds = array<i64: 32, 256>}]} {
    %c0 = arith.constant 0 : index
    %c0_0 = arith.constant 0 : index
    %0 = vector.load %arg2[%c0, %c0_0] : memref<64x2xf32, #tpu.memory_space<vmem>>, vector<64x2xf32>
    %c0_1 = arith.constant 0 : index
    %c0_2 = arith.constant 0 : index
    %1 = vector.load %arg1[%c0_1, %c0_2] : memref<2x256xf32, #tpu.memory_space<vmem>>, vector<2x256xf32>
    %cst = arith.constant dense<0.000000e+00> : vector<64x256xf32>
    %2 = tpu.matmul %0, %1, %cst {dimension_numbers = #tpu.dot_dimension_numbers<[1], [0], [0], [1], [0, 0, 1, 1], [], []>} : vector<64x2xf32>, vector<2x256xf32>, vector<64x256xf32> -> vector<64x256xf32>
    %c0_3 = arith.constant 0 : index
    %c0_4 = arith.constant 0 : index
    %3 = vector.load %arg3[%c0_3, %c0_4] : memref<64x1xf32, #tpu.memory_space<vmem>>, vector<64x1xf32>
    %4 = vector.broadcast %3 : vector<64x1xf32> to vector<64x256xf32>
    %5 = arith.addf %2, %4 : vector<64x256xf32>
    %6 = arith.mulf %5, %5 : vector<64x256xf32>
    %7 = arith.mulf %5, %6 : vector<64x256xf32>
    %cst_5 = arith.constant 4.471500e-02 : f32
    %8 = vector.broadcast %cst_5 : f32 to vector<64x256xf32>
    %9 = arith.mulf %8, %7 : vector<64x256xf32>
    %10 = arith.addf %5, %9 : vector<64x256xf32>
    %cst_6 = arith.constant 0.797884583 : f32
    %11 = vector.broadcast %cst_6 : f32 to vector<64x256xf32>
    %12 = arith.mulf %11, %10 : vector<64x256xf32>
    %13 = math.tanh %12 : vector<64x256xf32>
    %cst_7 = arith.constant 1.000000e+00 : f32
    %14 = vector.broadcast %cst_7 : f32 to vector<64x256xf32>
    %15 = arith.addf %14, %13 : vector<64x256xf32>
    %cst_8 = arith.constant 5.000000e-01 : f32
    %16 = vector.broadcast %cst_8 : f32 to vector<64x256xf32>
    %17 = arith.mulf %16, %15 : vector<64x256xf32>
    %18 = arith.mulf %5, %17 : vector<64x256xf32>
    %c0_9 = arith.constant 0 : index
    %c0_10 = arith.constant 0 : index
    %19 = vector.load %arg4[%c0_9, %c0_10] : memref<32x64xf32, #tpu.memory_space<vmem>>, vector<32x64xf32>
    %cst_11 = arith.constant dense<0.000000e+00> : vector<32x256xf32>
    %20 = tpu.matmul %19, %18, %cst_11 {dimension_numbers = #tpu.dot_dimension_numbers<[1], [0], [0], [1], [0, 0, 1, 1], [], []>} : vector<32x64xf32>, vector<64x256xf32>, vector<32x256xf32> -> vector<32x256xf32>
    %c0_12 = arith.constant 0 : index
    %c0_13 = arith.constant 0 : index
    %21 = vector.load %arg5[%c0_12, %c0_13] : memref<32x1xf32, #tpu.memory_space<vmem>>, vector<32x1xf32>
    %22 = vector.broadcast %21 : vector<32x1xf32> to vector<32x256xf32>
    %23 = arith.addf %20, %22 : vector<32x256xf32>
    %c0_14 = arith.constant 0 : index
    %c0_15 = arith.constant 0 : index
    %24 = vector.load %arg6[%c0_14, %c0_15] : memref<32x256xf32, #tpu.memory_space<vmem>>, vector<32x256xf32>
    tpu.vector_store %arg6[%c0_14, %c0_15], %23 {strides = array<i32>} : memref<32x256xf32, #tpu.memory_space<vmem>>, vector<32x256xf32>,
    return
  }
  func.func @transform_0(%arg0: i32) -> (i32, i32) {
    %c0_i32 = arith.constant 0 : i32
    %c0_i32_0 = arith.constant 0 : i32
    return %c0_i32, %arg0 : i32, i32
  }
  func.func @transform_1(%arg0: i32) -> (i32, i32) {
    %c0_i32 = arith.constant 0 : i32
    %c0_i32_0 = arith.constant 0 : i32
    %c0_i32_1 = arith.constant 0 : i32
    return %c0_i32, %c0_i32_0 : i32, i32
  }
  func.func @transform_2(%arg0: i32) -> (i32, i32) {
    %c0_i32 = arith.constant 0 : i32
    %c0_i32_0 = arith.constant 0 : i32
    %c0_i32_1 = arith.constant 0 : i32
    return %c0_i32, %c0_i32_0 : i32, i32
  }
  func.func @transform_3(%arg0: i32) -> (i32, i32) {
    %c0_i32 = arith.constant 0 : i32
    %c0_i32_0 = arith.constant 0 : i32
    %c0_i32_1 = arith.constant 0 : i32
    return %c0_i32, %c0_i32_0 : i32, i32
  }
  func.func @transform_4(%arg0: i32) -> (i32, i32) {
    %c0_i32 = arith.constant 0 : i32
    %c0_i32_0 = arith.constant 0 : i32
    %c0_i32_1 = arith.constant 0 : i32
    return %c0_i32, %c0_i32_0 : i32, i32
  }
  func.func @transform_5(%arg0: i32) -> (i32, i32) {
    %c0_i32 = arith.constant 0 : i32
    %c0_i32_0 = arith.constant 0 : i32
    return %c0_i32, %arg0 : i32, i32
  }
}

module attributes {stable_mosaic.version = 11 : i64} {
  func.func @_spectral_mix_kernel(%arg0: i32, %arg1: memref<64x2x32xf32, #tpu.memory_space<vmem>>, %arg2: memref<64x2x32xf32, #tpu.memory_space<vmem>>, %arg3: memref<64x32x32xbf16, #tpu.memory_space<vmem>>, %arg4: memref<64x32x32xbf16, #tpu.memory_space<vmem>>, %arg5: memref<64x2x32xf32, #tpu.memory_space<vmem>>, %arg6: memref<64x2x32xf32, #tpu.memory_space<vmem>>) attributes {dimension_semantics = [#tpu.dimension_semantics<parallel>], iteration_bounds = array<i64: 1>, scalar_prefetch = 0 : i64, scratch_operands = 0 : i64, tpu.core_type = #tpu.core_type<tc>, window_params = [{transform_indices = @transform_0, window_bounds = array<i64: 64, 2, 32>}, {transform_indices = @transform_1, window_bounds = array<i64: 64, 2, 32>}, {transform_indices = @transform_2, window_bounds = array<i64: 64, 32, 32>}, {transform_indices = @transform_3, window_bounds = array<i64: 64, 32, 32>}, {transform_indices = @transform_4, window_bounds = array<i64: 64, 2, 32>}, {transform_indices = @transform_5, window_bounds = array<i64: 64, 2, 32>}]} {
    %c0 = arith.constant 0 : index
    %c0_0 = arith.constant 0 : index
    %c0_1 = arith.constant 0 : index
    %0 = vector.load %arg1[%c0, %c0_0, %c0_1] : memref<64x2x32xf32, #tpu.memory_space<vmem>>, vector<64x2x32xf32>
    %c0_2 = arith.constant 0 : index
    %c0_3 = arith.constant 0 : index
    %c0_4 = arith.constant 0 : index
    %1 = vector.load %arg2[%c0_2, %c0_3, %c0_4] : memref<64x2x32xf32, #tpu.memory_space<vmem>>, vector<64x2x32xf32>
    %c0_5 = arith.constant 0 : index
    %c0_6 = arith.constant 0 : index
    %c0_7 = arith.constant 0 : index
    %2 = vector.load %arg3[%c0_5, %c0_6, %c0_7] : memref<64x32x32xbf16, #tpu.memory_space<vmem>>, vector<64x32x32xbf16>
    %3 = arith.extf %2 : vector<64x32x32xbf16> to vector<64x32x32xf32>
    %c0_8 = arith.constant 0 : index
    %c0_9 = arith.constant 0 : index
    %c0_10 = arith.constant 0 : index
    %4 = vector.load %arg4[%c0_8, %c0_9, %c0_10] : memref<64x32x32xbf16, #tpu.memory_space<vmem>>, vector<64x32x32xbf16>
    %5 = arith.extf %4 : vector<64x32x32xbf16> to vector<64x32x32xf32>
    "tpu.trace_start"() <{level = 10 : i32, message = "mbc,mcd->mbd"}> : () -> ()
    %cst = arith.constant dense<0.000000e+00> : vector<64x2x32xf32>
    %6 = tpu.matmul %0, %3, %cst {dimension_numbers = #tpu.dot_dimension_numbers<[2], [1], [1], [2], [0, 0, 0, 1, 1, 2], [0], [0]>} : vector<64x2x32xf32>, vector<64x32x32xf32>, vector<64x2x32xf32> -> vector<64x2x32xf32>
    %cst_11 = arith.constant dense<0.000000e+00> : vector<64x2x32xf32>
    %7 = tpu.matmul %1, %5, %cst_11 {dimension_numbers = #tpu.dot_dimension_numbers<[2], [1], [1], [2], [0, 0, 0, 1, 1, 2], [0], [0]>} : vector<64x2x32xf32>, vector<64x32x32xf32>, vector<64x2x32xf32> -> vector<64x2x32xf32>
    "tpu.trace_stop"() : () -> ()
    %8 = arith.subf %6, %7 : vector<64x2x32xf32>
    %c0_12 = arith.constant 0 : index
    %c0_13 = arith.constant 0 : index
    %c0_14 = arith.constant 0 : index
    %9 = vector.load %arg5[%c0_12, %c0_13, %c0_14] : memref<64x2x32xf32, #tpu.memory_space<vmem>>, vector<64x2x32xf32>
    tpu.vector_store %arg5[%c0_12, %c0_13, %c0_14], %8 {strides = array<i32>} : memref<64x2x32xf32, #tpu.memory_space<vmem>>, vector<64x2x32xf32>,
    "tpu.trace_start"() <{level = 10 : i32, message = "mbc,mcd->mbd"}> : () -> ()
    %cst_15 = arith.constant dense<0.000000e+00> : vector<64x2x32xf32>
    %10 = tpu.matmul %0, %5, %cst_15 {dimension_numbers = #tpu.dot_dimension_numbers<[2], [1], [1], [2], [0, 0, 0, 1, 1, 2], [0], [0]>} : vector<64x2x32xf32>, vector<64x32x32xf32>, vector<64x2x32xf32> -> vector<64x2x32xf32>
    %cst_16 = arith.constant dense<0.000000e+00> : vector<64x2x32xf32>
    %11 = tpu.matmul %1, %3, %cst_16 {dimension_numbers = #tpu.dot_dimension_numbers<[2], [1], [1], [2], [0, 0, 0, 1, 1, 2], [0], [0]>} : vector<64x2x32xf32>, vector<64x32x32xf32>, vector<64x2x32xf32> -> vector<64x2x32xf32>
    "tpu.trace_stop"() : () -> ()
    %12 = arith.addf %10, %11 : vector<64x2x32xf32>
    %c0_17 = arith.constant 0 : index
    %c0_18 = arith.constant 0 : index
    %c0_19 = arith.constant 0 : index
    %13 = vector.load %arg6[%c0_17, %c0_18, %c0_19] : memref<64x2x32xf32, #tpu.memory_space<vmem>>, vector<64x2x32xf32>
    tpu.vector_store %arg6[%c0_17, %c0_18, %c0_19], %12 {strides = array<i32>} : memref<64x2x32xf32, #tpu.memory_space<vmem>>, vector<64x2x32xf32>,
    return
  }
  func.func @transform_0(%arg0: i32) -> (i32, i32, i32) {
    %c0_i32 = arith.constant 0 : i32
    %c0_i32_0 = arith.constant 0 : i32
    %c0_i32_1 = arith.constant 0 : i32
    return %arg0, %c0_i32, %c0_i32_0 : i32, i32, i32
  }
  func.func @transform_1(%arg0: i32) -> (i32, i32, i32) {
    %c0_i32 = arith.constant 0 : i32
    %c0_i32_0 = arith.constant 0 : i32
    %c0_i32_1 = arith.constant 0 : i32
    return %arg0, %c0_i32, %c0_i32_0 : i32, i32, i32
  }
  func.func @transform_2(%arg0: i32) -> (i32, i32, i32) {
    %c0_i32 = arith.constant 0 : i32
    %c0_i32_0 = arith.constant 0 : i32
    %c0_i32_1 = arith.constant 0 : i32
    return %arg0, %c0_i32, %c0_i32_0 : i32, i32, i32
  }
  func.func @transform_3(%arg0: i32) -> (i32, i32, i32) {
    %c0_i32 = arith.constant 0 : i32
    %c0_i32_0 = arith.constant 0 : i32
    %c0_i32_1 = arith.constant 0 : i32
    return %arg0, %c0_i32, %c0_i32_0 : i32, i32, i32
  }
  func.func @transform_4(%arg0: i32) -> (i32, i32, i32) {
    %c0_i32 = arith.constant 0 : i32
    %c0_i32_0 = arith.constant 0 : i32
    %c0_i32_1 = arith.constant 0 : i32
    return %arg0, %c0_i32, %c0_i32_0 : i32, i32, i32
  }
  func.func @transform_5(%arg0: i32) -> (i32, i32, i32) {
    %c0_i32 = arith.constant 0 : i32
    %c0_i32_0 = arith.constant 0 : i32
    %c0_i32_1 = arith.constant 0 : i32
    return %arg0, %c0_i32, %c0_i32_0 : i32, i32, i32
  }
}

module attributes {stable_mosaic.version = 11 : i64} {
  func.func @_skip_res_kernel(%arg0: i32, %arg1: memref<32x256xf32, #tpu.memory_space<vmem>>, %arg2: memref<32x256xf32, #tpu.memory_space<vmem>>, %arg3: memref<32x32xf32, #tpu.memory_space<vmem>>, %arg4: memref<32x1xf32, #tpu.memory_space<vmem>>, %arg5: memref<32x256xf32, #tpu.memory_space<vmem>>) attributes {dimension_semantics = [#tpu.dimension_semantics<parallel>], iteration_bounds = array<i64: 4>, scalar_prefetch = 0 : i64, scratch_operands = 0 : i64, tpu.core_type = #tpu.core_type<tc>, window_params = [{transform_indices = @transform_0, window_bounds = array<i64: 32, 256>}, {transform_indices = @transform_1, window_bounds = array<i64: 32, 256>}, {pipeline_mode = #tpu.pipeline_mode<synchronous>, transform_indices = @transform_2, window_bounds = array<i64: 32, 32>}, {pipeline_mode = #tpu.pipeline_mode<synchronous>, transform_indices = @transform_3, window_bounds = array<i64: 32, 1>}, {transform_indices = @transform_4, window_bounds = array<i64: 32, 256>}]} {
    %c0 = arith.constant 0 : index
    %c0_0 = arith.constant 0 : index
    %0 = vector.load %arg3[%c0, %c0_0] : memref<32x32xf32, #tpu.memory_space<vmem>>, vector<32x32xf32>
    %c0_1 = arith.constant 0 : index
    %c0_2 = arith.constant 0 : index
    %1 = vector.load %arg1[%c0_1, %c0_2] : memref<32x256xf32, #tpu.memory_space<vmem>>, vector<32x256xf32>
    %cst = arith.constant dense<0.000000e+00> : vector<32x256xf32>
    %2 = tpu.matmul %0, %1, %cst {dimension_numbers = #tpu.dot_dimension_numbers<[1], [0], [0], [1], [0, 0, 1, 1], [], []>} : vector<32x32xf32>, vector<32x256xf32>, vector<32x256xf32> -> vector<32x256xf32>
    %c0_3 = arith.constant 0 : index
    %c0_4 = arith.constant 0 : index
    %3 = vector.load %arg4[%c0_3, %c0_4] : memref<32x1xf32, #tpu.memory_space<vmem>>, vector<32x1xf32>
    %4 = vector.broadcast %3 : vector<32x1xf32> to vector<32x256xf32>
    %5 = arith.addf %2, %4 : vector<32x256xf32>
    %c0_5 = arith.constant 0 : index
    %c0_6 = arith.constant 0 : index
    %6 = vector.load %arg2[%c0_5, %c0_6] : memref<32x256xf32, #tpu.memory_space<vmem>>, vector<32x256xf32>
    %7 = arith.addf %5, %6 : vector<32x256xf32>
    %8 = arith.mulf %7, %7 : vector<32x256xf32>
    %9 = arith.mulf %7, %8 : vector<32x256xf32>
    %cst_7 = arith.constant 4.471500e-02 : f32
    %10 = vector.broadcast %cst_7 : f32 to vector<32x256xf32>
    %11 = arith.mulf %10, %9 : vector<32x256xf32>
    %12 = arith.addf %7, %11 : vector<32x256xf32>
    %cst_8 = arith.constant 0.797884583 : f32
    %13 = vector.broadcast %cst_8 : f32 to vector<32x256xf32>
    %14 = arith.mulf %13, %12 : vector<32x256xf32>
    %15 = math.tanh %14 : vector<32x256xf32>
    %cst_9 = arith.constant 1.000000e+00 : f32
    %16 = vector.broadcast %cst_9 : f32 to vector<32x256xf32>
    %17 = arith.addf %16, %15 : vector<32x256xf32>
    %cst_10 = arith.constant 5.000000e-01 : f32
    %18 = vector.broadcast %cst_10 : f32 to vector<32x256xf32>
    %19 = arith.mulf %18, %17 : vector<32x256xf32>
    %20 = arith.mulf %7, %19 : vector<32x256xf32>
    %c0_11 = arith.constant 0 : index
    %c0_12 = arith.constant 0 : index
    %21 = vector.load %arg5[%c0_11, %c0_12] : memref<32x256xf32, #tpu.memory_space<vmem>>, vector<32x256xf32>
    tpu.vector_store %arg5[%c0_11, %c0_12], %20 {strides = array<i32>} : memref<32x256xf32, #tpu.memory_space<vmem>>, vector<32x256xf32>,
    return
  }
  func.func @transform_0(%arg0: i32) -> (i32, i32) {
    %c0_i32 = arith.constant 0 : i32
    %c0_i32_0 = arith.constant 0 : i32
    return %c0_i32, %arg0 : i32, i32
  }
  func.func @transform_1(%arg0: i32) -> (i32, i32) {
    %c0_i32 = arith.constant 0 : i32
    %c0_i32_0 = arith.constant 0 : i32
    return %c0_i32, %arg0 : i32, i32
  }
  func.func @transform_2(%arg0: i32) -> (i32, i32) {
    %c0_i32 = arith.constant 0 : i32
    %c0_i32_0 = arith.constant 0 : i32
    %c0_i32_1 = arith.constant 0 : i32
    return %c0_i32, %c0_i32_0 : i32, i32
  }
  func.func @transform_3(%arg0: i32) -> (i32, i32) {
    %c0_i32 = arith.constant 0 : i32
    %c0_i32_0 = arith.constant 0 : i32
    %c0_i32_1 = arith.constant 0 : i32
    return %c0_i32, %c0_i32_0 : i32, i32
  }
  func.func @transform_4(%arg0: i32) -> (i32, i32) {
    %c0_i32 = arith.constant 0 : i32
    %c0_i32_0 = arith.constant 0 : i32
    return %c0_i32, %arg0 : i32, i32
  }
}

module attributes {stable_mosaic.version = 11 : i64} {
  func.func @_skip_res_kernel(%arg0: i32, %arg1: memref<32x256xf32, #tpu.memory_space<vmem>>, %arg2: memref<32x256xf32, #tpu.memory_space<vmem>>, %arg3: memref<32x32xf32, #tpu.memory_space<vmem>>, %arg4: memref<32x1xf32, #tpu.memory_space<vmem>>, %arg5: memref<32x256xf32, #tpu.memory_space<vmem>>) attributes {dimension_semantics = [#tpu.dimension_semantics<parallel>], iteration_bounds = array<i64: 4>, scalar_prefetch = 0 : i64, scratch_operands = 0 : i64, tpu.core_type = #tpu.core_type<tc>, window_params = [{transform_indices = @transform_0, window_bounds = array<i64: 32, 256>}, {transform_indices = @transform_1, window_bounds = array<i64: 32, 256>}, {pipeline_mode = #tpu.pipeline_mode<synchronous>, transform_indices = @transform_2, window_bounds = array<i64: 32, 32>}, {pipeline_mode = #tpu.pipeline_mode<synchronous>, transform_indices = @transform_3, window_bounds = array<i64: 32, 1>}, {transform_indices = @transform_4, window_bounds = array<i64: 32, 256>}]} {
    %c0 = arith.constant 0 : index
    %c0_0 = arith.constant 0 : index
    %0 = vector.load %arg3[%c0, %c0_0] : memref<32x32xf32, #tpu.memory_space<vmem>>, vector<32x32xf32>
    %c0_1 = arith.constant 0 : index
    %c0_2 = arith.constant 0 : index
    %1 = vector.load %arg1[%c0_1, %c0_2] : memref<32x256xf32, #tpu.memory_space<vmem>>, vector<32x256xf32>
    %cst = arith.constant dense<0.000000e+00> : vector<32x256xf32>
    %2 = tpu.matmul %0, %1, %cst {dimension_numbers = #tpu.dot_dimension_numbers<[1], [0], [0], [1], [0, 0, 1, 1], [], []>} : vector<32x32xf32>, vector<32x256xf32>, vector<32x256xf32> -> vector<32x256xf32>
    %c0_3 = arith.constant 0 : index
    %c0_4 = arith.constant 0 : index
    %3 = vector.load %arg4[%c0_3, %c0_4] : memref<32x1xf32, #tpu.memory_space<vmem>>, vector<32x1xf32>
    %4 = vector.broadcast %3 : vector<32x1xf32> to vector<32x256xf32>
    %5 = arith.addf %2, %4 : vector<32x256xf32>
    %c0_5 = arith.constant 0 : index
    %c0_6 = arith.constant 0 : index
    %6 = vector.load %arg2[%c0_5, %c0_6] : memref<32x256xf32, #tpu.memory_space<vmem>>, vector<32x256xf32>
    %7 = arith.addf %5, %6 : vector<32x256xf32>
    %c0_7 = arith.constant 0 : index
    %c0_8 = arith.constant 0 : index
    %8 = vector.load %arg5[%c0_7, %c0_8] : memref<32x256xf32, #tpu.memory_space<vmem>>, vector<32x256xf32>
    tpu.vector_store %arg5[%c0_7, %c0_8], %7 {strides = array<i32>} : memref<32x256xf32, #tpu.memory_space<vmem>>, vector<32x256xf32>,
    return
  }
  func.func @transform_0(%arg0: i32) -> (i32, i32) {
    %c0_i32 = arith.constant 0 : i32
    %c0_i32_0 = arith.constant 0 : i32
    return %c0_i32, %arg0 : i32, i32
  }
  func.func @transform_1(%arg0: i32) -> (i32, i32) {
    %c0_i32 = arith.constant 0 : i32
    %c0_i32_0 = arith.constant 0 : i32
    return %c0_i32, %arg0 : i32, i32
  }
  func.func @transform_2(%arg0: i32) -> (i32, i32) {
    %c0_i32 = arith.constant 0 : i32
    %c0_i32_0 = arith.constant 0 : i32
    %c0_i32_1 = arith.constant 0 : i32
    return %c0_i32, %c0_i32_0 : i32, i32
  }
  func.func @transform_3(%arg0: i32) -> (i32, i32) {
    %c0_i32 = arith.constant 0 : i32
    %c0_i32_0 = arith.constant 0 : i32
    %c0_i32_1 = arith.constant 0 : i32
    return %c0_i32, %c0_i32_0 : i32, i32
  }
  func.func @transform_4(%arg0: i32) -> (i32, i32) {
    %c0_i32 = arith.constant 0 : i32
    %c0_i32_0 = arith.constant 0 : i32
    return %c0_i32, %arg0 : i32, i32
  }
}

module attributes {stable_mosaic.version = 11 : i64} {
  func.func @_mlp2_kernel(%arg0: i32, %arg1: memref<32x256xf32, #tpu.memory_space<vmem>>, %arg2: memref<64x32xf32, #tpu.memory_space<vmem>>, %arg3: memref<64x1xf32, #tpu.memory_space<vmem>>, %arg4: memref<1x64xf32, #tpu.memory_space<vmem>>, %arg5: memref<1x1xf32, #tpu.memory_space<vmem>>, %arg6: memref<1x256xf32, #tpu.memory_space<vmem>>) attributes {dimension_semantics = [#tpu.dimension_semantics<parallel>], iteration_bounds = array<i64: 4>, scalar_prefetch = 0 : i64, scratch_operands = 0 : i64, tpu.core_type = #tpu.core_type<tc>, window_params = [{transform_indices = @transform_0, window_bounds = array<i64: 32, 256>}, {pipeline_mode = #tpu.pipeline_mode<synchronous>, transform_indices = @transform_1, window_bounds = array<i64: 64, 32>}, {pipeline_mode = #tpu.pipeline_mode<synchronous>, transform_indices = @transform_2, window_bounds = array<i64: 64, 1>}, {pipeline_mode = #tpu.pipeline_mode<synchronous>, transform_indices = @transform_3, window_bounds = array<i64: 1, 64>}, {pipeline_mode = #tpu.pipeline_mode<synchronous>, transform_indices = @transform_4, window_bounds = array<i64: 1, 1>}, {transform_indices = @transform_5, window_bounds = array<i64: 1, 256>}]} {
    %c0 = arith.constant 0 : index
    %c0_0 = arith.constant 0 : index
    %0 = vector.load %arg2[%c0, %c0_0] : memref<64x32xf32, #tpu.memory_space<vmem>>, vector<64x32xf32>
    %c0_1 = arith.constant 0 : index
    %c0_2 = arith.constant 0 : index
    %1 = vector.load %arg1[%c0_1, %c0_2] : memref<32x256xf32, #tpu.memory_space<vmem>>, vector<32x256xf32>
    %cst = arith.constant dense<0.000000e+00> : vector<64x256xf32>
    %2 = tpu.matmul %0, %1, %cst {dimension_numbers = #tpu.dot_dimension_numbers<[1], [0], [0], [1], [0, 0, 1, 1], [], []>} : vector<64x32xf32>, vector<32x256xf32>, vector<64x256xf32> -> vector<64x256xf32>
    %c0_3 = arith.constant 0 : index
    %c0_4 = arith.constant 0 : index
    %3 = vector.load %arg3[%c0_3, %c0_4] : memref<64x1xf32, #tpu.memory_space<vmem>>, vector<64x1xf32>
    %4 = vector.broadcast %3 : vector<64x1xf32> to vector<64x256xf32>
    %5 = arith.addf %2, %4 : vector<64x256xf32>
    %6 = arith.mulf %5, %5 : vector<64x256xf32>
    %7 = arith.mulf %5, %6 : vector<64x256xf32>
    %cst_5 = arith.constant 4.471500e-02 : f32
    %8 = vector.broadcast %cst_5 : f32 to vector<64x256xf32>
    %9 = arith.mulf %8, %7 : vector<64x256xf32>
    %10 = arith.addf %5, %9 : vector<64x256xf32>
    %cst_6 = arith.constant 0.797884583 : f32
    %11 = vector.broadcast %cst_6 : f32 to vector<64x256xf32>
    %12 = arith.mulf %11, %10 : vector<64x256xf32>
    %13 = math.tanh %12 : vector<64x256xf32>
    %cst_7 = arith.constant 1.000000e+00 : f32
    %14 = vector.broadcast %cst_7 : f32 to vector<64x256xf32>
    %15 = arith.addf %14, %13 : vector<64x256xf32>
    %cst_8 = arith.constant 5.000000e-01 : f32
    %16 = vector.broadcast %cst_8 : f32 to vector<64x256xf32>
    %17 = arith.mulf %16, %15 : vector<64x256xf32>
    %18 = arith.mulf %5, %17 : vector<64x256xf32>
    %c0_9 = arith.constant 0 : index
    %c0_10 = arith.constant 0 : index
    %19 = vector.load %arg4[%c0_9, %c0_10] : memref<1x64xf32, #tpu.memory_space<vmem>>, vector<1x64xf32>
    %cst_11 = arith.constant dense<0.000000e+00> : vector<1x256xf32>
    %20 = tpu.matmul %19, %18, %cst_11 {dimension_numbers = #tpu.dot_dimension_numbers<[1], [0], [0], [1], [0, 0, 1, 1], [], []>} : vector<1x64xf32>, vector<64x256xf32>, vector<1x256xf32> -> vector<1x256xf32>
    %c0_12 = arith.constant 0 : index
    %c0_13 = arith.constant 0 : index
    %21 = vector.load %arg5[%c0_12, %c0_13] : memref<1x1xf32, #tpu.memory_space<vmem>>, vector<1x1xf32>
    %22 = vector.broadcast %21 : vector<1x1xf32> to vector<1x256xf32>
    %23 = arith.addf %20, %22 : vector<1x256xf32>
    %c0_14 = arith.constant 0 : index
    %c0_15 = arith.constant 0 : index
    %24 = vector.load %arg6[%c0_14, %c0_15] : memref<1x256xf32, #tpu.memory_space<vmem>>, vector<1x256xf32>
    tpu.vector_store %arg6[%c0_14, %c0_15], %23 {strides = array<i32>} : memref<1x256xf32, #tpu.memory_space<vmem>>, vector<1x256xf32>,
    return
  }
  func.func @transform_0(%arg0: i32) -> (i32, i32) {
    %c0_i32 = arith.constant 0 : i32
    %c0_i32_0 = arith.constant 0 : i32
    return %c0_i32, %arg0 : i32, i32
  }
  func.func @transform_1(%arg0: i32) -> (i32, i32) {
    %c0_i32 = arith.constant 0 : i32
    %c0_i32_0 = arith.constant 0 : i32
    %c0_i32_1 = arith.constant 0 : i32
    return %c0_i32, %c0_i32_0 : i32, i32
  }
  func.func @transform_2(%arg0: i32) -> (i32, i32) {
    %c0_i32 = arith.constant 0 : i32
    %c0_i32_0 = arith.constant 0 : i32
    %c0_i32_1 = arith.constant 0 : i32
    return %c0_i32, %c0_i32_0 : i32, i32
  }
  func.func @transform_3(%arg0: i32) -> (i32, i32) {
    %c0_i32 = arith.constant 0 : i32
    %c0_i32_0 = arith.constant 0 : i32
    %c0_i32_1 = arith.constant 0 : i32
    return %c0_i32, %c0_i32_0 : i32, i32
  }
  func.func @transform_4(%arg0: i32) -> (i32, i32) {
    %c0_i32 = arith.constant 0 : i32
    %c0_i32_0 = arith.constant 0 : i32
    %c0_i32_1 = arith.constant 0 : i32
    return %c0_i32, %c0_i32_0 : i32, i32
  }
  func.func @transform_5(%arg0: i32) -> (i32, i32) {
    %c0_i32 = arith.constant 0 : i32
    %c0_i32_0 = arith.constant 0 : i32
    return %c0_i32, %arg0 : i32, i32
  }
}

</mosaic_0001>

<bundles_post_ra>
// kernel: tfno_forward.10
= control target key start
LH: loop header
LB: loop body
LE: loop exit
PB: predicated region body
PF: predicated region fallthrough
CT: control target
= control target key end

     0   :  { %s949_s18 = smov 0   ;;  %s951_s19 = smov 0   ;;  %s1228_s0 = inlined_call_operand.vmem [shape: f32[2,1024], index: 0, kind: input, shape index: {}]   ;;  %s1229_s1 = inlined_call_operand.vmem [shape: f32[64,2], index: 1, kind: input, shape index: {}]   ;;  %s1230_s2 = inlined_call_operand.vmem [shape: f32[64,1], index: 2, kind: input, shape index: {}]   ;;  %s1231_s3 = inlined_call_operand.vmem [shape: f32[32,64], index: 3, kind: input, shape index: {}]   ;;  %s1232_s4 = inlined_call_operand.vmem [shape: f32[32,1], index: 4, kind: input, shape index: {}]   ;;  %s1233_s5 = inlined_call_operand.vmem [shape: f32[32,1024], index: 5, kind: output, shape index: {}]  }
   0x1   :  { %s953_s20 = smov 0  }
   0x2 LB: > { %s962_s21 = sadd.s32 4294967295, %s915_s20   ;;  %s964_s22 = sadd.s32 1, %s915_s20   ;;  %s915_s20 = sphi %s953_s20, %s1237_s20   ;;  %s911_s19 = sphi %s951_s19, %s1236_s19   ;;  %s907_s18 = sphi %s949_s18, %s1235_s18  }
   0x3   : > { %s129_s23 = ssub.s32 %s915_s20, %s964_s22  ;;  %s132_s24 = sadd.s32 1, %s911_s19 }
   0x4   : > { %p130_p0 = scmp.eq.s32.totalorder %s129_s23, 0  ;;  %p142_p1 = scmp.ne.s32.totalorder %s911_s19, %s907_s18 }
   0x5   : > { %p143_p2 = scmp.eq.s32.totalorder %s962_s21, 3  ;;  %p808_p3 = scmp.ge.s32.totalorder %s915_s20, 1 }
   0x6   : > { %s972_s25 = scalar_select %p130_p0, %s911_s19, %s132_s24  }
   0x7   : > { %p974_p4 = por %p143_p2, %p142_p1  ;;  %p188_p5 = scmp.lt.s32.totalorder %s915_s20, 5 }
   0x9   : > { %p189_p6 = pnand %p808_p3, %p188_p5 }
   0xa   : > { %s810_s27 = sshll.u32 (!%p189_p6), %s962_s21, 1  ;;  %s212_s17 = sand.u32 (!%p189_p6), 1, %s907_s18  }
   0xb   : > { %192 = sbr.rel (%p189_p6) target bundleno = 514 (0x202), region = 40  ;;  %p216_p7 = scmp.lt.s32.totalorder (!%p189_p6), %s810_s27, 7 }
   0xc   : > { %s809_s20 = sshll.u32 (!%p189_p6), %s212_s17, 6 }
   0xd   : > { %s1194_s23 = scalar_lea.vmem (!%p189_p6), [#allocation2], %s809_s20 }
  0x10   : > { %v917_v0 = vmov 0.0   ;;  %v918_v1 = vmov 0   ;;  %s1239_s27 = smov (!%p216_p7, %s810_s27), 7  ;;  %v236_v2 = vld [vmem:[%s1230_s2 + $0x28] sm:$0xff]  ;;  %v238_v3 = vld [vmem:[%s1230_s2 + $0x38] sm:$0xff]  ;;  %v235_v4 = vld [vmem:[%s1230_s2 + $0x20] sm:$0xff] }
  0x11   : > { %382 = vmatprep.mubr.f32.mxu0 %v917_v0  ;;  %680 = vmatprep.mubr.f32.mxu1 %v917_v0  ;;  %s811_s7 = sshll.u32 %s1239_s27, 1  ;;  %v237_v5 = vld [vmem:[%s1230_s2 + $0x30] sm:$0xff]  ;;  %vm313_vm0 = vcmask 1041408   ;;  %v222_v8 = vld [vmem:[%s1229_s1] sm:$0xff]  ;;  %vm288_vm1 = vcmask 15360   ;;  %v234_v10 = vld [vmem:[%s1230_s2 + $0x18] sm:$0xff] }
  0x12   : > { %860 = vset.pattern.permute.xlu1 %v918_v1  ;;  %859 = vset.pattern.permute.xlu0 %v918_v1  ;;  %s219_s14 = scalar_lea.vmem %s1228_s0, %s811_s7  ;;  %v233_v9 = vld [vmem:[%s1230_s2 + $0x10] sm:$0xff]  ;;  %v223_v11 = vld [vmem:[%s1229_s1 + $0x8] sm:$0xff]  ;;  %v231_v12 = vld [vmem:[%s1230_s2] sm:$0xff]  ;;  %vm603_vm2 = vcmask 523264   ;;  %s832_s18 = sshll.u32 (%p974_p4), %s962_s21, 4 }
  0x13   : > { %266 = vperm.xlu1 %860, %v236_v2   ;;  %276 = vperm.xlu0 %859, %v238_v3   ;;  %v812_v6 = vld.sshfl [vmem:[%s219_s14] sm:$0x33 pattern:$0x76325410]  ;;  %v232_v13 = vld [vmem:[%s1230_s2 + $0x8] sm:$0xff]  ;;  %v224_v14 = vld [vmem:[%s1229_s1 + $0x10] sm:$0xff]  ;;  %s722_s28 = scalar_lea.vmem (%p974_p4), %s1233_s5, %s832_s18 }
  0x14   : > { %v287_v7 = vcombine.high %v812_v6, %v812_v6  ;;  %v580_v15 = vld [vmem:[%s1232_s4 + $0x8] sm:$0xff]  ;;  %v579_v16 = vld [vmem:[%s1232_s4] sm:$0xff]  ;;  %v225_v17 = vld [vmem:[%s1229_s1 + $0x18] sm:$0xff] }
  0x15   : > { %v582_v18 = vld [vmem:[%s1232_s4 + $0x18] sm:$0xff]  ;;  %v581_v19 = vld [vmem:[%s1232_s4 + $0x10] sm:$0xff]  ;;  %v226_v20 = vld [vmem:[%s1229_s1 + $0x20] sm:$0xff] }
  0x16   : > { %813 = vmatprep.subr.msk.mxu0 %vm313_vm0, %v287_v7  ;;  %v227_v21 = vld [vmem:[%s1229_s1 + $0x28] sm:$0xff]  ;;  %v228_v22 = vld [vmem:[%s1229_s1 + $0x30] sm:$0xff]  ;;  %v229_v23 = vld [vmem:[%s1229_s1 + $0x38] sm:$0xff] }
  0x17   : > { %261 = vperm.xlu1 %860, %v235_v4   ;;  %271 = vperm.xlu0 %859, %v237_v5  }
  0x18   : > { %814 = vmatpush1.msk.msra.mxu0 %vm313_vm0, %v812_v6 }
  0x19   : > { %815 = vmatmul.mubr.msk.f32.vlgmr.msra.gmra.mxu0 %vm288_vm1, %v222_v8 }
  0x1a   : > { %388 = vmatprep.mubr.f32.mxu0 %v917_v0 }
  0x1b   : > { %251 = vperm.xlu1 %860, %v233_v9   ;;  %256 = vperm.xlu0 %859, %v234_v10  }
  0x1d   : > { %816 = vmatmul.mubr.msk.f32.gmra.mxu0 %vm288_vm1, %v223_v11 }
  0x1e   : > { %394 = vmatprep.mubr.f32.mxu0 %v917_v0 }
  0x1f   : > { %241 = vperm.xlu1 %860, %v231_v12   ;;  %246 = vperm.xlu0 %859, %v232_v13  }
  0x21   : > { %817 = vmatmul.mubr.msk.f32.gmra.mxu0 %vm288_vm1, %v224_v14 }
  0x22   : > { %400 = vmatprep.mubr.f32.mxu0 %v917_v0 }
  0x23   : > { %590 = vperm.xlu1 %860, %v580_v15   ;;  %585 = vperm.xlu0 %859, %v579_v16  }
  0x25   : > { %818 = vmatmul.mubr.msk.f32.gmra.mxu0 %vm288_vm1, %v225_v17 }
  0x26   : > { %406 = vmatprep.mubr.f32.mxu0 %v917_v0 }
  0x27   : > { %600 = vperm.xlu1 %860, %v582_v18   ;;  %595 = vperm.xlu0 %859, %v581_v19  }
  0x29   : > { %819 = vmatmul.mubr.msk.f32.gmra.mxu0 %vm288_vm1, %v226_v20 }
  0x2a   : > { %412 = vmatprep.mubr.f32.mxu0 %v917_v0 }
  0x2d   : > { %820 = vmatmul.mubr.msk.f32.gmra.mxu0 %vm288_vm1, %v227_v21 }
  0x2e   : > { %418 = vmatprep.mubr.f32.mxu0 %v917_v0 }
  0x31   : > { %821 = vmatmul.mubr.msk.f32.gmra.mxu0 %vm288_vm1, %v228_v22 }
  0x32   : > { %424 = vmatprep.mubr.f32.mxu0 %v917_v0 }
  0x35   : > { %822 = vmatmul.mubr.msk.f32.gmra.mxu0 %vm288_vm1, %v229_v23 }
  0x8e   : > { %v1059_v24 = vpop.permute.xlu0 %276  ;;  %v267_v25 = vpop.permute.xlu1 %266 }
  0x92   : > { %v272_v26 = vpop.permute.xlu0 %271  ;;  %v262_v28 = vpop.permute.xlu1 %261 }
  0x96   : > { %v257_v31 = vpop.permute.xlu0 %256  ;;  %v252_v33 = vpop.permute.xlu1 %251 }
  0x9a   : > { %v247_v36 = vpop.permute.xlu0 %246  ;;  %v242_v38 = vpop.permute.xlu1 %241 }
  0xd9   : > { %v384_v27 = vpop.f32.mrf.mxu0 }
  0xda   : > { %v1065_v42 = vadd.f32 %v384_v27, %v242_v38 }
  0xdb   : > { %v386_v29 = vpop.f32.mrf.mxu0 }
  0xdc   : > { %v1061_v39 = vadd.f32 %v386_v29, %v242_v38  ;;  %v431_v50 = vmul.f32 %v1065_v42, %v1065_v42 }
  0xdd   : > { %v390_v30 = vpop.f32.mrf.mxu0 }
  0xde   : > { %v1063_v40 = vadd.f32 %v390_v30, %v247_v36  ;;  %v432_v44 = vmul.f32 %v1061_v39, %v1061_v39  ;;  %v447_v5 = vmul.f32 %v431_v50, %v1065_v42 }
  0xdf   : > { %v392_v32 = vpop.f32.mrf.mxu0 }
  0xe0   : > { %v433_v45 = vmul.f32 %v1063_v40, %v1063_v40  ;;  %v1071_v46 = vadd.f32 %v392_v32, %v247_v36  ;;  %v448_v57 = vmul.f32 %v432_v44, %v1061_v39 }
  0xe1   : > { %v396_v34 = vpop.f32.mrf.mxu0 }
  0xe2   : > { %v1081_v53 = vadd.f32 %v396_v34, %v252_v33  ;;  %v449_v58 = vmul.f32 %v433_v45, %v1063_v40  ;;  %v434_v59 = vmul.f32 %v1071_v46, %v1071_v46  ;;  %v1109_v9 = vmul.f32 0.044715, %v448_v57 }
  0xe3   : > { %v398_v35 = vpop.f32.mrf.mxu0 }
  0xe4   : > { %v1093_v61 = vadd.f32 %v398_v35, %v252_v33  ;;  %v435_v6 = vmul.f32 %v1081_v53, %v1081_v53  ;;  %v465_v14 = vmul.f32 0.044715, %v449_v58  ;;  %v450_v15 = vmul.f32 %v434_v59, %v1071_v46 }
  0xe5   : > { %v402_v37 = vpop.f32.mrf.mxu0 }
  0xe6   : > { %v1073_v48 = vadd.f32 %v402_v37, %v257_v31  ;;  %v436_v16 = vmul.f32 %v1093_v61, %v1093_v61  ;;  %v451_v23 = vmul.f32 %v435_v6, %v1081_v53  ;;  %v466_v58 = vmul.f32 0.044715, %v450_v15 }
  0xe7   : > { %v404_v41 = vpop.f32.mrf.mxu0 }
  0xe8   : > { %v1083_v54 = vadd.f32 %v404_v41, %v257_v31  ;;  %v437_v62 = vmul.f32 %v1073_v48, %v1073_v48 }
  0xe9   : > { %v408_v43 = vpop.f32.mrf.mxu0 }
  0xea   : > { %v1079_v51 = vadd.f32 %v408_v43, %v262_v28  ;;  %v438_v7 = vmul.f32 %v1083_v54, %v1083_v54  ;;  %v453_v17 = vmul.f32 %v437_v62, %v1073_v48 }
  0xeb   : > { %v410_v47 = vpop.f32.mrf.mxu0 }
  0xec   : > { %v1075_v49 = vadd.f32 %v410_v47, %v262_v28  ;;  %v439_v2 = vmul.f32 %v1079_v51, %v1079_v51  ;;  %v469_v34 = vmul.f32 0.044715, %v453_v17 }
  0xed   : > { %v414_v52 = vpop.f32.mrf.mxu0 }
  0xee   : > { %v440_v55 = vmul.f32 %v1075_v49, %v1075_v49  ;;  %v1087_v56 = vadd.f32 %v414_v52, %v267_v25  ;;  %v455_v18 = vmul.f32 %v439_v2, %v1079_v51 }
  0xef   : > { %v416_v60 = vpop.f32.mrf.mxu0 }
  0xf0   : > { %v456_v63 = vmul.f32 %v440_v55, %v1075_v49  ;;  %v441_v1 = vmul.f32 %v1087_v56, %v1087_v56  ;;  %v1102_v3 = vadd.f32 %v416_v60, %v267_v25  ;;  %v454_v25 = vmul.f32 %v438_v7, %v1083_v54 }
  0xf1   : > { %v420_v4 = vpop.f32.mrf.mxu0  ;;  %v471_v37 = vmul.f32 0.044715, %v455_v18  ;;  %v463_v18 = vmul.f32 0.044715, %v447_v5 }
  0xf2   : > { %v472_v8 = vmul.f32 0.044715, %v456_v63  ;;  %v457_v10 = vmul.f32 %v441_v1, %v1087_v56  ;;  %v442_v11 = vmul.f32 %v1102_v3, %v1102_v3  ;;  %v1114_v12 = vadd.f32 %v420_v4, %v272_v26 }
  0xf3   : > { %v422_v13 = vpop.f32.mrf.mxu0  ;;  %v470_v44 = vmul.f32 0.044715, %v454_v25  ;;  %v467_v63 = vmul.f32 0.044715, %v451_v23  ;;  %v487_v1 = vadd.f32 %v471_v37, %v1079_v51  ;;  %v479_v5 = vadd.f32 %v463_v18, %v1065_v42 }
  0xf4   : > { %v458_v19 = vmul.f32 %v442_v11, %v1102_v3  ;;  %v443_v20 = vmul.f32 %v1114_v12, %v1114_v12  ;;  %v1124_v21 = vadd.f32 %v422_v13, %v272_v26  ;;  %v488_v27 = vadd.f32 %v472_v8, %v1075_v49 }
  0xf5   : > { %v426_v22 = vpop.f32.mrf.mxu0  ;;  %v473_v29 = vmul.f32 0.044715, %v457_v10  ;;  %v452_v26 = vmul.f32 %v436_v16, %v1093_v61  ;;  %v486_v6 = vadd.f32 %v470_v44, %v1083_v54  ;;  %v485_v10 = vadd.f32 %v469_v34, %v1073_v48 }
  0xf6   : > { %v1130_v28 = vadd.f32 %v426_v22, %v1059_v24  ;;  %v474_v30 = vmul.f32 0.044715, %v458_v19  ;;  %v459_v31 = vmul.f32 %v443_v20, %v1114_v12  ;;  %v444_v32 = vmul.f32 %v1124_v21, %v1124_v21 }
  0xf7   : > { %v428_v33 = vpop.f32.mrf.mxu0  ;;  %v504_v45 = vmul.f32 0.7978846, %v488_v27  ;;  %v489_v52 = vadd.f32 %v473_v29, %v1087_v56  ;;  %v468_v59 = vmul.f32 0.044715, %v452_v26  ;;  %v483_v19 = vadd.f32 %v467_v63, %v1081_v53 }
  0xf8   : > { %v445_v35 = vmul.f32 %v1130_v28, %v1130_v28  ;;  %v1139_v36 = vadd.f32 %v428_v33, %v1059_v24  ;;  %v490_v38 = vadd.f32 %v474_v30, %v1102_v3  ;;  %v475_v41 = vmul.f32 0.044715, %v459_v31 }
  0xf9   : > { %v460_v43 = vmul.f32 %v444_v32, %v1124_v21  ;;  %861 = vtanh.f32 %v504_v45  ;;  %v505_v11 = vmul.f32 0.7978846, %v489_v52  ;;  %v484_v15 = vadd.f32 %v468_v59, %v1093_v61 }
  0xfa   : > { %v461_v47 = vmul.f32 %v445_v35, %v1130_v28  ;;  %v446_v50 = vmul.f32 %v1139_v36, %v1139_v36  ;;  %v506_v55 = vmul.f32 0.7978846, %v490_v38  ;;  %v491_v57 = vadd.f32 %v475_v41, %v1114_v12 }
  0xfb   : > { %v476_v24 = vmul.f32 0.044715, %v460_v43  ;;  %v503_v20 = vmul.f32 0.7978846, %v487_v1  ;;  %v482_v22 = vadd.f32 %v466_v58, %v1071_v46  ;;  %v502_v23 = vmul.f32 0.7978846, %v486_v6 }
  0xfc   : > { %v477_v60 = vmul.f32 0.044715, %v461_v47  ;;  %v462_v62 = vmul.f32 %v446_v50, %v1139_v36  ;;  %v507_v2 = vmul.f32 0.7978846, %v491_v57  ;;  %863 = vtanh.f32 %v506_v55 }
  0xfd   : > { %v492_v4 = vadd.f32 %v476_v24, %v1124_v21  ;;  %v481_v27 = vadd.f32 %v465_v14, %v1063_v40  ;;  %v501_v29 = vmul.f32 0.7978846, %v485_v10  ;;  %v480_v30 = vadd.f32 %v1109_v9, %v1061_v39 }
  0xfe   : > { %v478_v7 = vmul.f32 0.044715, %v462_v62  ;;  %v493_v8 = vadd.f32 %v477_v60, %v1130_v28  ;;  %865 = vtanh.f32 %v507_v2  ;;  %v500_v31 = vmul.f32 0.7978846, %v484_v15 }
  0xff   : > { %v508_v13 = vmul.f32 0.7978846, %v492_v4  ;;  %v499_v32 = vmul.f32 0.7978846, %v483_v19  ;;  %v498_v33 = vmul.f32 0.7978846, %v482_v22 }
 0x100   : > { %v494_v16 = vadd.f32 %v478_v7, %v1139_v36  ;;  %v509_v17 = vmul.f32 0.7978846, %v493_v8  ;;  %v497_v26 = vmul.f32 0.7978846, %v481_v27  ;;  %v496_v34 = vmul.f32 0.7978846, %v480_v30 }
 0x101   : > { %867 = vtanh.f32 %v508_v13  ;;  %v495_v35 = vmul.f32 0.7978846, %v479_v5 }
 0x102   : > { %v510_v25 = vmul.f32 0.7978846, %v494_v16  ;;  %869 = vtanh.f32 %v509_v17 }
 0x103   : > { %871 = vtanh.f32 %v505_v11 }
 0x104   : > { %873 = vtanh.f32 %v510_v25 }
 0x105   : > { %875 = vtanh.f32 %v503_v20 }
 0x106   : > { %877 = vtanh.f32 %v502_v23  ;;  %v862_v14 = vpop.eup %861 }
 0x107   : > { %879 = vtanh.f32 %v501_v29  ;;  %v536_v1 = vadd.f32 1.0, %v862_v14 }
 0x108   : > { %881 = vtanh.f32 %v500_v31 }
 0x109   : > { %883 = vtanh.f32 %v499_v32  ;;  %v864_v37 = vpop.eup %863  ;;  %v552_v20 = vmul.f32 0.5, %v536_v1 }
 0x10a   : > { %885 = vtanh.f32 %v498_v33  ;;  %v538_v57 = vadd.f32 1.0, %v864_v37 }
 0x10b   : > { %887 = vtanh.f32 %v497_v26  ;;  %v866_v9 = vpop.eup %865 }
 0x10c   : > { %889 = vtanh.f32 %v496_v34  ;;  %v539_v50 = vadd.f32 1.0, %v866_v9  ;;  %v554_v10 = vmul.f32 0.5, %v538_v57 }
 0x10d   : > { %891 = vtanh.f32 %v495_v35 }
 0x10e   : > { %v868_v38 = vpop.eup %867  ;;  %v555_v4 = vmul.f32 0.5, %v539_v50  ;;  %v570_v30 = vmul.f32 %v554_v10, %v1102_v3  ;;  %v591_v50 = vpop.permute.xlu1 %590 }
 0x10f   : > { %v870_v41 = vpop.eup %869  ;;  %v540_v45 = vadd.f32 1.0, %v868_v38 }
 0x110   : > { %v872_v43 = vpop.eup %871  ;;  %v541_v44 = vadd.f32 1.0, %v870_v41  ;;  %v571_v25 = vmul.f32 %v555_v4, %v1114_v12 }
 0x111   : > { %v874_v47 = vpop.eup %873  ;;  %v537_v59 = vadd.f32 1.0, %v872_v43  ;;  %v556_v63 = vmul.f32 0.5, %v540_v45 }
 0x112   : > { %v876_v52 = vpop.eup %875  ;;  %v542_v55 = vadd.f32 1.0, %v874_v47  ;;  %v557_v58 = vmul.f32 0.5, %v541_v44  ;;  %v601_v1 = vpop.permute.xlu1 %600 }
 0x113   : > { %v878_v24 = vpop.eup %877  ;;  %v535_v6 = vadd.f32 1.0, %v876_v52  ;;  %v553_v16 = vmul.f32 0.5, %v537_v59  ;;  %v572_v19 = vmul.f32 %v556_v63, %v1124_v21  ;;  %v568_v21 = vmul.f32 %v552_v20, %v1075_v49 }
 0x114   : > { %v880_v60 = vpop.eup %879  ;;  %v558_v62 = vmul.f32 0.5, %v542_v55  ;;  %v534_v11 = vadd.f32 1.0, %v878_v24  ;;  %v573_v15 = vmul.f32 %v557_v58, %v1130_v28 }
 0x115   : > { %v882_v2 = vpop.eup %881  ;;  %v533_v17 = vadd.f32 1.0, %v880_v60  ;;  %v551_v27 = vmul.f32 0.5, %v535_v6  ;;  %v569_v5 = vmul.f32 %v553_v16, %v1087_v56 }
 0x116   : > { %v884_v7 = vpop.eup %883  ;;  %v574_v8 = vmul.f32 %v558_v62, %v1139_v36  ;;  %v532_v22 = vadd.f32 1.0, %v882_v2  ;;  %v550_v31 = vmul.f32 0.5, %v534_v11 }
 0x117   : > { %v886_v13 = vpop.eup %885  ;;  %v531_v29 = vadd.f32 1.0, %v884_v7  ;;  %v549_v32 = vmul.f32 0.5, %v533_v17  ;;  %v567_v12 = vmul.f32 %v551_v27, %v1079_v51 }
 0x118   : > { %v888_v18 = vpop.eup %887  ;;  %632 = vmatprep.subr.mxu1 %v574_v8  ;;  %v530_v28 = vadd.f32 1.0, %v886_v13  ;;  %v548_v26 = vmul.f32 0.5, %v532_v22  ;;  %v566_v3 = vmul.f32 %v550_v31, %v1083_v54 }
 0x119   : > { %v890_v23 = vpop.eup %889  ;;  %633 = vmatpush1.msra.mxu1 %v573_v15  ;;  %v529_v33 = vadd.f32 1.0, %v888_v18  ;;  %v547_v35 = vmul.f32 0.5, %v531_v29  ;;  %v565_v9 = vmul.f32 %v549_v32, %v1073_v48 }
 0x11a   : > { %v892_v36 = vpop.eup %891  ;;  %634 = vmatprep.subr.mxu1 %v572_v19  ;;  %v528_v34 = vadd.f32 1.0, %v890_v23  ;;  %v546_v37 = vmul.f32 0.5, %v530_v28  ;;  %v564_v38 = vmul.f32 %v548_v26, %v1093_v61  ;;  %v575_v61 = vld [vmem:[%s1231_s3] sm:$0xff] }
 0x11b   : > { %635 = vmatpush1.msra.mxu1 %v571_v25  ;;  %v527_v14 = vadd.f32 1.0, %v892_v36  ;;  %v545_v56 = vmul.f32 0.5, %v529_v33  ;;  %v563_v49 = vmul.f32 %v547_v35, %v1081_v53 }
 0x11c   : > { %636 = vmatprep.subr.mxu1 %v570_v30  ;;  %v544_v41 = vmul.f32 0.5, %v528_v34  ;;  %v562_v51 = vmul.f32 %v546_v37, %v1071_v46  ;;  %v586_v46 = vpop.permute.xlu0 %585 }
 0x11d   : > { %637 = vmatpush1.msra.mxu1 %v569_v5  ;;  %v543_v43 = vmul.f32 0.5, %v527_v14  ;;  %v561_v44 = vmul.f32 %v545_v56, %v1063_v40  ;;  %v576_v40 = vld [vmem:[%s1231_s3 + $0x8] sm:$0xff] }
 0x11e   : > { %638 = vmatprep.subr.mxu1 %v568_v21  ;;  %v560_v54 = vmul.f32 %v544_v41, %v1061_v39  ;;  %v577_v39 = vld [vmem:[%s1231_s3 + $0x10] sm:$0xff] }
 0x11f   : > { %639 = vmatpush1.msra.mxu1 %v567_v12  ;;  %v559_v48 = vmul.f32 %v543_v43, %v1065_v42  ;;  %v578_v42 = vld [vmem:[%s1231_s3 + $0x18] sm:$0xff] }
 0x120   : > { %640 = vmatprep.subr.mxu1 %v566_v3  ;;  %v596_v58 = vpop.permute.xlu0 %595 }
 0x121   : > { %641 = vmatpush1.msra.mxu1 %v565_v9 }
 0x122   : > { %642 = vmatprep.subr.mxu1 %v564_v38 }
 0x123   : > { %643 = vmatpush1.msra.mxu1 %v563_v49 }
 0x124   : > { %644 = vmatprep.subr.mxu1 %v562_v51 }
 0x125   : > { %645 = vmatpush1.msra.mxu1 %v561_v44 }
 0x126   : > { %646 = vmatprep.subr.mxu1 %v560_v54 }
 0x127   : > { %647 = vmatpush1.msra.mxu1 %v559_v48 }
 0x128   : > { %823 = vmatmul.mubr.msk.f32.vlgmr.msra.gmra.mxu1 %vm603_vm2, %v575_v61 }
 0x129   : > { %686 = vmatprep.mubr.f32.mxu1 %v917_v0 }
 0x12c   : > { %824 = vmatmul.mubr.msk.f32.gmra.mxu1 %vm603_vm2, %v576_v40 }
 0x12d   : > { %692 = vmatprep.mubr.f32.mxu1 %v917_v0 }
 0x130   : > { %825 = vmatmul.mubr.msk.f32.gmra.mxu1 %vm603_vm2, %v577_v39 }
 0x131   : > { %698 = vmatprep.mubr.f32.mxu1 %v917_v0 }
 0x134   : > { %826 = vmatmul.mubr.msk.f32.gmra.mxu1 %vm603_vm2, %v578_v42 }
 0x1e8   : > { %v682_v53 = vpop.f32.mrf.mxu1 }
 0x1e9   : > { %v683_v45 = vadd.f32 %v682_v53, %v586_v46 }
 0x1ea   : > { %v684_v47 = vpop.f32.mrf.mxu1 }
 0x1eb   : > { %705 = vst [vmem:[%s1194_s23] sm:$0xff] %v683_v45  ;;  %v685_v0 = vadd.f32 %v684_v47, %v586_v46 }
 0x1ec   : > { %v688_v52 = vpop.f32.mrf.mxu1 }
 0x1ed   : > { %706 = vst [vmem:[%s1194_s23 + $0x8] sm:$0xff] %v685_v0  ;;  %v689_v55 = vadd.f32 %v688_v52, %v591_v50 }
 0x1ee   : > { %v690_v57 = vpop.f32.mrf.mxu1 }
 0x1ef   : > { %707 = vst [vmem:[%s1194_s23 + $0x10] sm:$0xff] %v689_v55  ;;  %v691_v24 = vadd.f32 %v690_v57, %v591_v50 }
 0x1f0   : > { %v694_v59 = vpop.f32.mrf.mxu1 }
 0x1f1   : > { %708 = vst [vmem:[%s1194_s23 + $0x18] sm:$0xff] %v691_v24  ;;  %v695_v60 = vadd.f32 %v694_v59, %v596_v58 }
 0x1f2   : > { %v696_v62 = vpop.f32.mrf.mxu1  ;;  %v735_v8 = vld [vmem:[%s1194_s23] sm:$0xff] (%p974_p4) }
 0x1f3   : > { %709 = vst [vmem:[%s1194_s23 + $0x20] sm:$0xff] %v695_v60  ;;  %v697_v63 = vadd.f32 %v696_v62, %v596_v58  ;;  %736 = vst [vmem:[%s722_s28] sm:$0xff] (%p974_p4), %v735_v8 }
 0x1f4   : > { %v700_v2 = vpop.f32.mrf.mxu1  ;;  %v737_v10 = vld [vmem:[%s1194_s23 + $0x8] sm:$0xff] (%p974_p4) }
 0x1f5   : > { %710 = vst [vmem:[%s1194_s23 + $0x28] sm:$0xff] %v697_v63  ;;  %v701_v4 = vadd.f32 %v700_v2, %v601_v1  ;;  %719 = sbr.rel (!%p974_p4) target bundleno = 514 (0x202), region = 44  ;;  %738 = vst [vmem:[%s722_s28 + $0x8] sm:$0xff] (%p974_p4), %v737_v10 }
 0x1f6   : > { %v702_v6 = vpop.f32.mrf.mxu1  ;;  %v739_v11 = vld [vmem:[%s1194_s23 + $0x10] sm:$0xff] (%p974_p4) }
 0x1f7   : > { %711 = vst [vmem:[%s1194_s23 + $0x30] sm:$0xff] %v701_v4  ;;  %v703_v7 = vadd.f32 %v702_v6, %v601_v1  ;;  %740 = vst [vmem:[%s722_s28 + $0x40] sm:$0xff] (%p974_p4), %v739_v11 }
 0x1f8   : > { %v741_v13 = vld [vmem:[%s1194_s23 + $0x18] sm:$0xff] (%p974_p4) }
 0x1f9   : > { %712 = vst [vmem:[%s1194_s23 + $0x38] sm:$0xff] %v703_v7  ;;  %742 = vst [vmem:[%s722_s28 + $0x48] sm:$0xff] (%p974_p4), %v741_v13 }
 0x1fa   : > { %v743_v15 = vld [vmem:[%s1194_s23 + $0x20] sm:$0xff] }
 0x1fb   : > { %744 = vst [vmem:[%s722_s28 + $0x80] sm:$0xff] %v743_v15 }
 0x1fc   : > { %v745_v16 = vld [vmem:[%s1194_s23 + $0x28] sm:$0xff] }
 0x1fd   : > { %746 = vst [vmem:[%s722_s28 + $0x88] sm:$0xff] %v745_v16 }
 0x1fe   : > { %v747_v17 = vld [vmem:[%s1194_s23 + $0x30] sm:$0xff] }
 0x1ff   : > { %748 = vst [vmem:[%s722_s28 + $0xc0] sm:$0xff] %v747_v17 }
 0x200   : > { %v749_v18 = vld [vmem:[%s1194_s23 + $0x38] sm:$0xff] }
 0x201   : > { %750 = vst [vmem:[%s722_s28 + $0xc8] sm:$0xff] %v749_v18 }
 0x202 PF: > { %p12_p8 = scmp.ge.s32.totalorder %s964_s22, 6   ;;  %s1235_s18 = smov %s911_s19 }
 0x203   : > { %s1236_s19 = smov %s972_s25  ;;  %s1237_s20 = smov %s964_s22 }
 0x204   :  { %14 = sbr.rel (!%p12_p8) target bundleno = 2 (0x2), region = 93 }

// kernel: reverse.8
= control target key start
LH: loop header
LB: loop body
LE: loop exit
PB: predicated region body
PF: predicated region fallthrough
CT: control target
= control target key end

     0   :  { %s584_s0 = inlined_call_operand.vmem [shape: f32[32,2,8,8,3], index: 0, kind: input, shape index: {}]   ;;  %s585_s1 = inlined_call_operand.vmem [shape: f32[32,2,8,8,3], index: 1, kind: output, shape index: {}]  }
   0x1   :  { %v192_v0 = vld [vmem:[%s584_s0 + $0x80] sm:$0xff]  ;;  %v202_v6 = vld [vmem:[%s584_s0 + $0x88] sm:$0xff]  ;;  %v214_v12 = vld [vmem:[%s584_s0 + $0x90] sm:$0xff] }
   0x2   :  { %v193_v1 = vld [vmem:[%s584_s0 + $0x140] sm:$0xff]  ;;  %4 = vst [vmem:[%s585_s1] sm:$0xff] %v192_v0  ;;  %v204_v7 = vld [vmem:[%s584_s0 + $0x148] sm:$0xff]  ;;  %203 = vst [vmem:[%s585_s1 + $0x8] sm:$0xff] %v202_v6 }
   0x3   :  { %v195_v2 = vld [vmem:[%s584_s0 + $0x40] sm:$0xff]  ;;  %194 = vst [vmem:[%s585_s1 + $0xc0] sm:$0xff] %v193_v1  ;;  %v206_v8 = vld [vmem:[%s584_s0 + $0x48] sm:$0xff]  ;;  %205 = vst [vmem:[%s585_s1 + $0xc8] sm:$0xff] %v204_v7 }
   0x4   :  { %196 = vst [vmem:[%s585_s1 + $0x40] sm:$0xff] %v195_v2  ;;  %v197_v3 = vld [vmem:[%s584_s0 + $0x100] sm:$0xff]  ;;  %207 = vst [vmem:[%s585_s1 + $0x48] sm:$0xff] %v206_v8  ;;  %v208_v9 = vld [vmem:[%s584_s0 + $0x108] sm:$0xff] }
   0x5   :  { %v17_v4 = vld [vmem:[%s584_s0] sm:$0xff]  ;;  %198 = vst [vmem:[%s585_s1 + $0x100] sm:$0xff] %v197_v3  ;;  %v210_v10 = vld [vmem:[%s584_s0 + $0x8] sm:$0xff]  ;;  %209 = vst [vmem:[%s585_s1 + $0x108] sm:$0xff] %v208_v9 }
   0x6   :  { %v200_v5 = vld [vmem:[%s584_s0 + $0xc0] sm:$0xff]  ;;  %199 = vst [vmem:[%s585_s1 + $0x80] sm:$0xff] %v17_v4  ;;  %v212_v11 = vld [vmem:[%s584_s0 + $0xc8] sm:$0xff]  ;;  %211 = vst [vmem:[%s585_s1 + $0x88] sm:$0xff] %v210_v10 }
   0x7   :  { %201 = vst [vmem:[%s585_s1 + $0x140] sm:$0xff] %v200_v5  ;;  %213 = vst [vmem:[%s585_s1 + $0x148] sm:$0xff] %v212_v11  ;;  %v216_v13 = vld [vmem:[%s584_s0 + $0x150] sm:$0xff]  ;;  %v226_v18 = vld [vmem:[%s584_s0 + $0x98] sm:$0xff] }
   0x8   :  { %v218_v14 = vld [vmem:[%s584_s0 + $0x50] sm:$0xff]  ;;  %215 = vst [vmem:[%s585_s1 + $0x10] sm:$0xff] %v214_v12  ;;  %217 = vst [vmem:[%s585_s1 + $0xd0] sm:$0xff] %v216_v13  ;;  %v228_v19 = vld [vmem:[%s584_s0 + $0x158] sm:$0xff] }
   0x9   :  { %219 = vst [vmem:[%s585_s1 + $0x50] sm:$0xff] %v218_v14  ;;  %v220_v15 = vld [vmem:[%s584_s0 + $0x110] sm:$0xff]  ;;  %v230_v20 = vld [vmem:[%s584_s0 + $0x58] sm:$0xff]  ;;  %227 = vst [vmem:[%s585_s1 + $0x18] sm:$0xff] %v226_v18 }
   0xa   :  { %v222_v16 = vld [vmem:[%s584_s0 + $0x10] sm:$0xff]  ;;  %221 = vst [vmem:[%s585_s1 + $0x110] sm:$0xff] %v220_v15  ;;  %229 = vst [vmem:[%s585_s1 + $0xd8] sm:$0xff] %v228_v19  ;;  %v232_v21 = vld [vmem:[%s584_s0 + $0x118] sm:$0xff] }
   0xb   :  { %v224_v17 = vld [vmem:[%s584_s0 + $0xd0] sm:$0xff]  ;;  %223 = vst [vmem:[%s585_s1 + $0x90] sm:$0xff] %v222_v16  ;;  %231 = vst [vmem:[%s585_s1 + $0x58] sm:$0xff] %v230_v20  ;;  %v234_v22 = vld [vmem:[%s584_s0 + $0x18] sm:$0xff] }
   0xc   :  { %225 = vst [vmem:[%s585_s1 + $0x150] sm:$0xff] %v224_v17  ;;  %v236_v23 = vld [vmem:[%s584_s0 + $0xd8] sm:$0xff]  ;;  %233 = vst [vmem:[%s585_s1 + $0x118] sm:$0xff] %v232_v21  ;;  %v238_v24 = vld [vmem:[%s584_s0 + $0xa0] sm:$0xff] }
   0xd   :  { %235 = vst [vmem:[%s585_s1 + $0x98] sm:$0xff] %v234_v22  ;;  %237 = vst [vmem:[%s585_s1 + $0x158] sm:$0xff] %v236_v23  ;;  %v240_v25 = vld [vmem:[%s584_s0 + $0x160] sm:$0xff]  ;;  %v250_v30 = vld [vmem:[%s584_s0 + $0xa8] sm:$0xff] }
   0xe   :  { %v242_v26 = vld [vmem:[%s584_s0 + $0x60] sm:$0xff]  ;;  %239 = vst [vmem:[%s585_s1 + $0x20] sm:$0xff] %v238_v24  ;;  %241 = vst [vmem:[%s585_s1 + $0xe0] sm:$0xff] %v240_v25  ;;  %v252_v31 = vld [vmem:[%s584_s0 + $0x168] sm:$0xff] }
   0xf   :  { %243 = vst [vmem:[%s585_s1 + $0x60] sm:$0xff] %v242_v26  ;;  %v244_v27 = vld [vmem:[%s584_s0 + $0x120] sm:$0xff]  ;;  %v254_v32 = vld [vmem:[%s584_s0 + $0x68] sm:$0xff]  ;;  %251 = vst [vmem:[%s585_s1 + $0x28] sm:$0xff] %v250_v30 }
  0x10   :  { %v246_v28 = vld [vmem:[%s584_s0 + $0x20] sm:$0xff]  ;;  %245 = vst [vmem:[%s585_s1 + $0x120] sm:$0xff] %v244_v27  ;;  %253 = vst [vmem:[%s585_s1 + $0xe8] sm:$0xff] %v252_v31  ;;  %v256_v33 = vld [vmem:[%s584_s0 + $0x128] sm:$0xff] }
  0x11   :  { %v248_v29 = vld [vmem:[%s584_s0 + $0xe0] sm:$0xff]  ;;  %247 = vst [vmem:[%s585_s1 + $0xa0] sm:$0xff] %v246_v28  ;;  %255 = vst [vmem:[%s585_s1 + $0x68] sm:$0xff] %v254_v32  ;;  %v258_v34 = vld [vmem:[%s584_s0 + $0x28] sm:$0xff] }
  0x12   :  { %249 = vst [vmem:[%s585_s1 + $0x160] sm:$0xff] %v248_v29  ;;  %v260_v35 = vld [vmem:[%s584_s0 + $0xe8] sm:$0xff]  ;;  %257 = vst [vmem:[%s585_s1 + $0x128] sm:$0xff] %v256_v33  ;;  %v262_v36 = vld [vmem:[%s584_s0 + $0xb0] sm:$0xff] }
  0x13   :  { %259 = vst [vmem:[%s585_s1 + $0xa8] sm:$0xff] %v258_v34  ;;  %261 = vst [vmem:[%s585_s1 + $0x168] sm:$0xff] %v260_v35  ;;  %v264_v37 = vld [vmem:[%s584_s0 + $0x170] sm:$0xff]  ;;  %v274_v42 = vld [vmem:[%s584_s0 + $0xb8] sm:$0xff] }
  0x14   :  { %v266_v38 = vld [vmem:[%s584_s0 + $0x70] sm:$0xff]  ;;  %263 = vst [vmem:[%s585_s1 + $0x30] sm:$0xff] %v262_v36  ;;  %265 = vst [vmem:[%s585_s1 + $0xf0] sm:$0xff] %v264_v37  ;;  %v276_v43 = vld [vmem:[%s584_s0 + $0x178] sm:$0xff] }
  0x15   :  { %267 = vst [vmem:[%s585_s1 + $0x70] sm:$0xff] %v266_v38  ;;  %v268_v39 = vld [vmem:[%s584_s0 + $0x130] sm:$0xff]  ;;  %v278_v44 = vld [vmem:[%s584_s0 + $0x78] sm:$0xff]  ;;  %275 = vst [vmem:[%s585_s1 + $0x38] sm:$0xff] %v274_v42 }
  0x16   :  { %v270_v40 = vld [vmem:[%s584_s0 + $0x30] sm:$0xff]  ;;  %269 = vst [vmem:[%s585_s1 + $0x130] sm:$0xff] %v268_v39  ;;  %277 = vst [vmem:[%s585_s1 + $0xf8] sm:$0xff] %v276_v43  ;;  %v280_v45 = vld [vmem:[%s584_s0 + $0x138] sm:$0xff] }
  0x17   :  { %v272_v41 = vld [vmem:[%s584_s0 + $0xf0] sm:$0xff]  ;;  %271 = vst [vmem:[%s585_s1 + $0xb0] sm:$0xff] %v270_v40  ;;  %279 = vst [vmem:[%s585_s1 + $0x78] sm:$0xff] %v278_v44  ;;  %v282_v46 = vld [vmem:[%s584_s0 + $0x38] sm:$0xff] }
  0x18   :  { %273 = vst [vmem:[%s585_s1 + $0x170] sm:$0xff] %v272_v41  ;;  %v284_v47 = vld [vmem:[%s584_s0 + $0xf8] sm:$0xff]  ;;  %281 = vst [vmem:[%s585_s1 + $0x138] sm:$0xff] %v280_v45 }
  0x19   :  { %283 = vst [vmem:[%s585_s1 + $0xb8] sm:$0xff] %v282_v46  ;;  %285 = vst [vmem:[%s585_s1 + $0x178] sm:$0xff] %v284_v47 }

// kernel: tfno_forward.11
= control target key start
LH: loop header
LB: loop body
LE: loop exit
PB: predicated region body
PF: predicated region fallthrough
CT: control target
= control target key end

     0   :  { %v25437_v0 = vmov 0.0   ;;  %vm25438_vm0 = vmmov 0   ;;  %vm1171_vm1 = vcmask 261120   ;;  %vm10580_vm2 = vcmask 254976   ;;  %s32765_s2 = inlined_call_operand.vmem [shape: bf16[64,32,32], index: 2, kind: input, shape index: {}]   ;;  %s32766_s0 = inlined_call_operand.vmem [shape: f32[64,2,32], index: 0, kind: input, shape index: {}]   ;;  %s32767_s3 = inlined_call_operand.vmem [shape: bf16[64,32,32], index: 3, kind: input, shape index: {}]   ;;  %s32768_s1 = inlined_call_operand.vmem [shape: f32[64,2,32], index: 1, kind: input, shape index: {}]   ;;  %s32769_s4 = inlined_call_operand.vmem [shape: f32[64,2,32], index: 4, kind: output, shape index: {0}]   ;;  %s32770_s5 = inlined_call_operand.vmem [shape: f32[64,2,32], index: 5, kind: output, shape index: {1}]  }
   0x1   :  { %22491 = vmatprep.subr.mxu0 %v25437_v0  ;;  %22502 = vmatprep.subr.mxu1 %v25437_v0  ;;  %v25474_v1 = vld [vmem:[%s32765_s2 + $0x8] sm:$0xff]   ;;  %v25479_v2 = vld [vmem:[%s32765_s2 + $0x18] sm:$0xff]   ;;  %v25484_v3 = vld [vmem:[%s32765_s2] sm:$0xff]  }
   0x2   :  { %v32870_v4 = vunpack.c.l.bf16 %v25474_v1  ;;  %v32874_v5 = vunpack.c.h.bf16 %v25474_v1  ;;  %v32867_v6 = vunpack.c.l.bf16 %v25479_v2  ;;  %v32872_v7 = vunpack.c.h.bf16 %v25479_v2  ;;  %v25493_v8 = vld [vmem:[%s32765_s2 + $0x10] sm:$0xff]   ;;  %22499 = vmatprep.mubr.msk.f32.mxu0 %vm25438_vm0, %v25437_v0  ;;  %22510 = vmatprep.mubr.msk.f32.mxu1 %vm25438_vm0, %v25437_v0  ;;  %v25516_v13 = vld [vmem:[%s32765_s2 + $0x28] sm:$0xff]   ;;  %v25521_v14 = vld [vmem:[%s32765_s2 + $0x38] sm:$0xff]  }
   0x3   :  { %v32862_v9 = vunpack.c.h.bf16 %v25484_v3  ;;  %v32860_v10 = vunpack.c.h.bf16 %v25493_v8  ;;  %v32858_v11 = vunpack.c.l.bf16 %v25484_v3  ;;  %v32855_v12 = vunpack.c.l.bf16 %v25493_v8  ;;  %v19_v15 = vld [vmem:[%s32766_s0] sm:$0x3]  ;;  %v20_v16 = vld [vmem:[%s32766_s0 + $0x2] sm:$0x3]  ;;  %v25551_v20 = vld [vmem:[%s32765_s2 + $0x30] sm:$0xff]  }
   0x4   :  { %22492 = vmatpush3.msra.mxu0 %v32874_v5  ;;  %22503 = vmatpush3.msra.mxu1 %v32872_v7  ;;  %v32850_v17 = vunpack.c.h.bf16 %v25516_v13  ;;  %v32848_v18 = vunpack.c.h.bf16 %v25521_v14  ;;  %v25546_v19 = vld [vmem:[%s32765_s2 + $0x20] sm:$0xff]   ;;  %v32846_v21 = vunpack.c.l.bf16 %v25516_v13  ;;  %v32843_v22 = vunpack.c.l.bf16 %v25521_v14  ;;  %v25578_v27 = vld [vmem:[%s32765_s2 + $0x48] sm:$0xff]   ;;  %v25583_v28 = vld [vmem:[%s32765_s2 + $0x58] sm:$0xff]  }
   0x5   :  { %22493 = vmatprep.subr.mxu0 %v25437_v0  ;;  %22504 = vmatprep.subr.mxu1 %v25437_v0  ;;  %v32838_v23 = vunpack.c.h.bf16 %v25546_v19  ;;  %v32836_v24 = vunpack.c.h.bf16 %v25551_v20  ;;  %v32834_v25 = vunpack.c.l.bf16 %v25546_v19  ;;  %v32831_v26 = vunpack.c.l.bf16 %v25551_v20  ;;  %v21_v29 = vld [vmem:[%s32766_s0 + $0x4] sm:$0x3]  ;;  %v22_v30 = vld [vmem:[%s32766_s0 + $0x6] sm:$0x3]  ;;  %v25615_v34 = vld [vmem:[%s32765_s2 + $0x50] sm:$0xff]  }
   0x6   :  { %22494 = vmatpush3.msra.mxu0 %v32870_v4  ;;  %22505 = vmatpush3.msra.mxu1 %v32867_v6  ;;  %v32826_v31 = vunpack.c.h.bf16 %v25578_v27  ;;  %v32824_v32 = vunpack.c.h.bf16 %v25583_v28  ;;  %v25610_v33 = vld [vmem:[%s32765_s2 + $0x40] sm:$0xff]   ;;  %v32822_v35 = vunpack.c.l.bf16 %v25578_v27  ;;  %v32819_v36 = vunpack.c.l.bf16 %v25583_v28  ;;  %v25642_v41 = vld [vmem:[%s32765_s2 + $0x68] sm:$0xff]   ;;  %v25647_v42 = vld [vmem:[%s32765_s2 + $0x78] sm:$0xff]  }
   0x7   :  { %22495 = vmatprep.subr.mxu0 %v25437_v0  ;;  %22506 = vmatprep.subr.mxu1 %v25437_v0  ;;  %v32814_v37 = vunpack.c.h.bf16 %v25610_v33  ;;  %v32812_v38 = vunpack.c.h.bf16 %v25615_v34  ;;  %v32810_v39 = vunpack.c.l.bf16 %v25610_v33  ;;  %v32807_v40 = vunpack.c.l.bf16 %v25615_v34  ;;  %v23_v43 = vld [vmem:[%s32766_s0 + $0x8] sm:$0x3]  ;;  %v24_v44 = vld [vmem:[%s32766_s0 + $0xa] sm:$0x3]  ;;  %v25674_v47 = vld [vmem:[%s32765_s2 + $0x60] sm:$0xff]  }
   0x8   :  { %22496 = vmatpush3.msra.mxu0 %v32862_v9  ;;  %22507 = vmatpush3.msra.mxu1 %v32860_v10  ;;  %v32802_v45 = vunpack.c.h.bf16 %v25642_v41  ;;  %v32800_v46 = vunpack.c.h.bf16 %v25647_v42  ;;  %v25679_v48 = vld [vmem:[%s32765_s2 + $0x70] sm:$0xff]   ;;  %v32798_v49 = vunpack.c.l.bf16 %v25642_v41  ;;  %v32795_v50 = vunpack.c.l.bf16 %v25647_v42  ;;  %v25706_v55 = vld [vmem:[%s32765_s2 + $0x88] sm:$0xff]   ;;  %v25711_v56 = vld [vmem:[%s32765_s2 + $0x98] sm:$0xff]  }
   0x9   :  { %22497 = vmatprep.subr.mxu0 %v25437_v0  ;;  %22508 = vmatprep.subr.mxu1 %v25437_v0  ;;  %v32790_v51 = vunpack.c.h.bf16 %v25674_v47  ;;  %v32788_v52 = vunpack.c.h.bf16 %v25679_v48  ;;  %v32786_v53 = vunpack.c.l.bf16 %v25674_v47  ;;  %v32783_v54 = vunpack.c.l.bf16 %v25679_v48  ;;  %33519 = vst [vmem:[#allocation2_spill] sm:$0xff] %v25711_v56  ;;  %v25_v57 = vld [vmem:[%s32766_s0 + $0xc] sm:$0x3]  ;;  %v26_v58 = vld [vmem:[%s32766_s0 + $0xe] sm:$0x3]  ;;  %v25738_v61 = vld [vmem:[%s32765_s2 + $0x80] sm:$0xff]  }
   0xa   :  { %22498 = vmatpush3.msra.mxu0 %v32858_v11  ;;  %22509 = vmatpush3.msra.mxu1 %v32855_v12  ;;  %v32778_v59 = vunpack.c.h.bf16 %v25706_v55  ;;  %v32776_v60 = vunpack.c.h.bf16 %v25711_v56  ;;  %33520 = vst [vmem:[#allocation3_spill] sm:$0xff] %v25738_v61  ;;  %v25743_v62 = vld [vmem:[%s32765_s2 + $0x90] sm:$0xff]   ;;  %v32774_v63 = vunpack.c.l.bf16 %v25706_v55  ;;  %v42_v12 = vld [vmem:[%s32766_s0 + $0x2e] sm:$0x3]  ;;  %v26250_v11 = vld [vmem:[%s32765_s2 + $0x180] sm:$0xff]  }
   0xb   :  { %22500 = vmatmul.mubr.msk.f32.vlgmr.msra.gmra.mxu0 %vm1171_vm1, %v19_v15  ;;  %22511 = vmatmul.mubr.msk.f32.vlgmr.msra.gmra.mxu1 %vm1171_vm1, %v20_v16  ;;  %33521 = vst [vmem:[#allocation4_spill] sm:$0xff] %v25743_v62  ;;  %v32771_v15 = vunpack.c.l.bf16 %v25711_v56  ;;  %v32773_v16 = vunpack.c.h.bf16 %v25738_v61  ;;  %33552 = vst [vmem:[#allocation35_spill] sm:$0xff] %v26250_v11  ;;  %v32869_v9 = vunpack.c.h.bf16 %v26250_v11  ;;  %v44_v6 = vld [vmem:[%s32766_s0 + $0x32] sm:$0x3]  ;;  %v26314_v4 = vld [vmem:[%s32765_s2 + $0x1a0] sm:$0xff]  }
   0xc   :  { %22513 = vmatprep.subr.mxu0 %v25437_v0  ;;  %22524 = vmatprep.subr.mxu1 %v25437_v0  ;;  %33556 = vst [vmem:[#allocation39_spill] sm:$0xff] %v26314_v4  ;;  %v32880_v5 = vunpack.c.h.bf16 %v26314_v4 }
   0xd   :  { %22514 = vmatpush3.msra.mxu0 %v32850_v17  ;;  %22525 = vmatpush3.msra.mxu1 %v32848_v18 }
   0xe   :  { %22515 = vmatprep.subr.mxu0 %v25437_v0  ;;  %22526 = vmatprep.subr.mxu1 %v25437_v0 }
   0xf   :  { %22516 = vmatpush3.msra.mxu0 %v32846_v21  ;;  %22527 = vmatpush3.msra.mxu1 %v32843_v22  ;;  %v40_v22 = vld [vmem:[%s32766_s0 + $0x2a] sm:$0x3]  ;;  %v26186_v21 = vld [vmem:[%s32765_s2 + $0x160] sm:$0xff]  }
  0x10   :  { %22517 = vmatprep.subr.mxu0 %v25437_v0  ;;  %22528 = vmatprep.subr.mxu1 %v25437_v0  ;;  %33548 = vst [vmem:[#allocation31_spill] sm:$0xff] %v26186_v21  ;;  %v32857_v17 = vunpack.c.h.bf16 %v26186_v21 }
  0x11   :  { %22518 = vmatpush3.msra.mxu0 %v32838_v23  ;;  %22529 = vmatpush3.msra.mxu1 %v32836_v24 }
  0x12   :  { %22519 = vmatprep.subr.mxu0 %v25437_v0  ;;  %22530 = vmatprep.subr.mxu1 %v25437_v0 }
  0x13   :  { %22520 = vmatpush3.msra.mxu0 %v32834_v25  ;;  %22521 = vmatprep.mubr.msk.f32.mxu0 %vm25438_vm0, %v25437_v0  ;;  %v26122_v25 = vld [vmem:[%s32765_s2 + $0x140] sm:$0xff]  }
  0x14   :  { %22531 = vmatpush3.msra.mxu1 %v32831_v26  ;;  %22532 = vmatprep.mubr.msk.f32.mxu1 %vm25438_vm0, %v25437_v0  ;;  %v38_v26 = vld [vmem:[%s32766_s0 + $0x26] sm:$0x3]  ;;  %33544 = vst [vmem:[#allocation27_spill] sm:$0xff] %v26122_v25  ;;  %v32845_v23 = vunpack.c.h.bf16 %v26122_v25 }
  0x15   :  { %22522 = vmatmul.mubr.msk.f32.vlgmr.msra.gmra.mxu0 %vm1171_vm1, %v21_v29  ;;  %22533 = vmatmul.mubr.msk.f32.vlgmr.msra.gmra.mxu1 %vm1171_vm1, %v22_v30  ;;  %v32772_v29 = vunpack.c.h.bf16 %v25743_v62  ;;  %v32775_v30 = vunpack.c.l.bf16 %v25738_v61  ;;  %v27886_v61 = vld [vmem:[%s32767_s3 + $0xa8] sm:$0xff]  }
  0x16   :  { %22535 = vmatprep.subr.mxu0 %v25437_v0  ;;  %22546 = vmatprep.subr.mxu1 %v25437_v0  ;;  %33730 = vst [vmem:[#allocation135_spill] sm:$0xff] %v27886_v61 }
  0x17   :  { %22536 = vmatpush3.msra.mxu0 %v32826_v31  ;;  %22547 = vmatpush3.msra.mxu1 %v32824_v32 }
  0x18   :  { %22537 = vmatprep.subr.mxu0 %v25437_v0  ;;  %22548 = vmatprep.subr.mxu1 %v25437_v0 }
  0x19   :  { %22538 = vmatpush3.msra.mxu0 %v32822_v35  ;;  %22549 = vmatpush3.msra.mxu1 %v32819_v36  ;;  %v36_v36 = vld [vmem:[%s32766_s0 + $0x22] sm:$0x3] }
  0x1a   :  { %22539 = vmatprep.subr.mxu0 %v25437_v0  ;;  %22550 = vmatprep.subr.mxu1 %v25437_v0  ;;  %v26058_v35 = vld [vmem:[%s32765_s2 + $0x120] sm:$0xff]  }
  0x1b   :  { %22540 = vmatpush3.msra.mxu0 %v32814_v37  ;;  %22551 = vmatpush3.msra.mxu1 %v32812_v38  ;;  %33540 = vst [vmem:[#allocation23_spill] sm:$0xff] %v26058_v35  ;;  %v32833_v31 = vunpack.c.h.bf16 %v26058_v35 }
  0x1c   :  { %22541 = vmatprep.subr.mxu0 %v25437_v0  ;;  %22552 = vmatprep.subr.mxu1 %v25437_v0 }
  0x1d   :  { %22542 = vmatpush3.msra.mxu0 %v32810_v39  ;;  %22543 = vmatprep.mubr.msk.f32.mxu0 %vm25438_vm0, %v25437_v0  ;;  %v25994_v39 = vld [vmem:[%s32765_s2 + $0x100] sm:$0xff]  }
  0x1e   :  { %22553 = vmatpush3.msra.mxu1 %v32807_v40  ;;  %22554 = vmatprep.mubr.msk.f32.mxu1 %vm25438_vm0, %v25437_v0  ;;  %v34_v40 = vld [vmem:[%s32766_s0 + $0x1e] sm:$0x3]  ;;  %33536 = vst [vmem:[#allocation19_spill] sm:$0xff] %v25994_v39  ;;  %v32821_v37 = vunpack.c.h.bf16 %v25994_v39 }
  0x1f   :  { %22544 = vmatmul.mubr.msk.f32.vlgmr.msra.gmra.mxu0 %vm1171_vm1, %v23_v43  ;;  %22555 = vmatmul.mubr.msk.f32.vlgmr.msra.gmra.mxu1 %vm1171_vm1, %v24_v44  ;;  %v32777_v43 = vunpack.c.l.bf16 %v25743_v62  ;;  %v25770_v44 = vld [vmem:[%s32765_s2 + $0xa8] sm:$0xff]  }
  0x20   :  { %22557 = vmatprep.subr.mxu0 %v25437_v0  ;;  %22568 = vmatprep.subr.mxu1 %v25437_v0  ;;  %33522 = vst [vmem:[#allocation5_spill] sm:$0xff] %v25770_v44 }
  0x21   :  { %22558 = vmatpush3.msra.mxu0 %v32802_v45  ;;  %22569 = vmatpush3.msra.mxu1 %v32800_v46 }
  0x22   :  { %22559 = vmatprep.subr.mxu0 %v25437_v0  ;;  %22570 = vmatprep.subr.mxu1 %v25437_v0 }
  0x23   :  { %22560 = vmatpush3.msra.mxu0 %v32798_v49  ;;  %22571 = vmatpush3.msra.mxu1 %v32795_v50  ;;  %v32_v50 = vld [vmem:[%s32766_s0 + $0x1a] sm:$0x3]  ;;  %v25930_v49 = vld [vmem:[%s32765_s2 + $0xe0] sm:$0xff]  }
  0x24   :  { %22561 = vmatprep.subr.mxu0 %v25437_v0  ;;  %22572 = vmatprep.subr.mxu1 %v25437_v0  ;;  %33532 = vst [vmem:[#allocation15_spill] sm:$0xff] %v25930_v49  ;;  %v32809_v45 = vunpack.c.h.bf16 %v25930_v49 }
  0x25   :  { %22562 = vmatpush3.msra.mxu0 %v32790_v51  ;;  %22573 = vmatpush3.msra.mxu1 %v32788_v52 }
  0x26   :  { %22563 = vmatprep.subr.mxu0 %v25437_v0  ;;  %22574 = vmatprep.subr.mxu1 %v25437_v0 }
  0x27   :  { %22564 = vmatpush3.msra.mxu0 %v32786_v53  ;;  %22565 = vmatprep.mubr.msk.f32.mxu0 %vm25438_vm0, %v25437_v0  ;;  %v25866_v53 = vld [vmem:[%s32765_s2 + $0xc0] sm:$0xff]  }
  0x28   :  { %22575 = vmatpush3.msra.mxu1 %v32783_v54  ;;  %22576 = vmatprep.mubr.msk.f32.mxu1 %vm25438_vm0, %v25437_v0  ;;  %v30_v54 = vld [vmem:[%s32766_s0 + $0x16] sm:$0x3]  ;;  %33528 = vst [vmem:[#allocation11_spill] sm:$0xff] %v25866_v53  ;;  %v32797_v51 = vunpack.c.h.bf16 %v25866_v53 }
  0x29   :  { %22566 = vmatmul.mubr.msk.f32.vlgmr.msra.gmra.mxu0 %vm1171_vm1, %v25_v57  ;;  %22577 = vmatmul.mubr.msk.f32.vlgmr.msra.gmra.mxu1 %vm1171_vm1, %v26_v58  ;;  %v25775_v57 = vld [vmem:[%s32765_s2 + $0xb8] sm:$0xff]   ;;  %v27_v58 = vld [vmem:[%s32766_s0 + $0x10] sm:$0x3] }
  0x2a   :  { %22579 = vmatprep.subr.mxu0 %v25437_v0  ;;  %22590 = vmatprep.subr.mxu1 %v25437_v0  ;;  %33523 = vst [vmem:[#allocation6_spill] sm:$0xff] %v25775_v57 }
  0x2b   :  { %22580 = vmatpush3.msra.mxu0 %v32778_v59  ;;  %22591 = vmatpush3.msra.mxu1 %v32776_v60  ;;  %v32781_v60 = vunpack.c.l.bf16 %v25770_v44 }
  0x2c   :  { %22581 = vmatprep.subr.mxu0 %v25437_v0  ;;  %22592 = vmatprep.subr.mxu1 %v25437_v0 }
  0x2d   :  { %22582 = vmatpush3.msra.mxu0 %v32774_v63  ;;  %22593 = vmatpush3.msra.mxu1 %v32771_v15  ;;  %v28_v15 = vld [vmem:[%s32766_s0 + $0x12] sm:$0x3]  ;;  %v25802_v63 = vld [vmem:[%s32765_s2 + $0xa0] sm:$0xff]  }
  0x2e   :  { %22583 = vmatprep.subr.mxu0 %v25437_v0  ;;  %22594 = vmatprep.subr.mxu1 %v25437_v0  ;;  %33524 = vst [vmem:[#allocation7_spill] sm:$0xff] %v25802_v63  ;;  %v32785_v59 = vunpack.c.h.bf16 %v25802_v63 }
  0x2f   :  { %22584 = vmatpush3.msra.mxu0 %v32773_v16  ;;  %22595 = vmatpush3.msra.mxu1 %v32772_v29  ;;  %v32780_v29 = vunpack.c.h.bf16 %v25770_v44  ;;  %v32779_v16 = vunpack.c.h.bf16 %v25775_v57  ;;  %v27818_v44 = vld [vmem:[%s32767_s3 + $0x88] sm:$0xff]  }
  0x30   :  { %22585 = vmatprep.subr.mxu0 %v25437_v0  ;;  %22596 = vmatprep.subr.mxu1 %v25437_v0  ;;  %33720 = vst [vmem:[#allocation129_spill] sm:$0xff] %v27818_v44 }
  0x31   :  { %22586 = vmatpush3.msra.mxu0 %v32775_v30  ;;  %22587 = vmatprep.mubr.msk.f32.mxu0 %vm25438_vm0, %v25437_v0  ;;  %v25807_v30 = vld [vmem:[%s32765_s2 + $0xb0] sm:$0xff]  }
  0x32   :  { %22597 = vmatpush3.msra.mxu1 %v32777_v43  ;;  %22598 = vmatprep.mubr.msk.f32.mxu1 %vm25438_vm0, %v25437_v0  ;;  %33525 = vst [vmem:[#allocation8_spill] sm:$0xff] %v25807_v30  ;;  %v32782_v43 = vunpack.c.l.bf16 %v25775_v57 }
  0x33   :  { %22588 = vmatmul.mubr.msk.f32.vlgmr.msra.gmra.mxu0 %vm1171_vm1, %v27_v58  ;;  %22599 = vmatmul.mubr.msk.f32.vlgmr.msra.gmra.mxu1 %vm1171_vm1, %v28_v15  ;;  %v32784_v58 = vunpack.c.h.bf16 %v25807_v30  ;;  %v32787_v15 = vunpack.c.l.bf16 %v25802_v63  ;;  %v27750_v63 = vld [vmem:[%s32767_s3 + $0x68] sm:$0xff]  }
  0x34   :  { %22601 = vmatprep.subr.mxu0 %v25437_v0  ;;  %22612 = vmatprep.subr.mxu1 %v25437_v0  ;;  %33712 = vst [vmem:[#allocation125_spill] sm:$0xff] %v27750_v63 }
  0x35   :  { %22602 = vmatpush3.msra.mxu0 %v32780_v29  ;;  %22613 = vmatpush3.msra.mxu1 %v32779_v16  ;;  %v32789_v16 = vunpack.c.l.bf16 %v25807_v30  ;;  %v25834_v29 = vld [vmem:[%s32765_s2 + $0xc8] sm:$0xff]  }
  0x36   :  { %22603 = vmatprep.subr.mxu0 %v25437_v0  ;;  %22614 = vmatprep.subr.mxu1 %v25437_v0  ;;  %33526 = vst [vmem:[#allocation9_spill] sm:$0xff] %v25834_v29  ;;  %v32793_v52 = vunpack.c.l.bf16 %v25834_v29 }
  0x37   :  { %22604 = vmatpush3.msra.mxu0 %v32781_v60  ;;  %22615 = vmatpush3.msra.mxu1 %v32782_v43  ;;  %v25839_v60 = vld [vmem:[%s32765_s2 + $0xd8] sm:$0xff]   ;;  %v29_v43 = vld [vmem:[%s32766_s0 + $0x14] sm:$0x3] }
  0x38   :  { %22605 = vmatprep.subr.mxu0 %v25437_v0  ;;  %22616 = vmatprep.subr.mxu1 %v25437_v0  ;;  %33527 = vst [vmem:[#allocation10_spill] sm:$0xff] %v25839_v60 }
  0x39   :  { %22606 = vmatpush3.msra.mxu0 %v32785_v59  ;;  %22617 = vmatpush3.msra.mxu1 %v32784_v58  ;;  %v32792_v58 = vunpack.c.h.bf16 %v25834_v29  ;;  %v32791_v59 = vunpack.c.h.bf16 %v25839_v60  ;;  %v27682_v29 = vld [vmem:[%s32767_s3 + $0x48] sm:$0xff]  }
  0x3a   :  { %22607 = vmatprep.subr.mxu0 %v25437_v0  ;;  %22618 = vmatprep.subr.mxu1 %v25437_v0  ;;  %33704 = vst [vmem:[#allocation121_spill] sm:$0xff] %v27682_v29 }
  0x3b   :  { %22608 = vmatpush3.msra.mxu0 %v32787_v15  ;;  %22609 = vmatprep.mubr.msk.f32.mxu0 %vm25438_vm0, %v25437_v0  ;;  %v25871_v15 = vld [vmem:[%s32765_s2 + $0xd0] sm:$0xff]  }
  0x3c   :  { %22619 = vmatpush3.msra.mxu1 %v32789_v16  ;;  %22620 = vmatprep.mubr.msk.f32.mxu1 %vm25438_vm0, %v25437_v0  ;;  %33529 = vst [vmem:[#allocation12_spill] sm:$0xff] %v25871_v15  ;;  %v32794_v16 = vunpack.c.l.bf16 %v25839_v60 }
  0x3d   :  { %22610 = vmatmul.mubr.msk.f32.vlgmr.msra.gmra.mxu0 %vm1171_vm1, %v29_v43  ;;  %22621 = vmatmul.mubr.msk.f32.vlgmr.msra.gmra.mxu1 %vm1171_vm1, %v30_v54  ;;  %v32796_v43 = vunpack.c.h.bf16 %v25871_v15  ;;  %v32799_v54 = vunpack.c.l.bf16 %v25866_v53  ;;  %v27614_v53 = vld [vmem:[%s32767_s3 + $0x28] sm:$0xff]  }
  0x3e   :  { %22623 = vmatprep.subr.mxu0 %v25437_v0  ;;  %22634 = vmatprep.subr.mxu1 %v25437_v0  ;;  %33696 = vst [vmem:[#allocation117_spill] sm:$0xff] %v27614_v53 }
  0x3f   :  { %22624 = vmatpush3.msra.mxu0 %v32792_v58  ;;  %22635 = vmatpush3.msra.mxu1 %v32791_v59  ;;  %v32801_v59 = vunpack.c.l.bf16 %v25871_v15  ;;  %v25898_v58 = vld [vmem:[%s32765_s2 + $0xe8] sm:$0xff]  }
  0x40   :  { %22625 = vmatprep.subr.mxu0 %v25437_v0  ;;  %22636 = vmatprep.subr.mxu1 %v25437_v0  ;;  %33530 = vst [vmem:[#allocation13_spill] sm:$0xff] %v25898_v58  ;;  %v32805_v46 = vunpack.c.l.bf16 %v25898_v58 }
  0x41   :  { %22626 = vmatpush3.msra.mxu0 %v32793_v52  ;;  %22637 = vmatpush3.msra.mxu1 %v32794_v16  ;;  %v25903_v52 = vld [vmem:[%s32765_s2 + $0xf8] sm:$0xff]  }
  0x42   :  { %22627 = vmatprep.subr.mxu0 %v25437_v0  ;;  %22638 = vmatprep.subr.mxu1 %v25437_v0  ;;  %33531 = vst [vmem:[#allocation14_spill] sm:$0xff] %v25903_v52  ;;  %v31_v16 = vld [vmem:[%s32766_s0 + $0x18] sm:$0x3] }
  0x43   :  { %22628 = vmatpush3.msra.mxu0 %v32797_v51  ;;  %22639 = vmatpush3.msra.mxu1 %v32796_v43  ;;  %v32804_v43 = vunpack.c.h.bf16 %v25898_v58  ;;  %v32803_v51 = vunpack.c.h.bf16 %v25903_v52  ;;  %v27546_v58 = vld [vmem:[%s32767_s3 + $0x8] sm:$0xff]  }
  0x44   :  { %22629 = vmatprep.subr.mxu0 %v25437_v0  ;;  %22640 = vmatprep.subr.mxu1 %v25437_v0  ;;  %33688 = vst [vmem:[#allocation113_spill] sm:$0xff] %v27546_v58 }
  0x45   :  { %22630 = vmatpush3.msra.mxu0 %v32799_v54  ;;  %22631 = vmatprep.mubr.msk.f32.mxu0 %vm25438_vm0, %v25437_v0  ;;  %v25935_v54 = vld [vmem:[%s32765_s2 + $0xf0] sm:$0xff]  }
  0x46   :  { %22641 = vmatpush3.msra.mxu1 %v32801_v59  ;;  %22642 = vmatprep.mubr.msk.f32.mxu1 %vm25438_vm0, %v25437_v0  ;;  %33533 = vst [vmem:[#allocation16_spill] sm:$0xff] %v25935_v54  ;;  %v32806_v59 = vunpack.c.l.bf16 %v25903_v52 }
  0x47   :  { %22632 = vmatmul.mubr.msk.f32.vlgmr.msra.gmra.mxu0 %vm1171_vm1, %v31_v16  ;;  %22643 = vmatmul.mubr.msk.f32.vlgmr.msra.gmra.mxu1 %vm1171_vm1, %v32_v50  ;;  %v32808_v16 = vunpack.c.h.bf16 %v25935_v54  ;;  %v32811_v50 = vunpack.c.l.bf16 %v25930_v49  ;;  %v27478_v49 = vld [vmem:[%s32765_s2 + $0x3e8] sm:$0xff]  }
  0x48   :  { %22645 = vmatprep.subr.mxu0 %v25437_v0  ;;  %22656 = vmatprep.subr.mxu1 %v25437_v0  ;;  %33680 = vst [vmem:[#allocation109_spill] sm:$0xff] %v27478_v49 }
  0x49   :  { %22646 = vmatpush3.msra.mxu0 %v32804_v43  ;;  %22657 = vmatpush3.msra.mxu1 %v32803_v51  ;;  %v32813_v51 = vunpack.c.l.bf16 %v25935_v54  ;;  %v25962_v43 = vld [vmem:[%s32765_s2 + $0x108] sm:$0xff]  }
  0x4a   :  { %22647 = vmatprep.subr.mxu0 %v25437_v0  ;;  %22658 = vmatprep.subr.mxu1 %v25437_v0  ;;  %33534 = vst [vmem:[#allocation17_spill] sm:$0xff] %v25962_v43  ;;  %v32817_v38 = vunpack.c.l.bf16 %v25962_v43 }
  0x4b   :  { %22648 = vmatpush3.msra.mxu0 %v32805_v46  ;;  %22659 = vmatpush3.msra.mxu1 %v32806_v59  ;;  %v25967_v46 = vld [vmem:[%s32765_s2 + $0x118] sm:$0xff]  }
  0x4c   :  { %22649 = vmatprep.subr.mxu0 %v25437_v0  ;;  %22660 = vmatprep.subr.mxu1 %v25437_v0  ;;  %33535 = vst [vmem:[#allocation18_spill] sm:$0xff] %v25967_v46  ;;  %v33_v59 = vld [vmem:[%s32766_s0 + $0x1c] sm:$0x3] }
  0x4d   :  { %22650 = vmatpush3.msra.mxu0 %v32809_v45  ;;  %22661 = vmatpush3.msra.mxu1 %v32808_v16  ;;  %v32816_v16 = vunpack.c.h.bf16 %v25962_v43  ;;  %v32815_v45 = vunpack.c.h.bf16 %v25967_v46  ;;  %v27410_v43 = vld [vmem:[%s32765_s2 + $0x3c8] sm:$0xff]  }
  0x4e   :  { %22651 = vmatprep.subr.mxu0 %v25437_v0  ;;  %22662 = vmatprep.subr.mxu1 %v25437_v0  ;;  %33672 = vst [vmem:[#allocation105_spill] sm:$0xff] %v27410_v43 }
  0x4f   :  { %22652 = vmatpush3.msra.mxu0 %v32811_v50  ;;  %22653 = vmatprep.mubr.msk.f32.mxu0 %vm25438_vm0, %v25437_v0  ;;  %v25999_v50 = vld [vmem:[%s32765_s2 + $0x110] sm:$0xff]  }
  0x50   :  { %22663 = vmatpush3.msra.mxu1 %v32813_v51  ;;  %22664 = vmatprep.mubr.msk.f32.mxu1 %vm25438_vm0, %v25437_v0  ;;  %33537 = vst [vmem:[#allocation20_spill] sm:$0xff] %v25999_v50  ;;  %v32818_v51 = vunpack.c.l.bf16 %v25967_v46 }
  0x51   :  { %22654 = vmatmul.mubr.msk.f32.vlgmr.msra.gmra.mxu0 %vm1171_vm1, %v33_v59  ;;  %22665 = vmatmul.mubr.msk.f32.vlgmr.msra.gmra.mxu1 %vm1171_vm1, %v34_v40  ;;  %v32820_v59 = vunpack.c.h.bf16 %v25999_v50  ;;  %v32823_v40 = vunpack.c.l.bf16 %v25994_v39  ;;  %v27342_v39 = vld [vmem:[%s32765_s2 + $0x3a8] sm:$0xff]  }
  0x52   :  { %22667 = vmatprep.subr.mxu0 %v25437_v0  ;;  %22678 = vmatprep.subr.mxu1 %v25437_v0  ;;  %33664 = vst [vmem:[#allocation101_spill] sm:$0xff] %v27342_v39 }
  0x53   :  { %22668 = vmatpush3.msra.mxu0 %v32816_v16  ;;  %22679 = vmatpush3.msra.mxu1 %v32815_v45  ;;  %v32825_v45 = vunpack.c.l.bf16 %v25999_v50  ;;  %v26026_v16 = vld [vmem:[%s32765_s2 + $0x128] sm:$0xff]  }
  0x54   :  { %22669 = vmatprep.subr.mxu0 %v25437_v0  ;;  %22680 = vmatprep.subr.mxu1 %v25437_v0  ;;  %33538 = vst [vmem:[#allocation21_spill] sm:$0xff] %v26026_v16  ;;  %v32829_v32 = vunpack.c.l.bf16 %v26026_v16 }
  0x55   :  { %22670 = vmatpush3.msra.mxu0 %v32817_v38  ;;  %22681 = vmatpush3.msra.mxu1 %v32818_v51  ;;  %v26031_v38 = vld [vmem:[%s32765_s2 + $0x138] sm:$0xff]   ;;  %v35_v51 = vld [vmem:[%s32766_s0 + $0x20] sm:$0x3] }
  0x56   :  { %22671 = vmatprep.subr.mxu0 %v25437_v0  ;;  %22682 = vmatprep.subr.mxu1 %v25437_v0  ;;  %33539 = vst [vmem:[#allocation22_spill] sm:$0xff] %v26031_v38 }
  0x57   :  { %22672 = vmatpush3.msra.mxu0 %v32821_v37  ;;  %22683 = vmatpush3.msra.mxu1 %v32820_v59  ;;  %v32828_v59 = vunpack.c.h.bf16 %v26026_v16  ;;  %v32827_v37 = vunpack.c.h.bf16 %v26031_v38  ;;  %v27274_v16 = vld [vmem:[%s32765_s2 + $0x388] sm:$0xff]  }
  0x58   :  { %22673 = vmatprep.subr.mxu0 %v25437_v0  ;;  %22684 = vmatprep.subr.mxu1 %v25437_v0  ;;  %33656 = vst [vmem:[#allocation97_spill] sm:$0xff] %v27274_v16 }
  0x59   :  { %22674 = vmatpush3.msra.mxu0 %v32823_v40  ;;  %22675 = vmatprep.mubr.msk.f32.mxu0 %vm25438_vm0, %v25437_v0  ;;  %v26063_v40 = vld [vmem:[%s32765_s2 + $0x130] sm:$0xff]  }
  0x5a   :  { %22685 = vmatpush3.msra.mxu1 %v32825_v45  ;;  %22686 = vmatprep.mubr.msk.f32.mxu1 %vm25438_vm0, %v25437_v0  ;;  %33541 = vst [vmem:[#allocation24_spill] sm:$0xff] %v26063_v40  ;;  %v32830_v45 = vunpack.c.l.bf16 %v26031_v38 }
  0x5b   :  { %22676 = vmatmul.mubr.msk.f32.vlgmr.msra.gmra.mxu0 %vm1171_vm1, %v35_v51  ;;  %22687 = vmatmul.mubr.msk.f32.vlgmr.msra.gmra.mxu1 %vm1171_vm1, %v36_v36  ;;  %v32832_v51 = vunpack.c.h.bf16 %v26063_v40  ;;  %v32835_v36 = vunpack.c.l.bf16 %v26058_v35  ;;  %v27206_v35 = vld [vmem:[%s32765_s2 + $0x368] sm:$0xff]  }
  0x5c   :  { %22689 = vmatprep.subr.mxu0 %v25437_v0  ;;  %22700 = vmatprep.subr.mxu1 %v25437_v0  ;;  %33648 = vst [vmem:[#allocation93_spill] sm:$0xff] %v27206_v35 }
  0x5d   :  { %22690 = vmatpush3.msra.mxu0 %v32828_v59  ;;  %22701 = vmatpush3.msra.mxu1 %v32827_v37  ;;  %v32837_v37 = vunpack.c.l.bf16 %v26063_v40  ;;  %v26090_v59 = vld [vmem:[%s32765_s2 + $0x148] sm:$0xff]  }
  0x5e   :  { %22691 = vmatprep.subr.mxu0 %v25437_v0  ;;  %22702 = vmatprep.subr.mxu1 %v25437_v0  ;;  %33542 = vst [vmem:[#allocation25_spill] sm:$0xff] %v26090_v59  ;;  %v32841_v24 = vunpack.c.l.bf16 %v26090_v59 }
  0x5f   :  { %22692 = vmatpush3.msra.mxu0 %v32829_v32  ;;  %22703 = vmatpush3.msra.mxu1 %v32830_v45  ;;  %v26095_v32 = vld [vmem:[%s32765_s2 + $0x158] sm:$0xff]   ;;  %v37_v45 = vld [vmem:[%s32766_s0 + $0x24] sm:$0x3] }
  0x60   :  { %22693 = vmatprep.subr.mxu0 %v25437_v0  ;;  %22704 = vmatprep.subr.mxu1 %v25437_v0  ;;  %33543 = vst [vmem:[#allocation26_spill] sm:$0xff] %v26095_v32 }
  0x61   :  { %22694 = vmatpush3.msra.mxu0 %v32833_v31  ;;  %22705 = vmatpush3.msra.mxu1 %v32832_v51  ;;  %v32840_v51 = vunpack.c.h.bf16 %v26090_v59  ;;  %v32839_v31 = vunpack.c.h.bf16 %v26095_v32  ;;  %v27138_v59 = vld [vmem:[%s32765_s2 + $0x348] sm:$0xff]  }
  0x62   :  { %22695 = vmatprep.subr.mxu0 %v25437_v0  ;;  %22706 = vmatprep.subr.mxu1 %v25437_v0  ;;  %33640 = vst [vmem:[#allocation89_spill] sm:$0xff] %v27138_v59 }
  0x63   :  { %22696 = vmatpush3.msra.mxu0 %v32835_v36  ;;  %22697 = vmatprep.mubr.msk.f32.mxu0 %vm25438_vm0, %v25437_v0  ;;  %v26127_v36 = vld [vmem:[%s32765_s2 + $0x150] sm:$0xff]  }
  0x64   :  { %22707 = vmatpush3.msra.mxu1 %v32837_v37  ;;  %22708 = vmatprep.mubr.msk.f32.mxu1 %vm25438_vm0, %v25437_v0  ;;  %33545 = vst [vmem:[#allocation28_spill] sm:$0xff] %v26127_v36  ;;  %v32842_v37 = vunpack.c.l.bf16 %v26095_v32 }
  0x65   :  { %22698 = vmatmul.mubr.msk.f32.vlgmr.msra.gmra.mxu0 %vm1171_vm1, %v37_v45  ;;  %22709 = vmatmul.mubr.msk.f32.vlgmr.msra.gmra.mxu1 %vm1171_vm1, %v38_v26  ;;  %v32844_v45 = vunpack.c.h.bf16 %v26127_v36  ;;  %v32847_v26 = vunpack.c.l.bf16 %v26122_v25  ;;  %v27070_v25 = vld [vmem:[%s32765_s2 + $0x328] sm:$0xff]  }
  0x66   :  { %22711 = vmatprep.subr.mxu0 %v25437_v0  ;;  %22722 = vmatprep.subr.mxu1 %v25437_v0  ;;  %33632 = vst [vmem:[#allocation85_spill] sm:$0xff] %v27070_v25 }
  0x67   :  { %22712 = vmatpush3.msra.mxu0 %v32840_v51  ;;  %22723 = vmatpush3.msra.mxu1 %v32839_v31  ;;  %v32849_v31 = vunpack.c.l.bf16 %v26127_v36  ;;  %v26154_v51 = vld [vmem:[%s32765_s2 + $0x168] sm:$0xff]  }
  0x68   :  { %22713 = vmatprep.subr.mxu0 %v25437_v0  ;;  %22724 = vmatprep.subr.mxu1 %v25437_v0  ;;  %33546 = vst [vmem:[#allocation29_spill] sm:$0xff] %v26154_v51  ;;  %v32853_v18 = vunpack.c.l.bf16 %v26154_v51 }
  0x69   :  { %22714 = vmatpush3.msra.mxu0 %v32841_v24  ;;  %22725 = vmatpush3.msra.mxu1 %v32842_v37  ;;  %v26159_v24 = vld [vmem:[%s32765_s2 + $0x178] sm:$0xff]   ;;  %v39_v37 = vld [vmem:[%s32766_s0 + $0x28] sm:$0x3] }
  0x6a   :  { %22715 = vmatprep.subr.mxu0 %v25437_v0  ;;  %22726 = vmatprep.subr.mxu1 %v25437_v0  ;;  %33547 = vst [vmem:[#allocation30_spill] sm:$0xff] %v26159_v24 }
  0x6b   :  { %22716 = vmatpush3.msra.mxu0 %v32845_v23  ;;  %22727 = vmatpush3.msra.mxu1 %v32844_v45  ;;  %v32852_v45 = vunpack.c.h.bf16 %v26154_v51  ;;  %v32851_v23 = vunpack.c.h.bf16 %v26159_v24  ;;  %v27002_v51 = vld [vmem:[%s32765_s2 + $0x308] sm:$0xff]  }
  0x6c   :  { %22717 = vmatprep.subr.mxu0 %v25437_v0  ;;  %22728 = vmatprep.subr.mxu1 %v25437_v0  ;;  %33624 = vst [vmem:[#allocation81_spill] sm:$0xff] %v27002_v51 }
  0x6d   :  { %22718 = vmatpush3.msra.mxu0 %v32847_v26  ;;  %22719 = vmatprep.mubr.msk.f32.mxu0 %vm25438_vm0, %v25437_v0  ;;  %v26191_v26 = vld [vmem:[%s32765_s2 + $0x170] sm:$0xff]  }
  0x6e   :  { %22729 = vmatpush3.msra.mxu1 %v32849_v31  ;;  %22730 = vmatprep.mubr.msk.f32.mxu1 %vm25438_vm0, %v25437_v0  ;;  %33549 = vst [vmem:[#allocation32_spill] sm:$0xff] %v26191_v26  ;;  %v32854_v31 = vunpack.c.l.bf16 %v26159_v24 }
  0x6f   :  { %22720 = vmatmul.mubr.msk.f32.vlgmr.msra.gmra.mxu0 %vm1171_vm1, %v39_v37  ;;  %22731 = vmatmul.mubr.msk.f32.vlgmr.msra.gmra.mxu1 %vm1171_vm1, %v40_v22  ;;  %v32856_v37 = vunpack.c.h.bf16 %v26191_v26  ;;  %v32859_v22 = vunpack.c.l.bf16 %v26186_v21  ;;  %v26934_v21 = vld [vmem:[%s32765_s2 + $0x2e8] sm:$0xff]  }
  0x70   :  { %22733 = vmatprep.subr.mxu0 %v25437_v0  ;;  %22744 = vmatprep.subr.mxu1 %v25437_v0  ;;  %33616 = vst [vmem:[#allocation77_spill] sm:$0xff] %v26934_v21 }
  0x71   :  { %22734 = vmatpush3.msra.mxu0 %v32852_v45  ;;  %22745 = vmatpush3.msra.mxu1 %v32851_v23  ;;  %v32861_v23 = vunpack.c.l.bf16 %v26191_v26  ;;  %v26218_v45 = vld [vmem:[%s32765_s2 + $0x188] sm:$0xff]  }
  0x72   :  { %22735 = vmatprep.subr.mxu0 %v25437_v0  ;;  %22746 = vmatprep.subr.mxu1 %v25437_v0  ;;  %33550 = vst [vmem:[#allocation33_spill] sm:$0xff] %v26218_v45  ;;  %v32865_v10 = vunpack.c.l.bf16 %v26218_v45 }
  0x73   :  { %22736 = vmatpush3.msra.mxu0 %v32853_v18  ;;  %22747 = vmatpush3.msra.mxu1 %v32854_v31  ;;  %v26223_v18 = vld [vmem:[%s32765_s2 + $0x198] sm:$0xff]   ;;  %v41_v31 = vld [vmem:[%s32766_s0 + $0x2c] sm:$0x3] }
  0x74   :  { %22737 = vmatprep.subr.mxu0 %v25437_v0  ;;  %22748 = vmatprep.subr.mxu1 %v25437_v0  ;;  %33551 = vst [vmem:[#allocation34_spill] sm:$0xff] %v26223_v18 }
  0x75   :  { %22738 = vmatpush3.msra.mxu0 %v32857_v17  ;;  %22749 = vmatpush3.msra.mxu1 %v32856_v37  ;;  %v32864_v37 = vunpack.c.h.bf16 %v26218_v45  ;;  %v32863_v17 = vunpack.c.h.bf16 %v26223_v18  ;;  %v26866_v45 = vld [vmem:[%s32765_s2 + $0x2c8] sm:$0xff]  }
  0x76   :  { %22739 = vmatprep.subr.mxu0 %v25437_v0  ;;  %22750 = vmatprep.subr.mxu1 %v25437_v0  ;;  %33608 = vst [vmem:[#allocation73_spill] sm:$0xff] %v26866_v45 }
  0x77   :  { %22740 = vmatpush3.msra.mxu0 %v32859_v22  ;;  %22741 = vmatprep.mubr.msk.f32.mxu0 %vm25438_vm0, %v25437_v0  ;;  %v26255_v22 = vld [vmem:[%s32765_s2 + $0x190] sm:$0xff]  }
  0x78   :  { %22751 = vmatpush3.msra.mxu1 %v32861_v23  ;;  %22752 = vmatprep.mubr.msk.f32.mxu1 %vm25438_vm0, %v25437_v0  ;;  %33553 = vst [vmem:[#allocation36_spill] sm:$0xff] %v26255_v22  ;;  %v32866_v23 = vunpack.c.l.bf16 %v26223_v18 }
  0x79   :  { %22742 = vmatmul.mubr.msk.f32.vlgmr.msra.gmra.mxu0 %vm1171_vm1, %v41_v31  ;;  %22753 = vmatmul.mubr.msk.f32.vlgmr.msra.gmra.mxu1 %vm1171_vm1, %v42_v12  ;;  %v32868_v31 = vunpack.c.h.bf16 %v26255_v22  ;;  %v32871_v12 = vunpack.c.l.bf16 %v26250_v11  ;;  %v26798_v11 = vld [vmem:[%s32765_s2 + $0x2a8] sm:$0xff]  }
  0x7a   :  { %22755 = vmatprep.subr.mxu0 %v25437_v0  ;;  %22766 = vmatprep.subr.mxu1 %v25437_v0  ;;  %33600 = vst [vmem:[#allocation69_spill] sm:$0xff] %v26798_v11 }
  0x7b   :  { %22756 = vmatpush3.msra.mxu0 %v32864_v37  ;;  %22767 = vmatpush3.msra.mxu1 %v32863_v17  ;;  %v32873_v17 = vunpack.c.l.bf16 %v26255_v22  ;;  %v26282_v37 = vld [vmem:[%s32765_s2 + $0x1a8] sm:$0xff]  }
  0x7c   :  { %22757 = vmatprep.subr.mxu0 %v25437_v0  ;;  %22768 = vmatprep.subr.mxu1 %v25437_v0  ;;  %33554 = vst [vmem:[#allocation37_spill] sm:$0xff] %v26282_v37  ;;  %v32877_v7 = vunpack.c.l.bf16 %v26282_v37 }
  0x7d   :  { %22758 = vmatpush3.msra.mxu0 %v32865_v10  ;;  %22769 = vmatpush3.msra.mxu1 %v32866_v23  ;;  %v26287_v10 = vld [vmem:[%s32765_s2 + $0x1b8] sm:$0xff]   ;;  %v43_v23 = vld [vmem:[%s32766_s0 + $0x30] sm:$0x3] }
  0x7e   :  { %22759 = vmatprep.subr.mxu0 %v25437_v0  ;;  %22770 = vmatprep.subr.mxu1 %v25437_v0  ;;  %33555 = vst [vmem:[#allocation38_spill] sm:$0xff] %v26287_v10 }
  0x7f   :  { %22760 = vmatpush3.msra.mxu0 %v32869_v9  ;;  %22771 = vmatpush3.msra.mxu1 %v32868_v31  ;;  %v32876_v31 = vunpack.c.h.bf16 %v26282_v37  ;;  %v32875_v9 = vunpack.c.h.bf16 %v26287_v10  ;;  %v26378_v37 = vld [vmem:[%s32765_s2 + $0x1c0] sm:$0xff]  }
  0x80   :  { %22761 = vmatprep.subr.mxu0 %v25437_v0  ;;  %22772 = vmatprep.subr.mxu1 %v25437_v0  ;;  %33561 = vst [vmem:[#allocation43_spill] sm:$0xff] %v26378_v37 }
  0x81   :  { %22762 = vmatpush3.msra.mxu0 %v32871_v12  ;;  %22763 = vmatprep.mubr.msk.f32.mxu0 %vm25438_vm0, %v25437_v0  ;;  %v26319_v12 = vld [vmem:[%s32765_s2 + $0x1b0] sm:$0xff]  }
  0x82   :  { %22773 = vmatpush3.msra.mxu1 %v32873_v17  ;;  %22774 = vmatprep.mubr.msk.f32.mxu1 %vm25438_vm0, %v25437_v0  ;;  %33557 = vst [vmem:[#allocation40_spill] sm:$0xff] %v26319_v12  ;;  %v32878_v17 = vunpack.c.l.bf16 %v26287_v10  ;;  %v33560_v10 = vunpack.c.l.bf16 %v26319_v12 }
  0x83   :  { %22764 = vmatmul.mubr.msk.f32.vlgmr.msra.gmra.mxu0 %vm1171_vm1, %v43_v23  ;;  %22775 = vmatmul.mubr.msk.f32.vlgmr.msra.gmra.mxu1 %vm1171_vm1, %v44_v6  ;;  %v32879_v23 = vunpack.c.h.bf16 %v26319_v12  ;;  %v32885_v6 = vunpack.c.l.bf16 %v26314_v4  ;;  %v32894_v4 = vunpack.c.h.bf16 %v26378_v37 }
  0x84   :  { %22777 = vmatprep.subr.mxu0 %v25437_v0  ;;  %22788 = vmatprep.subr.mxu1 %v25437_v0 }
  0x85   :  { %22778 = vmatpush3.msra.mxu0 %v32876_v31  ;;  %22789 = vmatpush3.msra.mxu1 %v32875_v9  ;;  %v26346_v31 = vld [vmem:[%s32765_s2 + $0x1c8] sm:$0xff]   ;;  %v46_v9 = vld [vmem:[%s32766_s0 + $0x36] sm:$0x3] }
  0x86   :  { %22779 = vmatprep.subr.mxu0 %v25437_v0  ;;  %22790 = vmatprep.subr.mxu1 %v25437_v0  ;;  %33558 = vst [vmem:[#allocation41_spill] sm:$0xff] %v26346_v31 }
  0x87   :  { %22780 = vmatpush3.msra.mxu0 %v32877_v7  ;;  %22791 = vmatpush3.msra.mxu1 %v32878_v17  ;;  %v26351_v7 = vld [vmem:[%s32765_s2 + $0x1d8] sm:$0xff]   ;;  %v45_v17 = vld [vmem:[%s32766_s0 + $0x34] sm:$0x3] }
  0x88   :  { %22781 = vmatprep.subr.mxu0 %v25437_v0  ;;  %22792 = vmatprep.subr.mxu1 %v25437_v0  ;;  %33559 = vst [vmem:[#allocation42_spill] sm:$0xff] %v26351_v7  ;;  %v33563_v12 = vunpack.c.h.bf16 %v26351_v7 }
  0x89   :  { %22782 = vmatpush3.msra.mxu0 %v32880_v5  ;;  %22793 = vmatpush3.msra.mxu1 %v32879_v23  ;;  %v32890_v23 = vunpack.c.h.bf16 %v26346_v31  ;;  %v32891_v5 = vunpack.c.l.bf16 %v26346_v31  ;;  %v26442_v31 = vld [vmem:[%s32765_s2 + $0x1e0] sm:$0xff]  }
  0x8a   :  { %22783 = vmatprep.subr.mxu0 %v25437_v0  ;;  %22794 = vmatprep.subr.mxu1 %v25437_v0  ;;  %33567 = vst [vmem:[#allocation47_spill] sm:$0xff] %v26442_v31 }
  0x8b   :  { %22784 = vmatpush3.msra.mxu0 %v32885_v6  ;;  %22785 = vmatprep.mubr.msk.f32.mxu0 %vm25438_vm0, %v25437_v0  ;;  %v26383_v6 = vld [vmem:[%s32765_s2 + $0x1d0] sm:$0xff]  }
  0x8c   :  { %22795 = vmatpush3.msra.mxu1 %v33560_v10  ;;  %22796 = vmatprep.mubr.msk.f32.mxu1 %vm25438_vm0, %v25437_v0  ;;  %33562 = vst [vmem:[#allocation44_spill] sm:$0xff] %v26383_v6  ;;  %v32892_v10 = vunpack.c.l.bf16 %v26351_v7  ;;  %v33566_v7 = vunpack.c.l.bf16 %v26383_v6 }
  0x8d   :  { %22786 = vmatmul.mubr.msk.f32.vlgmr.msra.gmra.mxu0 %vm1171_vm1, %v45_v17  ;;  %22797 = vmatmul.mubr.msk.f32.vlgmr.msra.gmra.mxu1 %vm1171_vm1, %v46_v9  ;;  %v32893_v17 = vunpack.c.h.bf16 %v26383_v6  ;;  %v32899_v9 = vunpack.c.l.bf16 %v26378_v37  ;;  %v32908_v37 = vunpack.c.h.bf16 %v26442_v31 }
  0x8e   :  { %22799 = vmatprep.subr.mxu0 %v25437_v0  ;;  %22810 = vmatprep.subr.mxu1 %v25437_v0 }
  0x8f   :  { %22800 = vmatpush3.msra.mxu0 %v32890_v23  ;;  %22811 = vmatpush3.msra.mxu1 %v33563_v12  ;;  %v26410_v23 = vld [vmem:[%s32765_s2 + $0x1e8] sm:$0xff]   ;;  %v48_v12 = vld [vmem:[%s32766_s0 + $0x3a] sm:$0x3] }
  0x90   :  { %22801 = vmatprep.subr.mxu0 %v25437_v0  ;;  %22812 = vmatprep.subr.mxu1 %v25437_v0  ;;  %33564 = vst [vmem:[#allocation45_spill] sm:$0xff] %v26410_v23 }
  0x91   :  { %22802 = vmatpush3.msra.mxu0 %v32891_v5  ;;  %22813 = vmatpush3.msra.mxu1 %v32892_v10  ;;  %v26415_v5 = vld [vmem:[%s32765_s2 + $0x1f8] sm:$0xff]  }
  0x92   :  { %22803 = vmatprep.subr.mxu0 %v25437_v0  ;;  %22814 = vmatprep.subr.mxu1 %v25437_v0  ;;  %33565 = vst [vmem:[#allocation46_spill] sm:$0xff] %v26415_v5  ;;  %v47_v10 = vld [vmem:[%s32766_s0 + $0x38] sm:$0x3]  ;;  %v33569_v6 = vunpack.c.h.bf16 %v26415_v5 }
  0x93   :  { %22804 = vmatpush3.msra.mxu0 %v32894_v4  ;;  %22815 = vmatpush3.msra.mxu1 %v32893_v17  ;;  %v32904_v17 = vunpack.c.h.bf16 %v26410_v23  ;;  %v32905_v4 = vunpack.c.l.bf16 %v26410_v23  ;;  %v26506_v23 = vld [vmem:[%s32765_s2 + $0x200] sm:$0xff]  }
  0x94   :  { %22805 = vmatprep.subr.mxu0 %v25437_v0  ;;  %22816 = vmatprep.subr.mxu1 %v25437_v0  ;;  %33573 = vst [vmem:[#allocation51_spill] sm:$0xff] %v26506_v23 }
  0x95   :  { %22806 = vmatpush3.msra.mxu0 %v32899_v9  ;;  %22807 = vmatprep.mubr.msk.f32.mxu0 %vm25438_vm0, %v25437_v0  ;;  %v26447_v9 = vld [vmem:[%s32765_s2 + $0x1f0] sm:$0xff]  }
  0x96   :  { %22817 = vmatpush3.msra.mxu1 %v33566_v7  ;;  %22818 = vmatprep.mubr.msk.f32.mxu1 %vm25438_vm0, %v25437_v0  ;;  %33568 = vst [vmem:[#allocation48_spill] sm:$0xff] %v26447_v9  ;;  %v32906_v7 = vunpack.c.l.bf16 %v26415_v5  ;;  %v33572_v5 = vunpack.c.l.bf16 %v26447_v9 }
  0x97   :  { %22808 = vmatmul.mubr.msk.f32.vlgmr.msra.gmra.mxu0 %vm1171_vm1, %v47_v10  ;;  %22819 = vmatmul.mubr.msk.f32.vlgmr.msra.gmra.mxu1 %vm1171_vm1, %v48_v12  ;;  %v32907_v10 = vunpack.c.h.bf16 %v26447_v9  ;;  %v32913_v12 = vunpack.c.l.bf16 %v26442_v31  ;;  %v32922_v31 = vunpack.c.h.bf16 %v26506_v23 }
  0x98   :  { %22821 = vmatprep.subr.mxu0 %v25437_v0  ;;  %22832 = vmatprep.subr.mxu1 %v25437_v0 }
  0x99   :  { %22822 = vmatpush3.msra.mxu0 %v32904_v17  ;;  %22833 = vmatpush3.msra.mxu1 %v33569_v6  ;;  %v26474_v17 = vld [vmem:[%s32765_s2 + $0x208] sm:$0xff]   ;;  %v50_v6 = vld [vmem:[%s32766_s0 + $0x3e] sm:$0x3] }
  0x9a   :  { %22823 = vmatprep.subr.mxu0 %v25437_v0  ;;  %22834 = vmatprep.subr.mxu1 %v25437_v0  ;;  %33570 = vst [vmem:[#allocation49_spill] sm:$0xff] %v26474_v17 }
  0x9b   :  { %22824 = vmatpush3.msra.mxu0 %v32905_v4  ;;  %22835 = vmatpush3.msra.mxu1 %v32906_v7  ;;  %v26479_v4 = vld [vmem:[%s32765_s2 + $0x218] sm:$0xff]  }
  0x9c   :  { %22825 = vmatprep.subr.mxu0 %v25437_v0  ;;  %22836 = vmatprep.subr.mxu1 %v25437_v0  ;;  %33571 = vst [vmem:[#allocation50_spill] sm:$0xff] %v26479_v4  ;;  %v49_v7 = vld [vmem:[%s32766_s0 + $0x3c] sm:$0x3]  ;;  %v33575_v9 = vunpack.c.h.bf16 %v26479_v4 }
  0x9d   :  { %22826 = vmatpush3.msra.mxu0 %v32908_v37  ;;  %22837 = vmatpush3.msra.mxu1 %v32907_v10  ;;  %v32918_v10 = vunpack.c.h.bf16 %v26474_v17  ;;  %v32919_v37 = vunpack.c.l.bf16 %v26474_v17  ;;  %v26570_v17 = vld [vmem:[%s32765_s2 + $0x220] sm:$0xff]  }
  0x9e   :  { %22827 = vmatprep.subr.mxu0 %v25437_v0  ;;  %22838 = vmatprep.subr.mxu1 %v25437_v0  ;;  %33579 = vst [vmem:[#allocation55_spill] sm:$0xff] %v26570_v17 }
  0x9f   :  { %22828 = vmatpush3.msra.mxu0 %v32913_v12  ;;  %22829 = vmatprep.mubr.msk.f32.mxu0 %vm25438_vm0, %v25437_v0  ;;  %v26511_v12 = vld [vmem:[%s32765_s2 + $0x210] sm:$0xff]  }
  0xa0   :  { %22839 = vmatpush3.msra.mxu1 %v33572_v5  ;;  %22840 = vmatprep.mubr.msk.f32.mxu1 %vm25438_vm0, %v25437_v0  ;;  %33574 = vst [vmem:[#allocation52_spill] sm:$0xff] %v26511_v12  ;;  %v32920_v5 = vunpack.c.l.bf16 %v26479_v4  ;;  %v33578_v4 = vunpack.c.l.bf16 %v26511_v12 }
  0xa1   :  { %22830 = vmatmul.mubr.msk.f32.vlgmr.msra.gmra.mxu0 %vm1171_vm1, %v49_v7  ;;  %22841 = vmatmul.mubr.msk.f32.vlgmr.msra.gmra.mxu1 %vm1171_vm1, %v50_v6  ;;  %v32921_v7 = vunpack.c.h.bf16 %v26511_v12  ;;  %v32927_v6 = vunpack.c.l.bf16 %v26506_v23  ;;  %v32936_v23 = vunpack.c.h.bf16 %v26570_v17 }
  0xa2   :  { %22843 = vmatprep.subr.mxu0 %v25437_v0  ;;  %22854 = vmatprep.subr.mxu1 %v25437_v0 }
  0xa3   :  { %22844 = vmatpush3.msra.mxu0 %v32918_v10  ;;  %22855 = vmatpush3.msra.mxu1 %v33575_v9  ;;  %v26538_v10 = vld [vmem:[%s32765_s2 + $0x228] sm:$0xff]   ;;  %v52_v9 = vld [vmem:[%s32766_s0 + $0x42] sm:$0x3] }
  0xa4   :  { %22845 = vmatprep.subr.mxu0 %v25437_v0  ;;  %22856 = vmatprep.subr.mxu1 %v25437_v0  ;;  %33576 = vst [vmem:[#allocation53_spill] sm:$0xff] %v26538_v10 }
  0xa5   :  { %22846 = vmatpush3.msra.mxu0 %v32919_v37  ;;  %22857 = vmatpush3.msra.mxu1 %v32920_v5  ;;  %v26543_v37 = vld [vmem:[%s32765_s2 + $0x238] sm:$0xff]   ;;  %v51_v5 = vld [vmem:[%s32766_s0 + $0x40] sm:$0x3] }
  0xa6   :  { %22847 = vmatprep.subr.mxu0 %v25437_v0  ;;  %22858 = vmatprep.subr.mxu1 %v25437_v0  ;;  %33577 = vst [vmem:[#allocation54_spill] sm:$0xff] %v26543_v37  ;;  %v33581_v12 = vunpack.c.h.bf16 %v26543_v37 }
  0xa7   :  { %22848 = vmatpush3.msra.mxu0 %v32922_v31  ;;  %22859 = vmatpush3.msra.mxu1 %v32921_v7  ;;  %v32932_v7 = vunpack.c.h.bf16 %v26538_v10  ;;  %v32933_v31 = vunpack.c.l.bf16 %v26538_v10  ;;  %v26634_v10 = vld [vmem:[%s32765_s2 + $0x240] sm:$0xff]  }
  0xa8   :  { %22849 = vmatprep.subr.mxu0 %v25437_v0  ;;  %22860 = vmatprep.subr.mxu1 %v25437_v0  ;;  %33585 = vst [vmem:[#allocation59_spill] sm:$0xff] %v26634_v10 }
  0xa9   :  { %22850 = vmatpush3.msra.mxu0 %v32927_v6  ;;  %22851 = vmatprep.mubr.msk.f32.mxu0 %vm25438_vm0, %v25437_v0  ;;  %v26575_v6 = vld [vmem:[%s32765_s2 + $0x230] sm:$0xff]  }
  0xaa   :  { %22861 = vmatpush3.msra.mxu1 %v33578_v4  ;;  %22862 = vmatprep.mubr.msk.f32.mxu1 %vm25438_vm0, %v25437_v0  ;;  %33580 = vst [vmem:[#allocation56_spill] sm:$0xff] %v26575_v6  ;;  %v32934_v4 = vunpack.c.l.bf16 %v26543_v37  ;;  %v33584_v37 = vunpack.c.l.bf16 %v26575_v6 }
  0xab   :  { %22852 = vmatmul.mubr.msk.f32.vlgmr.msra.gmra.mxu0 %vm1171_vm1, %v51_v5  ;;  %22863 = vmatmul.mubr.msk.f32.vlgmr.msra.gmra.mxu1 %vm1171_vm1, %v52_v9  ;;  %v32935_v5 = vunpack.c.h.bf16 %v26575_v6  ;;  %v32941_v9 = vunpack.c.l.bf16 %v26570_v17  ;;  %v32950_v17 = vunpack.c.h.bf16 %v26634_v10 }
  0xac   :  { %22865 = vmatprep.subr.mxu0 %v25437_v0  ;;  %22876 = vmatprep.subr.mxu1 %v25437_v0 }
  0xad   :  { %22866 = vmatpush3.msra.mxu0 %v32932_v7  ;;  %22877 = vmatpush3.msra.mxu1 %v33581_v12  ;;  %v26602_v7 = vld [vmem:[%s32765_s2 + $0x248] sm:$0xff]   ;;  %v54_v12 = vld [vmem:[%s32766_s0 + $0x46] sm:$0x3] }
  0xae   :  { %22867 = vmatprep.subr.mxu0 %v25437_v0  ;;  %22878 = vmatprep.subr.mxu1 %v25437_v0  ;;  %33582 = vst [vmem:[#allocation57_spill] sm:$0xff] %v26602_v7 }
  0xaf   :  { %22868 = vmatpush3.msra.mxu0 %v32933_v31  ;;  %22879 = vmatpush3.msra.mxu1 %v32934_v4  ;;  %v26607_v31 = vld [vmem:[%s32765_s2 + $0x258] sm:$0xff]   ;;  %v53_v4 = vld [vmem:[%s32766_s0 + $0x44] sm:$0x3] }
  0xb0   :  { %22869 = vmatprep.subr.mxu0 %v25437_v0  ;;  %22880 = vmatprep.subr.mxu1 %v25437_v0  ;;  %33583 = vst [vmem:[#allocation58_spill] sm:$0xff] %v26607_v31  ;;  %v33587_v6 = vunpack.c.h.bf16 %v26607_v31 }
  0xb1   :  { %22870 = vmatpush3.msra.mxu0 %v32936_v23  ;;  %22881 = vmatpush3.msra.mxu1 %v32935_v5  ;;  %v32946_v5 = vunpack.c.h.bf16 %v26602_v7  ;;  %v32947_v23 = vunpack.c.l.bf16 %v26602_v7  ;;  %v26698_v7 = vld [vmem:[%s32765_s2 + $0x260] sm:$0xff]  }
  0xb2   :  { %22871 = vmatprep.subr.mxu0 %v25437_v0  ;;  %22882 = vmatprep.subr.mxu1 %v25437_v0  ;;  %33591 = vst [vmem:[#allocation63_spill] sm:$0xff] %v26698_v7 }
  0xb3   :  { %22872 = vmatpush3.msra.mxu0 %v32941_v9  ;;  %22873 = vmatprep.mubr.msk.f32.mxu0 %vm25438_vm0, %v25437_v0  ;;  %v26639_v9 = vld [vmem:[%s32765_s2 + $0x250] sm:$0xff]  }
  0xb4   :  { %22883 = vmatpush3.msra.mxu1 %v33584_v37  ;;  %22884 = vmatprep.mubr.msk.f32.mxu1 %vm25438_vm0, %v25437_v0  ;;  %33586 = vst [vmem:[#allocation60_spill] sm:$0xff] %v26639_v9  ;;  %v32948_v37 = vunpack.c.l.bf16 %v26607_v31  ;;  %v33590_v31 = vunpack.c.l.bf16 %v26639_v9 }
  0xb5   :  { %22874 = vmatmul.mubr.msk.f32.vlgmr.msra.gmra.mxu0 %vm1171_vm1, %v53_v4  ;;  %22885 = vmatmul.mubr.msk.f32.vlgmr.msra.gmra.mxu1 %vm1171_vm1, %v54_v12  ;;  %v32949_v4 = vunpack.c.h.bf16 %v26639_v9  ;;  %v32955_v12 = vunpack.c.l.bf16 %v26634_v10  ;;  %v32964_v10 = vunpack.c.h.bf16 %v26698_v7 }
  0xb6   :  { %22887 = vmatprep.subr.mxu0 %v25437_v0  ;;  %22898 = vmatprep.subr.mxu1 %v25437_v0 }
  0xb7   :  { %22888 = vmatpush3.msra.mxu0 %v32946_v5  ;;  %22899 = vmatpush3.msra.mxu1 %v33587_v6  ;;  %v26666_v5 = vld [vmem:[%s32765_s2 + $0x268] sm:$0xff]  }
  0xb8   :  { %22889 = vmatprep.subr.mxu0 %v25437_v0  ;;  %22900 = vmatprep.subr.mxu1 %v25437_v0  ;;  %33588 = vst [vmem:[#allocation61_spill] sm:$0xff] %v26666_v5  ;;  %v56_v6 = vld [vmem:[%s32766_s0 + $0x4a] sm:$0x3] }
  0xb9   :  { %22890 = vmatpush3.msra.mxu0 %v32947_v23  ;;  %22901 = vmatpush3.msra.mxu1 %v32948_v37  ;;  %v26671_v23 = vld [vmem:[%s32765_s2 + $0x278] sm:$0xff]   ;;  %v55_v37 = vld [vmem:[%s32766_s0 + $0x48] sm:$0x3] }
  0xba   :  { %22891 = vmatprep.subr.mxu0 %v25437_v0  ;;  %22902 = vmatprep.subr.mxu1 %v25437_v0  ;;  %33589 = vst [vmem:[#allocation62_spill] sm:$0xff] %v26671_v23  ;;  %v33593_v9 = vunpack.c.h.bf16 %v26671_v23 }
  0xbb   :  { %22892 = vmatpush3.msra.mxu0 %v32950_v17  ;;  %22903 = vmatpush3.msra.mxu1 %v32949_v4  ;;  %v32960_v4 = vunpack.c.h.bf16 %v26666_v5  ;;  %v32961_v17 = vunpack.c.l.bf16 %v26666_v5  ;;  %v26762_v5 = vld [vmem:[%s32765_s2 + $0x280] sm:$0xff]  }
  0xbc   :  { %22893 = vmatprep.subr.mxu0 %v25437_v0  ;;  %22904 = vmatprep.subr.mxu1 %v25437_v0  ;;  %33597 = vst [vmem:[#allocation67_spill] sm:$0xff] %v26762_v5 }
  0xbd   :  { %22894 = vmatpush3.msra.mxu0 %v32955_v12  ;;  %22895 = vmatprep.mubr.msk.f32.mxu0 %vm25438_vm0, %v25437_v0  ;;  %v26703_v12 = vld [vmem:[%s32765_s2 + $0x270] sm:$0xff]  }
  0xbe   :  { %22905 = vmatpush3.msra.mxu1 %v33590_v31  ;;  %22906 = vmatprep.mubr.msk.f32.mxu1 %vm25438_vm0, %v25437_v0  ;;  %33592 = vst [vmem:[#allocation64_spill] sm:$0xff] %v26703_v12  ;;  %v32962_v31 = vunpack.c.l.bf16 %v26671_v23  ;;  %v33596_v23 = vunpack.c.l.bf16 %v26703_v12 }
  0xbf   :  { %22896 = vmatmul.mubr.msk.f32.vlgmr.msra.gmra.mxu0 %vm1171_vm1, %v55_v37  ;;  %22907 = vmatmul.mubr.msk.f32.vlgmr.msra.gmra.mxu1 %vm1171_vm1, %v56_v6  ;;  %v32963_v37 = vunpack.c.h.bf16 %v26703_v12  ;;  %v32969_v6 = vunpack.c.l.bf16 %v26698_v7 }
  0xc0   :  { %22909 = vmatprep.subr.mxu0 %v25437_v0  ;;  %22920 = vmatprep.subr.mxu1 %v25437_v0 }
  0xc1   :  { %22910 = vmatpush3.msra.mxu0 %v32960_v4  ;;  %22921 = vmatpush3.msra.mxu1 %v33593_v9  ;;  %v26730_v4 = vld [vmem:[%s32765_s2 + $0x288] sm:$0xff]  }
  0xc2   :  { %22911 = vmatprep.subr.mxu0 %v25437_v0  ;;  %22922 = vmatprep.subr.mxu1 %v25437_v0  ;;  %33594 = vst [vmem:[#allocation65_spill] sm:$0xff] %v26730_v4  ;;  %v58_v9 = vld [vmem:[%s32766_s0 + $0x4e] sm:$0x3] }
  0xc3   :  { %22912 = vmatpush3.msra.mxu0 %v32961_v17  ;;  %22923 = vmatpush3.msra.mxu1 %v32962_v31  ;;  %v26735_v17 = vld [vmem:[%s32765_s2 + $0x298] sm:$0xff]   ;;  %v57_v31 = vld [vmem:[%s32766_s0 + $0x4c] sm:$0x3] }
  0xc4   :  { %22913 = vmatprep.subr.mxu0 %v25437_v0  ;;  %22924 = vmatprep.subr.mxu1 %v25437_v0  ;;  %33595 = vst [vmem:[#allocation66_spill] sm:$0xff] %v26735_v17  ;;  %v33599_v12 = vunpack.c.h.bf16 %v26735_v17 }
  0xc5   :  { %22914 = vmatpush3.msra.mxu0 %v32964_v10  ;;  %22925 = vmatpush3.msra.mxu1 %v32963_v37  ;;  %v32976_v37 = vunpack.c.h.bf16 %v26730_v4  ;;  %v32979_v10 = vunpack.c.l.bf16 %v26730_v4  ;;  %v26830_v4 = vld [vmem:[%s32765_s2 + $0x2a0] sm:$0xff]  }
  0xc6   :  { %22915 = vmatprep.subr.mxu0 %v25437_v0  ;;  %22926 = vmatprep.subr.mxu1 %v25437_v0  ;;  %33605 = vst [vmem:[#allocation71_spill] sm:$0xff] %v26830_v4 }
  0xc7   :  { %22916 = vmatpush3.msra.mxu0 %v32969_v6  ;;  %22917 = vmatprep.mubr.msk.f32.mxu0 %vm25438_vm0, %v25437_v0  ;;  %v26767_v6 = vld [vmem:[%s32765_s2 + $0x290] sm:$0xff]  }
  0xc8   :  { %22927 = vmatpush3.msra.mxu1 %v33596_v23  ;;  %22928 = vmatprep.mubr.msk.f32.mxu1 %vm25438_vm0, %v25437_v0  ;;  %33598 = vst [vmem:[#allocation68_spill] sm:$0xff] %v26767_v6  ;;  %v32980_v23 = vunpack.c.l.bf16 %v26735_v17  ;;  %v33604_v17 = vunpack.c.l.bf16 %v26767_v6 }
  0xc9   :  { %22918 = vmatmul.mubr.msk.f32.vlgmr.msra.gmra.mxu0 %vm1171_vm1, %v57_v31  ;;  %22929 = vmatmul.mubr.msk.f32.vlgmr.msra.gmra.mxu1 %vm1171_vm1, %v58_v9  ;;  %v60_v31 = vld [vmem:[%s32766_s0 + $0x52] sm:$0x3] }
  0xca   :  { %22931 = vmatprep.subr.mxu0 %v25437_v0  ;;  %22942 = vmatprep.subr.mxu1 %v25437_v0 }
  0xcb   :  { %22932 = vmatpush3.msra.mxu0 %v32976_v37  ;;  %22943 = vmatpush3.msra.mxu1 %v33599_v12  ;;  %v26781_v22 = vpop.f32.mrf.mxu0  ;;  %v26783_v9 = vpop.f32.mrf.mxu1  ;;  %v32985_v12 = vunpack.c.l.bf16 %v26762_v5 }
  0xcc   :  { %22933 = vmatprep.subr.mxu0 %v25437_v0  ;;  %22944 = vmatprep.subr.mxu1 %v25437_v0 }
  0xcd   :  { %22934 = vmatpush3.msra.mxu0 %v32979_v10  ;;  %22945 = vmatpush3.msra.mxu1 %v32980_v23  ;;  %v22501_v37 = vpop.f32.mrf.mxu0  ;;  %v22512_v7 = vpop.f32.mrf.mxu1  ;;  %v26803_v10 = vld [vmem:[%s32765_s2 + $0x2b8] sm:$0xff]   ;;  %v33602_v23 = vunpack.c.h.bf16 %v26762_v5 }
  0xce   :  { %22935 = vmatprep.subr.mxu0 %v25437_v0  ;;  %22946 = vmatprep.subr.mxu1 %v25437_v0  ;;  %33601 = vst [vmem:[#allocation70_spill] sm:$0xff] %v26803_v10  ;;  %v33603_v7 = vunpack.c.h.bf16 %v26767_v6  ;;  %v59_v37 = vld [vmem:[%s32766_s0 + $0x50] sm:$0x3]  ;;  %v33607_v6 = vunpack.c.h.bf16 %v26803_v10 }
  0xcf   :  { %22936 = vmatpush3.msra.mxu0 %v33602_v23  ;;  %22939 = vmatprep.mubr.msk.f32.mxu0 %vm25438_vm0, %v25437_v0  ;;  %v32992_v23 = vunpack.c.h.bf16 %v26798_v11 }
  0xd0   :  { %22947 = vmatpush3.msra.mxu1 %v33603_v7  ;;  %22937 = vmatprep.subr.mxu0 %v25437_v0  ;;  %v32995_v7 = vunpack.c.l.bf16 %v26798_v11  ;;  %v26898_v11 = vld [vmem:[%s32765_s2 + $0x2c0] sm:$0xff]  }
  0xd1   :  { %22948 = vmatprep.subr.mxu1 %v25437_v0  ;;  %22938 = vmatpush3.msra.mxu0 %v32985_v12  ;;  %v26835_v12 = vld [vmem:[%s32765_s2 + $0x2b0] sm:$0xff]   ;;  %33613 = vst [vmem:[#allocation75_spill] sm:$0xff] %v26898_v11 }
  0xd2   :  { %22949 = vmatpush3.msra.mxu1 %v33604_v17  ;;  %22950 = vmatprep.mubr.msk.f32.mxu1 %vm25438_vm0, %v25437_v0  ;;  %33606 = vst [vmem:[#allocation72_spill] sm:$0xff] %v26835_v12  ;;  %v32996_v17 = vunpack.c.l.bf16 %v26803_v10  ;;  %v33612_v10 = vunpack.c.l.bf16 %v26835_v12 }
  0xd3   :  { %22940 = vmatmul.mubr.msk.f32.vlgmr.msra.gmra.mxu0 %vm1171_vm1, %v59_v37  ;;  %22951 = vmatmul.mubr.msk.f32.vlgmr.msra.gmra.mxu1 %vm1171_vm1, %v60_v31  ;;  %v62_v37 = vld [vmem:[%s32766_s0 + $0x56] sm:$0x3] }
  0xd4   :  { %22953 = vmatprep.subr.mxu0 %v25437_v0  ;;  %22964 = vmatprep.subr.mxu1 %v25437_v0 }
  0xd5   :  { %22954 = vmatpush3.msra.mxu0 %v32992_v23  ;;  %22965 = vmatpush3.msra.mxu1 %v33607_v6  ;;  %v26849_v18 = vpop.f32.mrf.mxu0  ;;  %v26851_v31 = vpop.f32.mrf.mxu1  ;;  %v33001_v6 = vunpack.c.l.bf16 %v26830_v4 }
  0xd6   :  { %22955 = vmatprep.subr.mxu0 %v25437_v0  ;;  %22966 = vmatprep.subr.mxu1 %v25437_v0 }
  0xd7   :  { %22956 = vmatpush3.msra.mxu0 %v32995_v7  ;;  %22967 = vmatpush3.msra.mxu1 %v32996_v17  ;;  %v22523_v23 = vpop.f32.mrf.mxu0  ;;  %v22534_v5 = vpop.f32.mrf.mxu1  ;;  %v26871_v7 = vld [vmem:[%s32765_s2 + $0x2d8] sm:$0xff]   ;;  %v33610_v17 = vunpack.c.h.bf16 %v26830_v4 }
  0xd8   :  { %22957 = vmatprep.subr.mxu0 %v25437_v0  ;;  %22968 = vmatprep.subr.mxu1 %v25437_v0  ;;  %33609 = vst [vmem:[#allocation74_spill] sm:$0xff] %v26871_v7  ;;  %v33611_v5 = vunpack.c.h.bf16 %v26835_v12  ;;  %v61_v23 = vld [vmem:[%s32766_s0 + $0x54] sm:$0x3]  ;;  %v33615_v12 = vunpack.c.h.bf16 %v26871_v7 }
  0xd9   :  { %22958 = vmatpush3.msra.mxu0 %v33610_v17  ;;  %22961 = vmatprep.mubr.msk.f32.mxu0 %vm25438_vm0, %v25437_v0  ;;  %v33008_v17 = vunpack.c.h.bf16 %v26866_v45 }
  0xda   :  { %22969 = vmatpush3.msra.mxu1 %v33611_v5  ;;  %22959 = vmatprep.subr.mxu0 %v25437_v0  ;;  %v33011_v5 = vunpack.c.l.bf16 %v26866_v45  ;;  %v26966_v45 = vld [vmem:[%s32765_s2 + $0x2e0] sm:$0xff]  }
  0xdb   :  { %22970 = vmatprep.subr.mxu1 %v25437_v0  ;;  %22960 = vmatpush3.msra.mxu0 %v33001_v6  ;;  %v26903_v6 = vld [vmem:[%s32765_s2 + $0x2d0] sm:$0xff]   ;;  %33621 = vst [vmem:[#allocation79_spill] sm:$0xff] %v26966_v45 }
  0xdc   :  { %22971 = vmatpush3.msra.mxu1 %v33612_v10  ;;  %22972 = vmatprep.mubr.msk.f32.mxu1 %vm25438_vm0, %v25437_v0  ;;  %33614 = vst [vmem:[#allocation76_spill] sm:$0xff] %v26903_v6  ;;  %v33012_v10 = vunpack.c.l.bf16 %v26871_v7  ;;  %v33620_v7 = vunpack.c.l.bf16 %v26903_v6 }
  0xdd   :  { %22962 = vmatmul.mubr.msk.f32.vlgmr.msra.gmra.mxu0 %vm1171_vm1, %v61_v23  ;;  %22973 = vmatmul.mubr.msk.f32.vlgmr.msra.gmra.mxu1 %vm1171_vm1, %v62_v37  ;;  %v64_v23 = vld [vmem:[%s32766_s0 + $0x5a] sm:$0x3] }
  0xde   :  { %22975 = vmatprep.subr.mxu0 %v25437_v0  ;;  %22986 = vmatprep.subr.mxu1 %v25437_v0 }
  0xdf   :  { %22976 = vmatpush3.msra.mxu0 %v33008_v17  ;;  %22987 = vmatpush3.msra.mxu1 %v33615_v12  ;;  %v26917_v26 = vpop.f32.mrf.mxu0  ;;  %v26919_v37 = vpop.f32.mrf.mxu1  ;;  %v33017_v12 = vunpack.c.l.bf16 %v26898_v11 }
  0xe0   :  { %22977 = vmatprep.subr.mxu0 %v25437_v0  ;;  %22988 = vmatprep.subr.mxu1 %v25437_v0 }
  0xe1   :  { %22978 = vmatpush3.msra.mxu0 %v33011_v5  ;;  %22989 = vmatpush3.msra.mxu1 %v33012_v10  ;;  %v22545_v17 = vpop.f32.mrf.mxu0  ;;  %v22556_v4 = vpop.f32.mrf.mxu1  ;;  %v26939_v5 = vld [vmem:[%s32765_s2 + $0x2f8] sm:$0xff]   ;;  %v33618_v10 = vunpack.c.h.bf16 %v26898_v11 }
  0xe2   :  { %22979 = vmatprep.subr.mxu0 %v25437_v0  ;;  %22990 = vmatprep.subr.mxu1 %v25437_v0  ;;  %33617 = vst [vmem:[#allocation78_spill] sm:$0xff] %v26939_v5  ;;  %v33619_v4 = vunpack.c.h.bf16 %v26903_v6  ;;  %v63_v17 = vld [vmem:[%s32766_s0 + $0x58] sm:$0x3]  ;;  %v33623_v6 = vunpack.c.h.bf16 %v26939_v5 }
  0xe3   :  { %22980 = vmatpush3.msra.mxu0 %v33618_v10  ;;  %22983 = vmatprep.mubr.msk.f32.mxu0 %vm25438_vm0, %v25437_v0  ;;  %v33024_v10 = vunpack.c.h.bf16 %v26934_v21 }
  0xe4   :  { %22991 = vmatpush3.msra.mxu1 %v33619_v4  ;;  %22981 = vmatprep.subr.mxu0 %v25437_v0  ;;  %v33027_v4 = vunpack.c.l.bf16 %v26934_v21  ;;  %v27034_v21 = vld [vmem:[%s32765_s2 + $0x300] sm:$0xff]  }
  0xe5   :  { %22992 = vmatprep.subr.mxu1 %v25437_v0  ;;  %22982 = vmatpush3.msra.mxu0 %v33017_v12  ;;  %v26971_v12 = vld [vmem:[%s32765_s2 + $0x2f0] sm:$0xff]   ;;  %33629 = vst [vmem:[#allocation83_spill] sm:$0xff] %v27034_v21 }
  0xe6   :  { %22993 = vmatpush3.msra.mxu1 %v33620_v7  ;;  %22994 = vmatprep.mubr.msk.f32.mxu1 %vm25438_vm0, %v25437_v0  ;;  %33622 = vst [vmem:[#allocation80_spill] sm:$0xff] %v26971_v12  ;;  %v33028_v7 = vunpack.c.l.bf16 %v26939_v5  ;;  %v33628_v5 = vunpack.c.l.bf16 %v26971_v12 }
  0xe7   :  { %22984 = vmatmul.mubr.msk.f32.vlgmr.msra.gmra.mxu0 %vm1171_vm1, %v63_v17  ;;  %22995 = vmatmul.mubr.msk.f32.vlgmr.msra.gmra.mxu1 %vm1171_vm1, %v64_v23  ;;  %v66_v17 = vld [vmem:[%s32766_s0 + $0x5e] sm:$0x3] }
  0xe8   :  { %22997 = vmatprep.subr.mxu0 %v25437_v0  ;;  %23008 = vmatprep.subr.mxu1 %v25437_v0 }
  0xe9   :  { %22998 = vmatpush3.msra.mxu0 %v33024_v10  ;;  %23009 = vmatpush3.msra.mxu1 %v33623_v6  ;;  %v26985_v24 = vpop.f32.mrf.mxu0  ;;  %v26987_v23 = vpop.f32.mrf.mxu1  ;;  %v33033_v6 = vunpack.c.l.bf16 %v26966_v45 }
  0xea   :  { %22999 = vmatprep.subr.mxu0 %v25437_v0  ;;  %23010 = vmatprep.subr.mxu1 %v25437_v0 }
  0xeb   :  { %23000 = vmatpush3.msra.mxu0 %v33027_v4  ;;  %23011 = vmatpush3.msra.mxu1 %v33028_v7  ;;  %v22567_v10 = vpop.f32.mrf.mxu0  ;;  %v22578_v11 = vpop.f32.mrf.mxu1  ;;  %v27007_v4 = vld [vmem:[%s32765_s2 + $0x318] sm:$0xff]   ;;  %v33626_v7 = vunpack.c.h.bf16 %v26966_v45 }
  0xec   :  { %23001 = vmatprep.subr.mxu0 %v25437_v0  ;;  %23012 = vmatprep.subr.mxu1 %v25437_v0  ;;  %33625 = vst [vmem:[#allocation82_spill] sm:$0xff] %v27007_v4  ;;  %v33627_v11 = vunpack.c.h.bf16 %v26971_v12  ;;  %v65_v10 = vld [vmem:[%s32766_s0 + $0x5c] sm:$0x3]  ;;  %v33631_v12 = vunpack.c.h.bf16 %v27007_v4 }
  0xed   :  { %23002 = vmatpush3.msra.mxu0 %v33626_v7  ;;  %23005 = vmatprep.mubr.msk.f32.mxu0 %vm25438_vm0, %v25437_v0  ;;  %v33040_v7 = vunpack.c.h.bf16 %v27002_v51 }
  0xee   :  { %23013 = vmatpush3.msra.mxu1 %v33627_v11  ;;  %23003 = vmatprep.subr.mxu0 %v25437_v0  ;;  %v33043_v11 = vunpack.c.l.bf16 %v27002_v51  ;;  %v27102_v51 = vld [vmem:[%s32765_s2 + $0x320] sm:$0xff]  }
  0xef   :  { %23014 = vmatprep.subr.mxu1 %v25437_v0  ;;  %23004 = vmatpush3.msra.mxu0 %v33033_v6  ;;  %v27039_v6 = vld [vmem:[%s32765_s2 + $0x310] sm:$0xff]   ;;  %33637 = vst [vmem:[#allocation87_spill] sm:$0xff] %v27102_v51 }
  0xf0   :  { %23015 = vmatpush3.msra.mxu1 %v33628_v5  ;;  %23016 = vmatprep.mubr.msk.f32.mxu1 %vm25438_vm0, %v25437_v0  ;;  %33630 = vst [vmem:[#allocation84_spill] sm:$0xff] %v27039_v6  ;;  %v33044_v5 = vunpack.c.l.bf16 %v27007_v4  ;;  %v33636_v4 = vunpack.c.l.bf16 %v27039_v6 }
  0xf1   :  { %23006 = vmatmul.mubr.msk.f32.vlgmr.msra.gmra.mxu0 %vm1171_vm1, %v65_v10  ;;  %23017 = vmatmul.mubr.msk.f32.vlgmr.msra.gmra.mxu1 %vm1171_vm1, %v66_v17  ;;  %v68_v10 = vld [vmem:[%s32766_s0 + $0x62] sm:$0x3] }
  0xf2   :  { %23019 = vmatprep.subr.mxu0 %v25437_v0  ;;  %23030 = vmatprep.subr.mxu1 %v25437_v0 }
  0xf3   :  { %23020 = vmatpush3.msra.mxu0 %v33040_v7  ;;  %23031 = vmatpush3.msra.mxu1 %v33631_v12  ;;  %v27053_v36 = vpop.f32.mrf.mxu0  ;;  %v27055_v17 = vpop.f32.mrf.mxu1  ;;  %v33049_v12 = vunpack.c.l.bf16 %v27034_v21 }
  0xf4   :  { %23021 = vmatprep.subr.mxu0 %v25437_v0  ;;  %23032 = vmatprep.subr.mxu1 %v25437_v0 }
  0xf5   :  { %23022 = vmatpush3.msra.mxu0 %v33043_v11  ;;  %23033 = vmatpush3.msra.mxu1 %v33044_v5  ;;  %v22589_v7 = vpop.f32.mrf.mxu0  ;;  %v22600_v45 = vpop.f32.mrf.mxu1  ;;  %v27075_v11 = vld [vmem:[%s32765_s2 + $0x338] sm:$0xff]   ;;  %v33634_v5 = vunpack.c.h.bf16 %v27034_v21 }
  0xf6   :  { %23023 = vmatprep.subr.mxu0 %v25437_v0  ;;  %23034 = vmatprep.subr.mxu1 %v25437_v0  ;;  %33633 = vst [vmem:[#allocation86_spill] sm:$0xff] %v27075_v11  ;;  %v33635_v45 = vunpack.c.h.bf16 %v27039_v6  ;;  %v67_v7 = vld [vmem:[%s32766_s0 + $0x60] sm:$0x3]  ;;  %v33639_v6 = vunpack.c.h.bf16 %v27075_v11 }
  0xf7   :  { %23024 = vmatpush3.msra.mxu0 %v33634_v5  ;;  %23027 = vmatprep.mubr.msk.f32.mxu0 %vm25438_vm0, %v25437_v0  ;;  %v33056_v5 = vunpack.c.h.bf16 %v27070_v25 }
  0xf8   :  { %23035 = vmatpush3.msra.mxu1 %v33635_v45  ;;  %23025 = vmatprep.subr.mxu0 %v25437_v0  ;;  %v33059_v45 = vunpack.c.l.bf16 %v27070_v25  ;;  %v27170_v25 = vld [vmem:[%s32765_s2 + $0x340] sm:$0xff]  }
  0xf9   :  { %23036 = vmatprep.subr.mxu1 %v25437_v0  ;;  %23026 = vmatpush3.msra.mxu0 %v33049_v12  ;;  %v27107_v12 = vld [vmem:[%s32765_s2 + $0x330] sm:$0xff]   ;;  %33645 = vst [vmem:[#allocation91_spill] sm:$0xff] %v27170_v25 }
  0xfa   :  { %23037 = vmatpush3.msra.mxu1 %v33636_v4  ;;  %23038 = vmatprep.mubr.msk.f32.mxu1 %vm25438_vm0, %v25437_v0  ;;  %33638 = vst [vmem:[#allocation88_spill] sm:$0xff] %v27107_v12  ;;  %v33060_v4 = vunpack.c.l.bf16 %v27075_v11  ;;  %v33644_v11 = vunpack.c.l.bf16 %v27107_v12 }
  0xfb   :  { %23028 = vmatmul.mubr.msk.f32.vlgmr.msra.gmra.mxu0 %vm1171_vm1, %v67_v7  ;;  %23039 = vmatmul.mubr.msk.f32.vlgmr.msra.gmra.mxu1 %vm1171_vm1, %v68_v10  ;;  %v70_v7 = vld [vmem:[%s32766_s0 + $0x66] sm:$0x3] }
  0xfc   :  { %23041 = vmatprep.subr.mxu0 %v25437_v0  ;;  %23052 = vmatprep.subr.mxu1 %v25437_v0 }
  0xfd   :  { %23042 = vmatpush3.msra.mxu0 %v33056_v5  ;;  %23053 = vmatpush3.msra.mxu1 %v33639_v6  ;;  %v27121_v32 = vpop.f32.mrf.mxu0  ;;  %v27123_v10 = vpop.f32.mrf.mxu1  ;;  %v33065_v6 = vunpack.c.l.bf16 %v27102_v51 }
  0xfe   :  { %23043 = vmatprep.subr.mxu0 %v25437_v0  ;;  %23054 = vmatprep.subr.mxu1 %v25437_v0 }
  0xff   :  { %23044 = vmatpush3.msra.mxu0 %v33059_v45  ;;  %23055 = vmatpush3.msra.mxu1 %v33060_v4  ;;  %v22611_v5 = vpop.f32.mrf.mxu0  ;;  %v22622_v21 = vpop.f32.mrf.mxu1  ;;  %v27143_v45 = vld [vmem:[%s32765_s2 + $0x358] sm:$0xff]   ;;  %v33642_v4 = vunpack.c.h.bf16 %v27102_v51 }
 0x100   :  { %23045 = vmatprep.subr.mxu0 %v25437_v0  ;;  %23056 = vmatprep.subr.mxu1 %v25437_v0  ;;  %33641 = vst [vmem:[#allocation90_spill] sm:$0xff] %v27143_v45  ;;  %v33643_v21 = vunpack.c.h.bf16 %v27107_v12  ;;  %v69_v5 = vld [vmem:[%s32766_s0 + $0x64] sm:$0x3]  ;;  %v33647_v12 = vunpack.c.h.bf16 %v27143_v45 }
 0x101   :  { %23046 = vmatpush3.msra.mxu0 %v33642_v4  ;;  %23049 = vmatprep.mubr.msk.f32.mxu0 %vm25438_vm0, %v25437_v0  ;;  %v33072_v4 = vunpack.c.h.bf16 %v27138_v59 }
 0x102   :  { %23057 = vmatpush3.msra.mxu1 %v33643_v21  ;;  %23047 = vmatprep.subr.mxu0 %v25437_v0  ;;  %v33075_v21 = vunpack.c.l.bf16 %v27138_v59  ;;  %v27238_v59 = vld [vmem:[%s32765_s2 + $0x360] sm:$0xff]  }
 0x103   :  { %23058 = vmatprep.subr.mxu1 %v25437_v0  ;;  %23048 = vmatpush3.msra.mxu0 %v33065_v6  ;;  %v27175_v6 = vld [vmem:[%s32765_s2 + $0x350] sm:$0xff]   ;;  %33653 = vst [vmem:[#allocation95_spill] sm:$0xff] %v27238_v59 }
 0x104   :  { %23059 = vmatpush3.msra.mxu1 %v33644_v11  ;;  %23060 = vmatprep.mubr.msk.f32.mxu1 %vm25438_vm0, %v25437_v0  ;;  %33646 = vst [vmem:[#allocation92_spill] sm:$0xff] %v27175_v6  ;;  %v33076_v11 = vunpack.c.l.bf16 %v27143_v45  ;;  %v33652_v45 = vunpack.c.l.bf16 %v27175_v6 }
 0x105   :  { %23050 = vmatmul.mubr.msk.f32.vlgmr.msra.gmra.mxu0 %vm1171_vm1, %v69_v5  ;;  %23061 = vmatmul.mubr.msk.f32.vlgmr.msra.gmra.mxu1 %vm1171_vm1, %v70_v7  ;;  %v72_v5 = vld [vmem:[%s32766_s0 + $0x6a] sm:$0x3] }
 0x106   :  { %23063 = vmatprep.subr.mxu0 %v25437_v0  ;;  %23074 = vmatprep.subr.mxu1 %v25437_v0 }
 0x107   :  { %23064 = vmatpush3.msra.mxu0 %v33072_v4  ;;  %23075 = vmatpush3.msra.mxu1 %v33647_v12  ;;  %v27189_v40 = vpop.f32.mrf.mxu0  ;;  %v27191_v7 = vpop.f32.mrf.mxu1  ;;  %v33081_v12 = vunpack.c.l.bf16 %v27170_v25 }
 0x108   :  { %23065 = vmatprep.subr.mxu0 %v25437_v0  ;;  %23076 = vmatprep.subr.mxu1 %v25437_v0 }
 0x109   :  { %23066 = vmatpush3.msra.mxu0 %v33075_v21  ;;  %23077 = vmatpush3.msra.mxu1 %v33076_v11  ;;  %v22633_v4 = vpop.f32.mrf.mxu0  ;;  %v22644_v51 = vpop.f32.mrf.mxu1  ;;  %v27211_v21 = vld [vmem:[%s32765_s2 + $0x378] sm:$0xff]   ;;  %v33650_v11 = vunpack.c.h.bf16 %v27170_v25 }
 0x10a   :  { %23067 = vmatprep.subr.mxu0 %v25437_v0  ;;  %23078 = vmatprep.subr.mxu1 %v25437_v0  ;;  %33649 = vst [vmem:[#allocation94_spill] sm:$0xff] %v27211_v21  ;;  %v33651_v51 = vunpack.c.h.bf16 %v27175_v6  ;;  %v71_v4 = vld [vmem:[%s32766_s0 + $0x68] sm:$0x3]  ;;  %v33655_v6 = vunpack.c.h.bf16 %v27211_v21 }
 0x10b   :  { %23068 = vmatpush3.msra.mxu0 %v33650_v11  ;;  %23071 = vmatprep.mubr.msk.f32.mxu0 %vm25438_vm0, %v25437_v0  ;;  %v33088_v11 = vunpack.c.h.bf16 %v27206_v35 }
 0x10c   :  { %23079 = vmatpush3.msra.mxu1 %v33651_v51  ;;  %23069 = vmatprep.subr.mxu0 %v25437_v0  ;;  %v33091_v51 = vunpack.c.l.bf16 %v27206_v35  ;;  %v27306_v35 = vld [vmem:[%s32765_s2 + $0x380] sm:$0xff]  }
 0x10d   :  { %23080 = vmatprep.subr.mxu1 %v25437_v0  ;;  %23070 = vmatpush3.msra.mxu0 %v33081_v12  ;;  %v27243_v12 = vld [vmem:[%s32765_s2 + $0x370] sm:$0xff]   ;;  %33661 = vst [vmem:[#allocation99_spill] sm:$0xff] %v27306_v35 }
 0x10e   :  { %23081 = vmatpush3.msra.mxu1 %v33652_v45  ;;  %23082 = vmatprep.mubr.msk.f32.mxu1 %vm25438_vm0, %v25437_v0  ;;  %33654 = vst [vmem:[#allocation96_spill] sm:$0xff] %v27243_v12  ;;  %v33092_v45 = vunpack.c.l.bf16 %v27211_v21  ;;  %v33660_v21 = vunpack.c.l.bf16 %v27243_v12 }
 0x10f   :  { %23072 = vmatmul.mubr.msk.f32.vlgmr.msra.gmra.mxu0 %vm1171_vm1, %v71_v4  ;;  %23083 = vmatmul.mubr.msk.f32.vlgmr.msra.gmra.mxu1 %vm1171_vm1, %v72_v5  ;;  %v74_v4 = vld [vmem:[%s32766_s0 + $0x6e] sm:$0x3] }
 0x110   :  { %23085 = vmatprep.subr.mxu0 %v25437_v0  ;;  %23096 = vmatprep.subr.mxu1 %v25437_v0 }
 0x111   :  { %23086 = vmatpush3.msra.mxu0 %v33088_v11  ;;  %23097 = vmatpush3.msra.mxu1 %v33655_v6  ;;  %v27257_v38 = vpop.f32.mrf.mxu0  ;;  %v27259_v5 = vpop.f32.mrf.mxu1  ;;  %v33097_v6 = vunpack.c.l.bf16 %v27238_v59 }
 0x112   :  { %23087 = vmatprep.subr.mxu0 %v25437_v0  ;;  %23098 = vmatprep.subr.mxu1 %v25437_v0 }
 0x113   :  { %23088 = vmatpush3.msra.mxu0 %v33091_v51  ;;  %23099 = vmatpush3.msra.mxu1 %v33092_v45  ;;  %v22655_v11 = vpop.f32.mrf.mxu0  ;;  %v22666_v25 = vpop.f32.mrf.mxu1  ;;  %v27279_v51 = vld [vmem:[%s32765_s2 + $0x398] sm:$0xff]   ;;  %v33658_v45 = vunpack.c.h.bf16 %v27238_v59 }
 0x114   :  { %23089 = vmatprep.subr.mxu0 %v25437_v0  ;;  %23100 = vmatprep.subr.mxu1 %v25437_v0  ;;  %33657 = vst [vmem:[#allocation98_spill] sm:$0xff] %v27279_v51  ;;  %v33659_v25 = vunpack.c.h.bf16 %v27243_v12  ;;  %v73_v11 = vld [vmem:[%s32766_s0 + $0x6c] sm:$0x3]  ;;  %v33663_v12 = vunpack.c.h.bf16 %v27279_v51 }
 0x115   :  { %23090 = vmatpush3.msra.mxu0 %v33658_v45  ;;  %23093 = vmatprep.mubr.msk.f32.mxu0 %vm25438_vm0, %v25437_v0  ;;  %v33104_v45 = vunpack.c.h.bf16 %v27274_v16 }
 0x116   :  { %23101 = vmatpush3.msra.mxu1 %v33659_v25  ;;  %23091 = vmatprep.subr.mxu0 %v25437_v0  ;;  %v33107_v25 = vunpack.c.l.bf16 %v27274_v16  ;;  %v27374_v16 = vld [vmem:[%s32765_s2 + $0x3a0] sm:$0xff]  }
 0x117   :  { %23102 = vmatprep.subr.mxu1 %v25437_v0  ;;  %23092 = vmatpush3.msra.mxu0 %v33097_v6  ;;  %v27311_v6 = vld [vmem:[%s32765_s2 + $0x390] sm:$0xff]   ;;  %33669 = vst [vmem:[#allocation103_spill] sm:$0xff] %v27374_v16 }
 0x118   :  { %23103 = vmatpush3.msra.mxu1 %v33660_v21  ;;  %23104 = vmatprep.mubr.msk.f32.mxu1 %vm25438_vm0, %v25437_v0  ;;  %33662 = vst [vmem:[#allocation100_spill] sm:$0xff] %v27311_v6  ;;  %v33108_v21 = vunpack.c.l.bf16 %v27279_v51  ;;  %v33668_v51 = vunpack.c.l.bf16 %v27311_v6 }
 0x119   :  { %23094 = vmatmul.mubr.msk.f32.vlgmr.msra.gmra.mxu0 %vm1171_vm1, %v73_v11  ;;  %23105 = vmatmul.mubr.msk.f32.vlgmr.msra.gmra.mxu1 %vm1171_vm1, %v74_v4  ;;  %v76_v11 = vld [vmem:[%s32766_s0 + $0x72] sm:$0x3] }
 0x11a   :  { %23107 = vmatprep.subr.mxu0 %v25437_v0  ;;  %23118 = vmatprep.subr.mxu1 %v25437_v0 }
 0x11b   :  { %23108 = vmatpush3.msra.mxu0 %v33104_v45  ;;  %23119 = vmatpush3.msra.mxu1 %v33663_v12  ;;  %v27325_v50 = vpop.f32.mrf.mxu0  ;;  %v27327_v4 = vpop.f32.mrf.mxu1  ;;  %v33113_v12 = vunpack.c.l.bf16 %v27306_v35 }
 0x11c   :  { %23109 = vmatprep.subr.mxu0 %v25437_v0  ;;  %23120 = vmatprep.subr.mxu1 %v25437_v0 }
 0x11d   :  { %23110 = vmatpush3.msra.mxu0 %v33107_v25  ;;  %23121 = vmatpush3.msra.mxu1 %v33108_v21  ;;  %v22677_v45 = vpop.f32.mrf.mxu0  ;;  %v22688_v59 = vpop.f32.mrf.mxu1  ;;  %v27347_v25 = vld [vmem:[%s32765_s2 + $0x3b8] sm:$0xff]   ;;  %v33666_v21 = vunpack.c.h.bf16 %v27306_v35 }
 0x11e   :  { %23111 = vmatprep.subr.mxu0 %v25437_v0  ;;  %23122 = vmatprep.subr.mxu1 %v25437_v0  ;;  %33665 = vst [vmem:[#allocation102_spill] sm:$0xff] %v27347_v25  ;;  %v33667_v59 = vunpack.c.h.bf16 %v27311_v6  ;;  %v75_v45 = vld [vmem:[%s32766_s0 + $0x70] sm:$0x3]  ;;  %v33671_v6 = vunpack.c.h.bf16 %v27347_v25 }
 0x11f   :  { %23112 = vmatpush3.msra.mxu0 %v33666_v21  ;;  %23115 = vmatprep.mubr.msk.f32.mxu0 %vm25438_vm0, %v25437_v0  ;;  %v33120_v21 = vunpack.c.h.bf16 %v27342_v39 }
 0x120   :  { %23123 = vmatpush3.msra.mxu1 %v33667_v59  ;;  %23113 = vmatprep.subr.mxu0 %v25437_v0  ;;  %v33123_v59 = vunpack.c.l.bf16 %v27342_v39  ;;  %v27442_v39 = vld [vmem:[%s32765_s2 + $0x3c0] sm:$0xff]  }
 0x121   :  { %23124 = vmatprep.subr.mxu1 %v25437_v0  ;;  %23114 = vmatpush3.msra.mxu0 %v33113_v12  ;;  %v27379_v12 = vld [vmem:[%s32765_s2 + $0x3b0] sm:$0xff]   ;;  %33677 = vst [vmem:[#allocation107_spill] sm:$0xff] %v27442_v39 }
 0x122   :  { %23125 = vmatpush3.msra.mxu1 %v33668_v51  ;;  %23126 = vmatprep.mubr.msk.f32.mxu1 %vm25438_vm0, %v25437_v0  ;;  %33670 = vst [vmem:[#allocation104_spill] sm:$0xff] %v27379_v12  ;;  %v33124_v51 = vunpack.c.l.bf16 %v27347_v25  ;;  %v33676_v25 = vunpack.c.l.bf16 %v27379_v12 }
 0x123   :  { %23116 = vmatmul.mubr.msk.f32.vlgmr.msra.gmra.mxu0 %vm1171_vm1, %v75_v45  ;;  %23127 = vmatmul.mubr.msk.f32.vlgmr.msra.gmra.mxu1 %vm1171_vm1, %v76_v11  ;;  %v78_v45 = vld [vmem:[%s32766_s0 + $0x76] sm:$0x3] }
 0x124   :  { %23129 = vmatprep.subr.mxu0 %v25437_v0  ;;  %23140 = vmatprep.subr.mxu1 %v25437_v0 }
 0x125   :  { %23130 = vmatpush3.msra.mxu0 %v33120_v21  ;;  %23141 = vmatpush3.msra.mxu1 %v33671_v6  ;;  %v27393_v46 = vpop.f32.mrf.mxu0  ;;  %v27395_v11 = vpop.f32.mrf.mxu1  ;;  %v33129_v6 = vunpack.c.l.bf16 %v27374_v16 }
 0x126   :  { %23131 = vmatprep.subr.mxu0 %v25437_v0  ;;  %23142 = vmatprep.subr.mxu1 %v25437_v0 }
 0x127   :  { %23132 = vmatpush3.msra.mxu0 %v33123_v59  ;;  %23143 = vmatpush3.msra.mxu1 %v33124_v51  ;;  %v22699_v21 = vpop.f32.mrf.mxu0  ;;  %v22710_v35 = vpop.f32.mrf.mxu1  ;;  %v27415_v59 = vld [vmem:[%s32765_s2 + $0x3d8] sm:$0xff]   ;;  %v33674_v51 = vunpack.c.h.bf16 %v27374_v16 }
 0x128   :  { %23133 = vmatprep.subr.mxu0 %v25437_v0  ;;  %23144 = vmatprep.subr.mxu1 %v25437_v0  ;;  %33673 = vst [vmem:[#allocation106_spill] sm:$0xff] %v27415_v59  ;;  %v33675_v35 = vunpack.c.h.bf16 %v27379_v12  ;;  %v77_v21 = vld [vmem:[%s32766_s0 + $0x74] sm:$0x3]  ;;  %v33679_v12 = vunpack.c.h.bf16 %v27415_v59 }
 0x129   :  { %23134 = vmatpush3.msra.mxu0 %v33674_v51  ;;  %23137 = vmatprep.mubr.msk.f32.mxu0 %vm25438_vm0, %v25437_v0  ;;  %v33136_v51 = vunpack.c.h.bf16 %v27410_v43 }
 0x12a   :  { %23145 = vmatpush3.msra.mxu1 %v33675_v35  ;;  %23135 = vmatprep.subr.mxu0 %v25437_v0  ;;  %v33139_v35 = vunpack.c.l.bf16 %v27410_v43  ;;  %v27510_v43 = vld [vmem:[%s32765_s2 + $0x3e0] sm:$0xff]  }
 0x12b   :  { %23146 = vmatprep.subr.mxu1 %v25437_v0  ;;  %23136 = vmatpush3.msra.mxu0 %v33129_v6  ;;  %v27447_v6 = vld [vmem:[%s32765_s2 + $0x3d0] sm:$0xff]   ;;  %33685 = vst [vmem:[#allocation111_spill] sm:$0xff] %v27510_v43 }
 0x12c   :  { %23147 = vmatpush3.msra.mxu1 %v33676_v25  ;;  %23148 = vmatprep.mubr.msk.f32.mxu1 %vm25438_vm0, %v25437_v0  ;;  %33678 = vst [vmem:[#allocation108_spill] sm:$0xff] %v27447_v6  ;;  %v33140_v25 = vunpack.c.l.bf16 %v27415_v59  ;;  %v33684_v59 = vunpack.c.l.bf16 %v27447_v6 }
 0x12d   :  { %23138 = vmatmul.mubr.msk.f32.vlgmr.msra.gmra.mxu0 %vm1171_vm1, %v77_v21  ;;  %23149 = vmatmul.mubr.msk.f32.vlgmr.msra.gmra.mxu1 %vm1171_vm1, %v78_v45  ;;  %v80_v21 = vld [vmem:[%s32766_s0 + $0x7a] sm:$0x3] }
 0x12e   :  { %23151 = vmatprep.subr.mxu0 %v25437_v0  ;;  %23162 = vmatprep.subr.mxu1 %v25437_v0 }
 0x12f   :  { %23152 = vmatpush3.msra.mxu0 %v33136_v51  ;;  %23163 = vmatpush3.msra.mxu1 %v33679_v12  ;;  %v27461_v54 = vpop.f32.mrf.mxu0  ;;  %v27463_v45 = vpop.f32.mrf.mxu1  ;;  %v33145_v12 = vunpack.c.l.bf16 %v27442_v39 }
 0x130   :  { %23153 = vmatprep.subr.mxu0 %v25437_v0  ;;  %23164 = vmatprep.subr.mxu1 %v25437_v0 }
 0x131   :  { %23154 = vmatpush3.msra.mxu0 %v33139_v35  ;;  %23165 = vmatpush3.msra.mxu1 %v33140_v25  ;;  %v22721_v51 = vpop.f32.mrf.mxu0  ;;  %v22732_v16 = vpop.f32.mrf.mxu1  ;;  %v27483_v35 = vld [vmem:[%s32765_s2 + $0x3f8] sm:$0xff]   ;;  %v33682_v25 = vunpack.c.h.bf16 %v27442_v39 }
 0x132   :  { %23155 = vmatprep.subr.mxu0 %v25437_v0  ;;  %23166 = vmatprep.subr.mxu1 %v25437_v0  ;;  %33681 = vst [vmem:[#allocation110_spill] sm:$0xff] %v27483_v35  ;;  %v33683_v16 = vunpack.c.h.bf16 %v27447_v6  ;;  %v79_v51 = vld [vmem:[%s32766_s0 + $0x78] sm:$0x3]  ;;  %v33687_v6 = vunpack.c.h.bf16 %v27483_v35 }
 0x133   :  { %23156 = vmatpush3.msra.mxu0 %v33682_v25  ;;  %23159 = vmatprep.mubr.msk.f32.mxu0 %vm25438_vm0, %v25437_v0  ;;  %v33152_v25 = vunpack.c.h.bf16 %v27478_v49 }
 0x134   :  { %23167 = vmatpush3.msra.mxu1 %v33683_v16  ;;  %23157 = vmatprep.subr.mxu0 %v25437_v0  ;;  %v33155_v16 = vunpack.c.l.bf16 %v27478_v49  ;;  %v27578_v49 = vld [vmem:[%s32767_s3] sm:$0xff]  }
 0x135   :  { %23168 = vmatprep.subr.mxu1 %v25437_v0  ;;  %23158 = vmatpush3.msra.mxu0 %v33145_v12  ;;  %v27515_v12 = vld [vmem:[%s32765_s2 + $0x3f0] sm:$0xff]   ;;  %33693 = vst [vmem:[#allocation115_spill] sm:$0xff] %v27578_v49 }
 0x136   :  { %23169 = vmatpush3.msra.mxu1 %v33684_v59  ;;  %23170 = vmatprep.mubr.msk.f32.mxu1 %vm25438_vm0, %v25437_v0  ;;  %33686 = vst [vmem:[#allocation112_spill] sm:$0xff] %v27515_v12  ;;  %v33156_v59 = vunpack.c.l.bf16 %v27483_v35  ;;  %v33692_v35 = vunpack.c.l.bf16 %v27515_v12 }
 0x137   :  { %23160 = vmatmul.mubr.msk.f32.vlgmr.msra.gmra.mxu0 %vm1171_vm1, %v79_v51  ;;  %23171 = vmatmul.mubr.msk.f32.vlgmr.msra.gmra.mxu1 %vm1171_vm1, %v80_v21  ;;  %v82_v51 = vld [vmem:[%s32766_s0 + $0x7e] sm:$0x3] }
 0x138   :  { %23173 = vmatprep.subr.mxu0 %v25437_v0  ;;  %23184 = vmatprep.subr.mxu1 %v25437_v0 }
 0x139   :  { %23174 = vmatpush3.msra.mxu0 %v33152_v25  ;;  %23185 = vmatpush3.msra.mxu1 %v33687_v6  ;;  %v27529_v52 = vpop.f32.mrf.mxu0  ;;  %v27531_v21 = vpop.f32.mrf.mxu1  ;;  %v33161_v6 = vunpack.c.l.bf16 %v27510_v43 }
 0x13a   :  { %23175 = vmatprep.subr.mxu0 %v25437_v0  ;;  %23186 = vmatprep.subr.mxu1 %v25437_v0 }
 0x13b   :  { %23176 = vmatpush3.msra.mxu0 %v33155_v16  ;;  %23187 = vmatpush3.msra.mxu1 %v33156_v59  ;;  %v22743_v25 = vpop.f32.mrf.mxu0  ;;  %v22754_v39 = vpop.f32.mrf.mxu1  ;;  %v27551_v16 = vld [vmem:[%s32767_s3 + $0x18] sm:$0xff]   ;;  %v33690_v59 = vunpack.c.h.bf16 %v27510_v43 }
 0x13c   :  { %23177 = vmatprep.subr.mxu0 %v25437_v0  ;;  %23188 = vmatprep.subr.mxu1 %v25437_v0  ;;  %33689 = vst [vmem:[#allocation114_spill] sm:$0xff] %v27551_v16  ;;  %v33691_v39 = vunpack.c.h.bf16 %v27515_v12  ;;  %v81_v25 = vld [vmem:[%s32766_s0 + $0x7c] sm:$0x3]  ;;  %v33695_v12 = vunpack.c.h.bf16 %v27551_v16 }
 0x13d   :  { %23178 = vmatpush3.msra.mxu0 %v33690_v59  ;;  %23181 = vmatprep.mubr.msk.f32.mxu0 %vm25438_vm0, %v25437_v0  ;;  %v33168_v59 = vunpack.c.h.bf16 %v27546_v58 }
 0x13e   :  { %23189 = vmatpush3.msra.mxu1 %v33691_v39  ;;  %23179 = vmatprep.subr.mxu0 %v25437_v0  ;;  %v33171_v39 = vunpack.c.l.bf16 %v27546_v58  ;;  %v27646_v58 = vld [vmem:[%s32767_s3 + $0x20] sm:$0xff]  }
 0x13f   :  { %23190 = vmatprep.subr.mxu1 %v25437_v0  ;;  %23180 = vmatpush3.msra.mxu0 %v33161_v6  ;;  %v27583_v6 = vld [vmem:[%s32767_s3 + $0x10] sm:$0xff]   ;;  %33701 = vst [vmem:[#allocation119_spill] sm:$0xff] %v27646_v58 }
 0x140   :  { %23191 = vmatpush3.msra.mxu1 %v33692_v35  ;;  %23192 = vmatprep.mubr.msk.f32.mxu1 %vm25438_vm0, %v25437_v0  ;;  %33694 = vst [vmem:[#allocation116_spill] sm:$0xff] %v27583_v6  ;;  %v33172_v35 = vunpack.c.l.bf16 %v27551_v16  ;;  %v33700_v16 = vunpack.c.l.bf16 %v27583_v6 }
 0x141   :  { %23182 = vmatmul.mubr.msk.f32.vlgmr.msra.gmra.mxu0 %vm1171_vm1, %v81_v25  ;;  %23193 = vmatmul.mubr.msk.f32.vlgmr.msra.gmra.mxu1 %vm1171_vm1, %v82_v51  ;;  %v84_v25 = vld [vmem:[%s32768_s1 + $0x2] sm:$0x3] }
 0x142   :  { %23195 = vmatprep.subr.mxu0 %v25437_v0  ;;  %23206 = vmatprep.subr.mxu1 %v25437_v0 }
 0x143   :  { %23196 = vmatpush3.msra.mxu0 %v33168_v59  ;;  %23207 = vmatpush3.msra.mxu1 %v33695_v12  ;;  %v27597_v15 = vpop.f32.mrf.mxu0  ;;  %v27599_v51 = vpop.f32.mrf.mxu1  ;;  %v33177_v12 = vunpack.c.l.bf16 %v27578_v49 }
 0x144   :  { %23197 = vmatprep.subr.mxu0 %v25437_v0  ;;  %23208 = vmatprep.subr.mxu1 %v25437_v0 }
 0x145   :  { %23198 = vmatpush3.msra.mxu0 %v33171_v39  ;;  %23209 = vmatpush3.msra.mxu1 %v33172_v35  ;;  %v22765_v59 = vpop.f32.mrf.mxu0  ;;  %v22776_v43 = vpop.f32.mrf.mxu1  ;;  %v27619_v39 = vld [vmem:[%s32767_s3 + $0x38] sm:$0xff]   ;;  %v33698_v35 = vunpack.c.h.bf16 %v27578_v49 }
 0x146   :  { %23199 = vmatprep.subr.mxu0 %v25437_v0  ;;  %23210 = vmatprep.subr.mxu1 %v25437_v0  ;;  %33697 = vst [vmem:[#allocation118_spill] sm:$0xff] %v27619_v39  ;;  %v33699_v43 = vunpack.c.h.bf16 %v27583_v6  ;;  %v83_v59 = vld [vmem:[%s32768_s1] sm:$0x3]  ;;  %v33703_v6 = vunpack.c.h.bf16 %v27619_v39 }
 0x147   :  { %23200 = vmatpush3.msra.mxu0 %v33698_v35  ;;  %23203 = vmatprep.mubr.msk.f32.mxu0 %vm25438_vm0, %v25437_v0  ;;  %v33184_v35 = vunpack.c.h.bf16 %v27614_v53 }
 0x148   :  { %23211 = vmatpush3.msra.mxu1 %v33699_v43  ;;  %23201 = vmatprep.subr.mxu0 %v25437_v0  ;;  %v33187_v43 = vunpack.c.l.bf16 %v27614_v53  ;;  %v27714_v53 = vld [vmem:[%s32767_s3 + $0x40] sm:$0xff]  }
 0x149   :  { %23212 = vmatprep.subr.mxu1 %v25437_v0  ;;  %23202 = vmatpush3.msra.mxu0 %v33177_v12  ;;  %v27651_v12 = vld [vmem:[%s32767_s3 + $0x30] sm:$0xff]   ;;  %33709 = vst [vmem:[#allocation123_spill] sm:$0xff] %v27714_v53 }
 0x14a   :  { %23213 = vmatpush3.msra.mxu1 %v33700_v16  ;;  %23214 = vmatprep.mubr.msk.f32.mxu1 %vm25438_vm0, %v25437_v0  ;;  %33702 = vst [vmem:[#allocation120_spill] sm:$0xff] %v27651_v12  ;;  %v33188_v16 = vunpack.c.l.bf16 %v27619_v39  ;;  %v33708_v39 = vunpack.c.l.bf16 %v27651_v12 }
 0x14b   :  { %23204 = vmatmul.mubr.msk.f32.vlgmr.msra.gmra.mxu0 %vm1171_vm1, %v83_v59  ;;  %23215 = vmatmul.mubr.msk.f32.vlgmr.msra.gmra.mxu1 %vm1171_vm1, %v84_v25  ;;  %v86_v59 = vld [vmem:[%s32768_s1 + $0x6] sm:$0x3] }
 0x14c   :  { %23217 = vmatprep.subr.mxu0 %v25437_v0  ;;  %23228 = vmatprep.subr.mxu1 %v25437_v0 }
 0x14d   :  { %23218 = vmatpush3.msra.mxu0 %v33184_v35  ;;  %23229 = vmatpush3.msra.mxu1 %v33703_v6  ;;  %v27665_v60 = vpop.f32.mrf.mxu0  ;;  %v27667_v25 = vpop.f32.mrf.mxu1  ;;  %v33193_v6 = vunpack.c.l.bf16 %v27646_v58 }
 0x14e   :  { %23219 = vmatprep.subr.mxu0 %v25437_v0  ;;  %23230 = vmatprep.subr.mxu1 %v25437_v0 }
 0x14f   :  { %23220 = vmatpush3.msra.mxu0 %v33187_v43  ;;  %23231 = vmatpush3.msra.mxu1 %v33188_v16  ;;  %v22787_v35 = vpop.f32.mrf.mxu0  ;;  %v22798_v49 = vpop.f32.mrf.mxu1  ;;  %v27687_v43 = vld [vmem:[%s32767_s3 + $0x58] sm:$0xff]   ;;  %v33706_v16 = vunpack.c.h.bf16 %v27646_v58 }
 0x150   :  { %23221 = vmatprep.subr.mxu0 %v25437_v0  ;;  %23232 = vmatprep.subr.mxu1 %v25437_v0  ;;  %33705 = vst [vmem:[#allocation122_spill] sm:$0xff] %v27687_v43  ;;  %v33707_v49 = vunpack.c.h.bf16 %v27651_v12  ;;  %v85_v35 = vld [vmem:[%s32768_s1 + $0x4] sm:$0x3]  ;;  %v33711_v12 = vunpack.c.h.bf16 %v27687_v43 }
 0x151   :  { %23222 = vmatpush3.msra.mxu0 %v33706_v16  ;;  %23225 = vmatprep.mubr.msk.f32.mxu0 %vm25438_vm0, %v25437_v0  ;;  %v33200_v16 = vunpack.c.h.bf16 %v27682_v29 }
 0x152   :  { %23233 = vmatpush3.msra.mxu1 %v33707_v49  ;;  %23223 = vmatprep.subr.mxu0 %v25437_v0  ;;  %v33203_v49 = vunpack.c.l.bf16 %v27682_v29  ;;  %v27782_v29 = vld [vmem:[%s32767_s3 + $0x60] sm:$0xff]  }
 0x153   :  { %23234 = vmatprep.subr.mxu1 %v25437_v0  ;;  %23224 = vmatpush3.msra.mxu0 %v33193_v6  ;;  %v27719_v6 = vld [vmem:[%s32767_s3 + $0x50] sm:$0xff]   ;;  %33717 = vst [vmem:[#allocation127_spill] sm:$0xff] %v27782_v29 }
 0x154   :  { %23235 = vmatpush3.msra.mxu1 %v33708_v39  ;;  %23236 = vmatprep.mubr.msk.f32.mxu1 %vm25438_vm0, %v25437_v0  ;;  %33710 = vst [vmem:[#allocation124_spill] sm:$0xff] %v27719_v6  ;;  %v33204_v39 = vunpack.c.l.bf16 %v27687_v43  ;;  %v33716_v43 = vunpack.c.l.bf16 %v27719_v6 }
 0x155   :  { %23226 = vmatmul.mubr.msk.f32.vlgmr.msra.gmra.mxu0 %vm1171_vm1, %v85_v35  ;;  %23237 = vmatmul.mubr.msk.f32.vlgmr.msra.gmra.mxu1 %vm1171_vm1, %v86_v59  ;;  %v88_v35 = vld [vmem:[%s32768_s1 + $0xa] sm:$0x3] }
 0x156   :  { %23239 = vmatprep.subr.mxu0 %v25437_v0  ;;  %23250 = vmatprep.subr.mxu1 %v25437_v0 }
 0x157   :  { %23240 = vmatpush3.msra.mxu0 %v33200_v16  ;;  %23251 = vmatpush3.msra.mxu1 %v33711_v12  ;;  %v27733_v30 = vpop.f32.mrf.mxu0  ;;  %v27735_v59 = vpop.f32.mrf.mxu1  ;;  %v33209_v12 = vunpack.c.l.bf16 %v27714_v53 }
 0x158   :  { %23241 = vmatprep.subr.mxu0 %v25437_v0  ;;  %23252 = vmatprep.subr.mxu1 %v25437_v0 }
 0x159   :  { %23242 = vmatpush3.msra.mxu0 %v33203_v49  ;;  %23253 = vmatpush3.msra.mxu1 %v33204_v39  ;;  %v22809_v16 = vpop.f32.mrf.mxu0  ;;  %v22820_v58 = vpop.f32.mrf.mxu1  ;;  %v27755_v49 = vld [vmem:[%s32767_s3 + $0x78] sm:$0xff]   ;;  %v33714_v39 = vunpack.c.h.bf16 %v27714_v53 }
 0x15a   :  { %23243 = vmatprep.subr.mxu0 %v25437_v0  ;;  %23254 = vmatprep.subr.mxu1 %v25437_v0  ;;  %33713 = vst [vmem:[#allocation126_spill] sm:$0xff] %v27755_v49  ;;  %v33715_v58 = vunpack.c.h.bf16 %v27719_v6  ;;  %v87_v16 = vld [vmem:[%s32768_s1 + $0x8] sm:$0x3]  ;;  %v33719_v6 = vunpack.c.h.bf16 %v27755_v49 }
 0x15b   :  { %23244 = vmatpush3.msra.mxu0 %v33714_v39  ;;  %23247 = vmatprep.mubr.msk.f32.mxu0 %vm25438_vm0, %v25437_v0  ;;  %v33216_v39 = vunpack.c.h.bf16 %v27750_v63 }
 0x15c   :  { %23255 = vmatpush3.msra.mxu1 %v33715_v58  ;;  %23245 = vmatprep.subr.mxu0 %v25437_v0  ;;  %v33219_v58 = vunpack.c.l.bf16 %v27750_v63  ;;  %v27850_v63 = vld [vmem:[%s32767_s3 + $0x80] sm:$0xff]  }
 0x15d   :  { %23256 = vmatprep.subr.mxu1 %v25437_v0  ;;  %23246 = vmatpush3.msra.mxu0 %v33209_v12  ;;  %v27787_v12 = vld [vmem:[%s32767_s3 + $0x70] sm:$0xff]   ;;  %33725 = vst [vmem:[#allocation131_spill] sm:$0xff] %v27850_v63 }
 0x15e   :  { %23257 = vmatpush3.msra.mxu1 %v33716_v43  ;;  %23258 = vmatprep.mubr.msk.f32.mxu1 %vm25438_vm0, %v25437_v0  ;;  %33718 = vst [vmem:[#allocation128_spill] sm:$0xff] %v27787_v12  ;;  %v33220_v43 = vunpack.c.l.bf16 %v27755_v49  ;;  %v33724_v49 = vunpack.c.l.bf16 %v27787_v12 }
 0x15f   :  { %23248 = vmatmul.mubr.msk.f32.vlgmr.msra.gmra.mxu0 %vm1171_vm1, %v87_v16  ;;  %23259 = vmatmul.mubr.msk.f32.vlgmr.msra.gmra.mxu1 %vm1171_vm1, %v88_v35  ;;  %v90_v16 = vld [vmem:[%s32768_s1 + $0xe] sm:$0x3] }
 0x160   :  { %23261 = vmatprep.subr.mxu0 %v25437_v0  ;;  %23272 = vmatprep.subr.mxu1 %v25437_v0 }
 0x161   :  { %23262 = vmatpush3.msra.mxu0 %v33216_v39  ;;  %23273 = vmatpush3.msra.mxu1 %v33719_v6  ;;  %v27801_v57 = vpop.f32.mrf.mxu0  ;;  %v27803_v35 = vpop.f32.mrf.mxu1  ;;  %v33225_v6 = vunpack.c.l.bf16 %v27782_v29 }
 0x162   :  { %23263 = vmatprep.subr.mxu0 %v25437_v0  ;;  %23274 = vmatprep.subr.mxu1 %v25437_v0 }
 0x163   :  { %23264 = vmatpush3.msra.mxu0 %v33219_v58  ;;  %23275 = vmatpush3.msra.mxu1 %v33220_v43  ;;  %v22831_v39 = vpop.f32.mrf.mxu0  ;;  %v22842_v53 = vpop.f32.mrf.mxu1  ;;  %v27823_v58 = vld [vmem:[%s32767_s3 + $0x98] sm:$0xff]   ;;  %v33722_v43 = vunpack.c.h.bf16 %v27782_v29 }
 0x164   :  { %23265 = vmatprep.subr.mxu0 %v25437_v0  ;;  %23276 = vmatprep.subr.mxu1 %v25437_v0  ;;  %33721 = vst [vmem:[#allocation130_spill] sm:$0xff] %v27823_v58  ;;  %v33723_v53 = vunpack.c.h.bf16 %v27787_v12  ;;  %v89_v39 = vld [vmem:[%s32768_s1 + $0xc] sm:$0x3]  ;;  %v33727_v12 = vunpack.c.h.bf16 %v27823_v58 }
 0x165   :  { %23266 = vmatpush3.msra.mxu0 %v33722_v43  ;;  %23269 = vmatprep.mubr.msk.f32.mxu0 %vm25438_vm0, %v25437_v0  ;;  %v33232_v43 = vunpack.c.h.bf16 %v27818_v44 }
 0x166   :  { %23277 = vmatpush3.msra.mxu1 %v33723_v53  ;;  %23267 = vmatprep.subr.mxu0 %v25437_v0  ;;  %v33235_v53 = vunpack.c.l.bf16 %v27818_v44  ;;  %v27918_v44 = vld [vmem:[%s32767_s3 + $0xa0] sm:$0xff]  }
 0x167   :  { %23278 = vmatprep.subr.mxu1 %v25437_v0  ;;  %23268 = vmatpush3.msra.mxu0 %v33225_v6  ;;  %v27855_v6 = vld [vmem:[%s32767_s3 + $0x90] sm:$0xff]   ;;  %33735 = vst [vmem:[#allocation137_spill] sm:$0xff] %v27918_v44 }
 0x168   :  { %23279 = vmatpush3.msra.mxu1 %v33724_v49  ;;  %23280 = vmatprep.mubr.msk.f32.mxu1 %vm25438_vm0, %v25437_v0  ;;  %33726 = vst [vmem:[#allocation132_spill] sm:$0xff] %v27855_v6  ;;  %v33236_v49 = vunpack.c.l.bf16 %v27823_v58  ;;  %v33734_v58 = vunpack.c.l.bf16 %v27855_v6 }
 0x169   :  { %23270 = vmatmul.mubr.msk.f32.vlgmr.msra.gmra.mxu0 %vm1171_vm1, %v89_v39  ;;  %23281 = vmatmul.mubr.msk.f32.vlgmr.msra.gmra.mxu1 %vm1171_vm1, %v90_v16  ;;  %v92_v39 = vld [vmem:[%s32768_s1 + $0x12] sm:$0x3] }
 0x16a   :  { %23283 = vmatprep.subr.mxu0 %v25437_v0  ;;  %23294 = vmatprep.subr.mxu1 %v25437_v0 }
 0x16b   :  { %23284 = vmatpush3.msra.mxu0 %v33232_v43  ;;  %23295 = vmatpush3.msra.mxu1 %v33727_v12  ;;  %v27869_v62 = vpop.f32.mrf.mxu0  ;;  %v27871_v16 = vpop.f32.mrf.mxu1  ;;  %v33241_v12 = vunpack.c.l.bf16 %v27850_v63 }
 0x16c   :  { %33728 = vst [vmem:[#allocation133_spill] sm:$0xff] %v27869_v62  ;;  %33729 = vst [vmem:[#allocation134_spill] sm:$0xff] %v27871_v16  ;;  %23285 = vmatprep.subr.mxu0 %v25437_v0  ;;  %23296 = vmatprep.subr.mxu1 %v25437_v0 }
 0x16d   :  { %23286 = vmatpush3.msra.mxu0 %v33235_v53  ;;  %23297 = vmatpush3.msra.mxu1 %v33236_v49  ;;  %v22853_v43 = vpop.f32.mrf.mxu0  ;;  %v22864_v29 = vpop.f32.mrf.mxu1  ;;  %v27891_v53 = vld [vmem:[%s32767_s3 + $0xb8] sm:$0xff]   ;;  %v33732_v49 = vunpack.c.h.bf16 %v27850_v63 }
 0x16e   :  { %23287 = vmatprep.subr.mxu0 %v25437_v0  ;;  %23298 = vmatprep.subr.mxu1 %v25437_v0  ;;  %33731 = vst [vmem:[#allocation136_spill] sm:$0xff] %v27891_v53  ;;  %v33733_v29 = vunpack.c.h.bf16 %v27855_v6  ;;  %v91_v43 = vld [vmem:[%s32768_s1 + $0x10] sm:$0x3]  ;;  %v33737_v6 = vunpack.c.h.bf16 %v27891_v53 }
 0x16f   :  { %23288 = vmatpush3.msra.mxu0 %v33732_v49  ;;  %23291 = vmatprep.mubr.msk.f32.mxu0 %vm25438_vm0, %v25437_v0  ;;  %v33246_v49 = vunpack.c.h.bf16 %v27886_v61 }
 0x170   :  { %23299 = vmatpush3.msra.mxu1 %v33733_v29  ;;  %23289 = vmatprep.subr.mxu0 %v25437_v0  ;;  %v33247_v29 = vunpack.c.l.bf16 %v27886_v61  ;;  %v27986_v61 = vld [vmem:[%s32767_s3 + $0xc0] sm:$0xff]  }
 0x171   :  { %23300 = vmatprep.subr.mxu1 %v25437_v0  ;;  %23290 = vmatpush3.msra.mxu0 %v33241_v12  ;;  %v27923_v12 = vld [vmem:[%s32767_s3 + $0xb0] sm:$0xff]   ;;  %33745 = vst [vmem:[#allocation143_spill] sm:$0xff] %v27986_v61 }
 0x172   :  { %23301 = vmatpush3.msra.mxu1 %v33734_v58  ;;  %23302 = vmatprep.mubr.msk.f32.mxu1 %vm25438_vm0, %v25437_v0  ;;  %33736 = vst [vmem:[#allocation138_spill] sm:$0xff] %v27923_v12  ;;  %v33248_v58 = vunpack.c.l.bf16 %v27891_v53  ;;  %v33744_v53 = vunpack.c.l.bf16 %v27923_v12 }
 0x173   :  { %23292 = vmatmul.mubr.msk.f32.vlgmr.msra.gmra.mxu0 %vm1171_vm1, %v91_v43  ;;  %23303 = vmatmul.mubr.msk.f32.vlgmr.msra.gmra.mxu1 %vm1171_vm1, %v92_v39  ;;  %v94_v43 = vld [vmem:[%s32768_s1 + $0x16] sm:$0x3] }
 0x174   :  { %23305 = vmatprep.subr.mxu0 %v25437_v0  ;;  %23316 = vmatprep.subr.mxu1 %v25437_v0 }
 0x175   :  { %23306 = vmatpush3.msra.mxu0 %v33246_v49  ;;  %23317 = vmatpush3.msra.mxu1 %v33737_v6  ;;  %v27937_v16 = vpop.f32.mrf.mxu0  ;;  %v27939_v39 = vpop.f32.mrf.mxu1  ;;  %v33253_v6 = vunpack.c.l.bf16 %v27918_v44 }
 0x176   :  { %33738 = vst [vmem:[#allocation139_spill] sm:$0xff] %v27937_v16  ;;  %33739 = vst [vmem:[#allocation140_spill] sm:$0xff] %v27939_v39  ;;  %23307 = vmatprep.subr.mxu0 %v25437_v0  ;;  %23318 = vmatprep.subr.mxu1 %v25437_v0  ;;  %v27954_v39 = vld [vmem:[%s32767_s3 + $0xc8] sm:$0xff]  }
 0x177   :  { %23308 = vmatpush3.msra.mxu0 %v33247_v29  ;;  %23319 = vmatpush3.msra.mxu1 %v33248_v58  ;;  %v22875_v49 = vpop.f32.mrf.mxu0  ;;  %v22886_v63 = vpop.f32.mrf.mxu1  ;;  %33740 = vst [vmem:[#allocation141_spill] sm:$0xff] %v27954_v39  ;;  %v27959_v29 = vld [vmem:[%s32767_s3 + $0xd8] sm:$0xff]   ;;  %v33742_v58 = vunpack.c.h.bf16 %v27918_v44 }
 0x178   :  { %23309 = vmatprep.subr.mxu0 %v25437_v0  ;;  %23320 = vmatprep.subr.mxu1 %v25437_v0  ;;  %33741 = vst [vmem:[#allocation142_spill] sm:$0xff] %v27959_v29  ;;  %v33743_v63 = vunpack.c.h.bf16 %v27923_v12  ;;  %v93_v49 = vld [vmem:[%s32768_s1 + $0x14] sm:$0x3]  ;;  %v33747_v12 = vunpack.c.h.bf16 %v27959_v29 }
 0x179   :  { %23310 = vmatpush3.msra.mxu0 %v33742_v58  ;;  %23313 = vmatprep.mubr.msk.f32.mxu0 %vm25438_vm0, %v25437_v0  ;;  %v33258_v58 = vunpack.c.h.bf16 %v27954_v39 }
 0x17a   :  { %23321 = vmatpush3.msra.mxu1 %v33743_v63  ;;  %23311 = vmatprep.subr.mxu0 %v25437_v0  ;;  %v33259_v63 = vunpack.c.l.bf16 %v27954_v39  ;;  %v28054_v39 = vld [vmem:[%s32767_s3 + $0xe0] sm:$0xff]  }
 0x17b   :  { %23322 = vmatprep.subr.mxu1 %v25437_v0  ;;  %23312 = vmatpush3.msra.mxu0 %v33253_v6  ;;  %v27991_v6 = vld [vmem:[%s32767_s3 + $0xd0] sm:$0xff]   ;;  %33755 = vst [vmem:[#allocation149_spill] sm:$0xff] %v28054_v39 }
 0x17c   :  { %23323 = vmatpush3.msra.mxu1 %v33744_v53  ;;  %23324 = vmatprep.mubr.msk.f32.mxu1 %vm25438_vm0, %v25437_v0  ;;  %33746 = vst [vmem:[#allocation144_spill] sm:$0xff] %v27991_v6  ;;  %v33260_v53 = vunpack.c.l.bf16 %v27959_v29  ;;  %v33754_v29 = vunpack.c.l.bf16 %v27991_v6 }
 0x17d   :  { %23314 = vmatmul.mubr.msk.f32.vlgmr.msra.gmra.mxu0 %vm1171_vm1, %v93_v49  ;;  %23325 = vmatmul.mubr.msk.f32.vlgmr.msra.gmra.mxu1 %vm1171_vm1, %v94_v43  ;;  %v96_v49 = vld [vmem:[%s32768_s1 + $0x1a] sm:$0x3] }
 0x17e   :  { %23327 = vmatprep.subr.mxu0 %v25437_v0  ;;  %23338 = vmatprep.subr.mxu1 %v25437_v0 }
 0x17f   :  { %23328 = vmatpush3.msra.mxu0 %v33258_v58  ;;  %23339 = vmatpush3.msra.mxu1 %v33747_v12  ;;  %v28005_v16 = vpop.f32.mrf.mxu0  ;;  %v28007_v43 = vpop.f32.mrf.mxu1  ;;  %v33265_v12 = vunpack.c.l.bf16 %v27986_v61 }
 0x180   :  { %33748 = vst [vmem:[#allocation145_spill] sm:$0xff] %v28005_v16  ;;  %33749 = vst [vmem:[#allocation146_spill] sm:$0xff] %v28007_v43  ;;  %23329 = vmatprep.subr.mxu0 %v25437_v0  ;;  %23340 = vmatprep.subr.mxu1 %v25437_v0  ;;  %v28022_v43 = vld [vmem:[%s32767_s3 + $0xe8] sm:$0xff]  }
 0x181   :  { %23330 = vmatpush3.msra.mxu0 %v33259_v63  ;;  %23341 = vmatpush3.msra.mxu1 %v33260_v53  ;;  %v22897_v58 = vpop.f32.mrf.mxu0  ;;  %v22908_v44 = vpop.f32.mrf.mxu1  ;;  %33750 = vst [vmem:[#allocation147_spill] sm:$0xff] %v28022_v43  ;;  %v28027_v63 = vld [vmem:[%s32767_s3 + $0xf8] sm:$0xff]   ;;  %v33752_v53 = vunpack.c.h.bf16 %v27986_v61 }
 0x182   :  { %23331 = vmatprep.subr.mxu0 %v25437_v0  ;;  %23342 = vmatprep.subr.mxu1 %v25437_v0  ;;  %33751 = vst [vmem:[#allocation148_spill] sm:$0xff] %v28027_v63  ;;  %v33753_v44 = vunpack.c.h.bf16 %v27991_v6  ;;  %v95_v58 = vld [vmem:[%s32768_s1 + $0x18] sm:$0x3]  ;;  %v33757_v6 = vunpack.c.h.bf16 %v28027_v63 }
 0x183   :  { %23332 = vmatpush3.msra.mxu0 %v33752_v53  ;;  %23335 = vmatprep.mubr.msk.f32.mxu0 %vm25438_vm0, %v25437_v0  ;;  %v33270_v53 = vunpack.c.h.bf16 %v28022_v43 }
 0x184   :  { %23343 = vmatpush3.msra.mxu1 %v33753_v44  ;;  %23333 = vmatprep.subr.mxu0 %v25437_v0  ;;  %v33271_v44 = vunpack.c.l.bf16 %v28022_v43  ;;  %v28122_v43 = vld [vmem:[%s32767_s3 + $0x100] sm:$0xff]  }
 0x185   :  { %23344 = vmatprep.subr.mxu1 %v25437_v0  ;;  %23334 = vmatpush3.msra.mxu0 %v33265_v12  ;;  %v28059_v12 = vld [vmem:[%s32767_s3 + $0xf0] sm:$0xff]   ;;  %33765 = vst [vmem:[#allocation155_spill] sm:$0xff] %v28122_v43 }
 0x186   :  { %23345 = vmatpush3.msra.mxu1 %v33754_v29  ;;  %23346 = vmatprep.mubr.msk.f32.mxu1 %vm25438_vm0, %v25437_v0  ;;  %33756 = vst [vmem:[#allocation150_spill] sm:$0xff] %v28059_v12  ;;  %v33272_v29 = vunpack.c.l.bf16 %v28027_v63  ;;  %v33764_v63 = vunpack.c.l.bf16 %v28059_v12 }
 0x187   :  { %23336 = vmatmul.mubr.msk.f32.vlgmr.msra.gmra.mxu0 %vm1171_vm1, %v95_v58  ;;  %23347 = vmatmul.mubr.msk.f32.vlgmr.msra.gmra.mxu1 %vm1171_vm1, %v96_v49  ;;  %v98_v58 = vld [vmem:[%s32768_s1 + $0x1e] sm:$0x3] }
 0x188   :  { %23349 = vmatprep.subr.mxu0 %v25437_v0  ;;  %23360 = vmatprep.subr.mxu1 %v25437_v0 }
 0x189   :  { %23350 = vmatpush3.msra.mxu0 %v33270_v53  ;;  %23361 = vmatpush3.msra.mxu1 %v33757_v6  ;;  %v28073_v16 = vpop.f32.mrf.mxu0  ;;  %v28075_v49 = vpop.f32.mrf.mxu1  ;;  %v33277_v6 = vunpack.c.l.bf16 %v28054_v39 }
 0x18a   :  { %33758 = vst [vmem:[#allocation151_spill] sm:$0xff] %v28073_v16  ;;  %33759 = vst [vmem:[#allocation152_spill] sm:$0xff] %v28075_v49  ;;  %23351 = vmatprep.subr.mxu0 %v25437_v0  ;;  %23362 = vmatprep.subr.mxu1 %v25437_v0  ;;  %v28090_v49 = vld [vmem:[%s32767_s3 + $0x108] sm:$0xff]  }
 0x18b   :  { %23352 = vmatpush3.msra.mxu0 %v33271_v44  ;;  %23363 = vmatpush3.msra.mxu1 %v33272_v29  ;;  %v22919_v53 = vpop.f32.mrf.mxu0  ;;  %v22930_v61 = vpop.f32.mrf.mxu1  ;;  %33760 = vst [vmem:[#allocation153_spill] sm:$0xff] %v28090_v49  ;;  %v28095_v44 = vld [vmem:[%s32767_s3 + $0x118] sm:$0xff]   ;;  %v33762_v29 = vunpack.c.h.bf16 %v28054_v39 }
 0x18c   :  { %23353 = vmatprep.subr.mxu0 %v25437_v0  ;;  %23364 = vmatprep.subr.mxu1 %v25437_v0  ;;  %33761 = vst [vmem:[#allocation154_spill] sm:$0xff] %v28095_v44  ;;  %v33763_v61 = vunpack.c.h.bf16 %v28059_v12  ;;  %v97_v53 = vld [vmem:[%s32768_s1 + $0x1c] sm:$0x3]  ;;  %v33767_v12 = vunpack.c.h.bf16 %v28095_v44 }
 0x18d   :  { %23354 = vmatpush3.msra.mxu0 %v33762_v29  ;;  %23357 = vmatprep.mubr.msk.f32.mxu0 %vm25438_vm0, %v25437_v0  ;;  %v33282_v29 = vunpack.c.h.bf16 %v28090_v49 }
 0x18e   :  { %23365 = vmatpush3.msra.mxu1 %v33763_v61  ;;  %23355 = vmatprep.subr.mxu0 %v25437_v0  ;;  %v33283_v61 = vunpack.c.l.bf16 %v28090_v49  ;;  %v28190_v49 = vld [vmem:[%s32767_s3 + $0x120] sm:$0xff]  }
 0x18f   :  { %23366 = vmatprep.subr.mxu1 %v25437_v0  ;;  %23356 = vmatpush3.msra.mxu0 %v33277_v6  ;;  %v28127_v6 = vld [vmem:[%s32767_s3 + $0x110] sm:$0xff]   ;;  %33775 = vst [vmem:[#allocation161_spill] sm:$0xff] %v28190_v49 }
 0x190   :  { %23367 = vmatpush3.msra.mxu1 %v33764_v63  ;;  %23368 = vmatprep.mubr.msk.f32.mxu1 %vm25438_vm0, %v25437_v0  ;;  %33766 = vst [vmem:[#allocation156_spill] sm:$0xff] %v28127_v6  ;;  %v33284_v63 = vunpack.c.l.bf16 %v28095_v44  ;;  %v33774_v44 = vunpack.c.l.bf16 %v28127_v6 }
 0x191   :  { %23358 = vmatmul.mubr.msk.f32.vlgmr.msra.gmra.mxu0 %vm1171_vm1, %v97_v53  ;;  %23369 = vmatmul.mubr.msk.f32.vlgmr.msra.gmra.mxu1 %vm1171_vm1, %v98_v58  ;;  %v100_v53 = vld [vmem:[%s32768_s1 + $0x22] sm:$0x3] }
 0x192   :  { %23371 = vmatprep.subr.mxu0 %v25437_v0  ;;  %23382 = vmatprep.subr.mxu1 %v25437_v0 }
 0x193   :  { %23372 = vmatpush3.msra.mxu0 %v33282_v29  ;;  %23383 = vmatpush3.msra.mxu1 %v33767_v12  ;;  %v28141_v16 = vpop.f32.mrf.mxu0  ;;  %v28143_v58 = vpop.f32.mrf.mxu1  ;;  %v33289_v12 = vunpack.c.l.bf16 %v28122_v43 }
 0x194   :  { %33768 = vst [vmem:[#allocation157_spill] sm:$0xff] %v28141_v16  ;;  %33769 = vst [vmem:[#allocation158_spill] sm:$0xff] %v28143_v58  ;;  %23373 = vmatprep.subr.mxu0 %v25437_v0  ;;  %23384 = vmatprep.subr.mxu1 %v25437_v0  ;;  %v28158_v58 = vld [vmem:[%s32767_s3 + $0x128] sm:$0xff]  }
 0x195   :  { %23374 = vmatpush3.msra.mxu0 %v33283_v61  ;;  %23385 = vmatpush3.msra.mxu1 %v33284_v63  ;;  %v22941_v29 = vpop.f32.mrf.mxu0  ;;  %v22952_v39 = vpop.f32.mrf.mxu1  ;;  %33770 = vst [vmem:[#allocation159_spill] sm:$0xff] %v28158_v58  ;;  %v28163_v61 = vld [vmem:[%s32767_s3 + $0x138] sm:$0xff]   ;;  %v33772_v63 = vunpack.c.h.bf16 %v28122_v43 }
 0x196   :  { %23375 = vmatprep.subr.mxu0 %v25437_v0  ;;  %23386 = vmatprep.subr.mxu1 %v25437_v0  ;;  %33771 = vst [vmem:[#allocation160_spill] sm:$0xff] %v28163_v61  ;;  %v33773_v39 = vunpack.c.h.bf16 %v28127_v6  ;;  %v99_v29 = vld [vmem:[%s32768_s1 + $0x20] sm:$0x3]  ;;  %v33777_v6 = vunpack.c.h.bf16 %v28163_v61 }
 0x197   :  { %23376 = vmatpush3.msra.mxu0 %v33772_v63  ;;  %23379 = vmatprep.mubr.msk.f32.mxu0 %vm25438_vm0, %v25437_v0  ;;  %v33294_v63 = vunpack.c.h.bf16 %v28158_v58 }
 0x198   :  { %23387 = vmatpush3.msra.mxu1 %v33773_v39  ;;  %23377 = vmatprep.subr.mxu0 %v25437_v0  ;;  %v33295_v39 = vunpack.c.l.bf16 %v28158_v58  ;;  %v28258_v58 = vld [vmem:[%s32767_s3 + $0x140] sm:$0xff]  }
 0x199   :  { %23388 = vmatprep.subr.mxu1 %v25437_v0  ;;  %23378 = vmatpush3.msra.mxu0 %v33289_v12  ;;  %v28195_v12 = vld [vmem:[%s32767_s3 + $0x130] sm:$0xff]   ;;  %33785 = vst [vmem:[#allocation167_spill] sm:$0xff] %v28258_v58 }
 0x19a   :  { %23389 = vmatpush3.msra.mxu1 %v33774_v44  ;;  %23390 = vmatprep.mubr.msk.f32.mxu1 %vm25438_vm0, %v25437_v0  ;;  %33776 = vst [vmem:[#allocation162_spill] sm:$0xff] %v28195_v12  ;;  %v33296_v44 = vunpack.c.l.bf16 %v28163_v61  ;;  %v33784_v61 = vunpack.c.l.bf16 %v28195_v12 }
 0x19b   :  { %23380 = vmatmul.mubr.msk.f32.vlgmr.msra.gmra.mxu0 %vm1171_vm1, %v99_v29  ;;  %23391 = vmatmul.mubr.msk.f32.vlgmr.msra.gmra.mxu1 %vm1171_vm1, %v100_v53  ;;  %v102_v29 = vld [vmem:[%s32768_s1 + $0x26] sm:$0x3] }
 0x19c   :  { %23393 = vmatprep.subr.mxu0 %v25437_v0  ;;  %23404 = vmatprep.subr.mxu1 %v25437_v0 }
 0x19d   :  { %23394 = vmatpush3.msra.mxu0 %v33294_v63  ;;  %23405 = vmatpush3.msra.mxu1 %v33777_v6  ;;  %v28209_v16 = vpop.f32.mrf.mxu0  ;;  %v28211_v53 = vpop.f32.mrf.mxu1  ;;  %v33301_v6 = vunpack.c.l.bf16 %v28190_v49 }
 0x19e   :  { %33778 = vst [vmem:[#allocation163_spill] sm:$0xff] %v28209_v16  ;;  %33779 = vst [vmem:[#allocation164_spill] sm:$0xff] %v28211_v53  ;;  %23395 = vmatprep.subr.mxu0 %v25437_v0  ;;  %23406 = vmatprep.subr.mxu1 %v25437_v0  ;;  %v28226_v53 = vld [vmem:[%s32767_s3 + $0x148] sm:$0xff]  }
 0x19f   :  { %23396 = vmatpush3.msra.mxu0 %v33295_v39  ;;  %23407 = vmatpush3.msra.mxu1 %v33296_v44  ;;  %v22963_v63 = vpop.f32.mrf.mxu0  ;;  %v22974_v43 = vpop.f32.mrf.mxu1  ;;  %33780 = vst [vmem:[#allocation165_spill] sm:$0xff] %v28226_v53  ;;  %v28231_v39 = vld [vmem:[%s32767_s3 + $0x158] sm:$0xff]   ;;  %v33782_v44 = vunpack.c.h.bf16 %v28190_v49 }
 0x1a0   :  { %23397 = vmatprep.subr.mxu0 %v25437_v0  ;;  %23408 = vmatprep.subr.mxu1 %v25437_v0  ;;  %33781 = vst [vmem:[#allocation166_spill] sm:$0xff] %v28231_v39  ;;  %v33783_v43 = vunpack.c.h.bf16 %v28195_v12  ;;  %v101_v63 = vld [vmem:[%s32768_s1 + $0x24] sm:$0x3]  ;;  %v33787_v12 = vunpack.c.h.bf16 %v28231_v39 }
 0x1a1   :  { %23398 = vmatpush3.msra.mxu0 %v33782_v44  ;;  %23401 = vmatprep.mubr.msk.f32.mxu0 %vm25438_vm0, %v25437_v0  ;;  %v33306_v44 = vunpack.c.h.bf16 %v28226_v53 }
 0x1a2   :  { %23409 = vmatpush3.msra.mxu1 %v33783_v43  ;;  %23399 = vmatprep.subr.mxu0 %v25437_v0  ;;  %v33307_v43 = vunpack.c.l.bf16 %v28226_v53  ;;  %v28326_v53 = vld [vmem:[%s32767_s3 + $0x160] sm:$0xff]  }
 0x1a3   :  { %23410 = vmatprep.subr.mxu1 %v25437_v0  ;;  %23400 = vmatpush3.msra.mxu0 %v33301_v6  ;;  %v28263_v6 = vld [vmem:[%s32767_s3 + $0x150] sm:$0xff]   ;;  %33795 = vst [vmem:[#allocation173_spill] sm:$0xff] %v28326_v53 }
 0x1a4   :  { %23411 = vmatpush3.msra.mxu1 %v33784_v61  ;;  %23412 = vmatprep.mubr.msk.f32.mxu1 %vm25438_vm0, %v25437_v0  ;;  %33786 = vst [vmem:[#allocation168_spill] sm:$0xff] %v28263_v6  ;;  %v33308_v61 = vunpack.c.l.bf16 %v28231_v39  ;;  %v33794_v39 = vunpack.c.l.bf16 %v28263_v6 }
 0x1a5   :  { %23402 = vmatmul.mubr.msk.f32.vlgmr.msra.gmra.mxu0 %vm1171_vm1, %v101_v63  ;;  %23413 = vmatmul.mubr.msk.f32.vlgmr.msra.gmra.mxu1 %vm1171_vm1, %v102_v29  ;;  %v104_v63 = vld [vmem:[%s32768_s1 + $0x2a] sm:$0x3] }
 0x1a6   :  { %23415 = vmatprep.subr.mxu0 %v25437_v0  ;;  %23426 = vmatprep.subr.mxu1 %v25437_v0 }
 0x1a7   :  { %23416 = vmatpush3.msra.mxu0 %v33306_v44  ;;  %23427 = vmatpush3.msra.mxu1 %v33787_v12  ;;  %v28277_v16 = vpop.f32.mrf.mxu0  ;;  %v28279_v29 = vpop.f32.mrf.mxu1  ;;  %v33313_v12 = vunpack.c.l.bf16 %v28258_v58 }
 0x1a8   :  { %33788 = vst [vmem:[#allocation169_spill] sm:$0xff] %v28277_v16  ;;  %33789 = vst [vmem:[#allocation170_spill] sm:$0xff] %v28279_v29  ;;  %23417 = vmatprep.subr.mxu0 %v25437_v0  ;;  %23428 = vmatprep.subr.mxu1 %v25437_v0  ;;  %v28294_v29 = vld [vmem:[%s32767_s3 + $0x168] sm:$0xff]  }
 0x1a9   :  { %23418 = vmatpush3.msra.mxu0 %v33307_v43  ;;  %23429 = vmatpush3.msra.mxu1 %v33308_v61  ;;  %v22985_v44 = vpop.f32.mrf.mxu0  ;;  %v22996_v49 = vpop.f32.mrf.mxu1  ;;  %33790 = vst [vmem:[#allocation171_spill] sm:$0xff] %v28294_v29  ;;  %v28299_v43 = vld [vmem:[%s32767_s3 + $0x178] sm:$0xff]   ;;  %v33792_v61 = vunpack.c.h.bf16 %v28258_v58 }
 0x1aa   :  { %23419 = vmatprep.subr.mxu0 %v25437_v0  ;;  %23430 = vmatprep.subr.mxu1 %v25437_v0  ;;  %33791 = vst [vmem:[#allocation172_spill] sm:$0xff] %v28299_v43  ;;  %v33793_v49 = vunpack.c.h.bf16 %v28263_v6  ;;  %v103_v44 = vld [vmem:[%s32768_s1 + $0x28] sm:$0x3]  ;;  %v33797_v6 = vunpack.c.h.bf16 %v28299_v43 }
 0x1ab   :  { %23420 = vmatpush3.msra.mxu0 %v33792_v61  ;;  %23423 = vmatprep.mubr.msk.f32.mxu0 %vm25438_vm0, %v25437_v0  ;;  %v33318_v61 = vunpack.c.h.bf16 %v28294_v29 }
 0x1ac   :  { %23431 = vmatpush3.msra.mxu1 %v33793_v49  ;;  %23421 = vmatprep.subr.mxu0 %v25437_v0  ;;  %v33319_v49 = vunpack.c.l.bf16 %v28294_v29  ;;  %v28394_v29 = vld [vmem:[%s32767_s3 + $0x180] sm:$0xff]  }
 0x1ad   :  { %23432 = vmatprep.subr.mxu1 %v25437_v0  ;;  %23422 = vmatpush3.msra.mxu0 %v33313_v12  ;;  %v28331_v12 = vld [vmem:[%s32767_s3 + $0x170] sm:$0xff]   ;;  %33805 = vst [vmem:[#allocation179_spill] sm:$0xff] %v28394_v29 }
 0x1ae   :  { %23433 = vmatpush3.msra.mxu1 %v33794_v39  ;;  %23434 = vmatprep.mubr.msk.f32.mxu1 %vm25438_vm0, %v25437_v0  ;;  %33796 = vst [vmem:[#allocation174_spill] sm:$0xff] %v28331_v12  ;;  %v33320_v39 = vunpack.c.l.bf16 %v28299_v43  ;;  %v33804_v43 = vunpack.c.l.bf16 %v28331_v12 }
 0x1af   :  { %23424 = vmatmul.mubr.msk.f32.vlgmr.msra.gmra.mxu0 %vm1171_vm1, %v103_v44  ;;  %23435 = vmatmul.mubr.msk.f32.vlgmr.msra.gmra.mxu1 %vm1171_vm1, %v104_v63  ;;  %v106_v44 = vld [vmem:[%s32768_s1 + $0x2e] sm:$0x3] }
 0x1b0   :  { %23437 = vmatprep.subr.mxu0 %v25437_v0  ;;  %23448 = vmatprep.subr.mxu1 %v25437_v0 }
 0x1b1   :  { %23438 = vmatpush3.msra.mxu0 %v33318_v61  ;;  %23449 = vmatpush3.msra.mxu1 %v33797_v6  ;;  %v28345_v16 = vpop.f32.mrf.mxu0  ;;  %v28347_v63 = vpop.f32.mrf.mxu1  ;;  %v33325_v6 = vunpack.c.l.bf16 %v28326_v53 }
 0x1b2   :  { %33798 = vst [vmem:[#allocation175_spill] sm:$0xff] %v28345_v16  ;;  %33799 = vst [vmem:[#allocation176_spill] sm:$0xff] %v28347_v63  ;;  %23439 = vmatprep.subr.mxu0 %v25437_v0  ;;  %23450 = vmatprep.subr.mxu1 %v25437_v0  ;;  %v28362_v63 = vld [vmem:[%s32767_s3 + $0x188] sm:$0xff]  }
 0x1b3   :  { %23440 = vmatpush3.msra.mxu0 %v33319_v49  ;;  %23451 = vmatpush3.msra.mxu1 %v33320_v39  ;;  %v23007_v61 = vpop.f32.mrf.mxu0  ;;  %v23018_v58 = vpop.f32.mrf.mxu1  ;;  %33800 = vst [vmem:[#allocation177_spill] sm:$0xff] %v28362_v63  ;;  %v28367_v49 = vld [vmem:[%s32767_s3 + $0x198] sm:$0xff]   ;;  %v33802_v39 = vunpack.c.h.bf16 %v28326_v53 }
 0x1b4   :  { %23441 = vmatprep.subr.mxu0 %v25437_v0  ;;  %23452 = vmatprep.subr.mxu1 %v25437_v0  ;;  %33801 = vst [vmem:[#allocation178_spill] sm:$0xff] %v28367_v49  ;;  %v33803_v58 = vunpack.c.h.bf16 %v28331_v12  ;;  %v105_v61 = vld [vmem:[%s32768_s1 + $0x2c] sm:$0x3]  ;;  %v33807_v12 = vunpack.c.h.bf16 %v28367_v49 }
 0x1b5   :  { %23442 = vmatpush3.msra.mxu0 %v33802_v39  ;;  %23445 = vmatprep.mubr.msk.f32.mxu0 %vm25438_vm0, %v25437_v0  ;;  %v33330_v39 = vunpack.c.h.bf16 %v28362_v63 }
 0x1b6   :  { %23453 = vmatpush3.msra.mxu1 %v33803_v58  ;;  %23443 = vmatprep.subr.mxu0 %v25437_v0  ;;  %v33331_v58 = vunpack.c.l.bf16 %v28362_v63  ;;  %v28462_v63 = vld [vmem:[%s32767_s3 + $0x1a0] sm:$0xff]  }
 0x1b7   :  { %23454 = vmatprep.subr.mxu1 %v25437_v0  ;;  %23444 = vmatpush3.msra.mxu0 %v33325_v6  ;;  %v28399_v6 = vld [vmem:[%s32767_s3 + $0x190] sm:$0xff]   ;;  %33815 = vst [vmem:[#allocation185_spill] sm:$0xff] %v28462_v63 }
 0x1b8   :  { %23455 = vmatpush3.msra.mxu1 %v33804_v43  ;;  %23456 = vmatprep.mubr.msk.f32.mxu1 %vm25438_vm0, %v25437_v0  ;;  %33806 = vst [vmem:[#allocation180_spill] sm:$0xff] %v28399_v6  ;;  %v33332_v43 = vunpack.c.l.bf16 %v28367_v49  ;;  %v33814_v49 = vunpack.c.l.bf16 %v28399_v6 }
 0x1b9   :  { %23446 = vmatmul.mubr.msk.f32.vlgmr.msra.gmra.mxu0 %vm1171_vm1, %v105_v61  ;;  %23457 = vmatmul.mubr.msk.f32.vlgmr.msra.gmra.mxu1 %vm1171_vm1, %v106_v44  ;;  %v108_v61 = vld [vmem:[%s32768_s1 + $0x32] sm:$0x3] }
 0x1ba   :  { %23459 = vmatprep.subr.mxu0 %v25437_v0  ;;  %23470 = vmatprep.subr.mxu1 %v25437_v0 }
 0x1bb   :  { %23460 = vmatpush3.msra.mxu0 %v33330_v39  ;;  %23471 = vmatpush3.msra.mxu1 %v33807_v12  ;;  %v28413_v16 = vpop.f32.mrf.mxu0  ;;  %v28415_v44 = vpop.f32.mrf.mxu1  ;;  %v33337_v12 = vunpack.c.l.bf16 %v28394_v29 }
 0x1bc   :  { %33808 = vst [vmem:[#allocation181_spill] sm:$0xff] %v28413_v16  ;;  %33809 = vst [vmem:[#allocation182_spill] sm:$0xff] %v28415_v44  ;;  %23461 = vmatprep.subr.mxu0 %v25437_v0  ;;  %23472 = vmatprep.subr.mxu1 %v25437_v0  ;;  %v28430_v44 = vld [vmem:[%s32767_s3 + $0x1a8] sm:$0xff]  }
 0x1bd   :  { %23462 = vmatpush3.msra.mxu0 %v33331_v58  ;;  %23473 = vmatpush3.msra.mxu1 %v33332_v43  ;;  %v23029_v39 = vpop.f32.mrf.mxu0  ;;  %v23040_v53 = vpop.f32.mrf.mxu1  ;;  %33810 = vst [vmem:[#allocation183_spill] sm:$0xff] %v28430_v44  ;;  %v28435_v58 = vld [vmem:[%s32767_s3 + $0x1b8] sm:$0xff]   ;;  %v33812_v43 = vunpack.c.h.bf16 %v28394_v29 }
 0x1be   :  { %23463 = vmatprep.subr.mxu0 %v25437_v0  ;;  %23474 = vmatprep.subr.mxu1 %v25437_v0  ;;  %33811 = vst [vmem:[#allocation184_spill] sm:$0xff] %v28435_v58  ;;  %v33813_v53 = vunpack.c.h.bf16 %v28399_v6  ;;  %v107_v39 = vld [vmem:[%s32768_s1 + $0x30] sm:$0x3]  ;;  %v33817_v6 = vunpack.c.h.bf16 %v28435_v58 }
 0x1bf   :  { %23464 = vmatpush3.msra.mxu0 %v33812_v43  ;;  %23467 = vmatprep.mubr.msk.f32.mxu0 %vm25438_vm0, %v25437_v0  ;;  %v33342_v43 = vunpack.c.h.bf16 %v28430_v44 }
 0x1c0   :  { %23475 = vmatpush3.msra.mxu1 %v33813_v53  ;;  %23465 = vmatprep.subr.mxu0 %v25437_v0  ;;  %v33343_v53 = vunpack.c.l.bf16 %v28430_v44  ;;  %v28530_v44 = vld [vmem:[%s32767_s3 + $0x1c0] sm:$0xff]  }
 0x1c1   :  { %23476 = vmatprep.subr.mxu1 %v25437_v0  ;;  %23466 = vmatpush3.msra.mxu0 %v33337_v12  ;;  %v28467_v12 = vld [vmem:[%s32767_s3 + $0x1b0] sm:$0xff]   ;;  %33825 = vst [vmem:[#allocation191_spill] sm:$0xff] %v28530_v44 }
 0x1c2   :  { %23477 = vmatpush3.msra.mxu1 %v33814_v49  ;;  %23478 = vmatprep.mubr.msk.f32.mxu1 %vm25438_vm0, %v25437_v0  ;;  %33816 = vst [vmem:[#allocation186_spill] sm:$0xff] %v28467_v12  ;;  %v33344_v49 = vunpack.c.l.bf16 %v28435_v58  ;;  %v33824_v58 = vunpack.c.l.bf16 %v28467_v12 }
 0x1c3   :  { %23468 = vmatmul.mubr.msk.f32.vlgmr.msra.gmra.mxu0 %vm1171_vm1, %v107_v39  ;;  %23479 = vmatmul.mubr.msk.f32.vlgmr.msra.gmra.mxu1 %vm1171_vm1, %v108_v61  ;;  %v110_v39 = vld [vmem:[%s32768_s1 + $0x36] sm:$0x3] }
 0x1c4   :  { %23481 = vmatprep.subr.mxu0 %v25437_v0  ;;  %23492 = vmatprep.subr.mxu1 %v25437_v0 }
 0x1c5   :  { %23482 = vmatpush3.msra.mxu0 %v33342_v43  ;;  %23493 = vmatpush3.msra.mxu1 %v33817_v6  ;;  %v28481_v16 = vpop.f32.mrf.mxu0  ;;  %v28483_v61 = vpop.f32.mrf.mxu1  ;;  %v33349_v6 = vunpack.c.l.bf16 %v28462_v63 }
 0x1c6   :  { %33818 = vst [vmem:[#allocation187_spill] sm:$0xff] %v28481_v16  ;;  %33819 = vst [vmem:[#allocation188_spill] sm:$0xff] %v28483_v61  ;;  %23483 = vmatprep.subr.mxu0 %v25437_v0  ;;  %23494 = vmatprep.subr.mxu1 %v25437_v0  ;;  %v28498_v61 = vld [vmem:[%s32767_s3 + $0x1c8] sm:$0xff]  }
 0x1c7   :  { %23484 = vmatpush3.msra.mxu0 %v33343_v53  ;;  %23495 = vmatpush3.msra.mxu1 %v33344_v49  ;;  %v23051_v43 = vpop.f32.mrf.mxu0  ;;  %v23062_v29 = vpop.f32.mrf.mxu1  ;;  %33820 = vst [vmem:[#allocation189_spill] sm:$0xff] %v28498_v61  ;;  %v28503_v53 = vld [vmem:[%s32767_s3 + $0x1d8] sm:$0xff]   ;;  %v33822_v49 = vunpack.c.h.bf16 %v28462_v63 }
 0x1c8   :  { %23485 = vmatprep.subr.mxu0 %v25437_v0  ;;  %23496 = vmatprep.subr.mxu1 %v25437_v0  ;;  %33821 = vst [vmem:[#allocation190_spill] sm:$0xff] %v28503_v53  ;;  %v33823_v29 = vunpack.c.h.bf16 %v28467_v12  ;;  %v109_v43 = vld [vmem:[%s32768_s1 + $0x34] sm:$0x3]  ;;  %v33827_v12 = vunpack.c.h.bf16 %v28503_v53 }
 0x1c9   :  { %23486 = vmatpush3.msra.mxu0 %v33822_v49  ;;  %23489 = vmatprep.mubr.msk.f32.mxu0 %vm25438_vm0, %v25437_v0  ;;  %v33354_v49 = vunpack.c.h.bf16 %v28498_v61 }
 0x1ca   :  { %23497 = vmatpush3.msra.mxu1 %v33823_v29  ;;  %23487 = vmatprep.subr.mxu0 %v25437_v0  ;;  %v33355_v29 = vunpack.c.l.bf16 %v28498_v61  ;;  %v28598_v61 = vld [vmem:[%s32767_s3 + $0x1e0] sm:$0xff]  }
 0x1cb   :  { %23498 = vmatprep.subr.mxu1 %v25437_v0  ;;  %23488 = vmatpush3.msra.mxu0 %v33349_v6  ;;  %v28535_v6 = vld [vmem:[%s32767_s3 + $0x1d0] sm:$0xff]   ;;  %33835 = vst [vmem:[#allocation197_spill] sm:$0xff] %v28598_v61 }
 0x1cc   :  { %23499 = vmatpush3.msra.mxu1 %v33824_v58  ;;  %23500 = vmatprep.mubr.msk.f32.mxu1 %vm25438_vm0, %v25437_v0  ;;  %33826 = vst [vmem:[#allocation192_spill] sm:$0xff] %v28535_v6  ;;  %v33356_v58 = vunpack.c.l.bf16 %v28503_v53  ;;  %v33834_v53 = vunpack.c.l.bf16 %v28535_v6 }
 0x1cd   :  { %23490 = vmatmul.mubr.msk.f32.vlgmr.msra.gmra.mxu0 %vm1171_vm1, %v109_v43  ;;  %23501 = vmatmul.mubr.msk.f32.vlgmr.msra.gmra.mxu1 %vm1171_vm1, %v110_v39  ;;  %v112_v43 = vld [vmem:[%s32768_s1 + $0x3a] sm:$0x3] }
 0x1ce   :  { %23503 = vmatprep.subr.mxu0 %v25437_v0  ;;  %23514 = vmatprep.subr.mxu1 %v25437_v0 }
 0x1cf   :  { %23504 = vmatpush3.msra.mxu0 %v33354_v49  ;;  %23515 = vmatpush3.msra.mxu1 %v33827_v12  ;;  %v28549_v16 = vpop.f32.mrf.mxu0  ;;  %v28551_v39 = vpop.f32.mrf.mxu1  ;;  %v33361_v12 = vunpack.c.l.bf16 %v28530_v44 }
 0x1d0   :  { %33828 = vst [vmem:[#allocation193_spill] sm:$0xff] %v28549_v16  ;;  %33829 = vst [vmem:[#allocation194_spill] sm:$0xff] %v28551_v39  ;;  %23505 = vmatprep.subr.mxu0 %v25437_v0  ;;  %23516 = vmatprep.subr.mxu1 %v25437_v0  ;;  %v28566_v39 = vld [vmem:[%s32767_s3 + $0x1e8] sm:$0xff]  }
 0x1d1   :  { %23506 = vmatpush3.msra.mxu0 %v33355_v29  ;;  %23517 = vmatpush3.msra.mxu1 %v33356_v58  ;;  %v23073_v49 = vpop.f32.mrf.mxu0  ;;  %v23084_v63 = vpop.f32.mrf.mxu1  ;;  %33830 = vst [vmem:[#allocation195_spill] sm:$0xff] %v28566_v39  ;;  %v28571_v29 = vld [vmem:[%s32767_s3 + $0x1f8] sm:$0xff]   ;;  %v33832_v58 = vunpack.c.h.bf16 %v28530_v44 }
 0x1d2   :  { %23507 = vmatprep.subr.mxu0 %v25437_v0  ;;  %23518 = vmatprep.subr.mxu1 %v25437_v0  ;;  %33831 = vst [vmem:[#allocation196_spill] sm:$0xff] %v28571_v29  ;;  %v33833_v63 = vunpack.c.h.bf16 %v28535_v6  ;;  %v111_v49 = vld [vmem:[%s32768_s1 + $0x38] sm:$0x3]  ;;  %v33837_v6 = vunpack.c.h.bf16 %v28571_v29 }
 0x1d3   :  { %23508 = vmatpush3.msra.mxu0 %v33832_v58  ;;  %23511 = vmatprep.mubr.msk.f32.mxu0 %vm25438_vm0, %v25437_v0  ;;  %v33366_v58 = vunpack.c.h.bf16 %v28566_v39 }
 0x1d4   :  { %23519 = vmatpush3.msra.mxu1 %v33833_v63  ;;  %23509 = vmatprep.subr.mxu0 %v25437_v0  ;;  %v33367_v63 = vunpack.c.l.bf16 %v28566_v39  ;;  %v28666_v39 = vld [vmem:[%s32767_s3 + $0x200] sm:$0xff]  }
 0x1d5   :  { %23520 = vmatprep.subr.mxu1 %v25437_v0  ;;  %23510 = vmatpush3.msra.mxu0 %v33361_v12  ;;  %v28603_v12 = vld [vmem:[%s32767_s3 + $0x1f0] sm:$0xff]   ;;  %33845 = vst [vmem:[#allocation203_spill] sm:$0xff] %v28666_v39 }
 0x1d6   :  { %23521 = vmatpush3.msra.mxu1 %v33834_v53  ;;  %23522 = vmatprep.mubr.msk.f32.mxu1 %vm25438_vm0, %v25437_v0  ;;  %33836 = vst [vmem:[#allocation198_spill] sm:$0xff] %v28603_v12  ;;  %v33368_v53 = vunpack.c.l.bf16 %v28571_v29  ;;  %v33844_v29 = vunpack.c.l.bf16 %v28603_v12 }
 0x1d7   :  { %23512 = vmatmul.mubr.msk.f32.vlgmr.msra.gmra.mxu0 %vm1171_vm1, %v111_v49  ;;  %23523 = vmatmul.mubr.msk.f32.vlgmr.msra.gmra.mxu1 %vm1171_vm1, %v112_v43  ;;  %v114_v49 = vld [vmem:[%s32768_s1 + $0x3e] sm:$0x3] }
 0x1d8   :  { %23525 = vmatprep.subr.mxu0 %v25437_v0  ;;  %23536 = vmatprep.subr.mxu1 %v25437_v0 }
 0x1d9   :  { %23526 = vmatpush3.msra.mxu0 %v33366_v58  ;;  %23537 = vmatpush3.msra.mxu1 %v33837_v6  ;;  %v28617_v16 = vpop.f32.mrf.mxu0  ;;  %v28619_v43 = vpop.f32.mrf.mxu1  ;;  %v33373_v6 = vunpack.c.l.bf16 %v28598_v61 }
 0x1da   :  { %33838 = vst [vmem:[#allocation199_spill] sm:$0xff] %v28617_v16  ;;  %33839 = vst [vmem:[#allocation200_spill] sm:$0xff] %v28619_v43  ;;  %23527 = vmatprep.subr.mxu0 %v25437_v0  ;;  %23538 = vmatprep.subr.mxu1 %v25437_v0  ;;  %v28634_v43 = vld [vmem:[%s32767_s3 + $0x208] sm:$0xff]  }
 0x1db   :  { %23528 = vmatpush3.msra.mxu0 %v33367_v63  ;;  %23539 = vmatpush3.msra.mxu1 %v33368_v53  ;;  %v23095_v58 = vpop.f32.mrf.mxu0  ;;  %v23106_v44 = vpop.f32.mrf.mxu1  ;;  %33840 = vst [vmem:[#allocation201_spill] sm:$0xff] %v28634_v43  ;;  %v28639_v63 = vld [vmem:[%s32767_s3 + $0x218] sm:$0xff]   ;;  %v33842_v53 = vunpack.c.h.bf16 %v28598_v61 }
 0x1dc   :  { %23529 = vmatprep.subr.mxu0 %v25437_v0  ;;  %23540 = vmatprep.subr.mxu1 %v25437_v0  ;;  %33841 = vst [vmem:[#allocation202_spill] sm:$0xff] %v28639_v63  ;;  %v33843_v44 = vunpack.c.h.bf16 %v28603_v12  ;;  %v113_v58 = vld [vmem:[%s32768_s1 + $0x3c] sm:$0x3]  ;;  %v33847_v12 = vunpack.c.h.bf16 %v28639_v63 }
 0x1dd   :  { %23530 = vmatpush3.msra.mxu0 %v33842_v53  ;;  %23533 = vmatprep.mubr.msk.f32.mxu0 %vm25438_vm0, %v25437_v0  ;;  %v33378_v53 = vunpack.c.h.bf16 %v28634_v43 }
 0x1de   :  { %23541 = vmatpush3.msra.mxu1 %v33843_v44  ;;  %23531 = vmatprep.subr.mxu0 %v25437_v0  ;;  %v33379_v44 = vunpack.c.l.bf16 %v28634_v43  ;;  %v28734_v43 = vld [vmem:[%s32767_s3 + $0x220] sm:$0xff]  }
 0x1df   :  { %23542 = vmatprep.subr.mxu1 %v25437_v0  ;;  %23532 = vmatpush3.msra.mxu0 %v33373_v6  ;;  %v28671_v6 = vld [vmem:[%s32767_s3 + $0x210] sm:$0xff]   ;;  %33855 = vst [vmem:[#allocation209_spill] sm:$0xff] %v28734_v43 }
 0x1e0   :  { %23543 = vmatpush3.msra.mxu1 %v33844_v29  ;;  %23544 = vmatprep.mubr.msk.f32.mxu1 %vm25438_vm0, %v25437_v0  ;;  %33846 = vst [vmem:[#allocation204_spill] sm:$0xff] %v28671_v6  ;;  %v33380_v29 = vunpack.c.l.bf16 %v28639_v63  ;;  %v33854_v63 = vunpack.c.l.bf16 %v28671_v6 }
 0x1e1   :  { %23534 = vmatmul.mubr.msk.f32.vlgmr.msra.gmra.mxu0 %vm1171_vm1, %v113_v58  ;;  %23545 = vmatmul.mubr.msk.f32.vlgmr.msra.gmra.mxu1 %vm1171_vm1, %v114_v49  ;;  %v116_v58 = vld [vmem:[%s32768_s1 + $0x42] sm:$0x3] }
 0x1e2   :  { %23547 = vmatprep.subr.mxu0 %v25437_v0  ;;  %23558 = vmatprep.subr.mxu1 %v25437_v0 }
 0x1e3   :  { %23548 = vmatpush3.msra.mxu0 %v33378_v53  ;;  %23559 = vmatpush3.msra.mxu1 %v33847_v12  ;;  %v28685_v16 = vpop.f32.mrf.mxu0  ;;  %v28687_v49 = vpop.f32.mrf.mxu1  ;;  %v33385_v12 = vunpack.c.l.bf16 %v28666_v39 }
 0x1e4   :  { %33848 = vst [vmem:[#allocation205_spill] sm:$0xff] %v28685_v16  ;;  %33849 = vst [vmem:[#allocation206_spill] sm:$0xff] %v28687_v49  ;;  %23549 = vmatprep.subr.mxu0 %v25437_v0  ;;  %23560 = vmatprep.subr.mxu1 %v25437_v0  ;;  %v28702_v49 = vld [vmem:[%s32767_s3 + $0x228] sm:$0xff]  }
 0x1e5   :  { %23550 = vmatpush3.msra.mxu0 %v33379_v44  ;;  %23561 = vmatpush3.msra.mxu1 %v33380_v29  ;;  %v23117_v53 = vpop.f32.mrf.mxu0  ;;  %v23128_v61 = vpop.f32.mrf.mxu1  ;;  %33850 = vst [vmem:[#allocation207_spill] sm:$0xff] %v28702_v49  ;;  %v28707_v44 = vld [vmem:[%s32767_s3 + $0x238] sm:$0xff]   ;;  %v33852_v29 = vunpack.c.h.bf16 %v28666_v39 }
 0x1e6   :  { %23551 = vmatprep.subr.mxu0 %v25437_v0  ;;  %23562 = vmatprep.subr.mxu1 %v25437_v0  ;;  %33851 = vst [vmem:[#allocation208_spill] sm:$0xff] %v28707_v44  ;;  %v33853_v61 = vunpack.c.h.bf16 %v28671_v6  ;;  %v115_v53 = vld [vmem:[%s32768_s1 + $0x40] sm:$0x3]  ;;  %v33857_v6 = vunpack.c.h.bf16 %v28707_v44 }
 0x1e7   :  { %23552 = vmatpush3.msra.mxu0 %v33852_v29  ;;  %23555 = vmatprep.mubr.msk.f32.mxu0 %vm25438_vm0, %v25437_v0  ;;  %v33390_v29 = vunpack.c.h.bf16 %v28702_v49 }
 0x1e8   :  { %23563 = vmatpush3.msra.mxu1 %v33853_v61  ;;  %23553 = vmatprep.subr.mxu0 %v25437_v0  ;;  %v33391_v61 = vunpack.c.l.bf16 %v28702_v49  ;;  %v28802_v49 = vld [vmem:[%s32767_s3 + $0x240] sm:$0xff]  }
 0x1e9   :  { %23564 = vmatprep.subr.mxu1 %v25437_v0  ;;  %23554 = vmatpush3.msra.mxu0 %v33385_v12  ;;  %v28739_v12 = vld [vmem:[%s32767_s3 + $0x230] sm:$0xff]   ;;  %33865 = vst [vmem:[#allocation215_spill] sm:$0xff] %v28802_v49 }
 0x1ea   :  { %23565 = vmatpush3.msra.mxu1 %v33854_v63  ;;  %23566 = vmatprep.mubr.msk.f32.mxu1 %vm25438_vm0, %v25437_v0  ;;  %33856 = vst [vmem:[#allocation210_spill] sm:$0xff] %v28739_v12  ;;  %v33392_v63 = vunpack.c.l.bf16 %v28707_v44  ;;  %v33864_v44 = vunpack.c.l.bf16 %v28739_v12 }
 0x1eb   :  { %23556 = vmatmul.mubr.msk.f32.vlgmr.msra.gmra.mxu0 %vm1171_vm1, %v115_v53  ;;  %23567 = vmatmul.mubr.msk.f32.vlgmr.msra.gmra.mxu1 %vm1171_vm1, %v116_v58  ;;  %v118_v53 = vld [vmem:[%s32768_s1 + $0x46] sm:$0x3] }
 0x1ec   :  { %23569 = vmatprep.subr.mxu0 %v25437_v0  ;;  %23580 = vmatprep.subr.mxu1 %v25437_v0 }
 0x1ed   :  { %23570 = vmatpush3.msra.mxu0 %v33390_v29  ;;  %23581 = vmatpush3.msra.mxu1 %v33857_v6  ;;  %v28753_v16 = vpop.f32.mrf.mxu0  ;;  %v28755_v58 = vpop.f32.mrf.mxu1  ;;  %v33397_v6 = vunpack.c.l.bf16 %v28734_v43 }
 0x1ee   :  { %33858 = vst [vmem:[#allocation211_spill] sm:$0xff] %v28753_v16  ;;  %33859 = vst [vmem:[#allocation212_spill] sm:$0xff] %v28755_v58  ;;  %23571 = vmatprep.subr.mxu0 %v25437_v0  ;;  %23582 = vmatprep.subr.mxu1 %v25437_v0  ;;  %v28770_v58 = vld [vmem:[%s32767_s3 + $0x248] sm:$0xff]  }
 0x1ef   :  { %23572 = vmatpush3.msra.mxu0 %v33391_v61  ;;  %23583 = vmatpush3.msra.mxu1 %v33392_v63  ;;  %v23139_v29 = vpop.f32.mrf.mxu0  ;;  %v23150_v39 = vpop.f32.mrf.mxu1  ;;  %33860 = vst [vmem:[#allocation213_spill] sm:$0xff] %v28770_v58  ;;  %v28775_v61 = vld [vmem:[%s32767_s3 + $0x258] sm:$0xff]   ;;  %v33862_v63 = vunpack.c.h.bf16 %v28734_v43 }
 0x1f0   :  { %23573 = vmatprep.subr.mxu0 %v25437_v0  ;;  %23584 = vmatprep.subr.mxu1 %v25437_v0  ;;  %33861 = vst [vmem:[#allocation214_spill] sm:$0xff] %v28775_v61  ;;  %v33863_v39 = vunpack.c.h.bf16 %v28739_v12  ;;  %v117_v29 = vld [vmem:[%s32768_s1 + $0x44] sm:$0x3]  ;;  %v33867_v12 = vunpack.c.h.bf16 %v28775_v61 }
 0x1f1   :  { %23574 = vmatpush3.msra.mxu0 %v33862_v63  ;;  %23577 = vmatprep.mubr.msk.f32.mxu0 %vm25438_vm0, %v25437_v0  ;;  %v33402_v63 = vunpack.c.h.bf16 %v28770_v58 }
 0x1f2   :  { %23585 = vmatpush3.msra.mxu1 %v33863_v39  ;;  %23575 = vmatprep.subr.mxu0 %v25437_v0  ;;  %v33403_v39 = vunpack.c.l.bf16 %v28770_v58  ;;  %v28870_v58 = vld [vmem:[%s32767_s3 + $0x260] sm:$0xff]  }
 0x1f3   :  { %23586 = vmatprep.subr.mxu1 %v25437_v0  ;;  %23576 = vmatpush3.msra.mxu0 %v33397_v6  ;;  %v28807_v6 = vld [vmem:[%s32767_s3 + $0x250] sm:$0xff]   ;;  %33875 = vst [vmem:[#allocation221_spill] sm:$0xff] %v28870_v58 }
 0x1f4   :  { %23587 = vmatpush3.msra.mxu1 %v33864_v44  ;;  %23588 = vmatprep.mubr.msk.f32.mxu1 %vm25438_vm0, %v25437_v0  ;;  %33866 = vst [vmem:[#allocation216_spill] sm:$0xff] %v28807_v6  ;;  %v33404_v44 = vunpack.c.l.bf16 %v28775_v61  ;;  %v33874_v61 = vunpack.c.l.bf16 %v28807_v6 }
 0x1f5   :  { %23578 = vmatmul.mubr.msk.f32.vlgmr.msra.gmra.mxu0 %vm1171_vm1, %v117_v29  ;;  %23589 = vmatmul.mubr.msk.f32.vlgmr.msra.gmra.mxu1 %vm1171_vm1, %v118_v53  ;;  %v120_v29 = vld [vmem:[%s32768_s1 + $0x4a] sm:$0x3] }
 0x1f6   :  { %23591 = vmatprep.subr.mxu0 %v25437_v0  ;;  %23602 = vmatprep.subr.mxu1 %v25437_v0 }
 0x1f7   :  { %23592 = vmatpush3.msra.mxu0 %v33402_v63  ;;  %23603 = vmatpush3.msra.mxu1 %v33867_v12  ;;  %v28821_v16 = vpop.f32.mrf.mxu0  ;;  %v28823_v53 = vpop.f32.mrf.mxu1  ;;  %v33409_v12 = vunpack.c.l.bf16 %v28802_v49 }
 0x1f8   :  { %33868 = vst [vmem:[#allocation217_spill] sm:$0xff] %v28821_v16  ;;  %33869 = vst [vmem:[#allocation218_spill] sm:$0xff] %v28823_v53  ;;  %23593 = vmatprep.subr.mxu0 %v25437_v0  ;;  %23604 = vmatprep.subr.mxu1 %v25437_v0  ;;  %v28838_v53 = vld [vmem:[%s32767_s3 + $0x268] sm:$0xff]  }
 0x1f9   :  { %23594 = vmatpush3.msra.mxu0 %v33403_v39  ;;  %23605 = vmatpush3.msra.mxu1 %v33404_v44  ;;  %v23161_v63 = vpop.f32.mrf.mxu0  ;;  %v23172_v43 = vpop.f32.mrf.mxu1  ;;  %33870 = vst [vmem:[#allocation219_spill] sm:$0xff] %v28838_v53  ;;  %v28843_v39 = vld [vmem:[%s32767_s3 + $0x278] sm:$0xff]   ;;  %v33872_v44 = vunpack.c.h.bf16 %v28802_v49 }
 0x1fa   :  { %23595 = vmatprep.subr.mxu0 %v25437_v0  ;;  %23606 = vmatprep.subr.mxu1 %v25437_v0  ;;  %33871 = vst [vmem:[#allocation220_spill] sm:$0xff] %v28843_v39  ;;  %v33873_v43 = vunpack.c.h.bf16 %v28807_v6  ;;  %v119_v63 = vld [vmem:[%s32768_s1 + $0x48] sm:$0x3]  ;;  %v33877_v6 = vunpack.c.h.bf16 %v28843_v39 }
 0x1fb   :  { %23596 = vmatpush3.msra.mxu0 %v33872_v44  ;;  %23599 = vmatprep.mubr.msk.f32.mxu0 %vm25438_vm0, %v25437_v0  ;;  %v33414_v44 = vunpack.c.h.bf16 %v28838_v53 }
 0x1fc   :  { %23607 = vmatpush3.msra.mxu1 %v33873_v43  ;;  %23597 = vmatprep.subr.mxu0 %v25437_v0  ;;  %v33415_v43 = vunpack.c.l.bf16 %v28838_v53  ;;  %v28938_v53 = vld [vmem:[%s32767_s3 + $0x280] sm:$0xff]  }
 0x1fd   :  { %23608 = vmatprep.subr.mxu1 %v25437_v0  ;;  %23598 = vmatpush3.msra.mxu0 %v33409_v12  ;;  %v28875_v12 = vld [vmem:[%s32767_s3 + $0x270] sm:$0xff]   ;;  %33883 = vst [vmem:[#allocation225_spill] sm:$0xff] %v28938_v53 }
 0x1fe   :  { %23609 = vmatpush3.msra.mxu1 %v33874_v61  ;;  %23610 = vmatprep.mubr.msk.f32.mxu1 %vm25438_vm0, %v25437_v0  ;;  %33876 = vst [vmem:[#allocation222_spill] sm:$0xff] %v28875_v12  ;;  %v33416_v61 = vunpack.c.l.bf16 %v28843_v39  ;;  %v33882_v39 = vunpack.c.l.bf16 %v28875_v12 }
 0x1ff   :  { %23600 = vmatmul.mubr.msk.f32.vlgmr.msra.gmra.mxu0 %vm1171_vm1, %v119_v63  ;;  %23611 = vmatmul.mubr.msk.f32.vlgmr.msra.gmra.mxu1 %vm1171_vm1, %v120_v29  ;;  %v122_v63 = vld [vmem:[%s32768_s1 + $0x4e] sm:$0x3] }
 0x200   :  { %23613 = vmatprep.subr.mxu0 %v25437_v0  ;;  %23624 = vmatprep.subr.mxu1 %v25437_v0 }
 0x201   :  { %23614 = vmatpush3.msra.mxu0 %v33414_v44  ;;  %23625 = vmatpush3.msra.mxu1 %v33877_v6  ;;  %v28889_v16 = vpop.f32.mrf.mxu0  ;;  %v28891_v29 = vpop.f32.mrf.mxu1  ;;  %v33421_v6 = vunpack.c.l.bf16 %v28870_v58 }
 0x202   :  { %33878 = vst [vmem:[#allocation223_spill] sm:$0xff] %v28889_v16  ;;  %33879 = vst [vmem:[#allocation224_spill] sm:$0xff] %v28891_v29  ;;  %23615 = vmatprep.subr.mxu0 %v25437_v0  ;;  %23626 = vmatprep.subr.mxu1 %v25437_v0  ;;  %v28906_v29 = vld [vmem:[%s32767_s3 + $0x288] sm:$0xff]  }
 0x203   :  { %23616 = vmatpush3.msra.mxu0 %v33415_v43  ;;  %23627 = vmatpush3.msra.mxu1 %v33416_v61  ;;  %v23183_v44 = vpop.f32.mrf.mxu0  ;;  %v23194_v49 = vpop.f32.mrf.mxu1  ;;  %v28911_v43 = vld [vmem:[%s32767_s3 + $0x298] sm:$0xff]   ;;  %v33880_v61 = vunpack.c.h.bf16 %v28870_v58  ;;  %v33430_v58 = vunpack.c.l.bf16 %v28938_v53 }
 0x204   :  { %23617 = vmatprep.subr.mxu0 %v25437_v0  ;;  %23628 = vmatprep.subr.mxu1 %v25437_v0  ;;  %v33881_v49 = vunpack.c.h.bf16 %v28875_v12  ;;  %v121_v44 = vld [vmem:[%s32768_s1 + $0x4c] sm:$0x3]  ;;  %v33885_v12 = vunpack.c.h.bf16 %v28911_v43 }
 0x205   :  { %23618 = vmatpush3.msra.mxu0 %v33880_v61  ;;  %23621 = vmatprep.mubr.msk.f32.mxu0 %vm25438_vm0, %v25437_v0  ;;  %v33426_v61 = vunpack.c.h.bf16 %v28906_v29 }
 0x206   :  { %23629 = vmatpush3.msra.mxu1 %v33881_v49  ;;  %23619 = vmatprep.subr.mxu0 %v25437_v0 }
 0x207   :  { %23630 = vmatprep.subr.mxu1 %v25437_v0  ;;  %23620 = vmatpush3.msra.mxu0 %v33421_v6  ;;  %v28943_v6 = vld [vmem:[%s32767_s3 + $0x290] sm:$0xff]  }
 0x208   :  { %23631 = vmatpush3.msra.mxu1 %v33882_v39  ;;  %23632 = vmatprep.mubr.msk.f32.mxu1 %vm25438_vm0, %v25437_v0  ;;  %33884 = vst [vmem:[#allocation226_spill] sm:$0xff] %v28943_v6  ;;  %v33429_v56 = vunpack.c.l.bf16 %v28943_v6 }
 0x209   :  { %23622 = vmatmul.mubr.msk.f32.vlgmr.msra.gmra.mxu0 %vm1171_vm1, %v121_v44  ;;  %23633 = vmatmul.mubr.msk.f32.vlgmr.msra.gmra.mxu1 %vm1171_vm1, %v122_v63 }
 0x20a   :  { %23635 = vmatprep.subr.mxu0 %v25437_v0  ;;  %23646 = vmatprep.subr.mxu1 %v25437_v0 }
 0x20b   :  { %23636 = vmatpush3.msra.mxu0 %v33426_v61  ;;  %23647 = vmatpush3.msra.mxu1 %v33885_v12  ;;  %v5913_v16 = vpop.f32.mrf.mxu0  ;;  %v5986_v63 = vpop.f32.mrf.mxu1  ;;  %v33886_v61 = vunpack.c.l.bf16 %v28906_v29  ;;  %v33887_v12 = vunpack.c.l.bf16 %v28911_v43 }
 0x20c   :  { %23637 = vmatprep.subr.mxu0 %v25437_v0  ;;  %23648 = vmatprep.subr.mxu1 %v25437_v0  ;;  %v10516_v39 = vsub.f32 %v26781_v22, %v5913_v16  ;;  %v10517_v49 = vsub.f32 %v26783_v9, %v5986_v63  ;;  %v28972_v22 = vld [vmem:[%s32767_s3 + $0x2a8] sm:$0xff]   ;;  %v28977_v9 = vld [vmem:[%s32767_s3 + $0x2b8] sm:$0xff]   ;;  %v33889_v16 = vunpack.c.h.bf16 %v28943_v6  ;;  %v29012_v63 = vld [vmem:[%s32767_s3 + $0x2a0] sm:$0xff]  }
 0x20d   :  { %23638 = vmatpush3.msra.mxu0 %v33886_v61  ;;  %23649 = vmatpush3.msra.mxu1 %v33887_v12  ;;  %v23205_v44 = vpop.f32.mrf.mxu0  ;;  %v23216_v62 = vpop.f32.mrf.mxu1  ;;  %v123_v61 = vld [vmem:[%s32768_s1 + $0x50] sm:$0x3]  ;;  %33890 = vst [vmem:[#allocation227_spill] sm:$0xff] %v29012_v63  ;;  %v33892_v6 = vunpack.c.l.bf16 %v28972_v22 }
 0x20e   :  { %23639 = vmatprep.subr.mxu0 %v25437_v0  ;;  %23650 = vmatprep.subr.mxu1 %v25437_v0  ;;  %10581 = vst.msk [vmem:[%s32769_s4] sm:$0x3] %vm10580_vm2, %v10516_v39  ;;  %10582 = vst.msk [vmem:[%s32769_s4 + $0x2] sm:$0x3] %vm10580_vm2, %v10517_v49  ;;  %v33888_v62 = vunpack.c.h.bf16 %v28938_v53  ;;  %v124_v39 = vld [vmem:[%s32768_s1 + $0x52] sm:$0x3]  ;;  %v33433_v49 = vunpack.c.h.bf16 %v28972_v22  ;;  %v33434_v44 = vunpack.c.h.bf16 %v28977_v9 }
 0x20f   :  { %23651 = vmatpush3.msra.mxu1 %v33889_v16  ;;  %23643 = vmatprep.mubr.msk.f32.mxu0 %vm25438_vm0, %v25437_v0  ;;  %v29017_v12 = vld [vmem:[%s32767_s3 + $0x2b0] sm:$0xff]  }
 0x210   :  { %23640 = vmatpush3.msra.mxu0 %v33888_v62  ;;  %23652 = vmatprep.subr.mxu1 %v25437_v0  ;;  %33891 = vst [vmem:[#allocation228_spill] sm:$0xff] %v29017_v12  ;;  %v33437_v53 = vunpack.c.l.bf16 %v29017_v12 }
 0x211   :  { %23641 = vmatprep.subr.mxu0 %v25437_v0  ;;  %23653 = vmatpush3.msra.mxu1 %v33429_v56 }
 0x212   :  { %23642 = vmatpush3.msra.mxu0 %v33430_v58  ;;  %23654 = vmatprep.mubr.msk.f32.mxu1 %vm25438_vm0, %v25437_v0 }
 0x213   :  { %23644 = vmatmul.mubr.msk.f32.vlgmr.msra.gmra.mxu0 %vm1171_vm1, %v123_v61  ;;  %23655 = vmatmul.mubr.msk.f32.vlgmr.msra.gmra.mxu1 %vm1171_vm1, %v124_v39 }
 0x214   :  { %23657 = vmatprep.subr.mxu0 %v25437_v0  ;;  %23668 = vmatprep.subr.mxu1 %v25437_v0 }
 0x215   :  { %23658 = vmatpush3.msra.mxu0 %v33433_v49  ;;  %23669 = vmatpush3.msra.mxu1 %v33434_v44  ;;  %v6059_v58 = vpop.f32.mrf.mxu0  ;;  %v6132_v39 = vpop.f32.mrf.mxu1  ;;  %v33893_v49 = vunpack.c.l.bf16 %v28977_v9  ;;  %v33438_v44 = vunpack.c.l.bf16 %v29012_v63 }
 0x216   :  { %23659 = vmatprep.subr.mxu0 %v25437_v0  ;;  %23670 = vmatprep.subr.mxu1 %v25437_v0  ;;  %v10518_v16 = vsub.f32 %v26849_v18, %v6059_v58  ;;  %v10519_v62 = vsub.f32 %v26851_v31, %v6132_v39  ;;  %v29046_v18 = vld [vmem:[%s32767_s3 + $0x2c8] sm:$0xff]   ;;  %v29051_v31 = vld [vmem:[%s32767_s3 + $0x2d8] sm:$0xff]   ;;  %v33895_v58 = vunpack.c.h.bf16 %v29017_v12  ;;  %v29091_v39 = vld [vmem:[%s32767_s3 + $0x2d0] sm:$0xff]  }
 0x217   :  { %23660 = vmatpush3.msra.mxu0 %v33892_v6  ;;  %23671 = vmatpush3.msra.mxu1 %v33893_v49  ;;  %v23227_v56 = vpop.f32.mrf.mxu0  ;;  %v23238_v61 = vpop.f32.mrf.mxu1  ;;  %v125_v6 = vld [vmem:[%s32768_s1 + $0x54] sm:$0x3]  ;;  %v126_v49 = vld [vmem:[%s32768_s1 + $0x56] sm:$0x3]  ;;  %33897 = vst [vmem:[#allocation230_spill] sm:$0xff] %v29091_v39  ;;  %v33898_v12 = vunpack.c.l.bf16 %v29046_v18 }
 0x218   :  { %23661 = vmatprep.subr.mxu0 %v25437_v0  ;;  %23672 = vmatprep.subr.mxu1 %v25437_v0  ;;  %10583 = vst.msk [vmem:[%s32769_s4 + $0x4] sm:$0x3] %vm10580_vm2, %v10518_v16  ;;  %10584 = vst.msk [vmem:[%s32769_s4 + $0x6] sm:$0x3] %vm10580_vm2, %v10519_v62  ;;  %v33894_v56 = vunpack.c.h.bf16 %v29012_v63  ;;  %v33441_v62 = vunpack.c.h.bf16 %v29046_v18  ;;  %v33442_v16 = vunpack.c.h.bf16 %v29051_v31  ;;  %v29086_v61 = vld [vmem:[%s32767_s3 + $0x2c0] sm:$0xff]   ;;  %v33445_v63 = vunpack.c.l.bf16 %v29091_v39 }
 0x219   :  { %23673 = vmatpush3.msra.mxu1 %v33895_v58  ;;  %23665 = vmatprep.mubr.msk.f32.mxu0 %vm25438_vm0, %v25437_v0  ;;  %33896 = vst [vmem:[#allocation229_spill] sm:$0xff] %v29086_v61 }
 0x21a   :  { %23662 = vmatpush3.msra.mxu0 %v33894_v56  ;;  %23674 = vmatprep.subr.mxu1 %v25437_v0 }
 0x21b   :  { %23663 = vmatprep.subr.mxu0 %v25437_v0  ;;  %23675 = vmatpush3.msra.mxu1 %v33437_v53 }
 0x21c   :  { %23664 = vmatpush3.msra.mxu0 %v33438_v44  ;;  %23676 = vmatprep.mubr.msk.f32.mxu1 %vm25438_vm0, %v25437_v0 }
 0x21d   :  { %23666 = vmatmul.mubr.msk.f32.vlgmr.msra.gmra.mxu0 %vm1171_vm1, %v125_v6  ;;  %23677 = vmatmul.mubr.msk.f32.vlgmr.msra.gmra.mxu1 %vm1171_vm1, %v126_v49 }
 0x21e   :  { %23679 = vmatprep.subr.mxu0 %v25437_v0  ;;  %23690 = vmatprep.subr.mxu1 %v25437_v0 }
 0x21f   :  { %23680 = vmatpush3.msra.mxu0 %v33441_v62  ;;  %23691 = vmatpush3.msra.mxu1 %v33442_v16  ;;  %v6205_v44 = vpop.f32.mrf.mxu0  ;;  %v6278_v49 = vpop.f32.mrf.mxu1  ;;  %v33899_v62 = vunpack.c.l.bf16 %v29051_v31  ;;  %v33446_v16 = vunpack.c.l.bf16 %v29086_v61 }
 0x220   :  { %23681 = vmatprep.subr.mxu0 %v25437_v0  ;;  %23692 = vmatprep.subr.mxu1 %v25437_v0  ;;  %v10520_v58 = vsub.f32 %v26917_v26, %v6205_v44  ;;  %v10521_v56 = vsub.f32 %v26919_v37, %v6278_v49  ;;  %v29120_v26 = vld [vmem:[%s32767_s3 + $0x2e8] sm:$0xff]   ;;  %v29125_v37 = vld [vmem:[%s32767_s3 + $0x2f8] sm:$0xff]   ;;  %v33901_v44 = vunpack.c.h.bf16 %v29091_v39  ;;  %v29165_v49 = vld [vmem:[%s32767_s3 + $0x2f0] sm:$0xff]  }
 0x221   :  { %23682 = vmatpush3.msra.mxu0 %v33898_v12  ;;  %23693 = vmatpush3.msra.mxu1 %v33899_v62  ;;  %v23249_v53 = vpop.f32.mrf.mxu0  ;;  %v23260_v6 = vpop.f32.mrf.mxu1  ;;  %v127_v12 = vld [vmem:[%s32768_s1 + $0x58] sm:$0x3]  ;;  %v128_v62 = vld [vmem:[%s32768_s1 + $0x5a] sm:$0x3]  ;;  %33903 = vst [vmem:[#allocation232_spill] sm:$0xff] %v29165_v49  ;;  %v33904_v39 = vunpack.c.l.bf16 %v29120_v26 }
 0x222   :  { %23683 = vmatprep.subr.mxu0 %v25437_v0  ;;  %23694 = vmatprep.subr.mxu1 %v25437_v0  ;;  %10585 = vst.msk [vmem:[%s32769_s4 + $0x8] sm:$0x3] %vm10580_vm2, %v10520_v58  ;;  %10586 = vst.msk [vmem:[%s32769_s4 + $0xa] sm:$0x3] %vm10580_vm2, %v10521_v56  ;;  %v33900_v53 = vunpack.c.h.bf16 %v29086_v61  ;;  %v33449_v56 = vunpack.c.h.bf16 %v29120_v26  ;;  %v33450_v58 = vunpack.c.h.bf16 %v29125_v37  ;;  %v29160_v6 = vld [vmem:[%s32767_s3 + $0x2e0] sm:$0xff]   ;;  %v33453_v61 = vunpack.c.l.bf16 %v29165_v49 }
 0x223   :  { %23695 = vmatpush3.msra.mxu1 %v33901_v44  ;;  %23687 = vmatprep.mubr.msk.f32.mxu0 %vm25438_vm0, %v25437_v0  ;;  %33902 = vst [vmem:[#allocation231_spill] sm:$0xff] %v29160_v6 }
 0x224   :  { %23684 = vmatpush3.msra.mxu0 %v33900_v53  ;;  %23696 = vmatprep.subr.mxu1 %v25437_v0 }
 0x225   :  { %23685 = vmatprep.subr.mxu0 %v25437_v0  ;;  %23697 = vmatpush3.msra.mxu1 %v33445_v63 }
 0x226   :  { %23686 = vmatpush3.msra.mxu0 %v33446_v16  ;;  %23698 = vmatprep.mubr.msk.f32.mxu1 %vm25438_vm0, %v25437_v0 }
 0x227   :  { %23688 = vmatmul.mubr.msk.f32.vlgmr.msra.gmra.mxu0 %vm1171_vm1, %v127_v12  ;;  %23699 = vmatmul.mubr.msk.f32.vlgmr.msra.gmra.mxu1 %vm1171_vm1, %v128_v62 }
 0x228   :  { %23701 = vmatprep.subr.mxu0 %v25437_v0  ;;  %23712 = vmatprep.subr.mxu1 %v25437_v0 }
 0x229   :  { %23702 = vmatpush3.msra.mxu0 %v33449_v56  ;;  %23713 = vmatpush3.msra.mxu1 %v33450_v58  ;;  %v6351_v16 = vpop.f32.mrf.mxu0  ;;  %v6424_v62 = vpop.f32.mrf.mxu1  ;;  %v33905_v56 = vunpack.c.l.bf16 %v29125_v37  ;;  %v33454_v58 = vunpack.c.l.bf16 %v29160_v6 }
 0x22a   :  { %23703 = vmatprep.subr.mxu0 %v25437_v0  ;;  %23714 = vmatprep.subr.mxu1 %v25437_v0  ;;  %v10522_v44 = vsub.f32 %v26985_v24, %v6351_v16  ;;  %v10523_v53 = vsub.f32 %v26987_v23, %v6424_v62  ;;  %v29194_v24 = vld [vmem:[%s32767_s3 + $0x308] sm:$0xff]   ;;  %v29199_v23 = vld [vmem:[%s32767_s3 + $0x318] sm:$0xff]   ;;  %v33907_v16 = vunpack.c.h.bf16 %v29165_v49  ;;  %v29239_v62 = vld [vmem:[%s32767_s3 + $0x310] sm:$0xff]  }
 0x22b   :  { %23704 = vmatpush3.msra.mxu0 %v33904_v39  ;;  %23715 = vmatpush3.msra.mxu1 %v33905_v56  ;;  %v23271_v63 = vpop.f32.mrf.mxu0  ;;  %v23282_v12 = vpop.f32.mrf.mxu1  ;;  %v129_v39 = vld [vmem:[%s32768_s1 + $0x5c] sm:$0x3]  ;;  %v130_v56 = vld [vmem:[%s32768_s1 + $0x5e] sm:$0x3]  ;;  %33909 = vst [vmem:[#allocation234_spill] sm:$0xff] %v29239_v62  ;;  %v33910_v49 = vunpack.c.l.bf16 %v29194_v24 }
 0x22c   :  { %23705 = vmatprep.subr.mxu0 %v25437_v0  ;;  %23716 = vmatprep.subr.mxu1 %v25437_v0  ;;  %10587 = vst.msk [vmem:[%s32769_s4 + $0xc] sm:$0x3] %vm10580_vm2, %v10522_v44  ;;  %10588 = vst.msk [vmem:[%s32769_s4 + $0xe] sm:$0x3] %vm10580_vm2, %v10523_v53  ;;  %v33906_v63 = vunpack.c.h.bf16 %v29160_v6  ;;  %v33457_v53 = vunpack.c.h.bf16 %v29194_v24  ;;  %v33458_v44 = vunpack.c.h.bf16 %v29199_v23  ;;  %v29234_v12 = vld [vmem:[%s32767_s3 + $0x300] sm:$0xff]   ;;  %v33461_v6 = vunpack.c.l.bf16 %v29239_v62 }
 0x22d   :  { %23717 = vmatpush3.msra.mxu1 %v33907_v16  ;;  %23709 = vmatprep.mubr.msk.f32.mxu0 %vm25438_vm0, %v25437_v0  ;;  %33908 = vst [vmem:[#allocation233_spill] sm:$0xff] %v29234_v12 }
 0x22e   :  { %23706 = vmatpush3.msra.mxu0 %v33906_v63  ;;  %23718 = vmatprep.subr.mxu1 %v25437_v0 }
 0x22f   :  { %23707 = vmatprep.subr.mxu0 %v25437_v0  ;;  %23719 = vmatpush3.msra.mxu1 %v33453_v61 }
 0x230   :  { %23708 = vmatpush3.msra.mxu0 %v33454_v58  ;;  %23720 = vmatprep.mubr.msk.f32.mxu1 %vm25438_vm0, %v25437_v0 }
 0x231   :  { %23710 = vmatmul.mubr.msk.f32.vlgmr.msra.gmra.mxu0 %vm1171_vm1, %v129_v39  ;;  %23721 = vmatmul.mubr.msk.f32.vlgmr.msra.gmra.mxu1 %vm1171_vm1, %v130_v56 }
 0x232   :  { %23723 = vmatprep.subr.mxu0 %v25437_v0  ;;  %23734 = vmatprep.subr.mxu1 %v25437_v0 }
 0x233   :  { %23724 = vmatpush3.msra.mxu0 %v33457_v53  ;;  %23735 = vmatpush3.msra.mxu1 %v33458_v44  ;;  %v6497_v58 = vpop.f32.mrf.mxu0  ;;  %v6570_v56 = vpop.f32.mrf.mxu1  ;;  %v33911_v53 = vunpack.c.l.bf16 %v29199_v23  ;;  %v33462_v44 = vunpack.c.l.bf16 %v29234_v12 }
 0x234   :  { %23725 = vmatprep.subr.mxu0 %v25437_v0  ;;  %23736 = vmatprep.subr.mxu1 %v25437_v0  ;;  %v10524_v16 = vsub.f32 %v27053_v36, %v6497_v58  ;;  %v10525_v63 = vsub.f32 %v27055_v17, %v6570_v56  ;;  %v29268_v36 = vld [vmem:[%s32767_s3 + $0x328] sm:$0xff]   ;;  %v29273_v17 = vld [vmem:[%s32767_s3 + $0x338] sm:$0xff]   ;;  %v33913_v58 = vunpack.c.h.bf16 %v29239_v62  ;;  %v29313_v56 = vld [vmem:[%s32767_s3 + $0x330] sm:$0xff]  }
 0x235   :  { %23726 = vmatpush3.msra.mxu0 %v33910_v49  ;;  %23737 = vmatpush3.msra.mxu1 %v33911_v53  ;;  %v23293_v61 = vpop.f32.mrf.mxu0  ;;  %v23304_v39 = vpop.f32.mrf.mxu1  ;;  %v131_v49 = vld [vmem:[%s32768_s1 + $0x60] sm:$0x3]  ;;  %v132_v53 = vld [vmem:[%s32768_s1 + $0x62] sm:$0x3]  ;;  %33915 = vst [vmem:[#allocation236_spill] sm:$0xff] %v29313_v56  ;;  %v33916_v62 = vunpack.c.l.bf16 %v29268_v36 }
 0x236   :  { %23727 = vmatprep.subr.mxu0 %v25437_v0  ;;  %23738 = vmatprep.subr.mxu1 %v25437_v0  ;;  %10589 = vst.msk [vmem:[%s32769_s4 + $0x10] sm:$0x3] %vm10580_vm2, %v10524_v16  ;;  %10590 = vst.msk [vmem:[%s32769_s4 + $0x12] sm:$0x3] %vm10580_vm2, %v10525_v63  ;;  %v33912_v61 = vunpack.c.h.bf16 %v29234_v12  ;;  %v33465_v63 = vunpack.c.h.bf16 %v29268_v36  ;;  %v33466_v16 = vunpack.c.h.bf16 %v29273_v17  ;;  %v29308_v39 = vld [vmem:[%s32767_s3 + $0x320] sm:$0xff]   ;;  %v33469_v12 = vunpack.c.l.bf16 %v29313_v56 }
 0x237   :  { %23739 = vmatpush3.msra.mxu1 %v33913_v58  ;;  %23731 = vmatprep.mubr.msk.f32.mxu0 %vm25438_vm0, %v25437_v0  ;;  %33914 = vst [vmem:[#allocation235_spill] sm:$0xff] %v29308_v39 }
 0x238   :  { %23728 = vmatpush3.msra.mxu0 %v33912_v61  ;;  %23740 = vmatprep.subr.mxu1 %v25437_v0 }
 0x239   :  { %23729 = vmatprep.subr.mxu0 %v25437_v0  ;;  %23741 = vmatpush3.msra.mxu1 %v33461_v6 }
 0x23a   :  { %23730 = vmatpush3.msra.mxu0 %v33462_v44  ;;  %23742 = vmatprep.mubr.msk.f32.mxu1 %vm25438_vm0, %v25437_v0 }
 0x23b   :  { %23732 = vmatmul.mubr.msk.f32.vlgmr.msra.gmra.mxu0 %vm1171_vm1, %v131_v49  ;;  %23743 = vmatmul.mubr.msk.f32.vlgmr.msra.gmra.mxu1 %vm1171_vm1, %v132_v53 }
 0x23c   :  { %23745 = vmatprep.subr.mxu0 %v25437_v0  ;;  %23756 = vmatprep.subr.mxu1 %v25437_v0 }
 0x23d   :  { %23746 = vmatpush3.msra.mxu0 %v33465_v63  ;;  %23757 = vmatpush3.msra.mxu1 %v33466_v16  ;;  %v6643_v44 = vpop.f32.mrf.mxu0  ;;  %v6716_v53 = vpop.f32.mrf.mxu1  ;;  %v33917_v63 = vunpack.c.l.bf16 %v29273_v17  ;;  %v33470_v16 = vunpack.c.l.bf16 %v29308_v39 }
 0x23e   :  { %23747 = vmatprep.subr.mxu0 %v25437_v0  ;;  %23758 = vmatprep.subr.mxu1 %v25437_v0  ;;  %v10526_v58 = vsub.f32 %v27121_v32, %v6643_v44  ;;  %v10527_v61 = vsub.f32 %v27123_v10, %v6716_v53  ;;  %v29342_v32 = vld [vmem:[%s32767_s3 + $0x348] sm:$0xff]   ;;  %v29347_v10 = vld [vmem:[%s32767_s3 + $0x358] sm:$0xff]   ;;  %v33919_v44 = vunpack.c.h.bf16 %v29313_v56  ;;  %v29387_v53 = vld [vmem:[%s32767_s3 + $0x350] sm:$0xff]  }
 0x23f   :  { %23748 = vmatpush3.msra.mxu0 %v33916_v62  ;;  %23759 = vmatpush3.msra.mxu1 %v33917_v63  ;;  %v23315_v6 = vpop.f32.mrf.mxu0  ;;  %v23326_v49 = vpop.f32.mrf.mxu1  ;;  %v133_v62 = vld [vmem:[%s32768_s1 + $0x64] sm:$0x3]  ;;  %v134_v63 = vld [vmem:[%s32768_s1 + $0x66] sm:$0x3]  ;;  %33921 = vst [vmem:[#allocation238_spill] sm:$0xff] %v29387_v53  ;;  %v33922_v56 = vunpack.c.l.bf16 %v29342_v32 }
 0x240   :  { %23749 = vmatprep.subr.mxu0 %v25437_v0  ;;  %23760 = vmatprep.subr.mxu1 %v25437_v0  ;;  %10591 = vst.msk [vmem:[%s32769_s4 + $0x14] sm:$0x3] %vm10580_vm2, %v10526_v58  ;;  %10592 = vst.msk [vmem:[%s32769_s4 + $0x16] sm:$0x3] %vm10580_vm2, %v10527_v61  ;;  %v33918_v6 = vunpack.c.h.bf16 %v29308_v39  ;;  %v33473_v61 = vunpack.c.h.bf16 %v29342_v32  ;;  %v33474_v58 = vunpack.c.h.bf16 %v29347_v10  ;;  %v29382_v49 = vld [vmem:[%s32767_s3 + $0x340] sm:$0xff]   ;;  %v33477_v39 = vunpack.c.l.bf16 %v29387_v53 }
 0x241   :  { %23761 = vmatpush3.msra.mxu1 %v33919_v44  ;;  %23753 = vmatprep.mubr.msk.f32.mxu0 %vm25438_vm0, %v25437_v0  ;;  %33920 = vst [vmem:[#allocation237_spill] sm:$0xff] %v29382_v49 }
 0x242   :  { %23750 = vmatpush3.msra.mxu0 %v33918_v6  ;;  %23762 = vmatprep.subr.mxu1 %v25437_v0 }
 0x243   :  { %23751 = vmatprep.subr.mxu0 %v25437_v0  ;;  %23763 = vmatpush3.msra.mxu1 %v33469_v12 }
 0x244   :  { %23752 = vmatpush3.msra.mxu0 %v33470_v16  ;;  %23764 = vmatprep.mubr.msk.f32.mxu1 %vm25438_vm0, %v25437_v0 }
 0x245   :  { %23754 = vmatmul.mubr.msk.f32.vlgmr.msra.gmra.mxu0 %vm1171_vm1, %v133_v62  ;;  %23765 = vmatmul.mubr.msk.f32.vlgmr.msra.gmra.mxu1 %vm1171_vm1, %v134_v63 }
 0x246   :  { %23767 = vmatprep.subr.mxu0 %v25437_v0  ;;  %23778 = vmatprep.subr.mxu1 %v25437_v0 }
 0x247   :  { %23768 = vmatpush3.msra.mxu0 %v33473_v61  ;;  %23779 = vmatpush3.msra.mxu1 %v33474_v58  ;;  %v6789_v16 = vpop.f32.mrf.mxu0  ;;  %v6862_v63 = vpop.f32.mrf.mxu1  ;;  %v33923_v61 = vunpack.c.l.bf16 %v29347_v10  ;;  %v33478_v58 = vunpack.c.l.bf16 %v29382_v49 }
 0x248   :  { %23769 = vmatprep.subr.mxu0 %v25437_v0  ;;  %23780 = vmatprep.subr.mxu1 %v25437_v0  ;;  %v10528_v44 = vsub.f32 %v27189_v40, %v6789_v16  ;;  %v10529_v6 = vsub.f32 %v27191_v7, %v6862_v63  ;;  %v29416_v40 = vld [vmem:[%s32767_s3 + $0x368] sm:$0xff]   ;;  %v29421_v7 = vld [vmem:[%s32767_s3 + $0x378] sm:$0xff]   ;;  %v33925_v16 = vunpack.c.h.bf16 %v29387_v53  ;;  %v29461_v63 = vld [vmem:[%s32767_s3 + $0x370] sm:$0xff]  }
 0x249   :  { %23770 = vmatpush3.msra.mxu0 %v33922_v56  ;;  %23781 = vmatpush3.msra.mxu1 %v33923_v61  ;;  %v23337_v12 = vpop.f32.mrf.mxu0  ;;  %v23348_v62 = vpop.f32.mrf.mxu1  ;;  %v135_v56 = vld [vmem:[%s32768_s1 + $0x68] sm:$0x3]  ;;  %v136_v61 = vld [vmem:[%s32768_s1 + $0x6a] sm:$0x3]  ;;  %33927 = vst [vmem:[#allocation240_spill] sm:$0xff] %v29461_v63  ;;  %v33928_v53 = vunpack.c.l.bf16 %v29416_v40 }
 0x24a   :  { %23771 = vmatprep.subr.mxu0 %v25437_v0  ;;  %23782 = vmatprep.subr.mxu1 %v25437_v0  ;;  %10593 = vst.msk [vmem:[%s32769_s4 + $0x18] sm:$0x3] %vm10580_vm2, %v10528_v44  ;;  %10594 = vst.msk [vmem:[%s32769_s4 + $0x1a] sm:$0x3] %vm10580_vm2, %v10529_v6  ;;  %v33924_v12 = vunpack.c.h.bf16 %v29382_v49  ;;  %v33481_v6 = vunpack.c.h.bf16 %v29416_v40  ;;  %v33482_v44 = vunpack.c.h.bf16 %v29421_v7  ;;  %v29456_v62 = vld [vmem:[%s32767_s3 + $0x360] sm:$0xff]   ;;  %v33485_v49 = vunpack.c.l.bf16 %v29461_v63 }
 0x24b   :  { %23783 = vmatpush3.msra.mxu1 %v33925_v16  ;;  %23775 = vmatprep.mubr.msk.f32.mxu0 %vm25438_vm0, %v25437_v0  ;;  %33926 = vst [vmem:[#allocation239_spill] sm:$0xff] %v29456_v62 }
 0x24c   :  { %23772 = vmatpush3.msra.mxu0 %v33924_v12  ;;  %23784 = vmatprep.subr.mxu1 %v25437_v0 }
 0x24d   :  { %23773 = vmatprep.subr.mxu0 %v25437_v0  ;;  %23785 = vmatpush3.msra.mxu1 %v33477_v39 }
 0x24e   :  { %23774 = vmatpush3.msra.mxu0 %v33478_v58  ;;  %23786 = vmatprep.mubr.msk.f32.mxu1 %vm25438_vm0, %v25437_v0 }
 0x24f   :  { %23776 = vmatmul.mubr.msk.f32.vlgmr.msra.gmra.mxu0 %vm1171_vm1, %v135_v56  ;;  %23787 = vmatmul.mubr.msk.f32.vlgmr.msra.gmra.mxu1 %vm1171_vm1, %v136_v61 }
 0x250   :  { %23789 = vmatprep.subr.mxu0 %v25437_v0  ;;  %23800 = vmatprep.subr.mxu1 %v25437_v0 }
 0x251   :  { %23790 = vmatpush3.msra.mxu0 %v33481_v6  ;;  %23801 = vmatpush3.msra.mxu1 %v33482_v44  ;;  %v6935_v58 = vpop.f32.mrf.mxu0  ;;  %v7008_v61 = vpop.f32.mrf.mxu1  ;;  %v33929_v6 = vunpack.c.l.bf16 %v29421_v7  ;;  %v33486_v44 = vunpack.c.l.bf16 %v29456_v62 }
 0x252   :  { %23791 = vmatprep.subr.mxu0 %v25437_v0  ;;  %23802 = vmatprep.subr.mxu1 %v25437_v0  ;;  %v10530_v16 = vsub.f32 %v27257_v38, %v6935_v58  ;;  %v10531_v12 = vsub.f32 %v27259_v5, %v7008_v61  ;;  %v29490_v38 = vld [vmem:[%s32767_s3 + $0x388] sm:$0xff]   ;;  %v29495_v5 = vld [vmem:[%s32767_s3 + $0x398] sm:$0xff]   ;;  %v33931_v58 = vunpack.c.h.bf16 %v29461_v63  ;;  %v29535_v61 = vld [vmem:[%s32767_s3 + $0x390] sm:$0xff]  }
 0x253   :  { %23792 = vmatpush3.msra.mxu0 %v33928_v53  ;;  %23803 = vmatpush3.msra.mxu1 %v33929_v6  ;;  %v23359_v39 = vpop.f32.mrf.mxu0  ;;  %v23370_v56 = vpop.f32.mrf.mxu1  ;;  %v137_v53 = vld [vmem:[%s32768_s1 + $0x6c] sm:$0x3]  ;;  %v138_v6 = vld [vmem:[%s32768_s1 + $0x6e] sm:$0x3]  ;;  %33933 = vst [vmem:[#allocation242_spill] sm:$0xff] %v29535_v61  ;;  %v33934_v63 = vunpack.c.l.bf16 %v29490_v38 }
 0x254   :  { %23793 = vmatprep.subr.mxu0 %v25437_v0  ;;  %23804 = vmatprep.subr.mxu1 %v25437_v0  ;;  %10595 = vst.msk [vmem:[%s32769_s4 + $0x1c] sm:$0x3] %vm10580_vm2, %v10530_v16  ;;  %10596 = vst.msk [vmem:[%s32769_s4 + $0x1e] sm:$0x3] %vm10580_vm2, %v10531_v12  ;;  %v33930_v39 = vunpack.c.h.bf16 %v29456_v62  ;;  %v33489_v12 = vunpack.c.h.bf16 %v29490_v38  ;;  %v33490_v16 = vunpack.c.h.bf16 %v29495_v5  ;;  %v29530_v56 = vld [vmem:[%s32767_s3 + $0x380] sm:$0xff]   ;;  %v33493_v62 = vunpack.c.l.bf16 %v29535_v61 }
 0x255   :  { %23805 = vmatpush3.msra.mxu1 %v33931_v58  ;;  %23797 = vmatprep.mubr.msk.f32.mxu0 %vm25438_vm0, %v25437_v0  ;;  %33932 = vst [vmem:[#allocation241_spill] sm:$0xff] %v29530_v56 }
 0x256   :  { %23794 = vmatpush3.msra.mxu0 %v33930_v39  ;;  %23806 = vmatprep.subr.mxu1 %v25437_v0 }
 0x257   :  { %23795 = vmatprep.subr.mxu0 %v25437_v0  ;;  %23807 = vmatpush3.msra.mxu1 %v33485_v49 }
 0x258   :  { %23796 = vmatpush3.msra.mxu0 %v33486_v44  ;;  %23808 = vmatprep.mubr.msk.f32.mxu1 %vm25438_vm0, %v25437_v0 }
 0x259   :  { %23798 = vmatmul.mubr.msk.f32.vlgmr.msra.gmra.mxu0 %vm1171_vm1, %v137_v53  ;;  %23809 = vmatmul.mubr.msk.f32.vlgmr.msra.gmra.mxu1 %vm1171_vm1, %v138_v6 }
 0x25a   :  { %23811 = vmatprep.subr.mxu0 %v25437_v0  ;;  %23822 = vmatprep.subr.mxu1 %v25437_v0 }
 0x25b   :  { %23812 = vmatpush3.msra.mxu0 %v33489_v12  ;;  %23823 = vmatpush3.msra.mxu1 %v33490_v16  ;;  %v7081_v44 = vpop.f32.mrf.mxu0  ;;  %v7154_v6 = vpop.f32.mrf.mxu1  ;;  %v33935_v12 = vunpack.c.l.bf16 %v29495_v5  ;;  %v33494_v16 = vunpack.c.l.bf16 %v29530_v56 }
 0x25c   :  { %23813 = vmatprep.subr.mxu0 %v25437_v0  ;;  %23824 = vmatprep.subr.mxu1 %v25437_v0  ;;  %v10532_v58 = vsub.f32 %v27325_v50, %v7081_v44  ;;  %v10533_v39 = vsub.f32 %v27327_v4, %v7154_v6  ;;  %v29564_v50 = vld [vmem:[%s32767_s3 + $0x3a8] sm:$0xff]   ;;  %v29569_v4 = vld [vmem:[%s32767_s3 + $0x3b8] sm:$0xff]   ;;  %v33937_v44 = vunpack.c.h.bf16 %v29535_v61  ;;  %v29609_v6 = vld [vmem:[%s32767_s3 + $0x3b0] sm:$0xff]  }
 0x25d   :  { %23814 = vmatpush3.msra.mxu0 %v33934_v63  ;;  %23825 = vmatpush3.msra.mxu1 %v33935_v12  ;;  %v23381_v49 = vpop.f32.mrf.mxu0  ;;  %v23392_v53 = vpop.f32.mrf.mxu1  ;;  %v139_v63 = vld [vmem:[%s32768_s1 + $0x70] sm:$0x3]  ;;  %v140_v12 = vld [vmem:[%s32768_s1 + $0x72] sm:$0x3]  ;;  %33939 = vst [vmem:[#allocation244_spill] sm:$0xff] %v29609_v6  ;;  %v33940_v61 = vunpack.c.l.bf16 %v29564_v50 }
 0x25e   :  { %23815 = vmatprep.subr.mxu0 %v25437_v0  ;;  %23826 = vmatprep.subr.mxu1 %v25437_v0  ;;  %10597 = vst.msk [vmem:[%s32769_s4 + $0x20] sm:$0x3] %vm10580_vm2, %v10532_v58  ;;  %10598 = vst.msk [vmem:[%s32769_s4 + $0x22] sm:$0x3] %vm10580_vm2, %v10533_v39  ;;  %v33936_v49 = vunpack.c.h.bf16 %v29530_v56  ;;  %v33497_v39 = vunpack.c.h.bf16 %v29564_v50  ;;  %v33498_v58 = vunpack.c.h.bf16 %v29569_v4  ;;  %v29604_v53 = vld [vmem:[%s32767_s3 + $0x3a0] sm:$0xff]   ;;  %v33501_v56 = vunpack.c.l.bf16 %v29609_v6 }
 0x25f   :  { %23827 = vmatpush3.msra.mxu1 %v33937_v44  ;;  %23819 = vmatprep.mubr.msk.f32.mxu0 %vm25438_vm0, %v25437_v0  ;;  %33938 = vst [vmem:[#allocation243_spill] sm:$0xff] %v29604_v53 }
 0x260   :  { %23816 = vmatpush3.msra.mxu0 %v33936_v49  ;;  %23828 = vmatprep.subr.mxu1 %v25437_v0 }
 0x261   :  { %23817 = vmatprep.subr.mxu0 %v25437_v0  ;;  %23829 = vmatpush3.msra.mxu1 %v33493_v62 }
 0x262   :  { %23818 = vmatpush3.msra.mxu0 %v33494_v16  ;;  %23830 = vmatprep.mubr.msk.f32.mxu1 %vm25438_vm0, %v25437_v0 }
 0x263   :  { %23820 = vmatmul.mubr.msk.f32.vlgmr.msra.gmra.mxu0 %vm1171_vm1, %v139_v63  ;;  %23831 = vmatmul.mubr.msk.f32.vlgmr.msra.gmra.mxu1 %vm1171_vm1, %v140_v12 }
 0x264   :  { %23833 = vmatprep.subr.mxu0 %v25437_v0  ;;  %23844 = vmatprep.subr.mxu1 %v25437_v0 }
 0x265   :  { %23834 = vmatpush3.msra.mxu0 %v33497_v39  ;;  %23845 = vmatpush3.msra.mxu1 %v33498_v58  ;;  %v7227_v16 = vpop.f32.mrf.mxu0  ;;  %v7300_v12 = vpop.f32.mrf.mxu1  ;;  %v33941_v39 = vunpack.c.l.bf16 %v29569_v4  ;;  %v33502_v58 = vunpack.c.l.bf16 %v29604_v53 }
 0x266   :  { %23835 = vmatprep.subr.mxu0 %v25437_v0  ;;  %23846 = vmatprep.subr.mxu1 %v25437_v0  ;;  %v10534_v44 = vsub.f32 %v27393_v46, %v7227_v16  ;;  %v10535_v49 = vsub.f32 %v27395_v11, %v7300_v12  ;;  %v29638_v46 = vld [vmem:[%s32767_s3 + $0x3c8] sm:$0xff]   ;;  %v29643_v11 = vld [vmem:[%s32767_s3 + $0x3d8] sm:$0xff]   ;;  %v33943_v16 = vunpack.c.h.bf16 %v29609_v6  ;;  %v29683_v12 = vld [vmem:[%s32767_s3 + $0x3d0] sm:$0xff]  }
 0x267   :  { %23836 = vmatpush3.msra.mxu0 %v33940_v61  ;;  %23847 = vmatpush3.msra.mxu1 %v33941_v39  ;;  %v23403_v62 = vpop.f32.mrf.mxu0  ;;  %v23414_v63 = vpop.f32.mrf.mxu1  ;;  %v141_v61 = vld [vmem:[%s32768_s1 + $0x74] sm:$0x3]  ;;  %v142_v39 = vld [vmem:[%s32768_s1 + $0x76] sm:$0x3]  ;;  %33945 = vst [vmem:[#allocation246_spill] sm:$0xff] %v29683_v12  ;;  %v33946_v6 = vunpack.c.l.bf16 %v29638_v46 }
 0x268   :  { %23837 = vmatprep.subr.mxu0 %v25437_v0  ;;  %23848 = vmatprep.subr.mxu1 %v25437_v0  ;;  %10599 = vst.msk [vmem:[%s32769_s4 + $0x24] sm:$0x3] %vm10580_vm2, %v10534_v44  ;;  %10600 = vst.msk [vmem:[%s32769_s4 + $0x26] sm:$0x3] %vm10580_vm2, %v10535_v49  ;;  %v33942_v62 = vunpack.c.h.bf16 %v29604_v53  ;;  %v33505_v49 = vunpack.c.h.bf16 %v29638_v46  ;;  %v33506_v44 = vunpack.c.h.bf16 %v29643_v11  ;;  %v29678_v63 = vld [vmem:[%s32767_s3 + $0x3c0] sm:$0xff]   ;;  %v33509_v53 = vunpack.c.l.bf16 %v29683_v12 }
 0x269   :  { %23849 = vmatpush3.msra.mxu1 %v33943_v16  ;;  %23841 = vmatprep.mubr.msk.f32.mxu0 %vm25438_vm0, %v25437_v0  ;;  %33944 = vst [vmem:[#allocation245_spill] sm:$0xff] %v29678_v63 }
 0x26a   :  { %23838 = vmatpush3.msra.mxu0 %v33942_v62  ;;  %23850 = vmatprep.subr.mxu1 %v25437_v0 }
 0x26b   :  { %23839 = vmatprep.subr.mxu0 %v25437_v0  ;;  %23851 = vmatpush3.msra.mxu1 %v33501_v56 }
 0x26c   :  { %23840 = vmatpush3.msra.mxu0 %v33502_v58  ;;  %23852 = vmatprep.mubr.msk.f32.mxu1 %vm25438_vm0, %v25437_v0 }
 0x26d   :  { %23842 = vmatmul.mubr.msk.f32.vlgmr.msra.gmra.mxu0 %vm1171_vm1, %v141_v61  ;;  %23853 = vmatmul.mubr.msk.f32.vlgmr.msra.gmra.mxu1 %vm1171_vm1, %v142_v39 }
 0x26e   :  { %23855 = vmatprep.subr.mxu0 %v25437_v0  ;;  %23866 = vmatprep.subr.mxu1 %v25437_v0 }
 0x26f   :  { %23856 = vmatpush3.msra.mxu0 %v33505_v49  ;;  %23867 = vmatpush3.msra.mxu1 %v33506_v44  ;;  %v7373_v58 = vpop.f32.mrf.mxu0  ;;  %v7446_v39 = vpop.f32.mrf.mxu1  ;;  %v33947_v49 = vunpack.c.l.bf16 %v29643_v11  ;;  %v33510_v44 = vunpack.c.l.bf16 %v29678_v63 }
 0x270   :  { %23857 = vmatprep.subr.mxu0 %v25437_v0  ;;  %23868 = vmatprep.subr.mxu1 %v25437_v0  ;;  %v10536_v16 = vsub.f32 %v27461_v54, %v7373_v58  ;;  %v10537_v62 = vsub.f32 %v27463_v45, %v7446_v39  ;;  %v29712_v54 = vld [vmem:[%s32767_s3 + $0x3e8] sm:$0xff]   ;;  %v29717_v45 = vld [vmem:[%s32767_s3 + $0x3f8] sm:$0xff]   ;;  %v33949_v58 = vunpack.c.h.bf16 %v29683_v12  ;;  %v29757_v39 = vld [vmem:[%s32767_s3 + $0x3f0] sm:$0xff]  }
 0x271   :  { %23858 = vmatpush3.msra.mxu0 %v33946_v6  ;;  %23869 = vmatpush3.msra.mxu1 %v33947_v49  ;;  %v23425_v56 = vpop.f32.mrf.mxu0  ;;  %v23436_v61 = vpop.f32.mrf.mxu1  ;;  %v143_v6 = vld [vmem:[%s32768_s1 + $0x78] sm:$0x3]  ;;  %v144_v49 = vld [vmem:[%s32768_s1 + $0x7a] sm:$0x3]  ;;  %v33950_v12 = vunpack.c.l.bf16 %v29712_v54 }
 0x272   :  { %23859 = vmatprep.subr.mxu0 %v25437_v0  ;;  %23870 = vmatprep.subr.mxu1 %v25437_v0  ;;  %10601 = vst.msk [vmem:[%s32769_s4 + $0x28] sm:$0x3] %vm10580_vm2, %v10536_v16  ;;  %10602 = vst.msk [vmem:[%s32769_s4 + $0x2a] sm:$0x3] %vm10580_vm2, %v10537_v62  ;;  %v33948_v56 = vunpack.c.h.bf16 %v29678_v63  ;;  %v33513_v62 = vunpack.c.h.bf16 %v29712_v54  ;;  %v33514_v16 = vunpack.c.h.bf16 %v29717_v45  ;;  %v29752_v61 = vld [vmem:[%s32767_s3 + $0x3e0] sm:$0xff]   ;;  %v33517_v63 = vunpack.c.l.bf16 %v29757_v39 }
 0x273   :  { %23871 = vmatpush3.msra.mxu1 %v33949_v58  ;;  %23863 = vmatprep.mubr.msk.f32.mxu0 %vm25438_vm0, %v25437_v0 }
 0x274   :  { %23860 = vmatpush3.msra.mxu0 %v33948_v56  ;;  %23872 = vmatprep.subr.mxu1 %v25437_v0 }
 0x275   :  { %23861 = vmatprep.subr.mxu0 %v25437_v0  ;;  %23873 = vmatpush3.msra.mxu1 %v33509_v53 }
 0x276   :  { %23862 = vmatpush3.msra.mxu0 %v33510_v44  ;;  %23874 = vmatprep.mubr.msk.f32.mxu1 %vm25438_vm0, %v25437_v0 }
 0x277   :  { %23864 = vmatmul.mubr.msk.f32.vlgmr.msra.gmra.mxu0 %vm1171_vm1, %v143_v6  ;;  %23875 = vmatmul.mubr.msk.f32.vlgmr.msra.gmra.mxu1 %vm1171_vm1, %v144_v49 }
 0x278   :  { %23877 = vmatprep.subr.mxu0 %v25437_v0  ;;  %23888 = vmatprep.subr.mxu1 %v25437_v0 }
 0x279   :  { %23878 = vmatpush3.msra.mxu0 %v33513_v62  ;;  %23889 = vmatpush3.msra.mxu1 %v33514_v16  ;;  %v7519_v44 = vpop.f32.mrf.mxu0  ;;  %v7592_v49 = vpop.f32.mrf.mxu1  ;;  %v33951_v62 = vunpack.c.l.bf16 %v29717_v45  ;;  %v33518_v16 = vunpack.c.l.bf16 %v29752_v61 }
 0x27a   :  { %23879 = vmatprep.subr.mxu0 %v25437_v0  ;;  %23890 = vmatprep.subr.mxu1 %v25437_v0  ;;  %v10538_v58 = vsub.f32 %v27529_v52, %v7519_v44  ;;  %v10539_v56 = vsub.f32 %v27531_v21, %v7592_v49  ;;  %v33952_v52 = vunpack.c.h.bf16 %v29752_v61  ;;  %v33953_v21 = vunpack.c.h.bf16 %v29757_v39  ;;  %v146_v44 = vld [vmem:[%s32768_s1 + $0x7e] sm:$0x3] }
 0x27b   :  { %23880 = vmatpush3.msra.mxu0 %v33950_v12  ;;  %23891 = vmatpush3.msra.mxu1 %v33951_v62  ;;  %v23447_v53 = vpop.f32.mrf.mxu0  ;;  %v23458_v6 = vpop.f32.mrf.mxu1  ;;  %v33954_v12 = vunpack.c.h.bf16 %v25474_v1  ;;  %v33955_v62 = vunpack.c.h.bf16 %v25479_v2 }
 0x27c   :  { %23881 = vmatprep.subr.mxu0 %v25437_v0  ;;  %23892 = vmatprep.subr.mxu1 %v25437_v0  ;;  %10603 = vst.msk [vmem:[%s32769_s4 + $0x2c] sm:$0x3] %vm10580_vm2, %v10538_v58  ;;  %10604 = vst.msk [vmem:[%s32769_s4 + $0x2e] sm:$0x3] %vm10580_vm2, %v10539_v56  ;;  %v145_v53 = vld [vmem:[%s32768_s1 + $0x7c] sm:$0x3] }
 0x27d   :  { %23882 = vmatpush3.msra.mxu0 %v33952_v52  ;;  %23893 = vmatpush3.msra.mxu1 %v33953_v21  ;;  %v33956_v52 = vunpack.c.l.bf16 %v25474_v1  ;;  %v33957_v21 = vunpack.c.l.bf16 %v25479_v2  ;;  %v33958_v1 = vunpack.c.h.bf16 %v25484_v3  ;;  %v33959_v2 = vunpack.c.h.bf16 %v25493_v8 }
 0x27e   :  { %23883 = vmatprep.subr.mxu0 %v25437_v0  ;;  %23894 = vmatprep.subr.mxu1 %v25437_v0 }
 0x27f   :  { %23884 = vmatpush3.msra.mxu0 %v33518_v16  ;;  %23885 = vmatprep.mubr.msk.f32.mxu0 %vm25438_vm0, %v25437_v0  ;;  %v34374_v16 = vld [vmem:[#allocation120_spill] sm:$0xff] }
 0x280   :  { %23895 = vmatpush3.msra.mxu1 %v33517_v63  ;;  %23896 = vmatprep.mubr.msk.f32.mxu1 %vm25438_vm0, %v25437_v0 }
 0x281   :  { %23886 = vmatmul.mubr.msk.f32.vlgmr.msra.gmra.mxu0 %vm1171_vm1, %v145_v53  ;;  %23897 = vmatmul.mubr.msk.f32.vlgmr.msra.gmra.mxu1 %vm1171_vm1, %v146_v44 }
 0x282   :  { %23899 = vmatprep.subr.mxu0 %v25437_v0  ;;  %23910 = vmatprep.subr.mxu1 %v25437_v0 }
 0x283   :  { %23900 = vmatpush3.msra.mxu0 %v33954_v12  ;;  %23911 = vmatpush3.msra.mxu1 %v33955_v62  ;;  %v7665_v56 = vpop.f32.mrf.mxu0  ;;  %v7738_v58 = vpop.f32.mrf.mxu1  ;;  %v25309_v12 = vld [vmem:[%s32768_s1] sm:$0x3]  ;;  %v33963_v62 = vunpack.c.h.bf16 %v25521_v14 }
 0x284   :  { %23901 = vmatprep.subr.mxu0 %v25437_v0  ;;  %23912 = vmatprep.subr.mxu1 %v25437_v0  ;;  %v10540_v6 = vsub.f32 %v27597_v15, %v7665_v56  ;;  %v10541_v49 = vsub.f32 %v27599_v51, %v7738_v58  ;;  %v33960_v15 = vunpack.c.l.bf16 %v25484_v3  ;;  %v33961_v51 = vunpack.c.l.bf16 %v25493_v8  ;;  %v25310_v3 = vld [vmem:[%s32768_s1 + $0x2] sm:$0x3] }
 0x285   :  { %23902 = vmatpush3.msra.mxu0 %v33956_v52  ;;  %23913 = vmatpush3.msra.mxu1 %v33957_v21  ;;  %v23469_v53 = vpop.f32.mrf.mxu0  ;;  %v23480_v44 = vpop.f32.mrf.mxu1  ;;  %v33962_v8 = vunpack.c.h.bf16 %v25516_v13  ;;  %v33964_v52 = vunpack.c.l.bf16 %v25516_v13  ;;  %v33965_v21 = vunpack.c.l.bf16 %v25521_v14  ;;  %v33966_v13 = vunpack.c.h.bf16 %v25546_v19 }
 0x286   :  { %23903 = vmatprep.subr.mxu0 %v25437_v0  ;;  %23914 = vmatprep.subr.mxu1 %v25437_v0  ;;  %10605 = vst.msk [vmem:[%s32769_s4 + $0x30] sm:$0x3] %vm10580_vm2, %v10540_v6  ;;  %10606 = vst.msk [vmem:[%s32769_s4 + $0x32] sm:$0x3] %vm10580_vm2, %v10541_v49  ;;  %v33967_v14 = vunpack.c.h.bf16 %v25551_v20 }
 0x287   :  { %23904 = vmatpush3.msra.mxu0 %v33958_v1  ;;  %23915 = vmatpush3.msra.mxu1 %v33959_v2  ;;  %v25311_v1 = vld [vmem:[%s32768_s1 + $0x4] sm:$0x3]  ;;  %v33971_v2 = vunpack.c.h.bf16 %v25583_v28 }
 0x288   :  { %23905 = vmatprep.subr.mxu0 %v25437_v0  ;;  %23916 = vmatprep.subr.mxu1 %v25437_v0 }
 0x289   :  { %23906 = vmatpush3.msra.mxu0 %v33960_v15  ;;  %23907 = vmatprep.mubr.msk.f32.mxu0 %vm25438_vm0, %v25437_v0 }
 0x28a   :  { %23917 = vmatpush3.msra.mxu1 %v33961_v51  ;;  %23918 = vmatprep.mubr.msk.f32.mxu1 %vm25438_vm0, %v25437_v0 }
 0x28b   :  { %23908 = vmatmul.mubr.msk.f32.vlgmr.msra.gmra.mxu0 %vm1171_vm1, %v25309_v12  ;;  %23919 = vmatmul.mubr.msk.f32.vlgmr.msra.gmra.mxu1 %vm1171_vm1, %v25310_v3 }
 0x28c   :  { %23921 = vmatprep.subr.mxu0 %v25437_v0  ;;  %23932 = vmatprep.subr.mxu1 %v25437_v0 }
 0x28d   :  { %23922 = vmatpush3.msra.mxu0 %v33962_v8  ;;  %23933 = vmatpush3.msra.mxu1 %v33963_v62  ;;  %v7811_v56 = vpop.f32.mrf.mxu0  ;;  %v7884_v58 = vpop.f32.mrf.mxu1  ;;  %v33972_v8 = vunpack.c.l.bf16 %v25578_v27  ;;  %v33973_v62 = vunpack.c.l.bf16 %v25583_v28  ;;  %v33975_v28 = vunpack.c.h.bf16 %v25615_v34 }
 0x28e   :  { %23923 = vmatprep.subr.mxu0 %v25437_v0  ;;  %23934 = vmatprep.subr.mxu1 %v25437_v0  ;;  %v10542_v6 = vsub.f32 %v27665_v60, %v7811_v56  ;;  %v10543_v49 = vsub.f32 %v27667_v25, %v7884_v58  ;;  %v33968_v60 = vunpack.c.l.bf16 %v25546_v19  ;;  %v33969_v25 = vunpack.c.l.bf16 %v25551_v20  ;;  %v25312_v19 = vld [vmem:[%s32768_s1 + $0x6] sm:$0x3] }
 0x28f   :  { %23924 = vmatpush3.msra.mxu0 %v33964_v52  ;;  %23935 = vmatpush3.msra.mxu1 %v33965_v21  ;;  %v23491_v53 = vpop.f32.mrf.mxu0  ;;  %v23502_v44 = vpop.f32.mrf.mxu1  ;;  %v33970_v20 = vunpack.c.h.bf16 %v25578_v27  ;;  %v33974_v27 = vunpack.c.h.bf16 %v25610_v33 }
 0x290   :  { %23925 = vmatprep.subr.mxu0 %v25437_v0  ;;  %23936 = vmatprep.subr.mxu1 %v25437_v0  ;;  %10607 = vst.msk [vmem:[%s32769_s4 + $0x34] sm:$0x3] %vm10580_vm2, %v10542_v6  ;;  %10608 = vst.msk [vmem:[%s32769_s4 + $0x36] sm:$0x3] %vm10580_vm2, %v10543_v49  ;;  %v25313_v6 = vld [vmem:[%s32768_s1 + $0x8] sm:$0x3]  ;;  %v33979_v49 = vunpack.c.h.bf16 %v25647_v42 }
 0x291   :  { %23926 = vmatpush3.msra.mxu0 %v33966_v13  ;;  %23937 = vmatpush3.msra.mxu1 %v33967_v14  ;;  %v33980_v13 = vunpack.c.l.bf16 %v25642_v41  ;;  %v33981_v14 = vunpack.c.l.bf16 %v25647_v42  ;;  %v33983_v42 = vunpack.c.h.bf16 %v25679_v48 }
 0x292   :  { %23927 = vmatprep.subr.mxu0 %v25437_v0  ;;  %23938 = vmatprep.subr.mxu1 %v25437_v0 }
 0x293   :  { %23928 = vmatpush3.msra.mxu0 %v33968_v60  ;;  %23929 = vmatprep.mubr.msk.f32.mxu0 %vm25438_vm0, %v25437_v0 }
 0x294   :  { %23939 = vmatpush3.msra.mxu1 %v33969_v25  ;;  %23940 = vmatprep.mubr.msk.f32.mxu1 %vm25438_vm0, %v25437_v0 }
 0x295   :  { %23930 = vmatmul.mubr.msk.f32.vlgmr.msra.gmra.mxu0 %vm1171_vm1, %v25311_v1  ;;  %23941 = vmatmul.mubr.msk.f32.vlgmr.msra.gmra.mxu1 %vm1171_vm1, %v25312_v19  ;;  %v25315_v1 = vld [vmem:[%s32768_s1 + $0xc] sm:$0x3]  ;;  %v33987_v19 = vld [vmem:[#allocation2_spill] sm:$0xff] }
 0x296   :  { %23943 = vmatprep.subr.mxu0 %v25437_v0  ;;  %23954 = vmatprep.subr.mxu1 %v25437_v0 }
 0x297   :  { %23944 = vmatpush3.msra.mxu0 %v33970_v20  ;;  %23955 = vmatpush3.msra.mxu1 %v33971_v2  ;;  %v7957_v15 = vpop.f32.mrf.mxu0  ;;  %v8030_v51 = vpop.f32.mrf.mxu1  ;;  %v33988_v20 = vunpack.c.h.bf16 %v33987_v19 }
 0x298   :  { %23945 = vmatprep.subr.mxu0 %v25437_v0  ;;  %23956 = vmatprep.subr.mxu1 %v25437_v0  ;;  %v10544_v12 = vsub.f32 %v27733_v30, %v7957_v15  ;;  %v10545_v3 = vsub.f32 %v27735_v59, %v8030_v51  ;;  %v33976_v30 = vunpack.c.l.bf16 %v25610_v33  ;;  %v33977_v59 = vunpack.c.l.bf16 %v25615_v34  ;;  %v25314_v33 = vld [vmem:[%s32768_s1 + $0xa] sm:$0x3]  ;;  %v33989_v51 = vld [vmem:[#allocation133_spill] sm:$0xff] }
 0x299   :  { %23946 = vmatpush3.msra.mxu0 %v33972_v8  ;;  %23957 = vmatpush3.msra.mxu1 %v33973_v62  ;;  %v23513_v56 = vpop.f32.mrf.mxu0  ;;  %v23524_v58 = vpop.f32.mrf.mxu1  ;;  %v33978_v34 = vunpack.c.h.bf16 %v25642_v41  ;;  %v33982_v41 = vunpack.c.h.bf16 %v25674_v47  ;;  %v33991_v62 = vunpack.c.l.bf16 %v25706_v55 }
 0x29a   :  { %23947 = vmatprep.subr.mxu0 %v25437_v0  ;;  %23958 = vmatprep.subr.mxu1 %v25437_v0  ;;  %10609 = vst.msk [vmem:[%s32769_s4 + $0x38] sm:$0x3] %vm10580_vm2, %v10544_v12  ;;  %10610 = vst.msk [vmem:[%s32769_s4 + $0x3a] sm:$0x3] %vm10580_vm2, %v10545_v3  ;;  %v33990_v3 = vld [vmem:[#allocation134_spill] sm:$0xff]  ;;  %v33992_v56 = vunpack.c.l.bf16 %v33987_v19 }
 0x29b   :  { %23948 = vmatpush3.msra.mxu0 %v33974_v27  ;;  %23959 = vmatpush3.msra.mxu1 %v33975_v28 }
 0x29c   :  { %23949 = vmatprep.subr.mxu0 %v25437_v0  ;;  %23960 = vmatprep.subr.mxu1 %v25437_v0 }
 0x29d   :  { %23950 = vmatpush3.msra.mxu0 %v33976_v30  ;;  %23951 = vmatprep.mubr.msk.f32.mxu0 %vm25438_vm0, %v25437_v0  ;;  %v33995_v30 = vld [vmem:[#allocation4_spill] sm:$0xff] }
 0x29e   :  { %23961 = vmatpush3.msra.mxu1 %v33977_v59  ;;  %23962 = vmatprep.mubr.msk.f32.mxu1 %vm25438_vm0, %v25437_v0  ;;  %v33996_v59 = vunpack.c.h.bf16 %v33995_v30 }
 0x29f   :  { %23952 = vmatmul.mubr.msk.f32.vlgmr.msra.gmra.mxu0 %vm1171_vm1, %v25313_v6  ;;  %23963 = vmatmul.mubr.msk.f32.vlgmr.msra.gmra.mxu1 %vm1171_vm1, %v25314_v33  ;;  %v33998_v33 = vunpack.c.l.bf16 %v33995_v30 }
 0x2a0   :  { %23965 = vmatprep.subr.mxu0 %v25437_v0  ;;  %23976 = vmatprep.subr.mxu1 %v25437_v0 }
 0x2a1   :  { %23966 = vmatpush3.msra.mxu0 %v33978_v34  ;;  %23977 = vmatpush3.msra.mxu1 %v33979_v49  ;;  %v8103_v52 = vpop.f32.mrf.mxu0  ;;  %v8176_v21 = vpop.f32.mrf.mxu1  ;;  %v25317_v34 = vld [vmem:[%s32768_s1 + $0x10] sm:$0x3]  ;;  %v25318_v49 = vld [vmem:[%s32768_s1 + $0x12] sm:$0x3] }
 0x2a2   :  { %23967 = vmatprep.subr.mxu0 %v25437_v0  ;;  %23978 = vmatprep.subr.mxu1 %v25437_v0  ;;  %v10546_v53 = vsub.f32 %v27801_v57, %v8103_v52  ;;  %v10547_v44 = vsub.f32 %v27803_v35, %v8176_v21  ;;  %v33984_v57 = vunpack.c.l.bf16 %v25674_v47  ;;  %v33985_v35 = vunpack.c.l.bf16 %v25679_v48  ;;  %v25316_v47 = vld [vmem:[%s32768_s1 + $0xe] sm:$0x3]  ;;  %v33999_v52 = vld [vmem:[#allocation5_spill] sm:$0xff] }
 0x2a3   :  { %23968 = vmatpush3.msra.mxu0 %v33980_v13  ;;  %23979 = vmatpush3.msra.mxu1 %v33981_v14  ;;  %v23535_v60 = vpop.f32.mrf.mxu0  ;;  %v23546_v25 = vpop.f32.mrf.mxu1  ;;  %v33986_v48 = vunpack.c.h.bf16 %v25706_v55  ;;  %v33993_v55 = vld [vmem:[#allocation3_spill] sm:$0xff]  ;;  %v34000_v21 = vunpack.c.h.bf16 %v33999_v52 }
 0x2a4   :  { %23969 = vmatprep.subr.mxu0 %v25437_v0  ;;  %23980 = vmatprep.subr.mxu1 %v25437_v0  ;;  %10611 = vst.msk [vmem:[%s32769_s4 + $0x3c] sm:$0x3] %vm10580_vm2, %v10546_v53  ;;  %10612 = vst.msk [vmem:[%s32769_s4 + $0x3e] sm:$0x3] %vm10580_vm2, %v10547_v44  ;;  %v33994_v28 = vunpack.c.h.bf16 %v33993_v55  ;;  %v33997_v6 = vunpack.c.l.bf16 %v33993_v55  ;;  %v34001_v53 = vld [vmem:[#allocation6_spill] sm:$0xff]  ;;  %v34003_v60 = vld [vmem:[#allocation139_spill] sm:$0xff] }
 0x2a5   :  { %23970 = vmatpush3.msra.mxu0 %v33982_v41  ;;  %23981 = vmatpush3.msra.mxu1 %v33983_v42  ;;  %v34002_v44 = vunpack.c.h.bf16 %v34001_v53  ;;  %v34004_v41 = vld [vmem:[#allocation140_spill] sm:$0xff] }
 0x2a6   :  { %23971 = vmatprep.subr.mxu0 %v25437_v0  ;;  %23982 = vmatprep.subr.mxu1 %v25437_v0 }
 0x2a7   :  { %23972 = vmatpush3.msra.mxu0 %v33984_v57  ;;  %23973 = vmatprep.mubr.msk.f32.mxu0 %vm25438_vm0, %v25437_v0  ;;  %v34005_v57 = vunpack.c.l.bf16 %v33999_v52 }
 0x2a8   :  { %23983 = vmatpush3.msra.mxu1 %v33985_v35  ;;  %23984 = vmatprep.mubr.msk.f32.mxu1 %vm25438_vm0, %v25437_v0  ;;  %v34006_v35 = vunpack.c.l.bf16 %v34001_v53 }
 0x2a9   :  { %23974 = vmatmul.mubr.msk.f32.vlgmr.msra.gmra.mxu0 %vm1171_vm1, %v25315_v1  ;;  %23985 = vmatmul.mubr.msk.f32.vlgmr.msra.gmra.mxu1 %vm1171_vm1, %v25316_v47 }
 0x2aa   :  { %23987 = vmatprep.subr.mxu0 %v25437_v0  ;;  %23998 = vmatprep.subr.mxu1 %v25437_v0 }
 0x2ab   :  { %23988 = vmatpush3.msra.mxu0 %v33986_v48  ;;  %23999 = vmatpush3.msra.mxu1 %v33988_v20  ;;  %v8249_v2 = vpop.f32.mrf.mxu0  ;;  %v8322_v15 = vpop.f32.mrf.mxu1  ;;  %v34007_v48 = vld [vmem:[#allocation7_spill] sm:$0xff]  ;;  %v34009_v20 = vld [vmem:[#allocation8_spill] sm:$0xff] }
 0x2ac   :  { %23989 = vmatprep.subr.mxu0 %v25437_v0  ;;  %24000 = vmatprep.subr.mxu1 %v25437_v0  ;;  %v10548_v12 = vsub.f32 %v33989_v51, %v8249_v2  ;;  %v10549_v8 = vsub.f32 %v33990_v3, %v8322_v15  ;;  %v34008_v19 = vunpack.c.h.bf16 %v34007_v48  ;;  %v34010_v2 = vunpack.c.h.bf16 %v34009_v20  ;;  %v25320_v3 = vld [vmem:[%s32768_s1 + $0x16] sm:$0x3] }
 0x2ad   :  { %23990 = vmatpush3.msra.mxu0 %v33991_v62  ;;  %24001 = vmatpush3.msra.mxu1 %v33992_v56  ;;  %v23557_v58 = vpop.f32.mrf.mxu0  ;;  %v23568_v27 = vpop.f32.mrf.mxu1  ;;  %v34011_v15 = vunpack.c.l.bf16 %v34007_v48  ;;  %v34012_v51 = vunpack.c.l.bf16 %v34009_v20  ;;  %v34015_v56 = vld [vmem:[#allocation10_spill] sm:$0xff] }
 0x2ae   :  { %23991 = vmatprep.subr.mxu0 %v25437_v0  ;;  %24002 = vmatprep.subr.mxu1 %v25437_v0  ;;  %10613 = vst.msk [vmem:[%s32769_s4 + $0x40] sm:$0x3] %vm10580_vm2, %v10548_v12  ;;  %10614 = vst.msk [vmem:[%s32769_s4 + $0x42] sm:$0x3] %vm10580_vm2, %v10549_v8  ;;  %v25319_v12 = vld [vmem:[%s32768_s1 + $0x14] sm:$0x3]  ;;  %v34016_v58 = vunpack.c.h.bf16 %v34015_v56 }
 0x2af   :  { %23992 = vmatpush3.msra.mxu0 %v33994_v28  ;;  %24003 = vmatpush3.msra.mxu1 %v33996_v59  ;;  %v34013_v8 = vld [vmem:[#allocation9_spill] sm:$0xff]  ;;  %v34018_v59 = vld [vmem:[#allocation146_spill] sm:$0xff] }
 0x2b0   :  { %23993 = vmatprep.subr.mxu0 %v25437_v0  ;;  %24004 = vmatprep.subr.mxu1 %v25437_v0  ;;  %v34014_v62 = vunpack.c.h.bf16 %v34013_v8  ;;  %v34017_v28 = vld [vmem:[#allocation145_spill] sm:$0xff] }
 0x2b1   :  { %23994 = vmatpush3.msra.mxu0 %v33997_v6  ;;  %23995 = vmatprep.mubr.msk.f32.mxu0 %vm25438_vm0, %v25437_v0 }
 0x2b2   :  { %24005 = vmatpush3.msra.mxu1 %v33998_v33  ;;  %24006 = vmatprep.mubr.msk.f32.mxu1 %vm25438_vm0, %v25437_v0  ;;  %v34019_v33 = vunpack.c.l.bf16 %v34013_v8 }
 0x2b3   :  { %23996 = vmatmul.mubr.msk.f32.vlgmr.msra.gmra.mxu0 %vm1171_vm1, %v25317_v34  ;;  %24007 = vmatmul.mubr.msk.f32.vlgmr.msra.gmra.mxu1 %vm1171_vm1, %v25318_v49  ;;  %v34020_v34 = vunpack.c.l.bf16 %v34015_v56 }
 0x2b4   :  { %24009 = vmatprep.subr.mxu0 %v25437_v0  ;;  %24020 = vmatprep.subr.mxu1 %v25437_v0 }
 0x2b5   :  { %24010 = vmatpush3.msra.mxu0 %v34000_v21  ;;  %24021 = vmatpush3.msra.mxu1 %v34002_v44  ;;  %v8395_v13 = vpop.f32.mrf.mxu0  ;;  %v8468_v14 = vpop.f32.mrf.mxu1  ;;  %v34021_v21 = vld [vmem:[#allocation11_spill] sm:$0xff]  ;;  %v34023_v44 = vld [vmem:[#allocation12_spill] sm:$0xff] }
 0x2b6   :  { %24011 = vmatprep.subr.mxu0 %v25437_v0  ;;  %24022 = vmatprep.subr.mxu1 %v25437_v0  ;;  %v10550_v25 = vsub.f32 %v34003_v60, %v8395_v13  ;;  %v10551_v42 = vsub.f32 %v34004_v41, %v8468_v14  ;;  %v34022_v53 = vunpack.c.h.bf16 %v34021_v21  ;;  %v34024_v13 = vunpack.c.h.bf16 %v34023_v44  ;;  %v25322_v41 = vld [vmem:[%s32768_s1 + $0x1a] sm:$0x3] }
 0x2b7   :  { %24012 = vmatpush3.msra.mxu0 %v34005_v57  ;;  %24023 = vmatpush3.msra.mxu1 %v34006_v35  ;;  %v23579_v1 = vpop.f32.mrf.mxu0  ;;  %v23590_v47 = vpop.f32.mrf.mxu1  ;;  %v34025_v14 = vunpack.c.l.bf16 %v34021_v21  ;;  %v34026_v60 = vunpack.c.l.bf16 %v34023_v44  ;;  %v34029_v35 = vld [vmem:[#allocation14_spill] sm:$0xff] }
 0x2b8   :  { %24013 = vmatprep.subr.mxu0 %v25437_v0  ;;  %24024 = vmatprep.subr.mxu1 %v25437_v0  ;;  %10615 = vst.msk [vmem:[%s32769_s4 + $0x44] sm:$0x3] %vm10580_vm2, %v10550_v25  ;;  %10616 = vst.msk [vmem:[%s32769_s4 + $0x46] sm:$0x3] %vm10580_vm2, %v10551_v42  ;;  %v25321_v25 = vld [vmem:[%s32768_s1 + $0x18] sm:$0x3]  ;;  %v34030_v1 = vunpack.c.h.bf16 %v34029_v35 }
 0x2b9   :  { %24014 = vmatpush3.msra.mxu0 %v34008_v19  ;;  %24025 = vmatpush3.msra.mxu1 %v34010_v2  ;;  %v34027_v42 = vld [vmem:[#allocation13_spill] sm:$0xff]  ;;  %v34031_v19 = vld [vmem:[#allocation151_spill] sm:$0xff]  ;;  %v34032_v2 = vld [vmem:[#allocation152_spill] sm:$0xff] }
 0x2ba   :  { %24015 = vmatprep.subr.mxu0 %v25437_v0  ;;  %24026 = vmatprep.subr.mxu1 %v25437_v0  ;;  %v34028_v57 = vunpack.c.h.bf16 %v34027_v42 }
 0x2bb   :  { %24016 = vmatpush3.msra.mxu0 %v34011_v15  ;;  %24017 = vmatprep.mubr.msk.f32.mxu0 %vm25438_vm0, %v25437_v0 }
 0x2bc   :  { %24027 = vmatpush3.msra.mxu1 %v34012_v51  ;;  %24028 = vmatprep.mubr.msk.f32.mxu1 %vm25438_vm0, %v25437_v0  ;;  %v34033_v51 = vunpack.c.l.bf16 %v34027_v42 }
 0x2bd   :  { %24018 = vmatmul.mubr.msk.f32.vlgmr.msra.gmra.mxu0 %vm1171_vm1, %v25319_v12  ;;  %24029 = vmatmul.mubr.msk.f32.vlgmr.msra.gmra.mxu1 %vm1171_vm1, %v25320_v3  ;;  %v34034_v12 = vunpack.c.l.bf16 %v34029_v35 }
 0x2be   :  { %24031 = vmatprep.subr.mxu0 %v25437_v0  ;;  %24042 = vmatprep.subr.mxu1 %v25437_v0 }
 0x2bf   :  { %24032 = vmatpush3.msra.mxu0 %v34014_v62  ;;  %24043 = vmatpush3.msra.mxu1 %v34016_v58  ;;  %v8541_v27 = vpop.f32.mrf.mxu0  ;;  %v8614_v55 = vpop.f32.mrf.mxu1  ;;  %v34035_v62 = vld [vmem:[#allocation15_spill] sm:$0xff]  ;;  %v34037_v58 = vld [vmem:[#allocation16_spill] sm:$0xff] }
 0x2c0   :  { %24033 = vmatprep.subr.mxu0 %v25437_v0  ;;  %24044 = vmatprep.subr.mxu1 %v25437_v0  ;;  %v10552_v30 = vsub.f32 %v34017_v28, %v8541_v27  ;;  %v10553_v6 = vsub.f32 %v34018_v59, %v8614_v55  ;;  %v34036_v56 = vunpack.c.h.bf16 %v34035_v62  ;;  %v34038_v27 = vunpack.c.h.bf16 %v34037_v58  ;;  %v25324_v59 = vld [vmem:[%s32768_s1 + $0x1e] sm:$0x3] }
 0x2c1   :  { %24034 = vmatpush3.msra.mxu0 %v34019_v33  ;;  %24045 = vmatpush3.msra.mxu1 %v34020_v34  ;;  %v23601_v49 = vpop.f32.mrf.mxu0  ;;  %v23612_v52 = vpop.f32.mrf.mxu1  ;;  %v34039_v55 = vunpack.c.l.bf16 %v34035_v62  ;;  %v34040_v28 = vunpack.c.l.bf16 %v34037_v58  ;;  %v34043_v34 = vld [vmem:[#allocation18_spill] sm:$0xff] }
 0x2c2   :  { %24035 = vmatprep.subr.mxu0 %v25437_v0  ;;  %24046 = vmatprep.subr.mxu1 %v25437_v0  ;;  %10617 = vst.msk [vmem:[%s32769_s4 + $0x48] sm:$0x3] %vm10580_vm2, %v10552_v30  ;;  %10618 = vst.msk [vmem:[%s32769_s4 + $0x4a] sm:$0x3] %vm10580_vm2, %v10553_v6  ;;  %v25323_v30 = vld [vmem:[%s32768_s1 + $0x1c] sm:$0x3]  ;;  %v34044_v49 = vunpack.c.h.bf16 %v34043_v34 }
 0x2c3   :  { %24036 = vmatpush3.msra.mxu0 %v34022_v53  ;;  %24047 = vmatpush3.msra.mxu1 %v34024_v13  ;;  %v34041_v6 = vld [vmem:[#allocation17_spill] sm:$0xff]  ;;  %v34046_v13 = vld [vmem:[#allocation158_spill] sm:$0xff] }
 0x2c4   :  { %24037 = vmatprep.subr.mxu0 %v25437_v0  ;;  %24048 = vmatprep.subr.mxu1 %v25437_v0  ;;  %v34042_v33 = vunpack.c.h.bf16 %v34041_v6  ;;  %v34045_v53 = vld [vmem:[#allocation157_spill] sm:$0xff] }
 0x2c5   :  { %24038 = vmatpush3.msra.mxu0 %v34025_v14  ;;  %24039 = vmatprep.mubr.msk.f32.mxu0 %vm25438_vm0, %v25437_v0 }
 0x2c6   :  { %24049 = vmatpush3.msra.mxu1 %v34026_v60  ;;  %24050 = vmatprep.mubr.msk.f32.mxu1 %vm25438_vm0, %v25437_v0  ;;  %v34047_v60 = vunpack.c.l.bf16 %v34041_v6 }
 0x2c7   :  { %24040 = vmatmul.mubr.msk.f32.vlgmr.msra.gmra.mxu0 %vm1171_vm1, %v25321_v25  ;;  %24051 = vmatmul.mubr.msk.f32.vlgmr.msra.gmra.mxu1 %vm1171_vm1, %v25322_v41  ;;  %v34048_v25 = vunpack.c.l.bf16 %v34043_v34 }
 0x2c8   :  { %24053 = vmatprep.subr.mxu0 %v25437_v0  ;;  %24064 = vmatprep.subr.mxu1 %v25437_v0 }
 0x2c9   :  { %24054 = vmatpush3.msra.mxu0 %v34028_v57  ;;  %24065 = vmatpush3.msra.mxu1 %v34030_v1  ;;  %v8687_v47 = vpop.f32.mrf.mxu0  ;;  %v8760_v48 = vpop.f32.mrf.mxu1  ;;  %v34049_v57 = vld [vmem:[#allocation19_spill] sm:$0xff]  ;;  %v34051_v1 = vld [vmem:[#allocation20_spill] sm:$0xff] }
 0x2ca   :  { %24055 = vmatprep.subr.mxu0 %v25437_v0  ;;  %24066 = vmatprep.subr.mxu1 %v25437_v0  ;;  %v10554_v20 = vsub.f32 %v34031_v19, %v8687_v47  ;;  %v10555_v15 = vsub.f32 %v34032_v2, %v8760_v48  ;;  %v34050_v35 = vunpack.c.h.bf16 %v34049_v57  ;;  %v34052_v47 = vunpack.c.h.bf16 %v34051_v1  ;;  %v25326_v2 = vld [vmem:[%s32768_s1 + $0x22] sm:$0x3] }
 0x2cb   :  { %24056 = vmatpush3.msra.mxu0 %v34033_v51  ;;  %24067 = vmatpush3.msra.mxu1 %v34034_v12  ;;  %v23623_v3 = vpop.f32.mrf.mxu0  ;;  %v23634_v8 = vpop.f32.mrf.mxu1  ;;  %v34053_v48 = vunpack.c.l.bf16 %v34049_v57  ;;  %v34054_v19 = vunpack.c.l.bf16 %v34051_v1  ;;  %v34057_v12 = vld [vmem:[#allocation22_spill] sm:$0xff] }
 0x2cc   :  { %24057 = vmatprep.subr.mxu0 %v25437_v0  ;;  %24068 = vmatprep.subr.mxu1 %v25437_v0  ;;  %10619 = vst.msk [vmem:[%s32769_s4 + $0x4c] sm:$0x3] %vm10580_vm2, %v10554_v20  ;;  %10620 = vst.msk [vmem:[%s32769_s4 + $0x4e] sm:$0x3] %vm10580_vm2, %v10555_v15  ;;  %v25325_v20 = vld [vmem:[%s32768_s1 + $0x20] sm:$0x3]  ;;  %v34058_v3 = vunpack.c.h.bf16 %v34057_v12 }
 0x2cd   :  { %24058 = vmatpush3.msra.mxu0 %v34036_v56  ;;  %24069 = vmatpush3.msra.mxu1 %v34038_v27  ;;  %v34055_v15 = vld [vmem:[#allocation21_spill] sm:$0xff]  ;;  %v34059_v56 = vld [vmem:[#allocation163_spill] sm:$0xff]  ;;  %v34060_v27 = vld [vmem:[#allocation164_spill] sm:$0xff] }
 0x2ce   :  { %24059 = vmatprep.subr.mxu0 %v25437_v0  ;;  %24070 = vmatprep.subr.mxu1 %v25437_v0  ;;  %v34056_v51 = vunpack.c.h.bf16 %v34055_v15 }
 0x2cf   :  { %24060 = vmatpush3.msra.mxu0 %v34039_v55  ;;  %24061 = vmatprep.mubr.msk.f32.mxu0 %vm25438_vm0, %v25437_v0 }
 0x2d0   :  { %24071 = vmatpush3.msra.mxu1 %v34040_v28  ;;  %24072 = vmatprep.mubr.msk.f32.mxu1 %vm25438_vm0, %v25437_v0  ;;  %v34061_v28 = vunpack.c.l.bf16 %v34055_v15 }
 0x2d1   :  { %24062 = vmatmul.mubr.msk.f32.vlgmr.msra.gmra.mxu0 %vm1171_vm1, %v25323_v30  ;;  %24073 = vmatmul.mubr.msk.f32.vlgmr.msra.gmra.mxu1 %vm1171_vm1, %v25324_v59  ;;  %v34062_v30 = vunpack.c.l.bf16 %v34057_v12 }
 0x2d2   :  { %24075 = vmatprep.subr.mxu0 %v25437_v0  ;;  %24086 = vmatprep.subr.mxu1 %v25437_v0 }
 0x2d3   :  { %24076 = vmatpush3.msra.mxu0 %v34042_v33  ;;  %24087 = vmatpush3.msra.mxu1 %v34044_v49  ;;  %v8833_v52 = vpop.f32.mrf.mxu0  ;;  %v8906_v21 = vpop.f32.mrf.mxu1  ;;  %v34063_v33 = vld [vmem:[#allocation23_spill] sm:$0xff]  ;;  %v34065_v49 = vld [vmem:[#allocation24_spill] sm:$0xff] }
 0x2d4   :  { %24077 = vmatprep.subr.mxu0 %v25437_v0  ;;  %24088 = vmatprep.subr.mxu1 %v25437_v0  ;;  %v10556_v44 = vsub.f32 %v34045_v53, %v8833_v52  ;;  %v10557_v14 = vsub.f32 %v34046_v13, %v8906_v21  ;;  %v34064_v34 = vunpack.c.h.bf16 %v34063_v33  ;;  %v34066_v52 = vunpack.c.h.bf16 %v34065_v49  ;;  %v25328_v13 = vld [vmem:[%s32768_s1 + $0x26] sm:$0x3] }
 0x2d5   :  { %24078 = vmatpush3.msra.mxu0 %v34047_v60  ;;  %24089 = vmatpush3.msra.mxu1 %v34048_v25  ;;  %v23645_v41 = vpop.f32.mrf.mxu0  ;;  %v23656_v42 = vpop.f32.mrf.mxu1  ;;  %v34067_v21 = vunpack.c.l.bf16 %v34063_v33  ;;  %v34068_v53 = vunpack.c.l.bf16 %v34065_v49  ;;  %v34071_v25 = vld [vmem:[#allocation26_spill] sm:$0xff] }
 0x2d6   :  { %24079 = vmatprep.subr.mxu0 %v25437_v0  ;;  %24090 = vmatprep.subr.mxu1 %v25437_v0  ;;  %10621 = vst.msk [vmem:[%s32769_s4 + $0x50] sm:$0x3] %vm10580_vm2, %v10556_v44  ;;  %10622 = vst.msk [vmem:[%s32769_s4 + $0x52] sm:$0x3] %vm10580_vm2, %v10557_v14  ;;  %v25327_v44 = vld [vmem:[%s32768_s1 + $0x24] sm:$0x3]  ;;  %v34072_v41 = vunpack.c.h.bf16 %v34071_v25 }
 0x2d7   :  { %24080 = vmatpush3.msra.mxu0 %v34050_v35  ;;  %24091 = vmatpush3.msra.mxu1 %v34052_v47  ;;  %v34069_v14 = vld [vmem:[#allocation25_spill] sm:$0xff]  ;;  %v34074_v47 = vld [vmem:[#allocation170_spill] sm:$0xff] }
 0x2d8   :  { %24081 = vmatprep.subr.mxu0 %v25437_v0  ;;  %24092 = vmatprep.subr.mxu1 %v25437_v0  ;;  %v34070_v60 = vunpack.c.h.bf16 %v34069_v14  ;;  %v34073_v35 = vld [vmem:[#allocation169_spill] sm:$0xff] }
 0x2d9   :  { %24082 = vmatpush3.msra.mxu0 %v34053_v48  ;;  %24083 = vmatprep.mubr.msk.f32.mxu0 %vm25438_vm0, %v25437_v0 }
 0x2da   :  { %24093 = vmatpush3.msra.mxu1 %v34054_v19  ;;  %24094 = vmatprep.mubr.msk.f32.mxu1 %vm25438_vm0, %v25437_v0  ;;  %v34075_v19 = vunpack.c.l.bf16 %v34069_v14 }
 0x2db   :  { %24084 = vmatmul.mubr.msk.f32.vlgmr.msra.gmra.mxu0 %vm1171_vm1, %v25325_v20  ;;  %24095 = vmatmul.mubr.msk.f32.vlgmr.msra.gmra.mxu1 %vm1171_vm1, %v25326_v2  ;;  %v34076_v20 = vunpack.c.l.bf16 %v34071_v25 }
 0x2dc   :  { %24097 = vmatprep.subr.mxu0 %v25437_v0  ;;  %24108 = vmatprep.subr.mxu1 %v25437_v0 }
 0x2dd   :  { %24098 = vmatpush3.msra.mxu0 %v34056_v51  ;;  %24109 = vmatpush3.msra.mxu1 %v34058_v3  ;;  %v8979_v8 = vpop.f32.mrf.mxu0  ;;  %v9052_v62 = vpop.f32.mrf.mxu1  ;;  %v34077_v51 = vld [vmem:[#allocation27_spill] sm:$0xff]  ;;  %v34079_v3 = vld [vmem:[#allocation28_spill] sm:$0xff] }
 0x2de   :  { %24099 = vmatprep.subr.mxu0 %v25437_v0  ;;  %24110 = vmatprep.subr.mxu1 %v25437_v0  ;;  %v10558_v58 = vsub.f32 %v34059_v56, %v8979_v8  ;;  %v10559_v55 = vsub.f32 %v34060_v27, %v9052_v62  ;;  %v34078_v12 = vunpack.c.h.bf16 %v34077_v51  ;;  %v34080_v8 = vunpack.c.h.bf16 %v34079_v3  ;;  %v25330_v27 = vld [vmem:[%s32768_s1 + $0x2a] sm:$0x3] }
 0x2df   :  { %24100 = vmatpush3.msra.mxu0 %v34061_v28  ;;  %24111 = vmatpush3.msra.mxu1 %v34062_v30  ;;  %v23667_v59 = vpop.f32.mrf.mxu0  ;;  %v23678_v6 = vpop.f32.mrf.mxu1  ;;  %v34081_v62 = vunpack.c.l.bf16 %v34077_v51  ;;  %v34082_v56 = vunpack.c.l.bf16 %v34079_v3  ;;  %v34085_v30 = vld [vmem:[#allocation30_spill] sm:$0xff] }
 0x2e0   :  { %24101 = vmatprep.subr.mxu0 %v25437_v0  ;;  %24112 = vmatprep.subr.mxu1 %v25437_v0  ;;  %10623 = vst.msk [vmem:[%s32769_s4 + $0x54] sm:$0x3] %vm10580_vm2, %v10558_v58  ;;  %10624 = vst.msk [vmem:[%s32769_s4 + $0x56] sm:$0x3] %vm10580_vm2, %v10559_v55  ;;  %v25329_v58 = vld [vmem:[%s32768_s1 + $0x28] sm:$0x3]  ;;  %v34086_v59 = vunpack.c.h.bf16 %v34085_v30 }
 0x2e1   :  { %24102 = vmatpush3.msra.mxu0 %v34064_v34  ;;  %24113 = vmatpush3.msra.mxu1 %v34066_v52  ;;  %v34083_v55 = vld [vmem:[#allocation29_spill] sm:$0xff]  ;;  %v34087_v34 = vld [vmem:[#allocation175_spill] sm:$0xff]  ;;  %v34088_v52 = vld [vmem:[#allocation176_spill] sm:$0xff] }
 0x2e2   :  { %24103 = vmatprep.subr.mxu0 %v25437_v0  ;;  %24114 = vmatprep.subr.mxu1 %v25437_v0  ;;  %v34084_v28 = vunpack.c.h.bf16 %v34083_v55 }
 0x2e3   :  { %24104 = vmatpush3.msra.mxu0 %v34067_v21  ;;  %24105 = vmatprep.mubr.msk.f32.mxu0 %vm25438_vm0, %v25437_v0 }
 0x2e4   :  { %24115 = vmatpush3.msra.mxu1 %v34068_v53  ;;  %24116 = vmatprep.mubr.msk.f32.mxu1 %vm25438_vm0, %v25437_v0  ;;  %v34089_v53 = vunpack.c.l.bf16 %v34083_v55 }
 0x2e5   :  { %24106 = vmatmul.mubr.msk.f32.vlgmr.msra.gmra.mxu0 %vm1171_vm1, %v25327_v44  ;;  %24117 = vmatmul.mubr.msk.f32.vlgmr.msra.gmra.mxu1 %vm1171_vm1, %v25328_v13  ;;  %v34090_v44 = vunpack.c.l.bf16 %v34085_v30 }
 0x2e6   :  { %24119 = vmatprep.subr.mxu0 %v25437_v0  ;;  %24130 = vmatprep.subr.mxu1 %v25437_v0 }
 0x2e7   :  { %24120 = vmatpush3.msra.mxu0 %v34070_v60  ;;  %24131 = vmatpush3.msra.mxu1 %v34072_v41  ;;  %v9125_v42 = vpop.f32.mrf.mxu0  ;;  %v9198_v57 = vpop.f32.mrf.mxu1  ;;  %v34091_v60 = vld [vmem:[#allocation31_spill] sm:$0xff]  ;;  %v34093_v41 = vld [vmem:[#allocation32_spill] sm:$0xff] }
 0x2e8   :  { %24121 = vmatprep.subr.mxu0 %v25437_v0  ;;  %24132 = vmatprep.subr.mxu1 %v25437_v0  ;;  %v10560_v1 = vsub.f32 %v34073_v35, %v9125_v42  ;;  %v10561_v48 = vsub.f32 %v34074_v47, %v9198_v57  ;;  %v34092_v25 = vunpack.c.h.bf16 %v34091_v60  ;;  %v34094_v42 = vunpack.c.h.bf16 %v34093_v41  ;;  %v25332_v47 = vld [vmem:[%s32768_s1 + $0x2e] sm:$0x3] }
 0x2e9   :  { %24122 = vmatpush3.msra.mxu0 %v34075_v19  ;;  %24133 = vmatpush3.msra.mxu1 %v34076_v20  ;;  %v23689_v2 = vpop.f32.mrf.mxu0  ;;  %v23700_v15 = vpop.f32.mrf.mxu1  ;;  %v34095_v57 = vunpack.c.l.bf16 %v34091_v60  ;;  %v34096_v35 = vunpack.c.l.bf16 %v34093_v41  ;;  %v34099_v20 = vld [vmem:[#allocation34_spill] sm:$0xff] }
 0x2ea   :  { %24123 = vmatprep.subr.mxu0 %v25437_v0  ;;  %24134 = vmatprep.subr.mxu1 %v25437_v0  ;;  %10625 = vst.msk [vmem:[%s32769_s4 + $0x58] sm:$0x3] %vm10580_vm2, %v10560_v1  ;;  %10626 = vst.msk [vmem:[%s32769_s4 + $0x5a] sm:$0x3] %vm10580_vm2, %v10561_v48  ;;  %v25331_v1 = vld [vmem:[%s32768_s1 + $0x2c] sm:$0x3]  ;;  %v34100_v2 = vunpack.c.h.bf16 %v34099_v20 }
 0x2eb   :  { %24124 = vmatpush3.msra.mxu0 %v34078_v12  ;;  %24135 = vmatpush3.msra.mxu1 %v34080_v8  ;;  %v34097_v48 = vld [vmem:[#allocation33_spill] sm:$0xff]  ;;  %v34102_v8 = vld [vmem:[#allocation182_spill] sm:$0xff] }
 0x2ec   :  { %24125 = vmatprep.subr.mxu0 %v25437_v0  ;;  %24136 = vmatprep.subr.mxu1 %v25437_v0  ;;  %v34098_v19 = vunpack.c.h.bf16 %v34097_v48  ;;  %v34101_v12 = vld [vmem:[#allocation181_spill] sm:$0xff] }
 0x2ed   :  { %24126 = vmatpush3.msra.mxu0 %v34081_v62  ;;  %24127 = vmatprep.mubr.msk.f32.mxu0 %vm25438_vm0, %v25437_v0 }
 0x2ee   :  { %24137 = vmatpush3.msra.mxu1 %v34082_v56  ;;  %24138 = vmatprep.mubr.msk.f32.mxu1 %vm25438_vm0, %v25437_v0  ;;  %v34103_v56 = vunpack.c.l.bf16 %v34097_v48 }
 0x2ef   :  { %24128 = vmatmul.mubr.msk.f32.vlgmr.msra.gmra.mxu0 %vm1171_vm1, %v25329_v58  ;;  %24139 = vmatmul.mubr.msk.f32.vlgmr.msra.gmra.mxu1 %vm1171_vm1, %v25330_v27  ;;  %v34104_v58 = vunpack.c.l.bf16 %v34099_v20 }
 0x2f0   :  { %24141 = vmatprep.subr.mxu0 %v25437_v0  ;;  %24152 = vmatprep.subr.mxu1 %v25437_v0 }
 0x2f1   :  { %24142 = vmatpush3.msra.mxu0 %v34084_v28  ;;  %24153 = vmatpush3.msra.mxu1 %v34086_v59  ;;  %v9271_v6 = vpop.f32.mrf.mxu0  ;;  %v9344_v33 = vpop.f32.mrf.mxu1  ;;  %v34105_v28 = vld [vmem:[#allocation35_spill] sm:$0xff]  ;;  %v34107_v59 = vld [vmem:[#allocation36_spill] sm:$0xff] }
 0x2f2   :  { %24143 = vmatprep.subr.mxu0 %v25437_v0  ;;  %24154 = vmatprep.subr.mxu1 %v25437_v0  ;;  %v10562_v49 = vsub.f32 %v34087_v34, %v9271_v6  ;;  %v10563_v21 = vsub.f32 %v34088_v52, %v9344_v33  ;;  %v34106_v30 = vunpack.c.h.bf16 %v34105_v28  ;;  %v34108_v6 = vunpack.c.h.bf16 %v34107_v59  ;;  %v25334_v52 = vld [vmem:[%s32768_s1 + $0x32] sm:$0x3] }
 0x2f3   :  { %24144 = vmatpush3.msra.mxu0 %v34089_v53  ;;  %24155 = vmatpush3.msra.mxu1 %v34090_v44  ;;  %v23711_v13 = vpop.f32.mrf.mxu0  ;;  %v23722_v14 = vpop.f32.mrf.mxu1  ;;  %v34109_v33 = vunpack.c.l.bf16 %v34105_v28  ;;  %v34110_v34 = vunpack.c.l.bf16 %v34107_v59  ;;  %v34113_v44 = vld [vmem:[#allocation38_spill] sm:$0xff] }
 0x2f4   :  { %24145 = vmatprep.subr.mxu0 %v25437_v0  ;;  %24156 = vmatprep.subr.mxu1 %v25437_v0  ;;  %10627 = vst.msk [vmem:[%s32769_s4 + $0x5c] sm:$0x3] %vm10580_vm2, %v10562_v49  ;;  %10628 = vst.msk [vmem:[%s32769_s4 + $0x5e] sm:$0x3] %vm10580_vm2, %v10563_v21  ;;  %v25333_v49 = vld [vmem:[%s32768_s1 + $0x30] sm:$0x3]  ;;  %v34114_v13 = vunpack.c.h.bf16 %v34113_v44 }
 0x2f5   :  { %24146 = vmatpush3.msra.mxu0 %v34092_v25  ;;  %24157 = vmatpush3.msra.mxu1 %v34094_v42  ;;  %v34111_v21 = vld [vmem:[#allocation37_spill] sm:$0xff]  ;;  %v34115_v25 = vld [vmem:[#allocation187_spill] sm:$0xff]  ;;  %v34116_v42 = vld [vmem:[#allocation188_spill] sm:$0xff] }
 0x2f6   :  { %24147 = vmatprep.subr.mxu0 %v25437_v0  ;;  %24158 = vmatprep.subr.mxu1 %v25437_v0  ;;  %v34112_v53 = vunpack.c.h.bf16 %v34111_v21 }
 0x2f7   :  { %24148 = vmatpush3.msra.mxu0 %v34095_v57  ;;  %24149 = vmatprep.mubr.msk.f32.mxu0 %vm25438_vm0, %v25437_v0 }
 0x2f8   :  { %24159 = vmatpush3.msra.mxu1 %v34096_v35  ;;  %24160 = vmatprep.mubr.msk.f32.mxu1 %vm25438_vm0, %v25437_v0  ;;  %v34117_v35 = vunpack.c.l.bf16 %v34111_v21 }
 0x2f9   :  { %24150 = vmatmul.mubr.msk.f32.vlgmr.msra.gmra.mxu0 %vm1171_vm1, %v25331_v1  ;;  %24161 = vmatmul.mubr.msk.f32.vlgmr.msra.gmra.mxu1 %vm1171_vm1, %v25332_v47  ;;  %v34118_v1 = vunpack.c.l.bf16 %v34113_v44 }
 0x2fa   :  { %24163 = vmatprep.subr.mxu0 %v25437_v0  ;;  %24174 = vmatprep.subr.mxu1 %v25437_v0 }
 0x2fb   :  { %24164 = vmatpush3.msra.mxu0 %v34098_v19  ;;  %24175 = vmatpush3.msra.mxu1 %v34100_v2  ;;  %v9417_v15 = vpop.f32.mrf.mxu0  ;;  %v9490_v51 = vpop.f32.mrf.mxu1  ;;  %v34119_v19 = vld [vmem:[#allocation39_spill] sm:$0xff]  ;;  %v34121_v2 = vld [vmem:[#allocation40_spill] sm:$0xff] }
 0x2fc   :  { %24165 = vmatprep.subr.mxu0 %v25437_v0  ;;  %24176 = vmatprep.subr.mxu1 %v25437_v0  ;;  %v10564_v3 = vsub.f32 %v34101_v12, %v9417_v15  ;;  %v10565_v62 = vsub.f32 %v34102_v8, %v9490_v51  ;;  %v34120_v20 = vunpack.c.h.bf16 %v34119_v19  ;;  %v34122_v15 = vunpack.c.h.bf16 %v34121_v2  ;;  %v25336_v8 = vld [vmem:[%s32768_s1 + $0x36] sm:$0x3] }
 0x2fd   :  { %24166 = vmatpush3.msra.mxu0 %v34103_v56  ;;  %24177 = vmatpush3.msra.mxu1 %v34104_v58  ;;  %v23733_v27 = vpop.f32.mrf.mxu0  ;;  %v23744_v55 = vpop.f32.mrf.mxu1  ;;  %v34123_v51 = vunpack.c.l.bf16 %v34119_v19  ;;  %v34124_v12 = vunpack.c.l.bf16 %v34121_v2  ;;  %v34127_v58 = vld [vmem:[#allocation42_spill] sm:$0xff] }
 0x2fe   :  { %24167 = vmatprep.subr.mxu0 %v25437_v0  ;;  %24178 = vmatprep.subr.mxu1 %v25437_v0  ;;  %10629 = vst.msk [vmem:[%s32769_s4 + $0x60] sm:$0x3] %vm10580_vm2, %v10564_v3  ;;  %10630 = vst.msk [vmem:[%s32769_s4 + $0x62] sm:$0x3] %vm10580_vm2, %v10565_v62  ;;  %v25335_v3 = vld [vmem:[%s32768_s1 + $0x34] sm:$0x3]  ;;  %v34128_v27 = vunpack.c.h.bf16 %v34127_v58 }
 0x2ff   :  { %24168 = vmatpush3.msra.mxu0 %v34106_v30  ;;  %24179 = vmatpush3.msra.mxu1 %v34108_v6  ;;  %v34125_v62 = vld [vmem:[#allocation41_spill] sm:$0xff]  ;;  %v34130_v6 = vld [vmem:[#allocation194_spill] sm:$0xff] }
 0x300   :  { %24169 = vmatprep.subr.mxu0 %v25437_v0  ;;  %24180 = vmatprep.subr.mxu1 %v25437_v0  ;;  %v34126_v56 = vunpack.c.h.bf16 %v34125_v62  ;;  %v34129_v30 = vld [vmem:[#allocation193_spill] sm:$0xff] }
 0x301   :  { %24170 = vmatpush3.msra.mxu0 %v34109_v33  ;;  %24171 = vmatprep.mubr.msk.f32.mxu0 %vm25438_vm0, %v25437_v0 }
 0x302   :  { %24181 = vmatpush3.msra.mxu1 %v34110_v34  ;;  %24182 = vmatprep.mubr.msk.f32.mxu1 %vm25438_vm0, %v25437_v0  ;;  %v34131_v34 = vunpack.c.l.bf16 %v34125_v62 }
 0x303   :  { %24172 = vmatmul.mubr.msk.f32.vlgmr.msra.gmra.mxu0 %vm1171_vm1, %v25333_v49  ;;  %24183 = vmatmul.mubr.msk.f32.vlgmr.msra.gmra.mxu1 %vm1171_vm1, %v25334_v52  ;;  %v34132_v49 = vunpack.c.l.bf16 %v34127_v58 }
 0x304   :  { %24185 = vmatprep.subr.mxu0 %v25437_v0  ;;  %24196 = vmatprep.subr.mxu1 %v25437_v0 }
 0x305   :  { %24186 = vmatpush3.msra.mxu0 %v34112_v53  ;;  %24197 = vmatpush3.msra.mxu1 %v34114_v13  ;;  %v9563_v14 = vpop.f32.mrf.mxu0  ;;  %v9636_v60 = vpop.f32.mrf.mxu1  ;;  %v34133_v53 = vld [vmem:[#allocation43_spill] sm:$0xff]  ;;  %v34135_v13 = vld [vmem:[#allocation44_spill] sm:$0xff] }
 0x306   :  { %24187 = vmatprep.subr.mxu0 %v25437_v0  ;;  %24198 = vmatprep.subr.mxu1 %v25437_v0  ;;  %v10566_v41 = vsub.f32 %v34115_v25, %v9563_v14  ;;  %v10567_v57 = vsub.f32 %v34116_v42, %v9636_v60  ;;  %v34134_v44 = vunpack.c.h.bf16 %v34133_v53  ;;  %v34136_v14 = vunpack.c.h.bf16 %v34135_v13  ;;  %v25338_v42 = vld [vmem:[%s32768_s1 + $0x3a] sm:$0x3] }
 0x307   :  { %24188 = vmatpush3.msra.mxu0 %v34117_v35  ;;  %24199 = vmatpush3.msra.mxu1 %v34118_v1  ;;  %v23755_v47 = vpop.f32.mrf.mxu0  ;;  %v23766_v48 = vpop.f32.mrf.mxu1  ;;  %v34137_v60 = vunpack.c.l.bf16 %v34133_v53  ;;  %v34138_v25 = vunpack.c.l.bf16 %v34135_v13  ;;  %v34141_v1 = vld [vmem:[#allocation46_spill] sm:$0xff] }
 0x308   :  { %24189 = vmatprep.subr.mxu0 %v25437_v0  ;;  %24200 = vmatprep.subr.mxu1 %v25437_v0  ;;  %10631 = vst.msk [vmem:[%s32769_s4 + $0x64] sm:$0x3] %vm10580_vm2, %v10566_v41  ;;  %10632 = vst.msk [vmem:[%s32769_s4 + $0x66] sm:$0x3] %vm10580_vm2, %v10567_v57  ;;  %v25337_v41 = vld [vmem:[%s32768_s1 + $0x38] sm:$0x3]  ;;  %v34142_v47 = vunpack.c.h.bf16 %v34141_v1 }
 0x309   :  { %24190 = vmatpush3.msra.mxu0 %v34120_v20  ;;  %24201 = vmatpush3.msra.mxu1 %v34122_v15  ;;  %v34139_v57 = vld [vmem:[#allocation45_spill] sm:$0xff]  ;;  %v34143_v20 = vld [vmem:[#allocation199_spill] sm:$0xff]  ;;  %v34144_v15 = vld [vmem:[#allocation200_spill] sm:$0xff] }
 0x30a   :  { %24191 = vmatprep.subr.mxu0 %v25437_v0  ;;  %24202 = vmatprep.subr.mxu1 %v25437_v0  ;;  %v34140_v35 = vunpack.c.h.bf16 %v34139_v57 }
 0x30b   :  { %24192 = vmatpush3.msra.mxu0 %v34123_v51  ;;  %24193 = vmatprep.mubr.msk.f32.mxu0 %vm25438_vm0, %v25437_v0 }
 0x30c   :  { %24203 = vmatpush3.msra.mxu1 %v34124_v12  ;;  %24204 = vmatprep.mubr.msk.f32.mxu1 %vm25438_vm0, %v25437_v0  ;;  %v34145_v12 = vunpack.c.l.bf16 %v34139_v57 }
 0x30d   :  { %24194 = vmatmul.mubr.msk.f32.vlgmr.msra.gmra.mxu0 %vm1171_vm1, %v25335_v3  ;;  %24205 = vmatmul.mubr.msk.f32.vlgmr.msra.gmra.mxu1 %vm1171_vm1, %v25336_v8  ;;  %v34146_v3 = vunpack.c.l.bf16 %v34141_v1 }
 0x30e   :  { %24207 = vmatprep.subr.mxu0 %v25437_v0  ;;  %24218 = vmatprep.subr.mxu1 %v25437_v0 }
 0x30f   :  { %24208 = vmatpush3.msra.mxu0 %v34126_v56  ;;  %24219 = vmatpush3.msra.mxu1 %v34128_v27  ;;  %v9709_v55 = vpop.f32.mrf.mxu0  ;;  %v9782_v28 = vpop.f32.mrf.mxu1  ;;  %v34147_v56 = vld [vmem:[#allocation47_spill] sm:$0xff]  ;;  %v34149_v27 = vld [vmem:[#allocation48_spill] sm:$0xff] }
 0x310   :  { %24209 = vmatprep.subr.mxu0 %v25437_v0  ;;  %24220 = vmatprep.subr.mxu1 %v25437_v0  ;;  %v10568_v59 = vsub.f32 %v34129_v30, %v9709_v55  ;;  %v10569_v33 = vsub.f32 %v34130_v6, %v9782_v28  ;;  %v34148_v58 = vunpack.c.h.bf16 %v34147_v56  ;;  %v34150_v55 = vunpack.c.h.bf16 %v34149_v27  ;;  %v25340_v6 = vld [vmem:[%s32768_s1 + $0x3e] sm:$0x3] }
 0x311   :  { %24210 = vmatpush3.msra.mxu0 %v34131_v34  ;;  %24221 = vmatpush3.msra.mxu1 %v34132_v49  ;;  %v23777_v52 = vpop.f32.mrf.mxu0  ;;  %v23788_v21 = vpop.f32.mrf.mxu1  ;;  %v34151_v28 = vunpack.c.l.bf16 %v34147_v56  ;;  %v34152_v30 = vunpack.c.l.bf16 %v34149_v27  ;;  %v34155_v49 = vld [vmem:[#allocation50_spill] sm:$0xff] }
 0x312   :  { %24211 = vmatprep.subr.mxu0 %v25437_v0  ;;  %24222 = vmatprep.subr.mxu1 %v25437_v0  ;;  %10633 = vst.msk [vmem:[%s32769_s4 + $0x68] sm:$0x3] %vm10580_vm2, %v10568_v59  ;;  %10634 = vst.msk [vmem:[%s32769_s4 + $0x6a] sm:$0x3] %vm10580_vm2, %v10569_v33  ;;  %v25339_v59 = vld [vmem:[%s32768_s1 + $0x3c] sm:$0x3]  ;;  %v34156_v52 = vunpack.c.h.bf16 %v34155_v49 }
 0x313   :  { %24212 = vmatpush3.msra.mxu0 %v34134_v44  ;;  %24223 = vmatpush3.msra.mxu1 %v34136_v14  ;;  %v34153_v33 = vld [vmem:[#allocation49_spill] sm:$0xff]  ;;  %v34158_v14 = vld [vmem:[#allocation206_spill] sm:$0xff] }
 0x314   :  { %24213 = vmatprep.subr.mxu0 %v25437_v0  ;;  %24224 = vmatprep.subr.mxu1 %v25437_v0  ;;  %v34154_v34 = vunpack.c.h.bf16 %v34153_v33  ;;  %v34157_v44 = vld [vmem:[#allocation205_spill] sm:$0xff] }
 0x315   :  { %24214 = vmatpush3.msra.mxu0 %v34137_v60  ;;  %24215 = vmatprep.mubr.msk.f32.mxu0 %vm25438_vm0, %v25437_v0 }
 0x316   :  { %24225 = vmatpush3.msra.mxu1 %v34138_v25  ;;  %24226 = vmatprep.mubr.msk.f32.mxu1 %vm25438_vm0, %v25437_v0  ;;  %v34159_v25 = vunpack.c.l.bf16 %v34153_v33 }
 0x317   :  { %24216 = vmatmul.mubr.msk.f32.vlgmr.msra.gmra.mxu0 %vm1171_vm1, %v25337_v41  ;;  %24227 = vmatmul.mubr.msk.f32.vlgmr.msra.gmra.mxu1 %vm1171_vm1, %v25338_v42  ;;  %v34160_v41 = vunpack.c.l.bf16 %v34155_v49 }
 0x318   :  { %24229 = vmatprep.subr.mxu0 %v25437_v0  ;;  %24240 = vmatprep.subr.mxu1 %v25437_v0 }
 0x319   :  { %24230 = vmatpush3.msra.mxu0 %v34140_v35  ;;  %24241 = vmatpush3.msra.mxu1 %v34142_v47  ;;  %v9855_v48 = vpop.f32.mrf.mxu0  ;;  %v9928_v19 = vpop.f32.mrf.mxu1  ;;  %v34161_v35 = vld [vmem:[#allocation51_spill] sm:$0xff]  ;;  %v34163_v47 = vld [vmem:[#allocation52_spill] sm:$0xff] }
 0x31a   :  { %24231 = vmatprep.subr.mxu0 %v25437_v0  ;;  %24242 = vmatprep.subr.mxu1 %v25437_v0  ;;  %v10570_v2 = vsub.f32 %v34143_v20, %v9855_v48  ;;  %v10571_v51 = vsub.f32 %v34144_v15, %v9928_v19  ;;  %v34162_v1 = vunpack.c.h.bf16 %v34161_v35  ;;  %v34164_v48 = vunpack.c.h.bf16 %v34163_v47  ;;  %v25342_v15 = vld [vmem:[%s32768_s1 + $0x42] sm:$0x3] }
 0x31b   :  { %24232 = vmatpush3.msra.mxu0 %v34145_v12  ;;  %24243 = vmatpush3.msra.mxu1 %v34146_v3  ;;  %v23799_v8 = vpop.f32.mrf.mxu0  ;;  %v23810_v62 = vpop.f32.mrf.mxu1  ;;  %v34165_v19 = vunpack.c.l.bf16 %v34161_v35  ;;  %v34166_v20 = vunpack.c.l.bf16 %v34163_v47  ;;  %v34169_v3 = vld [vmem:[#allocation54_spill] sm:$0xff] }
 0x31c   :  { %24233 = vmatprep.subr.mxu0 %v25437_v0  ;;  %24244 = vmatprep.subr.mxu1 %v25437_v0  ;;  %10635 = vst.msk [vmem:[%s32769_s4 + $0x6c] sm:$0x3] %vm10580_vm2, %v10570_v2  ;;  %10636 = vst.msk [vmem:[%s32769_s4 + $0x6e] sm:$0x3] %vm10580_vm2, %v10571_v51  ;;  %v25341_v2 = vld [vmem:[%s32768_s1 + $0x40] sm:$0x3]  ;;  %v34170_v8 = vunpack.c.h.bf16 %v34169_v3 }
 0x31d   :  { %24234 = vmatpush3.msra.mxu0 %v34148_v58  ;;  %24245 = vmatpush3.msra.mxu1 %v34150_v55  ;;  %v34167_v51 = vld [vmem:[#allocation53_spill] sm:$0xff]  ;;  %v34171_v58 = vld [vmem:[#allocation211_spill] sm:$0xff]  ;;  %v34172_v55 = vld [vmem:[#allocation212_spill] sm:$0xff] }
 0x31e   :  { %24235 = vmatprep.subr.mxu0 %v25437_v0  ;;  %24246 = vmatprep.subr.mxu1 %v25437_v0  ;;  %v34168_v12 = vunpack.c.h.bf16 %v34167_v51 }
 0x31f   :  { %24236 = vmatpush3.msra.mxu0 %v34151_v28  ;;  %24237 = vmatprep.mubr.msk.f32.mxu0 %vm25438_vm0, %v25437_v0 }
 0x320   :  { %24247 = vmatpush3.msra.mxu1 %v34152_v30  ;;  %24248 = vmatprep.mubr.msk.f32.mxu1 %vm25438_vm0, %v25437_v0  ;;  %v34173_v30 = vunpack.c.l.bf16 %v34167_v51 }
 0x321   :  { %24238 = vmatmul.mubr.msk.f32.vlgmr.msra.gmra.mxu0 %vm1171_vm1, %v25339_v59  ;;  %24249 = vmatmul.mubr.msk.f32.vlgmr.msra.gmra.mxu1 %vm1171_vm1, %v25340_v6  ;;  %v34174_v59 = vunpack.c.l.bf16 %v34169_v3 }
 0x322   :  { %24251 = vmatprep.subr.mxu0 %v25437_v0  ;;  %24262 = vmatprep.subr.mxu1 %v25437_v0 }
 0x323   :  { %24252 = vmatpush3.msra.mxu0 %v34154_v34  ;;  %24263 = vmatpush3.msra.mxu1 %v34156_v52  ;;  %v10001_v21 = vpop.f32.mrf.mxu0  ;;  %v10074_v53 = vpop.f32.mrf.mxu1  ;;  %v34175_v34 = vld [vmem:[#allocation55_spill] sm:$0xff]  ;;  %v34177_v52 = vld [vmem:[#allocation56_spill] sm:$0xff] }
 0x324   :  { %24253 = vmatprep.subr.mxu0 %v25437_v0  ;;  %24264 = vmatprep.subr.mxu1 %v25437_v0  ;;  %v10572_v13 = vsub.f32 %v34157_v44, %v10001_v21  ;;  %v10573_v60 = vsub.f32 %v34158_v14, %v10074_v53  ;;  %v34176_v49 = vunpack.c.h.bf16 %v34175_v34  ;;  %v34178_v21 = vunpack.c.h.bf16 %v34177_v52  ;;  %v25344_v14 = vld [vmem:[%s32768_s1 + $0x46] sm:$0x3] }
 0x325   :  { %24254 = vmatpush3.msra.mxu0 %v34159_v25  ;;  %24265 = vmatpush3.msra.mxu1 %v34160_v41  ;;  %v23821_v42 = vpop.f32.mrf.mxu0  ;;  %v23832_v57 = vpop.f32.mrf.mxu1  ;;  %v34179_v53 = vunpack.c.l.bf16 %v34175_v34  ;;  %v34180_v44 = vunpack.c.l.bf16 %v34177_v52  ;;  %v34183_v41 = vld [vmem:[#allocation58_spill] sm:$0xff] }
 0x326   :  { %24255 = vmatprep.subr.mxu0 %v25437_v0  ;;  %24266 = vmatprep.subr.mxu1 %v25437_v0  ;;  %10637 = vst.msk [vmem:[%s32769_s4 + $0x70] sm:$0x3] %vm10580_vm2, %v10572_v13  ;;  %10638 = vst.msk [vmem:[%s32769_s4 + $0x72] sm:$0x3] %vm10580_vm2, %v10573_v60  ;;  %v25343_v13 = vld [vmem:[%s32768_s1 + $0x44] sm:$0x3]  ;;  %v34184_v42 = vunpack.c.h.bf16 %v34183_v41 }
 0x327   :  { %24256 = vmatpush3.msra.mxu0 %v34162_v1  ;;  %24267 = vmatpush3.msra.mxu1 %v34164_v48  ;;  %v34181_v60 = vld [vmem:[#allocation57_spill] sm:$0xff]  ;;  %v34186_v48 = vld [vmem:[#allocation218_spill] sm:$0xff] }
 0x328   :  { %24257 = vmatprep.subr.mxu0 %v25437_v0  ;;  %24268 = vmatprep.subr.mxu1 %v25437_v0  ;;  %v34182_v25 = vunpack.c.h.bf16 %v34181_v60  ;;  %v34185_v1 = vld [vmem:[#allocation217_spill] sm:$0xff] }
 0x329   :  { %24258 = vmatpush3.msra.mxu0 %v34165_v19  ;;  %24259 = vmatprep.mubr.msk.f32.mxu0 %vm25438_vm0, %v25437_v0 }
 0x32a   :  { %24269 = vmatpush3.msra.mxu1 %v34166_v20  ;;  %24270 = vmatprep.mubr.msk.f32.mxu1 %vm25438_vm0, %v25437_v0  ;;  %v34187_v20 = vunpack.c.l.bf16 %v34181_v60 }
 0x32b   :  { %24260 = vmatmul.mubr.msk.f32.vlgmr.msra.gmra.mxu0 %vm1171_vm1, %v25341_v2  ;;  %24271 = vmatmul.mubr.msk.f32.vlgmr.msra.gmra.mxu1 %vm1171_vm1, %v25342_v15  ;;  %v34188_v2 = vunpack.c.l.bf16 %v34183_v41 }
 0x32c   :  { %24273 = vmatprep.subr.mxu0 %v25437_v0  ;;  %24284 = vmatprep.subr.mxu1 %v25437_v0 }
 0x32d   :  { %24274 = vmatpush3.msra.mxu0 %v34168_v12  ;;  %24285 = vmatpush3.msra.mxu1 %v34170_v8  ;;  %v10147_v62 = vpop.f32.mrf.mxu0  ;;  %v10220_v56 = vpop.f32.mrf.mxu1  ;;  %v34189_v12 = vld [vmem:[#allocation59_spill] sm:$0xff]  ;;  %v34191_v8 = vld [vmem:[#allocation60_spill] sm:$0xff] }
 0x32e   :  { %24275 = vmatprep.subr.mxu0 %v25437_v0  ;;  %24286 = vmatprep.subr.mxu1 %v25437_v0  ;;  %v10574_v27 = vsub.f32 %v34171_v58, %v10147_v62  ;;  %v10575_v28 = vsub.f32 %v34172_v55, %v10220_v56  ;;  %v34190_v3 = vunpack.c.h.bf16 %v34189_v12  ;;  %v34192_v62 = vunpack.c.h.bf16 %v34191_v8  ;;  %v25346_v55 = vld [vmem:[%s32768_s1 + $0x4a] sm:$0x3] }
 0x32f   :  { %24276 = vmatpush3.msra.mxu0 %v34173_v30  ;;  %24287 = vmatpush3.msra.mxu1 %v34174_v59  ;;  %v23843_v6 = vpop.f32.mrf.mxu0  ;;  %v23854_v33 = vpop.f32.mrf.mxu1  ;;  %v34193_v56 = vunpack.c.l.bf16 %v34189_v12  ;;  %v34194_v58 = vunpack.c.l.bf16 %v34191_v8  ;;  %v34197_v59 = vld [vmem:[#allocation62_spill] sm:$0xff] }
 0x330   :  { %24277 = vmatprep.subr.mxu0 %v25437_v0  ;;  %24288 = vmatprep.subr.mxu1 %v25437_v0  ;;  %10639 = vst.msk [vmem:[%s32769_s4 + $0x74] sm:$0x3] %vm10580_vm2, %v10574_v27  ;;  %10640 = vst.msk [vmem:[%s32769_s4 + $0x76] sm:$0x3] %vm10580_vm2, %v10575_v28  ;;  %v25345_v27 = vld [vmem:[%s32768_s1 + $0x48] sm:$0x3]  ;;  %v34198_v6 = vunpack.c.h.bf16 %v34197_v59 }
 0x331   :  { %24278 = vmatpush3.msra.mxu0 %v34176_v49  ;;  %24289 = vmatpush3.msra.mxu1 %v34178_v21  ;;  %v34195_v28 = vld [vmem:[#allocation61_spill] sm:$0xff]  ;;  %v34199_v49 = vld [vmem:[#allocation223_spill] sm:$0xff]  ;;  %v34200_v21 = vld [vmem:[#allocation224_spill] sm:$0xff] }
 0x332   :  { %24279 = vmatprep.subr.mxu0 %v25437_v0  ;;  %24290 = vmatprep.subr.mxu1 %v25437_v0  ;;  %v34196_v30 = vunpack.c.h.bf16 %v34195_v28 }
 0x333   :  { %24280 = vmatpush3.msra.mxu0 %v34179_v53  ;;  %24281 = vmatprep.mubr.msk.f32.mxu0 %vm25438_vm0, %v25437_v0 }
 0x334   :  { %24291 = vmatpush3.msra.mxu1 %v34180_v44  ;;  %24292 = vmatprep.mubr.msk.f32.mxu1 %vm25438_vm0, %v25437_v0  ;;  %v34201_v44 = vunpack.c.l.bf16 %v34195_v28 }
 0x335   :  { %24282 = vmatmul.mubr.msk.f32.vlgmr.msra.gmra.mxu0 %vm1171_vm1, %v25343_v13  ;;  %24293 = vmatmul.mubr.msk.f32.vlgmr.msra.gmra.mxu1 %vm1171_vm1, %v25344_v14  ;;  %v34202_v13 = vunpack.c.l.bf16 %v34197_v59 }
 0x336   :  { %24295 = vmatprep.subr.mxu0 %v25437_v0  ;;  %24306 = vmatprep.subr.mxu1 %v25437_v0 }
 0x337   :  { %24296 = vmatpush3.msra.mxu0 %v34182_v25  ;;  %24307 = vmatpush3.msra.mxu1 %v34184_v42  ;;  %v10293_v57 = vpop.f32.mrf.mxu0  ;;  %v10366_v35 = vpop.f32.mrf.mxu1  ;;  %v34203_v25 = vld [vmem:[#allocation63_spill] sm:$0xff]  ;;  %v34205_v42 = vld [vmem:[#allocation64_spill] sm:$0xff] }
 0x338   :  { %24297 = vmatprep.subr.mxu0 %v25437_v0  ;;  %24308 = vmatprep.subr.mxu1 %v25437_v0  ;;  %v10576_v47 = vsub.f32 %v34185_v1, %v10293_v57  ;;  %v10577_v19 = vsub.f32 %v34186_v48, %v10366_v35  ;;  %v34204_v41 = vunpack.c.h.bf16 %v34203_v25  ;;  %v34206_v57 = vunpack.c.h.bf16 %v34205_v42  ;;  %v25348_v48 = vld [vmem:[%s32768_s1 + $0x4e] sm:$0x3] }
 0x339   :  { %24298 = vmatpush3.msra.mxu0 %v34187_v20  ;;  %24309 = vmatpush3.msra.mxu1 %v34188_v2  ;;  %v23865_v15 = vpop.f32.mrf.mxu0  ;;  %v23876_v51 = vpop.f32.mrf.mxu1  ;;  %v34207_v35 = vunpack.c.l.bf16 %v34203_v25  ;;  %v34208_v1 = vunpack.c.l.bf16 %v34205_v42  ;;  %v34211_v2 = vld [vmem:[#allocation66_spill] sm:$0xff] }
 0x33a   :  { %24299 = vmatprep.subr.mxu0 %v25437_v0  ;;  %24310 = vmatprep.subr.mxu1 %v25437_v0  ;;  %10641 = vst.msk [vmem:[%s32769_s4 + $0x78] sm:$0x3] %vm10580_vm2, %v10576_v47  ;;  %10642 = vst.msk [vmem:[%s32769_s4 + $0x7a] sm:$0x3] %vm10580_vm2, %v10577_v19  ;;  %v25347_v47 = vld [vmem:[%s32768_s1 + $0x4c] sm:$0x3]  ;;  %v34212_v15 = vunpack.c.h.bf16 %v34211_v2  ;;  %v34214_v8 = vunpack.c.l.bf16 %v34211_v2 }
 0x33b   :  { %24300 = vmatpush3.msra.mxu0 %v34190_v3  ;;  %24311 = vmatpush3.msra.mxu1 %v34192_v62  ;;  %v34209_v19 = vld [vmem:[#allocation65_spill] sm:$0xff] }
 0x33c   :  { %24301 = vmatprep.subr.mxu0 %v25437_v0  ;;  %24312 = vmatprep.subr.mxu1 %v25437_v0  ;;  %v34210_v20 = vunpack.c.h.bf16 %v34209_v19  ;;  %v34213_v3 = vunpack.c.l.bf16 %v34209_v19  ;;  %v25352_v19 = vld [vmem:[%s32768_s1 + $0x56] sm:$0x3] }
 0x33d   :  { %24302 = vmatpush3.msra.mxu0 %v34193_v56  ;;  %24303 = vmatprep.mubr.msk.f32.mxu0 %vm25438_vm0, %v25437_v0 }
 0x33e   :  { %24313 = vmatpush3.msra.mxu1 %v34194_v58  ;;  %24314 = vmatprep.mubr.msk.f32.mxu1 %vm25438_vm0, %v25437_v0  ;;  %v34215_v58 = vld [vmem:[#allocation67_spill] sm:$0xff] }
 0x33f   :  { %24304 = vmatmul.mubr.msk.f32.vlgmr.msra.gmra.mxu0 %vm1171_vm1, %v25345_v27  ;;  %24315 = vmatmul.mubr.msk.f32.vlgmr.msra.gmra.mxu1 %vm1171_vm1, %v25346_v55  ;;  %v34216_v27 = vunpack.c.h.bf16 %v34215_v58  ;;  %v34217_v55 = vld [vmem:[#allocation68_spill] sm:$0xff] }
 0x340   :  { %24317 = vmatprep.subr.mxu0 %v25437_v0  ;;  %24328 = vmatprep.subr.mxu1 %v25437_v0  ;;  %v34218_v28 = vunpack.c.h.bf16 %v34217_v55  ;;  %v34220_v59 = vunpack.c.l.bf16 %v34217_v55 }
 0x341   :  { %24318 = vmatpush3.msra.mxu0 %v34196_v30  ;;  %24329 = vmatpush3.msra.mxu1 %v34198_v6  ;;  %v10439_v33 = vpop.f32.mrf.mxu0  ;;  %v10512_v34 = vpop.f32.mrf.mxu1  ;;  %v34219_v30 = vunpack.c.l.bf16 %v34215_v58  ;;  %v25349_v6 = vld [vmem:[%s32768_s1 + $0x50] sm:$0x3] }
 0x342   :  { %24319 = vmatprep.subr.mxu0 %v25437_v0  ;;  %24330 = vmatprep.subr.mxu1 %v25437_v0  ;;  %v10578_v52 = vsub.f32 %v34199_v49, %v10439_v33  ;;  %v10579_v53 = vsub.f32 %v34200_v21, %v10512_v34  ;;  %v25350_v33 = vld [vmem:[%s32768_s1 + $0x52] sm:$0x3]  ;;  %v34221_v34 = vld [vmem:[#allocation69_spill] sm:$0xff] }
 0x343   :  { %24320 = vmatpush3.msra.mxu0 %v34201_v44  ;;  %24331 = vmatpush3.msra.mxu1 %v34202_v13  ;;  %v23887_v14 = vpop.f32.mrf.mxu0  ;;  %v23898_v60 = vpop.f32.mrf.mxu1  ;;  %v34222_v49 = vunpack.c.h.bf16 %v34221_v34  ;;  %v34225_v13 = vunpack.c.l.bf16 %v34221_v34 }
 0x344   :  { %24321 = vmatprep.subr.mxu0 %v25437_v0  ;;  %24332 = vmatprep.subr.mxu1 %v25437_v0  ;;  %10643 = vst.msk [vmem:[%s32769_s4 + $0x7c] sm:$0x3] %vm10580_vm2, %v10578_v52  ;;  %10644 = vst.msk [vmem:[%s32769_s4 + $0x7e] sm:$0x3] %vm10580_vm2, %v10579_v53  ;;  %v34223_v52 = vld [vmem:[#allocation70_spill] sm:$0xff] }
 0x345   :  { %24322 = vmatpush3.msra.mxu0 %v34204_v41  ;;  %24333 = vmatpush3.msra.mxu1 %v34206_v57  ;;  %v34224_v21 = vunpack.c.h.bf16 %v34223_v52  ;;  %v34226_v14 = vunpack.c.l.bf16 %v34223_v52  ;;  %v34227_v41 = vld [vmem:[#allocation71_spill] sm:$0xff]  ;;  %v34229_v57 = vld [vmem:[#allocation72_spill] sm:$0xff]  ;;  %v25354_v52 = vld [vmem:[%s32768_s1 + $0x5a] sm:$0x3] }
 0x346   :  { %24323 = vmatprep.subr.mxu0 %v25437_v0  ;;  %24334 = vmatprep.subr.mxu1 %v25437_v0  ;;  %v34228_v42 = vunpack.c.h.bf16 %v34227_v41 }
 0x347   :  { %24324 = vmatpush3.msra.mxu0 %v34207_v35  ;;  %24325 = vmatprep.mubr.msk.f32.mxu0 %vm25438_vm0, %v25437_v0  ;;  %v34230_v35 = vunpack.c.h.bf16 %v34229_v57 }
 0x348   :  { %24335 = vmatpush3.msra.mxu1 %v34208_v1  ;;  %24336 = vmatprep.mubr.msk.f32.mxu1 %vm25438_vm0, %v25437_v0  ;;  %v34231_v1 = vunpack.c.l.bf16 %v34227_v41 }
 0x349   :  { %24326 = vmatmul.mubr.msk.f32.vlgmr.msra.gmra.mxu0 %vm1171_vm1, %v25347_v47  ;;  %24337 = vmatmul.mubr.msk.f32.vlgmr.msra.gmra.mxu1 %vm1171_vm1, %v25348_v48  ;;  %v34232_v47 = vunpack.c.l.bf16 %v34229_v57  ;;  %v25351_v48 = vld [vmem:[%s32768_s1 + $0x54] sm:$0x3] }
 0x34a   :  { %24339 = vmatprep.subr.mxu0 %v25437_v0  ;;  %24350 = vmatprep.subr.mxu1 %v25437_v0 }
 0x34b   :  { %24340 = vmatpush3.msra.mxu0 %v34210_v20  ;;  %24351 = vmatpush3.msra.mxu1 %v34212_v15  ;;  %v30739_v51 = vpop.f32.mrf.mxu0  ;;  %v30741_v12 = vpop.f32.mrf.mxu1  ;;  %v34233_v20 = vld [vmem:[#allocation73_spill] sm:$0xff]  ;;  %v34235_v15 = vld [vmem:[#allocation74_spill] sm:$0xff] }
 0x34c   :  { %24341 = vmatprep.subr.mxu0 %v25437_v0  ;;  %24352 = vmatprep.subr.mxu1 %v25437_v0  ;;  %v34234_v2 = vunpack.c.h.bf16 %v34233_v20  ;;  %v34238_v58 = vunpack.c.l.bf16 %v34235_v15 }
 0x34d   :  { %24342 = vmatpush3.msra.mxu0 %v34213_v3  ;;  %24353 = vmatpush3.msra.mxu1 %v34214_v8  ;;  %v23909_v62 = vpop.f32.mrf.mxu0  ;;  %v23920_v56 = vpop.f32.mrf.mxu1  ;;  %v34236_v3 = vunpack.c.h.bf16 %v34235_v15 }
 0x34e   :  { %24343 = vmatprep.subr.mxu0 %v25437_v0  ;;  %24354 = vmatprep.subr.mxu1 %v25437_v0  ;;  %v34237_v56 = vunpack.c.l.bf16 %v34233_v20 }
 0x34f   :  { %24344 = vmatpush3.msra.mxu0 %v34216_v27  ;;  %24355 = vmatpush3.msra.mxu1 %v34218_v28  ;;  %v34239_v28 = vld [vmem:[#allocation75_spill] sm:$0xff] }
 0x350   :  { %24345 = vmatprep.subr.mxu0 %v25437_v0  ;;  %24356 = vmatprep.subr.mxu1 %v25437_v0 }
 0x351   :  { %24346 = vmatpush3.msra.mxu0 %v34219_v30  ;;  %24347 = vmatprep.mubr.msk.f32.mxu0 %vm25438_vm0, %v25437_v0  ;;  %v34240_v30 = vunpack.c.h.bf16 %v34239_v28 }
 0x352   :  { %24357 = vmatpush3.msra.mxu1 %v34220_v59  ;;  %24358 = vmatprep.mubr.msk.f32.mxu1 %vm25438_vm0, %v25437_v0  ;;  %v34241_v59 = vld [vmem:[#allocation76_spill] sm:$0xff] }
 0x353   :  { %24348 = vmatmul.mubr.msk.f32.vlgmr.msra.gmra.mxu0 %vm1171_vm1, %v25349_v6  ;;  %24359 = vmatmul.mubr.msk.f32.vlgmr.msra.gmra.mxu1 %vm1171_vm1, %v25350_v33  ;;  %v34242_v6 = vunpack.c.h.bf16 %v34241_v59  ;;  %v34243_v33 = vunpack.c.l.bf16 %v34239_v28  ;;  %v34244_v34 = vunpack.c.l.bf16 %v34241_v59 }
 0x354   :  { %24361 = vmatprep.subr.mxu0 %v25437_v0  ;;  %24372 = vmatprep.subr.mxu1 %v25437_v0 }
 0x355   :  { %24362 = vmatpush3.msra.mxu0 %v34222_v49  ;;  %24373 = vmatpush3.msra.mxu1 %v34224_v21  ;;  %v30779_v53 = vpop.f32.mrf.mxu0  ;;  %v30781_v44 = vpop.f32.mrf.mxu1  ;;  %v25353_v49 = vld [vmem:[%s32768_s1 + $0x58] sm:$0x3] }
 0x356   :  { %24363 = vmatprep.subr.mxu0 %v25437_v0  ;;  %24374 = vmatprep.subr.mxu1 %v25437_v0  ;;  %v34245_v21 = vld [vmem:[#allocation77_spill] sm:$0xff] }
 0x357   :  { %24364 = vmatpush3.msra.mxu0 %v34225_v13  ;;  %24375 = vmatpush3.msra.mxu1 %v34226_v14  ;;  %v23931_v60 = vpop.f32.mrf.mxu0  ;;  %v23942_v25 = vpop.f32.mrf.mxu1  ;;  %v34246_v13 = vunpack.c.h.bf16 %v34245_v21  ;;  %v34247_v14 = vld [vmem:[#allocation78_spill] sm:$0xff] }
 0x358   :  { %24365 = vmatprep.subr.mxu0 %v25437_v0  ;;  %24376 = vmatprep.subr.mxu1 %v25437_v0  ;;  %v34248_v60 = vunpack.c.h.bf16 %v34247_v14  ;;  %v34250_v57 = vunpack.c.l.bf16 %v34247_v14 }
 0x359   :  { %24366 = vmatpush3.msra.mxu0 %v34228_v42  ;;  %24377 = vmatpush3.msra.mxu1 %v34230_v35  ;;  %v34249_v42 = vunpack.c.l.bf16 %v34245_v21 }
 0x35a   :  { %24367 = vmatprep.subr.mxu0 %v25437_v0  ;;  %24378 = vmatprep.subr.mxu1 %v25437_v0 }
 0x35b   :  { %24368 = vmatpush3.msra.mxu0 %v34231_v1  ;;  %24369 = vmatprep.mubr.msk.f32.mxu0 %vm25438_vm0, %v25437_v0 }
 0x35c   :  { %24379 = vmatpush3.msra.mxu1 %v34232_v47  ;;  %24380 = vmatprep.mubr.msk.f32.mxu1 %vm25438_vm0, %v25437_v0  ;;  %v34251_v47 = vld [vmem:[#allocation79_spill] sm:$0xff] }
 0x35d   :  { %24370 = vmatmul.mubr.msk.f32.vlgmr.msra.gmra.mxu0 %vm1171_vm1, %v25351_v48  ;;  %24381 = vmatmul.mubr.msk.f32.vlgmr.msra.gmra.mxu1 %vm1171_vm1, %v25352_v19  ;;  %v34252_v48 = vunpack.c.h.bf16 %v34251_v47  ;;  %v34253_v19 = vld [vmem:[#allocation80_spill] sm:$0xff] }
 0x35e   :  { %24383 = vmatprep.subr.mxu0 %v25437_v0  ;;  %24394 = vmatprep.subr.mxu1 %v25437_v0  ;;  %v34254_v20 = vunpack.c.h.bf16 %v34253_v19  ;;  %v34256_v15 = vunpack.c.l.bf16 %v34253_v19 }
 0x35f   :  { %24384 = vmatpush3.msra.mxu0 %v34234_v2  ;;  %24395 = vmatpush3.msra.mxu1 %v34236_v3  ;;  %v30819_v8 = vpop.f32.mrf.mxu0  ;;  %v30821_v62 = vpop.f32.mrf.mxu1  ;;  %v34255_v2 = vunpack.c.l.bf16 %v34251_v47  ;;  %v25355_v3 = vld [vmem:[%s32768_s1 + $0x5c] sm:$0x3] }
 0x360   :  { %24385 = vmatprep.subr.mxu0 %v25437_v0  ;;  %24396 = vmatprep.subr.mxu1 %v25437_v0 }
 0x361   :  { %24386 = vmatpush3.msra.mxu0 %v34237_v56  ;;  %24397 = vmatpush3.msra.mxu1 %v34238_v58  ;;  %v23953_v27 = vpop.f32.mrf.mxu0  ;;  %v23964_v55 = vpop.f32.mrf.mxu1  ;;  %v25356_v56 = vld [vmem:[%s32768_s1 + $0x5e] sm:$0x3] }
 0x362   :  { %24387 = vmatprep.subr.mxu0 %v25437_v0  ;;  %24398 = vmatprep.subr.mxu1 %v25437_v0  ;;  %v34257_v58 = vld [vmem:[#allocation81_spill] sm:$0xff]  ;;  %v34259_v55 = vld [vmem:[#allocation82_spill] sm:$0xff] }
 0x363   :  { %24388 = vmatpush3.msra.mxu0 %v34240_v30  ;;  %24399 = vmatpush3.msra.mxu1 %v34242_v6  ;;  %v34258_v27 = vunpack.c.h.bf16 %v34257_v58  ;;  %v34260_v28 = vunpack.c.h.bf16 %v34259_v55  ;;  %v34261_v6 = vunpack.c.l.bf16 %v34257_v58 }
 0x364   :  { %24389 = vmatprep.subr.mxu0 %v25437_v0  ;;  %24400 = vmatprep.subr.mxu1 %v25437_v0 }
 0x365   :  { %24390 = vmatpush3.msra.mxu0 %v34243_v33  ;;  %24391 = vmatprep.mubr.msk.f32.mxu0 %vm25438_vm0, %v25437_v0  ;;  %v34262_v33 = vunpack.c.l.bf16 %v34259_v55 }
 0x366   :  { %24401 = vmatpush3.msra.mxu1 %v34244_v34  ;;  %24402 = vmatprep.mubr.msk.f32.mxu1 %vm25438_vm0, %v25437_v0 }
 0x367   :  { %24392 = vmatmul.mubr.msk.f32.vlgmr.msra.gmra.mxu0 %vm1171_vm1, %v25353_v49  ;;  %24403 = vmatmul.mubr.msk.f32.vlgmr.msra.gmra.mxu1 %vm1171_vm1, %v25354_v52  ;;  %v34263_v52 = vld [vmem:[#allocation83_spill] sm:$0xff] }
 0x368   :  { %24405 = vmatprep.subr.mxu0 %v25437_v0  ;;  %24416 = vmatprep.subr.mxu1 %v25437_v0  ;;  %v34264_v21 = vunpack.c.h.bf16 %v34263_v52 }
 0x369   :  { %24406 = vmatpush3.msra.mxu0 %v34246_v13  ;;  %24417 = vmatpush3.msra.mxu1 %v34248_v60  ;;  %v30859_v25 = vpop.f32.mrf.mxu0  ;;  %v30861_v41 = vpop.f32.mrf.mxu1  ;;  %v34265_v13 = vld [vmem:[#allocation84_spill] sm:$0xff]  ;;  %v34267_v60 = vunpack.c.l.bf16 %v34263_v52  ;;  %v25360_v52 = vld [vmem:[%s32768_s1 + $0x66] sm:$0x3] }
 0x36a   :  { %24407 = vmatprep.subr.mxu0 %v25437_v0  ;;  %24418 = vmatprep.subr.mxu1 %v25437_v0  ;;  %v34266_v14 = vunpack.c.h.bf16 %v34265_v13 }
 0x36b   :  { %24408 = vmatpush3.msra.mxu0 %v34249_v42  ;;  %24419 = vmatpush3.msra.mxu1 %v34250_v57  ;;  %v23975_v35 = vpop.f32.mrf.mxu0  ;;  %v23986_v1 = vpop.f32.mrf.mxu1  ;;  %v34268_v42 = vunpack.c.l.bf16 %v34265_v13  ;;  %v25357_v57 = vld [vmem:[%s32768_s1 + $0x60] sm:$0x3] }
 0x36c   :  { %24409 = vmatprep.subr.mxu0 %v25437_v0  ;;  %24420 = vmatprep.subr.mxu1 %v25437_v0  ;;  %v25358_v35 = vld [vmem:[%s32768_s1 + $0x62] sm:$0x3]  ;;  %v34269_v1 = vld [vmem:[#allocation85_spill] sm:$0xff] }
 0x36d   :  { %24410 = vmatpush3.msra.mxu0 %v34252_v48  ;;  %24421 = vmatpush3.msra.mxu1 %v34254_v20  ;;  %v34270_v47 = vunpack.c.h.bf16 %v34269_v1  ;;  %v34271_v48 = vld [vmem:[#allocation86_spill] sm:$0xff] }
 0x36e   :  { %24411 = vmatprep.subr.mxu0 %v25437_v0  ;;  %24422 = vmatprep.subr.mxu1 %v25437_v0  ;;  %v34272_v19 = vunpack.c.h.bf16 %v34271_v48 }
 0x36f   :  { %24412 = vmatpush3.msra.mxu0 %v34255_v2  ;;  %24413 = vmatprep.mubr.msk.f32.mxu0 %vm25438_vm0, %v25437_v0 }
 0x370   :  { %24423 = vmatpush3.msra.mxu1 %v34256_v15  ;;  %24424 = vmatprep.mubr.msk.f32.mxu1 %vm25438_vm0, %v25437_v0  ;;  %v34273_v15 = vunpack.c.l.bf16 %v34269_v1 }
 0x371   :  { %24414 = vmatmul.mubr.msk.f32.vlgmr.msra.gmra.mxu0 %vm1171_vm1, %v25355_v3  ;;  %24425 = vmatmul.mubr.msk.f32.vlgmr.msra.gmra.mxu1 %vm1171_vm1, %v25356_v56  ;;  %v34274_v3 = vunpack.c.l.bf16 %v34271_v48 }
 0x372   :  { %24427 = vmatprep.subr.mxu0 %v25437_v0  ;;  %24438 = vmatprep.subr.mxu1 %v25437_v0 }
 0x373   :  { %24428 = vmatpush3.msra.mxu0 %v34258_v27  ;;  %24439 = vmatpush3.msra.mxu1 %v34260_v28  ;;  %v30899_v30 = vpop.f32.mrf.mxu0  ;;  %v30901_v59 = vpop.f32.mrf.mxu1  ;;  %v34275_v27 = vld [vmem:[#allocation87_spill] sm:$0xff]  ;;  %v34277_v28 = vld [vmem:[#allocation88_spill] sm:$0xff] }
 0x374   :  { %24429 = vmatprep.subr.mxu0 %v25437_v0  ;;  %24440 = vmatprep.subr.mxu1 %v25437_v0  ;;  %v34276_v55 = vunpack.c.h.bf16 %v34275_v27 }
 0x375   :  { %24430 = vmatpush3.msra.mxu0 %v34261_v6  ;;  %24441 = vmatpush3.msra.mxu1 %v34262_v33  ;;  %v23997_v34 = vpop.f32.mrf.mxu0  ;;  %v24008_v49 = vpop.f32.mrf.mxu1  ;;  %v34278_v6 = vunpack.c.h.bf16 %v34277_v28  ;;  %v34279_v33 = vunpack.c.l.bf16 %v34275_v27 }
 0x376   :  { %24431 = vmatprep.subr.mxu0 %v25437_v0  ;;  %24442 = vmatprep.subr.mxu1 %v25437_v0  ;;  %v34280_v34 = vunpack.c.l.bf16 %v34277_v28  ;;  %v25359_v49 = vld [vmem:[%s32768_s1 + $0x64] sm:$0x3]  ;;  %v25362_v28 = vld [vmem:[%s32768_s1 + $0x6a] sm:$0x3] }
 0x377   :  { %24432 = vmatpush3.msra.mxu0 %v34264_v21  ;;  %24443 = vmatpush3.msra.mxu1 %v34266_v14  ;;  %v34281_v21 = vld [vmem:[#allocation89_spill] sm:$0xff]  ;;  %v34283_v14 = vld [vmem:[#allocation90_spill] sm:$0xff] }
 0x378   :  { %24433 = vmatprep.subr.mxu0 %v25437_v0  ;;  %24444 = vmatprep.subr.mxu1 %v25437_v0  ;;  %v34282_v13 = vunpack.c.h.bf16 %v34281_v21  ;;  %v34286_v1 = vunpack.c.l.bf16 %v34283_v14 }
 0x379   :  { %24434 = vmatpush3.msra.mxu0 %v34267_v60  ;;  %24435 = vmatprep.mubr.msk.f32.mxu0 %vm25438_vm0, %v25437_v0  ;;  %v34284_v60 = vunpack.c.h.bf16 %v34283_v14 }
 0x37a   :  { %24445 = vmatpush3.msra.mxu1 %v34268_v42  ;;  %24446 = vmatprep.mubr.msk.f32.mxu1 %vm25438_vm0, %v25437_v0 }
 0x37b   :  { %24436 = vmatmul.mubr.msk.f32.vlgmr.msra.gmra.mxu0 %vm1171_vm1, %v25357_v57  ;;  %24447 = vmatmul.mubr.msk.f32.vlgmr.msra.gmra.mxu1 %vm1171_vm1, %v25358_v35  ;;  %v34285_v35 = vunpack.c.l.bf16 %v34281_v21 }
 0x37c   :  { %24449 = vmatprep.subr.mxu0 %v25437_v0  ;;  %24460 = vmatprep.subr.mxu1 %v25437_v0 }
 0x37d   :  { %24450 = vmatpush3.msra.mxu0 %v34270_v47  ;;  %24461 = vmatpush3.msra.mxu1 %v34272_v19  ;;  %v30939_v20 = vpop.f32.mrf.mxu0  ;;  %v30941_v2 = vpop.f32.mrf.mxu1  ;;  %v34287_v19 = vld [vmem:[#allocation91_spill] sm:$0xff] }
 0x37e   :  { %24451 = vmatprep.subr.mxu0 %v25437_v0  ;;  %24462 = vmatprep.subr.mxu1 %v25437_v0 }
 0x37f   :  { %24452 = vmatpush3.msra.mxu0 %v34273_v15  ;;  %24463 = vmatpush3.msra.mxu1 %v34274_v3  ;;  %v24019_v56 = vpop.f32.mrf.mxu0  ;;  %v24030_v58 = vpop.f32.mrf.mxu1  ;;  %v34288_v15 = vunpack.c.h.bf16 %v34287_v19  ;;  %v34289_v3 = vld [vmem:[#allocation92_spill] sm:$0xff] }
 0x380   :  { %24453 = vmatprep.subr.mxu0 %v25437_v0  ;;  %24464 = vmatprep.subr.mxu1 %v25437_v0  ;;  %v34290_v56 = vunpack.c.h.bf16 %v34289_v3  ;;  %v34291_v58 = vunpack.c.l.bf16 %v34287_v19  ;;  %v34292_v27 = vunpack.c.l.bf16 %v34289_v3 }
 0x381   :  { %24454 = vmatpush3.msra.mxu0 %v34276_v55  ;;  %24465 = vmatpush3.msra.mxu1 %v34278_v6  ;;  %v25361_v55 = vld [vmem:[%s32768_s1 + $0x68] sm:$0x3]  ;;  %v34293_v6 = vld [vmem:[#allocation93_spill] sm:$0xff] }
 0x382   :  { %24455 = vmatprep.subr.mxu0 %v25437_v0  ;;  %24466 = vmatprep.subr.mxu1 %v25437_v0 }
 0x383   :  { %24456 = vmatpush3.msra.mxu0 %v34279_v33  ;;  %24457 = vmatprep.mubr.msk.f32.mxu0 %vm25438_vm0, %v25437_v0  ;;  %v34294_v33 = vunpack.c.h.bf16 %v34293_v6 }
 0x384   :  { %24467 = vmatpush3.msra.mxu1 %v34280_v34  ;;  %24468 = vmatprep.mubr.msk.f32.mxu1 %vm25438_vm0, %v25437_v0  ;;  %v34295_v34 = vld [vmem:[#allocation94_spill] sm:$0xff] }
 0x385   :  { %24458 = vmatmul.mubr.msk.f32.vlgmr.msra.gmra.mxu0 %vm1171_vm1, %v25359_v49  ;;  %24469 = vmatmul.mubr.msk.f32.vlgmr.msra.gmra.mxu1 %vm1171_vm1, %v25360_v52  ;;  %v34296_v49 = vunpack.c.h.bf16 %v34295_v34  ;;  %v34298_v14 = vunpack.c.l.bf16 %v34295_v34 }
 0x386   :  { %24471 = vmatprep.subr.mxu0 %v25437_v0  ;;  %24482 = vmatprep.subr.mxu1 %v25437_v0 }
 0x387   :  { %24472 = vmatpush3.msra.mxu0 %v34282_v13  ;;  %24483 = vmatpush3.msra.mxu1 %v34284_v60  ;;  %v30979_v42 = vpop.f32.mrf.mxu0  ;;  %v30981_v57 = vpop.f32.mrf.mxu1  ;;  %v34297_v13 = vunpack.c.l.bf16 %v34293_v6 }
 0x388   :  { %24473 = vmatprep.subr.mxu0 %v25437_v0  ;;  %24484 = vmatprep.subr.mxu1 %v25437_v0 }
 0x389   :  { %24474 = vmatpush3.msra.mxu0 %v34285_v35  ;;  %24485 = vmatpush3.msra.mxu1 %v34286_v1  ;;  %v24041_v47 = vpop.f32.mrf.mxu0  ;;  %v24052_v48 = vpop.f32.mrf.mxu1  ;;  %v34299_v1 = vld [vmem:[#allocation95_spill] sm:$0xff] }
 0x38a   :  { %24475 = vmatprep.subr.mxu0 %v25437_v0  ;;  %24486 = vmatprep.subr.mxu1 %v25437_v0  ;;  %v34300_v47 = vunpack.c.h.bf16 %v34299_v1  ;;  %v34301_v48 = vld [vmem:[#allocation96_spill] sm:$0xff] }
 0x38b   :  { %24476 = vmatpush3.msra.mxu0 %v34288_v15  ;;  %24487 = vmatpush3.msra.mxu1 %v34290_v56  ;;  %v34302_v19 = vunpack.c.h.bf16 %v34301_v48  ;;  %v34303_v15 = vunpack.c.l.bf16 %v34299_v1  ;;  %v34304_v3 = vunpack.c.l.bf16 %v34301_v48  ;;  %v25363_v56 = vld [vmem:[%s32768_s1 + $0x6c] sm:$0x3] }
 0x38c   :  { %24477 = vmatprep.subr.mxu0 %v25437_v0  ;;  %24488 = vmatprep.subr.mxu1 %v25437_v0 }
 0x38d   :  { %24478 = vmatpush3.msra.mxu0 %v34291_v58  ;;  %24479 = vmatprep.mubr.msk.f32.mxu0 %vm25438_vm0, %v25437_v0  ;;  %v25364_v58 = vld [vmem:[%s32768_s1 + $0x6e] sm:$0x3] }
 0x38e   :  { %24489 = vmatpush3.msra.mxu1 %v34292_v27  ;;  %24490 = vmatprep.mubr.msk.f32.mxu1 %vm25438_vm0, %v25437_v0  ;;  %v34305_v27 = vld [vmem:[#allocation97_spill] sm:$0xff] }
 0x38f   :  { %24480 = vmatmul.mubr.msk.f32.vlgmr.msra.gmra.mxu0 %vm1171_vm1, %v25361_v55  ;;  %24491 = vmatmul.mubr.msk.f32.vlgmr.msra.gmra.mxu1 %vm1171_vm1, %v25362_v28  ;;  %v34306_v55 = vunpack.c.h.bf16 %v34305_v27  ;;  %v34307_v28 = vld [vmem:[#allocation98_spill] sm:$0xff] }
 0x390   :  { %24493 = vmatprep.subr.mxu0 %v25437_v0  ;;  %24504 = vmatprep.subr.mxu1 %v25437_v0  ;;  %v34308_v6 = vunpack.c.h.bf16 %v34307_v28 }
 0x391   :  { %24494 = vmatpush3.msra.mxu0 %v34294_v33  ;;  %24505 = vmatpush3.msra.mxu1 %v34296_v49  ;;  %v31019_v52 = vpop.f32.mrf.mxu0  ;;  %v31021_v21 = vpop.f32.mrf.mxu1  ;;  %v34309_v49 = vunpack.c.l.bf16 %v34305_v27 }
 0x392   :  { %24495 = vmatprep.subr.mxu0 %v25437_v0  ;;  %24506 = vmatprep.subr.mxu1 %v25437_v0 }
 0x393   :  { %24496 = vmatpush3.msra.mxu0 %v34297_v13  ;;  %24507 = vmatpush3.msra.mxu1 %v34298_v14  ;;  %v24063_v60 = vpop.f32.mrf.mxu0  ;;  %v24074_v35 = vpop.f32.mrf.mxu1  ;;  %v34310_v13 = vunpack.c.l.bf16 %v34307_v28 }
 0x394   :  { %24497 = vmatprep.subr.mxu0 %v25437_v0  ;;  %24508 = vmatprep.subr.mxu1 %v25437_v0  ;;  %v34311_v35 = vld [vmem:[#allocation99_spill] sm:$0xff] }
 0x395   :  { %24498 = vmatpush3.msra.mxu0 %v34300_v47  ;;  %24509 = vmatpush3.msra.mxu1 %v34302_v19  ;;  %v34312_v1 = vunpack.c.h.bf16 %v34311_v35  ;;  %v34313_v47 = vld [vmem:[#allocation100_spill] sm:$0xff]  ;;  %v34315_v19 = vunpack.c.l.bf16 %v34311_v35 }
 0x396   :  { %24499 = vmatprep.subr.mxu0 %v25437_v0  ;;  %24510 = vmatprep.subr.mxu1 %v25437_v0  ;;  %v34314_v48 = vunpack.c.h.bf16 %v34313_v47 }
 0x397   :  { %24500 = vmatpush3.msra.mxu0 %v34303_v15  ;;  %24501 = vmatprep.mubr.msk.f32.mxu0 %vm25438_vm0, %v25437_v0  ;;  %v34316_v15 = vunpack.c.l.bf16 %v34313_v47 }
 0x398   :  { %24511 = vmatpush3.msra.mxu1 %v34304_v3  ;;  %24512 = vmatprep.mubr.msk.f32.mxu1 %vm25438_vm0, %v25437_v0  ;;  %v25365_v3 = vld [vmem:[%s32768_s1 + $0x70] sm:$0x3] }
 0x399   :  { %24502 = vmatmul.mubr.msk.f32.vlgmr.msra.gmra.mxu0 %vm1171_vm1, %v25363_v56  ;;  %24513 = vmatmul.mubr.msk.f32.vlgmr.msra.gmra.mxu1 %vm1171_vm1, %v25364_v58  ;;  %v25366_v56 = vld [vmem:[%s32768_s1 + $0x72] sm:$0x3]  ;;  %v34317_v58 = vld [vmem:[#allocation101_spill] sm:$0xff] }
 0x39a   :  { %24515 = vmatprep.subr.mxu0 %v25437_v0  ;;  %24526 = vmatprep.subr.mxu1 %v25437_v0  ;;  %v34318_v27 = vunpack.c.h.bf16 %v34317_v58 }
 0x39b   :  { %24516 = vmatpush3.msra.mxu0 %v34306_v55  ;;  %24527 = vmatpush3.msra.mxu1 %v34308_v6  ;;  %v31059_v33 = vpop.f32.mrf.mxu0  ;;  %v31061_v34 = vpop.f32.mrf.mxu1  ;;  %v34319_v55 = vld [vmem:[#allocation102_spill] sm:$0xff] }
 0x39c   :  { %24517 = vmatprep.subr.mxu0 %v25437_v0  ;;  %24528 = vmatprep.subr.mxu1 %v25437_v0  ;;  %v34320_v28 = vunpack.c.h.bf16 %v34319_v55 }
 0x39d   :  { %24518 = vmatpush3.msra.mxu0 %v34309_v49  ;;  %24529 = vmatpush3.msra.mxu1 %v34310_v13  ;;  %v24085_v14 = vpop.f32.mrf.mxu0  ;;  %v24096_v60 = vpop.f32.mrf.mxu1  ;;  %v34321_v13 = vunpack.c.l.bf16 %v34317_v58  ;;  %v25368_v58 = vld [vmem:[%s32768_s1 + $0x76] sm:$0x3] }
 0x39e   :  { %24519 = vmatprep.subr.mxu0 %v25437_v0  ;;  %24530 = vmatprep.subr.mxu1 %v25437_v0  ;;  %v34322_v14 = vunpack.c.l.bf16 %v34319_v55 }
 0x39f   :  { %24520 = vmatpush3.msra.mxu0 %v34312_v1  ;;  %24531 = vmatpush3.msra.mxu1 %v34314_v48  ;;  %v34323_v1 = vld [vmem:[#allocation103_spill] sm:$0xff]  ;;  %v34325_v48 = vld [vmem:[#allocation104_spill] sm:$0xff] }
 0x3a0   :  { %24521 = vmatprep.subr.mxu0 %v25437_v0  ;;  %24532 = vmatprep.subr.mxu1 %v25437_v0  ;;  %v34324_v47 = vunpack.c.h.bf16 %v34323_v1 }
 0x3a1   :  { %24522 = vmatpush3.msra.mxu0 %v34315_v19  ;;  %24523 = vmatprep.mubr.msk.f32.mxu0 %vm25438_vm0, %v25437_v0  ;;  %v34326_v19 = vunpack.c.h.bf16 %v34325_v48 }
 0x3a2   :  { %24533 = vmatpush3.msra.mxu1 %v34316_v15  ;;  %24534 = vmatprep.mubr.msk.f32.mxu1 %vm25438_vm0, %v25437_v0  ;;  %v34327_v15 = vunpack.c.l.bf16 %v34323_v1 }
 0x3a3   :  { %24524 = vmatmul.mubr.msk.f32.vlgmr.msra.gmra.mxu0 %vm1171_vm1, %v25365_v3  ;;  %24535 = vmatmul.mubr.msk.f32.vlgmr.msra.gmra.mxu1 %vm1171_vm1, %v25366_v56  ;;  %v34328_v3 = vunpack.c.l.bf16 %v34325_v48  ;;  %v25367_v56 = vld [vmem:[%s32768_s1 + $0x74] sm:$0x3] }
 0x3a4   :  { %24537 = vmatprep.subr.mxu0 %v25437_v0  ;;  %24548 = vmatprep.subr.mxu1 %v25437_v0 }
 0x3a5   :  { %24538 = vmatpush3.msra.mxu0 %v34318_v27  ;;  %24549 = vmatpush3.msra.mxu1 %v34320_v28  ;;  %v31099_v6 = vpop.f32.mrf.mxu0  ;;  %v31101_v49 = vpop.f32.mrf.mxu1  ;;  %v34329_v27 = vld [vmem:[#allocation105_spill] sm:$0xff]  ;;  %v34331_v28 = vld [vmem:[#allocation106_spill] sm:$0xff] }
 0x3a6   :  { %24539 = vmatprep.subr.mxu0 %v25437_v0  ;;  %24550 = vmatprep.subr.mxu1 %v25437_v0  ;;  %v34330_v55 = vunpack.c.h.bf16 %v34329_v27  ;;  %v34334_v1 = vunpack.c.l.bf16 %v34331_v28 }
 0x3a7   :  { %24540 = vmatpush3.msra.mxu0 %v34321_v13  ;;  %24551 = vmatpush3.msra.mxu1 %v34322_v14  ;;  %v24107_v60 = vpop.f32.mrf.mxu0  ;;  %v24118_v35 = vpop.f32.mrf.mxu1  ;;  %v34332_v13 = vunpack.c.h.bf16 %v34331_v28  ;;  %v25370_v28 = vld [vmem:[%s32768_s1 + $0x7a] sm:$0x3] }
 0x3a8   :  { %24541 = vmatprep.subr.mxu0 %v25437_v0  ;;  %24552 = vmatprep.subr.mxu1 %v25437_v0  ;;  %v34333_v35 = vunpack.c.l.bf16 %v34329_v27 }
 0x3a9   :  { %24542 = vmatpush3.msra.mxu0 %v34324_v47  ;;  %24553 = vmatpush3.msra.mxu1 %v34326_v19  ;;  %v34335_v19 = vld [vmem:[#allocation107_spill] sm:$0xff] }
 0x3aa   :  { %24543 = vmatprep.subr.mxu0 %v25437_v0  ;;  %24554 = vmatprep.subr.mxu1 %v25437_v0 }
 0x3ab   :  { %24544 = vmatpush3.msra.mxu0 %v34327_v15  ;;  %24545 = vmatprep.mubr.msk.f32.mxu0 %vm25438_vm0, %v25437_v0  ;;  %v34336_v15 = vunpack.c.h.bf16 %v34335_v19 }
 0x3ac   :  { %24555 = vmatpush3.msra.mxu1 %v34328_v3  ;;  %24556 = vmatprep.mubr.msk.f32.mxu1 %vm25438_vm0, %v25437_v0  ;;  %v34337_v3 = vld [vmem:[#allocation108_spill] sm:$0xff] }
 0x3ad   :  { %24546 = vmatmul.mubr.msk.f32.vlgmr.msra.gmra.mxu0 %vm1171_vm1, %v25367_v56  ;;  %24557 = vmatmul.mubr.msk.f32.vlgmr.msra.gmra.mxu1 %vm1171_vm1, %v25368_v58  ;;  %v34338_v56 = vunpack.c.h.bf16 %v34337_v3  ;;  %v34339_v58 = vunpack.c.l.bf16 %v34335_v19  ;;  %v34340_v27 = vunpack.c.l.bf16 %v34337_v3 }
 0x3ae   :  { %24559 = vmatprep.subr.mxu0 %v25437_v0  ;;  %24570 = vmatprep.subr.mxu1 %v25437_v0 }
 0x3af   :  { %24560 = vmatpush3.msra.mxu0 %v34330_v55  ;;  %24571 = vmatpush3.msra.mxu1 %v34332_v13  ;;  %v31139_v14 = vpop.f32.mrf.mxu0  ;;  %v31141_v60 = vpop.f32.mrf.mxu1  ;;  %v25369_v55 = vld [vmem:[%s32768_s1 + $0x78] sm:$0x3] }
 0x3b0   :  { %24561 = vmatprep.subr.mxu0 %v25437_v0  ;;  %24572 = vmatprep.subr.mxu1 %v25437_v0  ;;  %v34341_v13 = vld [vmem:[#allocation109_spill] sm:$0xff] }
 0x3b1   :  { %24562 = vmatpush3.msra.mxu0 %v34333_v35  ;;  %24573 = vmatpush3.msra.mxu1 %v34334_v1  ;;  %v24129_v47 = vpop.f32.mrf.mxu0  ;;  %v24140_v48 = vpop.f32.mrf.mxu1  ;;  %v34342_v35 = vunpack.c.h.bf16 %v34341_v13  ;;  %v34343_v1 = vld [vmem:[#allocation110_spill] sm:$0xff] }
 0x3b2   :  { %24563 = vmatprep.subr.mxu0 %v25437_v0  ;;  %24574 = vmatprep.subr.mxu1 %v25437_v0  ;;  %v34344_v47 = vunpack.c.h.bf16 %v34343_v1  ;;  %v34346_v3 = vunpack.c.l.bf16 %v34343_v1 }
 0x3b3   :  { %24564 = vmatpush3.msra.mxu0 %v34336_v15  ;;  %24575 = vmatpush3.msra.mxu1 %v34338_v56  ;;  %v34345_v15 = vunpack.c.l.bf16 %v34341_v13 }
 0x3b4   :  { %24565 = vmatprep.subr.mxu0 %v25437_v0  ;;  %24576 = vmatprep.subr.mxu1 %v25437_v0 }
 0x3b5   :  { %24566 = vmatpush3.msra.mxu0 %v34339_v58  ;;  %24567 = vmatprep.mubr.msk.f32.mxu0 %vm25438_vm0, %v25437_v0 }
 0x3b6   :  { %24577 = vmatpush3.msra.mxu1 %v34340_v27  ;;  %24578 = vmatprep.mubr.msk.f32.mxu1 %vm25438_vm0, %v25437_v0  ;;  %v34347_v27 = vld [vmem:[#allocation111_spill] sm:$0xff] }
 0x3b7   :  { %24568 = vmatmul.mubr.msk.f32.vlgmr.msra.gmra.mxu0 %vm1171_vm1, %v25369_v55  ;;  %24579 = vmatmul.mubr.msk.f32.vlgmr.msra.gmra.mxu1 %vm1171_vm1, %v25370_v28  ;;  %v34348_v55 = vunpack.c.h.bf16 %v34347_v27  ;;  %v34349_v28 = vld [vmem:[#allocation112_spill] sm:$0xff]  ;;  %v34351_v13 = vunpack.c.l.bf16 %v34347_v27 }
 0x3b8   :  { %24581 = vmatprep.subr.mxu0 %v25437_v0  ;;  %24592 = vmatprep.subr.mxu1 %v25437_v0  ;;  %v34352_v1 = vunpack.c.l.bf16 %v34349_v28 }
 0x3b9   :  { %24582 = vmatpush3.msra.mxu0 %v34342_v35  ;;  %24593 = vmatpush3.msra.mxu1 %v34344_v47  ;;  %v31179_v48 = vpop.f32.mrf.mxu0  ;;  %v31181_v19 = vpop.f32.mrf.mxu1  ;;  %v34350_v35 = vunpack.c.h.bf16 %v34349_v28  ;;  %v25371_v47 = vld [vmem:[%s32768_s1 + $0x7c] sm:$0x3] }
 0x3ba   :  { %24583 = vmatprep.subr.mxu0 %v25437_v0  ;;  %24594 = vmatprep.subr.mxu1 %v25437_v0 }
 0x3bb   :  { %24584 = vmatpush3.msra.mxu0 %v34345_v15  ;;  %24595 = vmatpush3.msra.mxu1 %v34346_v3  ;;  %v24151_v56 = vpop.f32.mrf.mxu0  ;;  %v24162_v58 = vpop.f32.mrf.mxu1  ;;  %v25372_v15 = vld [vmem:[%s32768_s1 + $0x7e] sm:$0x3] }
 0x3bc   :  { %24585 = vmatprep.subr.mxu0 %v25437_v0  ;;  %24596 = vmatprep.subr.mxu1 %v25437_v0  ;;  %v34353_v3 = vld [vmem:[#allocation113_spill] sm:$0xff]  ;;  %v34355_v58 = vld [vmem:[#allocation114_spill] sm:$0xff] }
 0x3bd   :  { %24586 = vmatpush3.msra.mxu0 %v34348_v55  ;;  %24597 = vmatpush3.msra.mxu1 %v34350_v35  ;;  %v34354_v56 = vunpack.c.h.bf16 %v34353_v3  ;;  %v34356_v27 = vunpack.c.h.bf16 %v34355_v58  ;;  %v34357_v35 = vunpack.c.l.bf16 %v34353_v3 }
 0x3be   :  { %24587 = vmatprep.subr.mxu0 %v25437_v0  ;;  %24598 = vmatprep.subr.mxu1 %v25437_v0 }
 0x3bf   :  { %24588 = vmatpush3.msra.mxu0 %v34351_v13  ;;  %24589 = vmatprep.mubr.msk.f32.mxu0 %vm25438_vm0, %v25437_v0  ;;  %v34358_v13 = vunpack.c.l.bf16 %v34355_v58 }
 0x3c0   :  { %24599 = vmatpush3.msra.mxu1 %v34352_v1  ;;  %24600 = vmatprep.mubr.msk.f32.mxu1 %vm25438_vm0, %v25437_v0 }
 0x3c1   :  { %24590 = vmatmul.mubr.msk.f32.vlgmr.msra.gmra.mxu0 %vm1171_vm1, %v25371_v47  ;;  %24601 = vmatmul.mubr.msk.f32.vlgmr.msra.gmra.mxu1 %vm1171_vm1, %v25372_v15  ;;  %v34359_v15 = vld [vmem:[#allocation115_spill] sm:$0xff] }
 0x3c2   :  { %24603 = vmatprep.subr.mxu0 %v25437_v0  ;;  %24614 = vmatprep.subr.mxu1 %v25437_v0  ;;  %v34363_v3 = vunpack.c.l.bf16 %v34359_v15 }
 0x3c3   :  { %24604 = vmatpush3.msra.mxu0 %v34354_v56  ;;  %24615 = vmatpush3.msra.mxu1 %v34356_v27  ;;  %v31219_v55 = vpop.f32.mrf.mxu0  ;;  %v31221_v28 = vpop.f32.mrf.mxu1  ;;  %v34360_v56 = vunpack.c.h.bf16 %v34359_v15  ;;  %v34361_v27 = vld [vmem:[#allocation116_spill] sm:$0xff] }
 0x3c4   :  { %24605 = vmatprep.subr.mxu0 %v25437_v0  ;;  %24616 = vmatprep.subr.mxu1 %v25437_v0  ;;  %v34362_v63 = vunpack.c.h.bf16 %v34361_v27  ;;  %v34364_v58 = vunpack.c.l.bf16 %v34361_v27 }
 0x3c5   :  { %24606 = vmatpush3.msra.mxu0 %v34357_v35  ;;  %24617 = vmatpush3.msra.mxu1 %v34358_v13  ;;  %v24173_v1 = vpop.f32.mrf.mxu0  ;;  %v24184_v47 = vpop.f32.mrf.mxu1  ;;  %v25374_v35 = vld [vmem:[%s32766_s0 + $0x2] sm:$0x3]  ;;  %v34365_v13 = vld [vmem:[#allocation117_spill] sm:$0xff] }
 0x3c6   :  { %24607 = vmatprep.subr.mxu0 %v25437_v0  ;;  %24618 = vmatprep.subr.mxu1 %v25437_v0  ;;  %v34366_v1 = vunpack.c.h.bf16 %v34365_v13  ;;  %v34367_v47 = vld [vmem:[#allocation118_spill] sm:$0xff] }
 0x3c7   :  { %24608 = vmatpush3.msra.mxu0 %v34360_v56  ;;  %24619 = vmatpush3.msra.mxu1 %v34362_v63  ;;  %v25373_v63 = vld [vmem:[%s32766_s0] sm:$0x3]  ;;  %v34368_v15 = vunpack.c.h.bf16 %v34367_v47 }
 0x3c8   :  { %24609 = vmatprep.subr.mxu0 %v25437_v0  ;;  %24620 = vmatprep.subr.mxu1 %v25437_v0 }
 0x3c9   :  { %24610 = vmatpush3.msra.mxu0 %v34363_v3  ;;  %24611 = vmatprep.mubr.msk.f32.mxu0 %vm25438_vm0, %v25437_v0  ;;  %v34370_v3 = vunpack.c.l.bf16 %v34365_v13 }
 0x3ca   :  { %24621 = vmatpush3.msra.mxu1 %v34364_v58  ;;  %24622 = vmatprep.mubr.msk.f32.mxu1 %vm25438_vm0, %v25437_v0  ;;  %v34371_v58 = vunpack.c.l.bf16 %v34367_v47  ;;  %v34377_v47 = vunpack.c.l.bf16 %v34374_v16 }
 0x3cb   :  { %24612 = vmatmul.mubr.msk.f32.vlgmr.msra.gmra.mxu0 %vm1171_vm1, %v25373_v63  ;;  %24623 = vmatmul.mubr.msk.f32.vlgmr.msra.gmra.mxu1 %vm1171_vm1, %v25374_v35 }
 0x3cc   :  { %24625 = vmatprep.subr.mxu0 %v25437_v0  ;;  %24636 = vmatprep.subr.mxu1 %v25437_v0 }
 0x3cd   :  { %24626 = vmatpush3.msra.mxu0 %v34366_v1  ;;  %24637 = vmatpush3.msra.mxu1 %v34368_v15  ;;  %v31259_v56 = vpop.f32.mrf.mxu0  ;;  %v31261_v27 = vpop.f32.mrf.mxu1  ;;  %v34372_v1 = vld [vmem:[#allocation119_spill] sm:$0xff] }
 0x3ce   :  { %34369 = vst [vmem:[#allocation2_spill] sm:$0xff] %v31261_v27  ;;  %24627 = vmatprep.subr.mxu0 %v25437_v0  ;;  %24638 = vmatprep.subr.mxu1 %v25437_v0  ;;  %v34373_v15 = vunpack.c.h.bf16 %v34372_v1  ;;  %v34375_v27 = vunpack.c.h.bf16 %v34374_v16  ;;  %v34376_v13 = vunpack.c.l.bf16 %v34372_v1  ;;  %v34378_v16 = vld [vmem:[#allocation121_spill] sm:$0xff] }
 0x3cf   :  { %24628 = vmatpush3.msra.mxu0 %v34370_v3  ;;  %24639 = vmatpush3.msra.mxu1 %v34371_v58  ;;  %v24195_v63 = vpop.f32.mrf.mxu0  ;;  %v24206_v35 = vpop.f32.mrf.mxu1  ;;  %v25376_v3 = vld [vmem:[%s32766_s0 + $0x6] sm:$0x3]  ;;  %v34379_v58 = vunpack.c.h.bf16 %v34378_v16 }
 0x3d0   :  { %24629 = vmatprep.subr.mxu0 %v25437_v0  ;;  %24640 = vmatprep.subr.mxu1 %v25437_v0  ;;  %v34380_v63 = vld [vmem:[#allocation122_spill] sm:$0xff] }
 0x3d1   :  { %24630 = vmatpush3.msra.mxu0 %v34373_v15  ;;  %24641 = vmatpush3.msra.mxu1 %v34375_v27  ;;  %v25375_v27 = vld [vmem:[%s32766_s0 + $0x4] sm:$0x3]  ;;  %v34381_v35 = vunpack.c.h.bf16 %v34380_v63 }
 0x3d2   :  { %24631 = vmatprep.subr.mxu0 %v25437_v0  ;;  %24642 = vmatprep.subr.mxu1 %v25437_v0 }
 0x3d3   :  { %24632 = vmatpush3.msra.mxu0 %v34376_v13  ;;  %24633 = vmatprep.mubr.msk.f32.mxu0 %vm25438_vm0, %v25437_v0  ;;  %v34384_v13 = vunpack.c.l.bf16 %v34378_v16 }
 0x3d4   :  { %24643 = vmatpush3.msra.mxu1 %v34377_v47  ;;  %24644 = vmatprep.mubr.msk.f32.mxu1 %vm25438_vm0, %v25437_v0  ;;  %v34385_v47 = vunpack.c.l.bf16 %v34380_v63 }
 0x3d5   :  { %24634 = vmatmul.mubr.msk.f32.vlgmr.msra.gmra.mxu0 %vm1171_vm1, %v25375_v27  ;;  %24645 = vmatmul.mubr.msk.f32.vlgmr.msra.gmra.mxu1 %vm1171_vm1, %v25376_v3 }
 0x3d6   :  { %24647 = vmatprep.subr.mxu0 %v25437_v0  ;;  %24658 = vmatprep.subr.mxu1 %v25437_v0 }
 0x3d7   :  { %24648 = vmatpush3.msra.mxu0 %v34379_v58  ;;  %24659 = vmatpush3.msra.mxu1 %v34381_v35  ;;  %v31299_v1 = vpop.f32.mrf.mxu0  ;;  %v31301_v15 = vpop.f32.mrf.mxu1  ;;  %v34386_v58 = vld [vmem:[#allocation123_spill] sm:$0xff] }
 0x3d8   :  { %34382 = vst [vmem:[#allocation133_spill] sm:$0xff] %v31299_v1  ;;  %34383 = vst [vmem:[#allocation134_spill] sm:$0xff] %v31301_v15  ;;  %24649 = vmatprep.subr.mxu0 %v25437_v0  ;;  %24660 = vmatprep.subr.mxu1 %v25437_v0  ;;  %v34387_v35 = vunpack.c.h.bf16 %v34386_v58  ;;  %v34388_v15 = vld [vmem:[#allocation124_spill] sm:$0xff]  ;;  %v34390_v16 = vunpack.c.l.bf16 %v34386_v58 }
 0x3d9   :  { %24650 = vmatpush3.msra.mxu0 %v34384_v13  ;;  %24661 = vmatpush3.msra.mxu1 %v34385_v47  ;;  %v24217_v27 = vpop.f32.mrf.mxu0  ;;  %v24228_v3 = vpop.f32.mrf.mxu1  ;;  %v34389_v1 = vunpack.c.h.bf16 %v34388_v15  ;;  %v34391_v63 = vunpack.c.l.bf16 %v34388_v15  ;;  %v25378_v13 = vld [vmem:[%s32766_s0 + $0xa] sm:$0x3]  ;;  %v34392_v15 = vld [vmem:[#allocation125_spill] sm:$0xff] }
 0x3da   :  { %24651 = vmatprep.subr.mxu0 %v25437_v0  ;;  %24662 = vmatprep.subr.mxu1 %v25437_v0  ;;  %v34393_v47 = vunpack.c.h.bf16 %v34392_v15  ;;  %v34394_v27 = vld [vmem:[#allocation126_spill] sm:$0xff] }
 0x3db   :  { %24652 = vmatpush3.msra.mxu0 %v34387_v35  ;;  %24663 = vmatpush3.msra.mxu1 %v34389_v1  ;;  %v25377_v1 = vld [vmem:[%s32766_s0 + $0x8] sm:$0x3]  ;;  %v34395_v3 = vunpack.c.h.bf16 %v34394_v27 }
 0x3dc   :  { %24653 = vmatprep.subr.mxu0 %v25437_v0  ;;  %24664 = vmatprep.subr.mxu1 %v25437_v0 }
 0x3dd   :  { %24654 = vmatpush3.msra.mxu0 %v34390_v16  ;;  %24655 = vmatprep.mubr.msk.f32.mxu0 %vm25438_vm0, %v25437_v0  ;;  %v34398_v16 = vunpack.c.l.bf16 %v34392_v15 }
 0x3de   :  { %24665 = vmatpush3.msra.mxu1 %v34391_v63  ;;  %24666 = vmatprep.mubr.msk.f32.mxu1 %vm25438_vm0, %v25437_v0  ;;  %v34399_v63 = vunpack.c.l.bf16 %v34394_v27 }
 0x3df   :  { %24656 = vmatmul.mubr.msk.f32.vlgmr.msra.gmra.mxu0 %vm1171_vm1, %v25377_v1  ;;  %24667 = vmatmul.mubr.msk.f32.vlgmr.msra.gmra.mxu1 %vm1171_vm1, %v25378_v13 }
 0x3e0   :  { %24669 = vmatprep.subr.mxu0 %v25437_v0  ;;  %24680 = vmatprep.subr.mxu1 %v25437_v0 }
 0x3e1   :  { %24670 = vmatpush3.msra.mxu0 %v34393_v47  ;;  %24681 = vmatpush3.msra.mxu1 %v34395_v3  ;;  %v31339_v58 = vpop.f32.mrf.mxu0  ;;  %v31341_v35 = vpop.f32.mrf.mxu1  ;;  %v34400_v47 = vld [vmem:[#allocation127_spill] sm:$0xff] }
 0x3e2   :  { %34396 = vst [vmem:[#allocation3_spill] sm:$0xff] %v31339_v58  ;;  %34397 = vst [vmem:[#allocation4_spill] sm:$0xff] %v31341_v35  ;;  %24671 = vmatprep.subr.mxu0 %v25437_v0  ;;  %24682 = vmatprep.subr.mxu1 %v25437_v0  ;;  %v34401_v3 = vunpack.c.h.bf16 %v34400_v47  ;;  %v34402_v35 = vld [vmem:[#allocation128_spill] sm:$0xff]  ;;  %v34404_v15 = vunpack.c.l.bf16 %v34400_v47 }
 0x3e3   :  { %24672 = vmatpush3.msra.mxu0 %v34398_v16  ;;  %24683 = vmatpush3.msra.mxu1 %v34399_v63  ;;  %v24239_v1 = vpop.f32.mrf.mxu0  ;;  %v24250_v13 = vpop.f32.mrf.mxu1  ;;  %v34403_v58 = vunpack.c.h.bf16 %v34402_v35  ;;  %v34405_v27 = vunpack.c.l.bf16 %v34402_v35  ;;  %v25380_v16 = vld [vmem:[%s32766_s0 + $0xe] sm:$0x3]  ;;  %v34406_v35 = vld [vmem:[#allocation129_spill] sm:$0xff] }
 0x3e4   :  { %24673 = vmatprep.subr.mxu0 %v25437_v0  ;;  %24684 = vmatprep.subr.mxu1 %v25437_v0  ;;  %v34407_v63 = vunpack.c.h.bf16 %v34406_v35  ;;  %v34408_v1 = vld [vmem:[#allocation130_spill] sm:$0xff] }
 0x3e5   :  { %24674 = vmatpush3.msra.mxu0 %v34401_v3  ;;  %24685 = vmatpush3.msra.mxu1 %v34403_v58  ;;  %v25379_v58 = vld [vmem:[%s32766_s0 + $0xc] sm:$0x3]  ;;  %v34409_v13 = vunpack.c.h.bf16 %v34408_v1 }
 0x3e6   :  { %24675 = vmatprep.subr.mxu0 %v25437_v0  ;;  %24686 = vmatprep.subr.mxu1 %v25437_v0 }
 0x3e7   :  { %24676 = vmatpush3.msra.mxu0 %v34404_v15  ;;  %24677 = vmatprep.mubr.msk.f32.mxu0 %vm25438_vm0, %v25437_v0  ;;  %v34412_v15 = vunpack.c.l.bf16 %v34406_v35 }
 0x3e8   :  { %24687 = vmatpush3.msra.mxu1 %v34405_v27  ;;  %24688 = vmatprep.mubr.msk.f32.mxu1 %vm25438_vm0, %v25437_v0  ;;  %v34413_v27 = vunpack.c.l.bf16 %v34408_v1 }
 0x3e9   :  { %24678 = vmatmul.mubr.msk.f32.vlgmr.msra.gmra.mxu0 %vm1171_vm1, %v25379_v58  ;;  %24689 = vmatmul.mubr.msk.f32.vlgmr.msra.gmra.mxu1 %vm1171_vm1, %v25380_v16 }
 0x3ea   :  { %24691 = vmatprep.subr.mxu0 %v25437_v0  ;;  %24702 = vmatprep.subr.mxu1 %v25437_v0 }
 0x3eb   :  { %24692 = vmatpush3.msra.mxu0 %v34407_v63  ;;  %24703 = vmatpush3.msra.mxu1 %v34409_v13  ;;  %v31379_v47 = vpop.f32.mrf.mxu0  ;;  %v31381_v3 = vpop.f32.mrf.mxu1  ;;  %v34414_v63 = vld [vmem:[#allocation131_spill] sm:$0xff] }
 0x3ec   :  { %34410 = vst [vmem:[#allocation5_spill] sm:$0xff] %v31379_v47  ;;  %34411 = vst [vmem:[#allocation6_spill] sm:$0xff] %v31381_v3  ;;  %24693 = vmatprep.subr.mxu0 %v25437_v0  ;;  %24704 = vmatprep.subr.mxu1 %v25437_v0  ;;  %v34415_v13 = vunpack.c.h.bf16 %v34414_v63  ;;  %v34416_v3 = vld [vmem:[#allocation132_spill] sm:$0xff]  ;;  %v34418_v35 = vunpack.c.l.bf16 %v34414_v63 }
 0x3ed   :  { %24694 = vmatpush3.msra.mxu0 %v34412_v15  ;;  %24705 = vmatpush3.msra.mxu1 %v34413_v27  ;;  %v24261_v58 = vpop.f32.mrf.mxu0  ;;  %v24272_v16 = vpop.f32.mrf.mxu1  ;;  %v34417_v47 = vunpack.c.h.bf16 %v34416_v3  ;;  %v34419_v1 = vunpack.c.l.bf16 %v34416_v3  ;;  %v25382_v15 = vld [vmem:[%s32766_s0 + $0x12] sm:$0x3]  ;;  %v34420_v3 = vld [vmem:[#allocation135_spill] sm:$0xff] }
 0x3ee   :  { %24695 = vmatprep.subr.mxu0 %v25437_v0  ;;  %24706 = vmatprep.subr.mxu1 %v25437_v0  ;;  %v34421_v27 = vunpack.c.h.bf16 %v34420_v3  ;;  %v34422_v58 = vld [vmem:[#allocation136_spill] sm:$0xff] }
 0x3ef   :  { %24696 = vmatpush3.msra.mxu0 %v34415_v13  ;;  %24707 = vmatpush3.msra.mxu1 %v34417_v47  ;;  %v25381_v47 = vld [vmem:[%s32766_s0 + $0x10] sm:$0x3]  ;;  %v34423_v16 = vunpack.c.h.bf16 %v34422_v58 }
 0x3f0   :  { %24697 = vmatprep.subr.mxu0 %v25437_v0  ;;  %24708 = vmatprep.subr.mxu1 %v25437_v0 }
 0x3f1   :  { %24698 = vmatpush3.msra.mxu0 %v34418_v35  ;;  %24699 = vmatprep.mubr.msk.f32.mxu0 %vm25438_vm0, %v25437_v0  ;;  %v34426_v35 = vunpack.c.l.bf16 %v34420_v3 }
 0x3f2   :  { %24709 = vmatpush3.msra.mxu1 %v34419_v1  ;;  %24710 = vmatprep.mubr.msk.f32.mxu1 %vm25438_vm0, %v25437_v0  ;;  %v34427_v1 = vunpack.c.l.bf16 %v34422_v58 }
 0x3f3   :  { %24700 = vmatmul.mubr.msk.f32.vlgmr.msra.gmra.mxu0 %vm1171_vm1, %v25381_v47  ;;  %24711 = vmatmul.mubr.msk.f32.vlgmr.msra.gmra.mxu1 %vm1171_vm1, %v25382_v15 }
 0x3f4   :  { %24713 = vmatprep.subr.mxu0 %v25437_v0  ;;  %24724 = vmatprep.subr.mxu1 %v25437_v0 }
 0x3f5   :  { %24714 = vmatpush3.msra.mxu0 %v34421_v27  ;;  %24725 = vmatpush3.msra.mxu1 %v34423_v16  ;;  %v31419_v63 = vpop.f32.mrf.mxu0  ;;  %v31421_v13 = vpop.f32.mrf.mxu1  ;;  %v34428_v27 = vld [vmem:[#allocation137_spill] sm:$0xff] }
 0x3f6   :  { %34424 = vst [vmem:[#allocation139_spill] sm:$0xff] %v31419_v63  ;;  %34425 = vst [vmem:[#allocation140_spill] sm:$0xff] %v31421_v13  ;;  %24715 = vmatprep.subr.mxu0 %v25437_v0  ;;  %24726 = vmatprep.subr.mxu1 %v25437_v0  ;;  %v34429_v16 = vunpack.c.h.bf16 %v34428_v27  ;;  %v34430_v13 = vld [vmem:[#allocation138_spill] sm:$0xff]  ;;  %v34432_v3 = vunpack.c.l.bf16 %v34428_v27 }
 0x3f7   :  { %24716 = vmatpush3.msra.mxu0 %v34426_v35  ;;  %24727 = vmatpush3.msra.mxu1 %v34427_v1  ;;  %v24283_v47 = vpop.f32.mrf.mxu0  ;;  %v24294_v15 = vpop.f32.mrf.mxu1  ;;  %v34431_v63 = vunpack.c.h.bf16 %v34430_v13  ;;  %v34433_v58 = vunpack.c.l.bf16 %v34430_v13  ;;  %v25384_v35 = vld [vmem:[%s32766_s0 + $0x16] sm:$0x3]  ;;  %v34434_v13 = vld [vmem:[#allocation141_spill] sm:$0xff] }
 0x3f8   :  { %24717 = vmatprep.subr.mxu0 %v25437_v0  ;;  %24728 = vmatprep.subr.mxu1 %v25437_v0  ;;  %v34435_v1 = vunpack.c.h.bf16 %v34434_v13  ;;  %v34436_v47 = vld [vmem:[#allocation142_spill] sm:$0xff] }
 0x3f9   :  { %24718 = vmatpush3.msra.mxu0 %v34429_v16  ;;  %24729 = vmatpush3.msra.mxu1 %v34431_v63  ;;  %v25383_v63 = vld [vmem:[%s32766_s0 + $0x14] sm:$0x3]  ;;  %v34437_v15 = vunpack.c.h.bf16 %v34436_v47 }
 0x3fa   :  { %24719 = vmatprep.subr.mxu0 %v25437_v0  ;;  %24730 = vmatprep.subr.mxu1 %v25437_v0 }
 0x3fb   :  { %24720 = vmatpush3.msra.mxu0 %v34432_v3  ;;  %24721 = vmatprep.mubr.msk.f32.mxu0 %vm25438_vm0, %v25437_v0  ;;  %v34440_v3 = vunpack.c.l.bf16 %v34434_v13 }
 0x3fc   :  { %24731 = vmatpush3.msra.mxu1 %v34433_v58  ;;  %24732 = vmatprep.mubr.msk.f32.mxu1 %vm25438_vm0, %v25437_v0  ;;  %v34441_v58 = vunpack.c.l.bf16 %v34436_v47 }
 0x3fd   :  { %24722 = vmatmul.mubr.msk.f32.vlgmr.msra.gmra.mxu0 %vm1171_vm1, %v25383_v63  ;;  %24733 = vmatmul.mubr.msk.f32.vlgmr.msra.gmra.mxu1 %vm1171_vm1, %v25384_v35 }
 0x3fe   :  { %24735 = vmatprep.subr.mxu0 %v25437_v0  ;;  %24746 = vmatprep.subr.mxu1 %v25437_v0 }
 0x3ff   :  { %24736 = vmatpush3.msra.mxu0 %v34435_v1  ;;  %24747 = vmatpush3.msra.mxu1 %v34437_v15  ;;  %v31459_v27 = vpop.f32.mrf.mxu0  ;;  %v31461_v16 = vpop.f32.mrf.mxu1  ;;  %v34442_v1 = vld [vmem:[#allocation143_spill] sm:$0xff] }
 0x400   :  { %34438 = vst [vmem:[#allocation7_spill] sm:$0xff] %v31459_v27  ;;  %34439 = vst [vmem:[#allocation8_spill] sm:$0xff] %v31461_v16  ;;  %24737 = vmatprep.subr.mxu0 %v25437_v0  ;;  %24748 = vmatprep.subr.mxu1 %v25437_v0  ;;  %v34443_v15 = vunpack.c.h.bf16 %v34442_v1  ;;  %v34444_v16 = vld [vmem:[#allocation144_spill] sm:$0xff]  ;;  %v34446_v13 = vunpack.c.l.bf16 %v34442_v1 }
 0x401   :  { %24738 = vmatpush3.msra.mxu0 %v34440_v3  ;;  %24749 = vmatpush3.msra.mxu1 %v34441_v58  ;;  %v24305_v63 = vpop.f32.mrf.mxu0  ;;  %v24316_v35 = vpop.f32.mrf.mxu1  ;;  %v34445_v27 = vunpack.c.h.bf16 %v34444_v16  ;;  %v34447_v47 = vunpack.c.l.bf16 %v34444_v16  ;;  %v25386_v3 = vld [vmem:[%s32766_s0 + $0x1a] sm:$0x3]  ;;  %v34448_v16 = vld [vmem:[#allocation147_spill] sm:$0xff] }
 0x402   :  { %24739 = vmatprep.subr.mxu0 %v25437_v0  ;;  %24750 = vmatprep.subr.mxu1 %v25437_v0  ;;  %v34449_v58 = vunpack.c.h.bf16 %v34448_v16  ;;  %v34450_v63 = vld [vmem:[#allocation148_spill] sm:$0xff] }
 0x403   :  { %24740 = vmatpush3.msra.mxu0 %v34443_v15  ;;  %24751 = vmatpush3.msra.mxu1 %v34445_v27  ;;  %v25385_v27 = vld [vmem:[%s32766_s0 + $0x18] sm:$0x3]  ;;  %v34451_v35 = vunpack.c.h.bf16 %v34450_v63 }
 0x404   :  { %24741 = vmatprep.subr.mxu0 %v25437_v0  ;;  %24752 = vmatprep.subr.mxu1 %v25437_v0 }
 0x405   :  { %24742 = vmatpush3.msra.mxu0 %v34446_v13  ;;  %24743 = vmatprep.mubr.msk.f32.mxu0 %vm25438_vm0, %v25437_v0  ;;  %v34454_v13 = vunpack.c.l.bf16 %v34448_v16 }
 0x406   :  { %24753 = vmatpush3.msra.mxu1 %v34447_v47  ;;  %24754 = vmatprep.mubr.msk.f32.mxu1 %vm25438_vm0, %v25437_v0  ;;  %v34455_v47 = vunpack.c.l.bf16 %v34450_v63 }
 0x407   :  { %24744 = vmatmul.mubr.msk.f32.vlgmr.msra.gmra.mxu0 %vm1171_vm1, %v25385_v27  ;;  %24755 = vmatmul.mubr.msk.f32.vlgmr.msra.gmra.mxu1 %vm1171_vm1, %v25386_v3 }
 0x408   :  { %24757 = vmatprep.subr.mxu0 %v25437_v0  ;;  %24768 = vmatprep.subr.mxu1 %v25437_v0 }
 0x409   :  { %24758 = vmatpush3.msra.mxu0 %v34449_v58  ;;  %24769 = vmatpush3.msra.mxu1 %v34451_v35  ;;  %v31499_v1 = vpop.f32.mrf.mxu0  ;;  %v31501_v15 = vpop.f32.mrf.mxu1  ;;  %v34456_v58 = vld [vmem:[#allocation149_spill] sm:$0xff] }
 0x40a   :  { %34452 = vst [vmem:[#allocation9_spill] sm:$0xff] %v31499_v1  ;;  %34453 = vst [vmem:[#allocation10_spill] sm:$0xff] %v31501_v15  ;;  %24759 = vmatprep.subr.mxu0 %v25437_v0  ;;  %24770 = vmatprep.subr.mxu1 %v25437_v0  ;;  %v34457_v35 = vunpack.c.h.bf16 %v34456_v58  ;;  %v34458_v15 = vld [vmem:[#allocation150_spill] sm:$0xff]  ;;  %v34460_v16 = vunpack.c.l.bf16 %v34456_v58 }
 0x40b   :  { %24760 = vmatpush3.msra.mxu0 %v34454_v13  ;;  %24771 = vmatpush3.msra.mxu1 %v34455_v47  ;;  %v24327_v27 = vpop.f32.mrf.mxu0  ;;  %v24338_v3 = vpop.f32.mrf.mxu1  ;;  %v34459_v1 = vunpack.c.h.bf16 %v34458_v15  ;;  %v34461_v63 = vunpack.c.l.bf16 %v34458_v15  ;;  %v25388_v13 = vld [vmem:[%s32766_s0 + $0x1e] sm:$0x3] }
 0x40c   :  { %24761 = vmatprep.subr.mxu0 %v25437_v0  ;;  %24772 = vmatprep.subr.mxu1 %v25437_v0  ;;  %v34462_v15 = vld [vmem:[#allocation153_spill] sm:$0xff]  ;;  %v34464_v27 = vld [vmem:[#allocation154_spill] sm:$0xff] }
 0x40d   :  { %24762 = vmatpush3.msra.mxu0 %v34457_v35  ;;  %24773 = vmatpush3.msra.mxu1 %v34459_v1  ;;  %v25387_v1 = vld [vmem:[%s32766_s0 + $0x1c] sm:$0x3]  ;;  %v34463_v47 = vunpack.c.h.bf16 %v34462_v15  ;;  %v34465_v3 = vunpack.c.h.bf16 %v34464_v27 }
 0x40e   :  { %24763 = vmatprep.subr.mxu0 %v25437_v0  ;;  %24774 = vmatprep.subr.mxu1 %v25437_v0 }
 0x40f   :  { %24764 = vmatpush3.msra.mxu0 %v34460_v16  ;;  %24765 = vmatprep.mubr.msk.f32.mxu0 %vm25438_vm0, %v25437_v0  ;;  %v34468_v16 = vunpack.c.l.bf16 %v34462_v15 }
 0x410   :  { %24775 = vmatpush3.msra.mxu1 %v34461_v63  ;;  %24776 = vmatprep.mubr.msk.f32.mxu1 %vm25438_vm0, %v25437_v0  ;;  %v34469_v63 = vunpack.c.l.bf16 %v34464_v27 }
 0x411   :  { %24766 = vmatmul.mubr.msk.f32.vlgmr.msra.gmra.mxu0 %vm1171_vm1, %v25387_v1  ;;  %24777 = vmatmul.mubr.msk.f32.vlgmr.msra.gmra.mxu1 %vm1171_vm1, %v25388_v13 }
 0x412   :  { %24779 = vmatprep.subr.mxu0 %v25437_v0  ;;  %24790 = vmatprep.subr.mxu1 %v25437_v0 }
 0x413   :  { %24780 = vmatpush3.msra.mxu0 %v34463_v47  ;;  %24791 = vmatpush3.msra.mxu1 %v34465_v3  ;;  %v31539_v58 = vpop.f32.mrf.mxu0  ;;  %v31541_v35 = vpop.f32.mrf.mxu1  ;;  %v34470_v47 = vld [vmem:[#allocation155_spill] sm:$0xff] }
 0x414   :  { %34466 = vst [vmem:[#allocation145_spill] sm:$0xff] %v31539_v58  ;;  %34467 = vst [vmem:[#allocation146_spill] sm:$0xff] %v31541_v35  ;;  %24781 = vmatprep.subr.mxu0 %v25437_v0  ;;  %24792 = vmatprep.subr.mxu1 %v25437_v0  ;;  %v34471_v3 = vunpack.c.h.bf16 %v34470_v47  ;;  %v34472_v35 = vld [vmem:[#allocation156_spill] sm:$0xff]  ;;  %v34474_v15 = vunpack.c.l.bf16 %v34470_v47 }
 0x415   :  { %24782 = vmatpush3.msra.mxu0 %v34468_v16  ;;  %24793 = vmatpush3.msra.mxu1 %v34469_v63  ;;  %v24349_v1 = vpop.f32.mrf.mxu0  ;;  %v24360_v13 = vpop.f32.mrf.mxu1  ;;  %v34473_v58 = vunpack.c.h.bf16 %v34472_v35  ;;  %v34475_v27 = vunpack.c.l.bf16 %v34472_v35  ;;  %v25390_v16 = vld [vmem:[%s32766_s0 + $0x22] sm:$0x3]  ;;  %v34476_v35 = vld [vmem:[#allocation159_spill] sm:$0xff] }
 0x416   :  { %24783 = vmatprep.subr.mxu0 %v25437_v0  ;;  %24794 = vmatprep.subr.mxu1 %v25437_v0  ;;  %v34477_v63 = vunpack.c.h.bf16 %v34476_v35  ;;  %v34478_v1 = vld [vmem:[#allocation160_spill] sm:$0xff] }
 0x417   :  { %24784 = vmatpush3.msra.mxu0 %v34471_v3  ;;  %24795 = vmatpush3.msra.mxu1 %v34473_v58  ;;  %v25389_v58 = vld [vmem:[%s32766_s0 + $0x20] sm:$0x3]  ;;  %v34479_v13 = vunpack.c.h.bf16 %v34478_v1 }
 0x418   :  { %24785 = vmatprep.subr.mxu0 %v25437_v0  ;;  %24796 = vmatprep.subr.mxu1 %v25437_v0 }
 0x419   :  { %24786 = vmatpush3.msra.mxu0 %v34474_v15  ;;  %24787 = vmatprep.mubr.msk.f32.mxu0 %vm25438_vm0, %v25437_v0  ;;  %v34482_v15 = vunpack.c.l.bf16 %v34476_v35 }
 0x41a   :  { %24797 = vmatpush3.msra.mxu1 %v34475_v27  ;;  %24798 = vmatprep.mubr.msk.f32.mxu1 %vm25438_vm0, %v25437_v0  ;;  %v34483_v27 = vunpack.c.l.bf16 %v34478_v1 }
 0x41b   :  { %24788 = vmatmul.mubr.msk.f32.vlgmr.msra.gmra.mxu0 %vm1171_vm1, %v25389_v58  ;;  %24799 = vmatmul.mubr.msk.f32.vlgmr.msra.gmra.mxu1 %vm1171_vm1, %v25390_v16 }
 0x41c   :  { %24801 = vmatprep.subr.mxu0 %v25437_v0  ;;  %24812 = vmatprep.subr.mxu1 %v25437_v0 }
 0x41d   :  { %24802 = vmatpush3.msra.mxu0 %v34477_v63  ;;  %24813 = vmatpush3.msra.mxu1 %v34479_v13  ;;  %v31579_v47 = vpop.f32.mrf.mxu0  ;;  %v31581_v3 = vpop.f32.mrf.mxu1  ;;  %v34484_v63 = vld [vmem:[#allocation161_spill] sm:$0xff] }
 0x41e   :  { %34480 = vst [vmem:[#allocation11_spill] sm:$0xff] %v31579_v47  ;;  %34481 = vst [vmem:[#allocation12_spill] sm:$0xff] %v31581_v3  ;;  %24803 = vmatprep.subr.mxu0 %v25437_v0  ;;  %24814 = vmatprep.subr.mxu1 %v25437_v0  ;;  %v34485_v13 = vunpack.c.h.bf16 %v34484_v63  ;;  %v34486_v3 = vld [vmem:[#allocation162_spill] sm:$0xff]  ;;  %v34488_v35 = vunpack.c.l.bf16 %v34484_v63 }
 0x41f   :  { %24804 = vmatpush3.msra.mxu0 %v34482_v15  ;;  %24815 = vmatpush3.msra.mxu1 %v34483_v27  ;;  %v24371_v58 = vpop.f32.mrf.mxu0  ;;  %v24382_v16 = vpop.f32.mrf.mxu1  ;;  %v34487_v47 = vunpack.c.h.bf16 %v34486_v3  ;;  %v34489_v1 = vunpack.c.l.bf16 %v34486_v3  ;;  %v25392_v15 = vld [vmem:[%s32766_s0 + $0x26] sm:$0x3]  ;;  %v34490_v3 = vld [vmem:[#allocation165_spill] sm:$0xff] }
 0x420   :  { %24805 = vmatprep.subr.mxu0 %v25437_v0  ;;  %24816 = vmatprep.subr.mxu1 %v25437_v0  ;;  %v34491_v27 = vunpack.c.h.bf16 %v34490_v3  ;;  %v34492_v58 = vld [vmem:[#allocation166_spill] sm:$0xff] }
 0x421   :  { %24806 = vmatpush3.msra.mxu0 %v34485_v13  ;;  %24817 = vmatpush3.msra.mxu1 %v34487_v47  ;;  %v25391_v47 = vld [vmem:[%s32766_s0 + $0x24] sm:$0x3]  ;;  %v34493_v16 = vunpack.c.h.bf16 %v34492_v58 }
 0x422   :  { %24807 = vmatprep.subr.mxu0 %v25437_v0  ;;  %24818 = vmatprep.subr.mxu1 %v25437_v0 }
 0x423   :  { %24808 = vmatpush3.msra.mxu0 %v34488_v35  ;;  %24809 = vmatprep.mubr.msk.f32.mxu0 %vm25438_vm0, %v25437_v0  ;;  %v34496_v35 = vunpack.c.l.bf16 %v34490_v3 }
 0x424   :  { %24819 = vmatpush3.msra.mxu1 %v34489_v1  ;;  %24820 = vmatprep.mubr.msk.f32.mxu1 %vm25438_vm0, %v25437_v0  ;;  %v34497_v1 = vunpack.c.l.bf16 %v34492_v58 }
 0x425   :  { %24810 = vmatmul.mubr.msk.f32.vlgmr.msra.gmra.mxu0 %vm1171_vm1, %v25391_v47  ;;  %24821 = vmatmul.mubr.msk.f32.vlgmr.msra.gmra.mxu1 %vm1171_vm1, %v25392_v15 }
 0x426   :  { %24823 = vmatprep.subr.mxu0 %v25437_v0  ;;  %24834 = vmatprep.subr.mxu1 %v25437_v0 }
 0x427   :  { %24824 = vmatpush3.msra.mxu0 %v34491_v27  ;;  %24835 = vmatpush3.msra.mxu1 %v34493_v16  ;;  %v31619_v63 = vpop.f32.mrf.mxu0  ;;  %v31621_v13 = vpop.f32.mrf.mxu1  ;;  %v34498_v27 = vld [vmem:[#allocation167_spill] sm:$0xff] }
 0x428   :  { %34494 = vst [vmem:[#allocation13_spill] sm:$0xff] %v31619_v63  ;;  %34495 = vst [vmem:[#allocation14_spill] sm:$0xff] %v31621_v13  ;;  %24825 = vmatprep.subr.mxu0 %v25437_v0  ;;  %24836 = vmatprep.subr.mxu1 %v25437_v0  ;;  %v34499_v16 = vunpack.c.h.bf16 %v34498_v27  ;;  %v34500_v13 = vld [vmem:[#allocation168_spill] sm:$0xff]  ;;  %v34502_v3 = vunpack.c.l.bf16 %v34498_v27 }
 0x429   :  { %24826 = vmatpush3.msra.mxu0 %v34496_v35  ;;  %24837 = vmatpush3.msra.mxu1 %v34497_v1  ;;  %v24393_v47 = vpop.f32.mrf.mxu0  ;;  %v24404_v15 = vpop.f32.mrf.mxu1  ;;  %v34501_v63 = vunpack.c.h.bf16 %v34500_v13  ;;  %v34503_v58 = vunpack.c.l.bf16 %v34500_v13  ;;  %v25394_v35 = vld [vmem:[%s32766_s0 + $0x2a] sm:$0x3] }
 0x42a   :  { %24827 = vmatprep.subr.mxu0 %v25437_v0  ;;  %24838 = vmatprep.subr.mxu1 %v25437_v0  ;;  %v34504_v13 = vld [vmem:[#allocation171_spill] sm:$0xff]  ;;  %v34506_v47 = vld [vmem:[#allocation172_spill] sm:$0xff] }
 0x42b   :  { %24828 = vmatpush3.msra.mxu0 %v34499_v16  ;;  %24839 = vmatpush3.msra.mxu1 %v34501_v63  ;;  %v25393_v63 = vld [vmem:[%s32766_s0 + $0x28] sm:$0x3]  ;;  %v34505_v1 = vunpack.c.h.bf16 %v34504_v13  ;;  %v34507_v15 = vunpack.c.h.bf16 %v34506_v47 }
 0x42c   :  { %24829 = vmatprep.subr.mxu0 %v25437_v0  ;;  %24840 = vmatprep.subr.mxu1 %v25437_v0 }
 0x42d   :  { %24830 = vmatpush3.msra.mxu0 %v34502_v3  ;;  %24831 = vmatprep.mubr.msk.f32.mxu0 %vm25438_vm0, %v25437_v0  ;;  %v34510_v3 = vunpack.c.l.bf16 %v34504_v13 }
 0x42e   :  { %24841 = vmatpush3.msra.mxu1 %v34503_v58  ;;  %24842 = vmatprep.mubr.msk.f32.mxu1 %vm25438_vm0, %v25437_v0  ;;  %v34511_v58 = vunpack.c.l.bf16 %v34506_v47 }
 0x42f   :  { %24832 = vmatmul.mubr.msk.f32.vlgmr.msra.gmra.mxu0 %vm1171_vm1, %v25393_v63  ;;  %24843 = vmatmul.mubr.msk.f32.vlgmr.msra.gmra.mxu1 %vm1171_vm1, %v25394_v35 }
 0x430   :  { %24845 = vmatprep.subr.mxu0 %v25437_v0  ;;  %24856 = vmatprep.subr.mxu1 %v25437_v0 }
 0x431   :  { %24846 = vmatpush3.msra.mxu0 %v34505_v1  ;;  %24857 = vmatpush3.msra.mxu1 %v34507_v15  ;;  %v31659_v27 = vpop.f32.mrf.mxu0  ;;  %v31661_v16 = vpop.f32.mrf.mxu1  ;;  %v34512_v1 = vld [vmem:[#allocation173_spill] sm:$0xff] }
 0x432   :  { %34508 = vst [vmem:[#allocation151_spill] sm:$0xff] %v31659_v27  ;;  %34509 = vst [vmem:[#allocation152_spill] sm:$0xff] %v31661_v16  ;;  %24847 = vmatprep.subr.mxu0 %v25437_v0  ;;  %24858 = vmatprep.subr.mxu1 %v25437_v0  ;;  %v34513_v15 = vunpack.c.h.bf16 %v34512_v1  ;;  %v34514_v16 = vld [vmem:[#allocation174_spill] sm:$0xff]  ;;  %v34516_v13 = vunpack.c.l.bf16 %v34512_v1 }
 0x433   :  { %24848 = vmatpush3.msra.mxu0 %v34510_v3  ;;  %24859 = vmatpush3.msra.mxu1 %v34511_v58  ;;  %v24415_v63 = vpop.f32.mrf.mxu0  ;;  %v24426_v35 = vpop.f32.mrf.mxu1  ;;  %v34515_v27 = vunpack.c.h.bf16 %v34514_v16  ;;  %v34517_v47 = vunpack.c.l.bf16 %v34514_v16  ;;  %v25396_v3 = vld [vmem:[%s32766_s0 + $0x2e] sm:$0x3]  ;;  %v34518_v16 = vld [vmem:[#allocation177_spill] sm:$0xff] }
 0x434   :  { %24849 = vmatprep.subr.mxu0 %v25437_v0  ;;  %24860 = vmatprep.subr.mxu1 %v25437_v0  ;;  %v34519_v58 = vunpack.c.h.bf16 %v34518_v16  ;;  %v34520_v63 = vld [vmem:[#allocation178_spill] sm:$0xff] }
 0x435   :  { %24850 = vmatpush3.msra.mxu0 %v34513_v15  ;;  %24861 = vmatpush3.msra.mxu1 %v34515_v27  ;;  %v25395_v27 = vld [vmem:[%s32766_s0 + $0x2c] sm:$0x3]  ;;  %v34521_v35 = vunpack.c.h.bf16 %v34520_v63 }
 0x436   :  { %24851 = vmatprep.subr.mxu0 %v25437_v0  ;;  %24862 = vmatprep.subr.mxu1 %v25437_v0 }
 0x437   :  { %24852 = vmatpush3.msra.mxu0 %v34516_v13  ;;  %24853 = vmatprep.mubr.msk.f32.mxu0 %vm25438_vm0, %v25437_v0  ;;  %v34524_v13 = vunpack.c.l.bf16 %v34518_v16 }
 0x438   :  { %24863 = vmatpush3.msra.mxu1 %v34517_v47  ;;  %24864 = vmatprep.mubr.msk.f32.mxu1 %vm25438_vm0, %v25437_v0  ;;  %v34525_v47 = vunpack.c.l.bf16 %v34520_v63 }
 0x439   :  { %24854 = vmatmul.mubr.msk.f32.vlgmr.msra.gmra.mxu0 %vm1171_vm1, %v25395_v27  ;;  %24865 = vmatmul.mubr.msk.f32.vlgmr.msra.gmra.mxu1 %vm1171_vm1, %v25396_v3 }
 0x43a   :  { %24867 = vmatprep.subr.mxu0 %v25437_v0  ;;  %24878 = vmatprep.subr.mxu1 %v25437_v0 }
 0x43b   :  { %24868 = vmatpush3.msra.mxu0 %v34519_v58  ;;  %24879 = vmatpush3.msra.mxu1 %v34521_v35  ;;  %v31699_v1 = vpop.f32.mrf.mxu0  ;;  %v31701_v15 = vpop.f32.mrf.mxu1  ;;  %v34526_v58 = vld [vmem:[#allocation179_spill] sm:$0xff] }
 0x43c   :  { %34522 = vst [vmem:[#allocation15_spill] sm:$0xff] %v31699_v1  ;;  %34523 = vst [vmem:[#allocation16_spill] sm:$0xff] %v31701_v15  ;;  %24869 = vmatprep.subr.mxu0 %v25437_v0  ;;  %24880 = vmatprep.subr.mxu1 %v25437_v0  ;;  %v34527_v35 = vunpack.c.h.bf16 %v34526_v58  ;;  %v34528_v15 = vld [vmem:[#allocation180_spill] sm:$0xff]  ;;  %v34530_v16 = vunpack.c.l.bf16 %v34526_v58 }
 0x43d   :  { %24870 = vmatpush3.msra.mxu0 %v34524_v13  ;;  %24881 = vmatpush3.msra.mxu1 %v34525_v47  ;;  %v24437_v27 = vpop.f32.mrf.mxu0  ;;  %v24448_v3 = vpop.f32.mrf.mxu1  ;;  %v34529_v1 = vunpack.c.h.bf16 %v34528_v15  ;;  %v34531_v63 = vunpack.c.l.bf16 %v34528_v15  ;;  %v25398_v13 = vld [vmem:[%s32766_s0 + $0x32] sm:$0x3]  ;;  %v34532_v15 = vld [vmem:[#allocation183_spill] sm:$0xff] }
 0x43e   :  { %24871 = vmatprep.subr.mxu0 %v25437_v0  ;;  %24882 = vmatprep.subr.mxu1 %v25437_v0  ;;  %v34533_v47 = vunpack.c.h.bf16 %v34532_v15  ;;  %v34534_v27 = vld [vmem:[#allocation184_spill] sm:$0xff] }
 0x43f   :  { %24872 = vmatpush3.msra.mxu0 %v34527_v35  ;;  %24883 = vmatpush3.msra.mxu1 %v34529_v1  ;;  %v25397_v1 = vld [vmem:[%s32766_s0 + $0x30] sm:$0x3]  ;;  %v34535_v3 = vunpack.c.h.bf16 %v34534_v27 }
 0x440   :  { %24873 = vmatprep.subr.mxu0 %v25437_v0  ;;  %24884 = vmatprep.subr.mxu1 %v25437_v0 }
 0x441   :  { %24874 = vmatpush3.msra.mxu0 %v34530_v16  ;;  %24875 = vmatprep.mubr.msk.f32.mxu0 %vm25438_vm0, %v25437_v0  ;;  %v34538_v16 = vunpack.c.l.bf16 %v34532_v15 }
 0x442   :  { %24885 = vmatpush3.msra.mxu1 %v34531_v63  ;;  %24886 = vmatprep.mubr.msk.f32.mxu1 %vm25438_vm0, %v25437_v0  ;;  %v34539_v63 = vunpack.c.l.bf16 %v34534_v27 }
 0x443   :  { %24876 = vmatmul.mubr.msk.f32.vlgmr.msra.gmra.mxu0 %vm1171_vm1, %v25397_v1  ;;  %24887 = vmatmul.mubr.msk.f32.vlgmr.msra.gmra.mxu1 %vm1171_vm1, %v25398_v13 }
 0x444   :  { %24889 = vmatprep.subr.mxu0 %v25437_v0  ;;  %24900 = vmatprep.subr.mxu1 %v25437_v0 }
 0x445   :  { %24890 = vmatpush3.msra.mxu0 %v34533_v47  ;;  %24901 = vmatpush3.msra.mxu1 %v34535_v3  ;;  %v31739_v58 = vpop.f32.mrf.mxu0  ;;  %v31741_v35 = vpop.f32.mrf.mxu1  ;;  %v34540_v47 = vld [vmem:[#allocation185_spill] sm:$0xff] }
 0x446   :  { %34536 = vst [vmem:[#allocation17_spill] sm:$0xff] %v31739_v58  ;;  %34537 = vst [vmem:[#allocation18_spill] sm:$0xff] %v31741_v35  ;;  %24891 = vmatprep.subr.mxu0 %v25437_v0  ;;  %24902 = vmatprep.subr.mxu1 %v25437_v0  ;;  %v34541_v3 = vunpack.c.h.bf16 %v34540_v47  ;;  %v34542_v35 = vld [vmem:[#allocation186_spill] sm:$0xff]  ;;  %v34544_v15 = vunpack.c.l.bf16 %v34540_v47 }
 0x447   :  { %24892 = vmatpush3.msra.mxu0 %v34538_v16  ;;  %24903 = vmatpush3.msra.mxu1 %v34539_v63  ;;  %v24459_v1 = vpop.f32.mrf.mxu0  ;;  %v24470_v13 = vpop.f32.mrf.mxu1  ;;  %v34543_v58 = vunpack.c.h.bf16 %v34542_v35  ;;  %v34545_v27 = vunpack.c.l.bf16 %v34542_v35  ;;  %v25400_v16 = vld [vmem:[%s32766_s0 + $0x36] sm:$0x3]  ;;  %v34546_v35 = vld [vmem:[#allocation189_spill] sm:$0xff] }
 0x448   :  { %24893 = vmatprep.subr.mxu0 %v25437_v0  ;;  %24904 = vmatprep.subr.mxu1 %v25437_v0  ;;  %v34547_v63 = vunpack.c.h.bf16 %v34546_v35  ;;  %v34548_v1 = vld [vmem:[#allocation190_spill] sm:$0xff] }
 0x449   :  { %24894 = vmatpush3.msra.mxu0 %v34541_v3  ;;  %24905 = vmatpush3.msra.mxu1 %v34543_v58  ;;  %v25399_v58 = vld [vmem:[%s32766_s0 + $0x34] sm:$0x3]  ;;  %v34549_v13 = vunpack.c.h.bf16 %v34548_v1 }
 0x44a   :  { %24895 = vmatprep.subr.mxu0 %v25437_v0  ;;  %24906 = vmatprep.subr.mxu1 %v25437_v0 }
 0x44b   :  { %24896 = vmatpush3.msra.mxu0 %v34544_v15  ;;  %24897 = vmatprep.mubr.msk.f32.mxu0 %vm25438_vm0, %v25437_v0  ;;  %v34552_v15 = vunpack.c.l.bf16 %v34546_v35 }
 0x44c   :  { %24907 = vmatpush3.msra.mxu1 %v34545_v27  ;;  %24908 = vmatprep.mubr.msk.f32.mxu1 %vm25438_vm0, %v25437_v0  ;;  %v34553_v27 = vunpack.c.l.bf16 %v34548_v1 }
 0x44d   :  { %24898 = vmatmul.mubr.msk.f32.vlgmr.msra.gmra.mxu0 %vm1171_vm1, %v25399_v58  ;;  %24909 = vmatmul.mubr.msk.f32.vlgmr.msra.gmra.mxu1 %vm1171_vm1, %v25400_v16 }
 0x44e   :  { %24911 = vmatprep.subr.mxu0 %v25437_v0  ;;  %24922 = vmatprep.subr.mxu1 %v25437_v0 }
 0x44f   :  { %24912 = vmatpush3.msra.mxu0 %v34547_v63  ;;  %24923 = vmatpush3.msra.mxu1 %v34549_v13  ;;  %v31779_v47 = vpop.f32.mrf.mxu0  ;;  %v31781_v3 = vpop.f32.mrf.mxu1  ;;  %v34554_v63 = vld [vmem:[#allocation191_spill] sm:$0xff] }
 0x450   :  { %34550 = vst [vmem:[#allocation157_spill] sm:$0xff] %v31779_v47  ;;  %34551 = vst [vmem:[#allocation158_spill] sm:$0xff] %v31781_v3  ;;  %24913 = vmatprep.subr.mxu0 %v25437_v0  ;;  %24924 = vmatprep.subr.mxu1 %v25437_v0  ;;  %v34555_v13 = vunpack.c.h.bf16 %v34554_v63  ;;  %v34556_v3 = vld [vmem:[#allocation192_spill] sm:$0xff]  ;;  %v34558_v35 = vunpack.c.l.bf16 %v34554_v63 }
 0x451   :  { %24914 = vmatpush3.msra.mxu0 %v34552_v15  ;;  %24925 = vmatpush3.msra.mxu1 %v34553_v27  ;;  %v24481_v58 = vpop.f32.mrf.mxu0  ;;  %v24492_v16 = vpop.f32.mrf.mxu1  ;;  %v34557_v47 = vunpack.c.h.bf16 %v34556_v3  ;;  %v34559_v1 = vunpack.c.l.bf16 %v34556_v3  ;;  %v25402_v15 = vld [vmem:[%s32766_s0 + $0x3a] sm:$0x3]  ;;  %v34560_v3 = vld [vmem:[#allocation195_spill] sm:$0xff] }
 0x452   :  { %24915 = vmatprep.subr.mxu0 %v25437_v0  ;;  %24926 = vmatprep.subr.mxu1 %v25437_v0  ;;  %v34561_v27 = vunpack.c.h.bf16 %v34560_v3  ;;  %v34562_v58 = vld [vmem:[#allocation196_spill] sm:$0xff] }
 0x453   :  { %24916 = vmatpush3.msra.mxu0 %v34555_v13  ;;  %24927 = vmatpush3.msra.mxu1 %v34557_v47  ;;  %v25401_v47 = vld [vmem:[%s32766_s0 + $0x38] sm:$0x3]  ;;  %v34563_v16 = vunpack.c.h.bf16 %v34562_v58 }
 0x454   :  { %24917 = vmatprep.subr.mxu0 %v25437_v0  ;;  %24928 = vmatprep.subr.mxu1 %v25437_v0 }
 0x455   :  { %24918 = vmatpush3.msra.mxu0 %v34558_v35  ;;  %24919 = vmatprep.mubr.msk.f32.mxu0 %vm25438_vm0, %v25437_v0  ;;  %v34566_v35 = vunpack.c.l.bf16 %v34560_v3 }
 0x456   :  { %24929 = vmatpush3.msra.mxu1 %v34559_v1  ;;  %24930 = vmatprep.mubr.msk.f32.mxu1 %vm25438_vm0, %v25437_v0  ;;  %v34567_v1 = vunpack.c.l.bf16 %v34562_v58 }
 0x457   :  { %24920 = vmatmul.mubr.msk.f32.vlgmr.msra.gmra.mxu0 %vm1171_vm1, %v25401_v47  ;;  %24931 = vmatmul.mubr.msk.f32.vlgmr.msra.gmra.mxu1 %vm1171_vm1, %v25402_v15 }
 0x458   :  { %24933 = vmatprep.subr.mxu0 %v25437_v0  ;;  %24944 = vmatprep.subr.mxu1 %v25437_v0 }
 0x459   :  { %24934 = vmatpush3.msra.mxu0 %v34561_v27  ;;  %24945 = vmatpush3.msra.mxu1 %v34563_v16  ;;  %v31819_v63 = vpop.f32.mrf.mxu0  ;;  %v31821_v13 = vpop.f32.mrf.mxu1  ;;  %v34568_v27 = vld [vmem:[#allocation197_spill] sm:$0xff] }
 0x45a   :  { %34564 = vst [vmem:[#allocation19_spill] sm:$0xff] %v31819_v63  ;;  %34565 = vst [vmem:[#allocation20_spill] sm:$0xff] %v31821_v13  ;;  %24935 = vmatprep.subr.mxu0 %v25437_v0  ;;  %24946 = vmatprep.subr.mxu1 %v25437_v0  ;;  %v34569_v16 = vunpack.c.h.bf16 %v34568_v27  ;;  %v34570_v13 = vld [vmem:[#allocation198_spill] sm:$0xff]  ;;  %v34572_v3 = vunpack.c.l.bf16 %v34568_v27 }
 0x45b   :  { %24936 = vmatpush3.msra.mxu0 %v34566_v35  ;;  %24947 = vmatpush3.msra.mxu1 %v34567_v1  ;;  %v24503_v47 = vpop.f32.mrf.mxu0  ;;  %v24514_v15 = vpop.f32.mrf.mxu1  ;;  %v34571_v63 = vunpack.c.h.bf16 %v34570_v13  ;;  %v34573_v58 = vunpack.c.l.bf16 %v34570_v13  ;;  %v25404_v35 = vld [vmem:[%s32766_s0 + $0x3e] sm:$0x3] }
 0x45c   :  { %24937 = vmatprep.subr.mxu0 %v25437_v0  ;;  %24948 = vmatprep.subr.mxu1 %v25437_v0  ;;  %v34574_v13 = vld [vmem:[#allocation201_spill] sm:$0xff]  ;;  %v34576_v47 = vld [vmem:[#allocation202_spill] sm:$0xff] }
 0x45d   :  { %24938 = vmatpush3.msra.mxu0 %v34569_v16  ;;  %24949 = vmatpush3.msra.mxu1 %v34571_v63  ;;  %v25403_v63 = vld [vmem:[%s32766_s0 + $0x3c] sm:$0x3]  ;;  %v34575_v1 = vunpack.c.h.bf16 %v34574_v13  ;;  %v34577_v15 = vunpack.c.h.bf16 %v34576_v47 }
 0x45e   :  { %24939 = vmatprep.subr.mxu0 %v25437_v0  ;;  %24950 = vmatprep.subr.mxu1 %v25437_v0 }
 0x45f   :  { %24940 = vmatpush3.msra.mxu0 %v34572_v3  ;;  %24941 = vmatprep.mubr.msk.f32.mxu0 %vm25438_vm0, %v25437_v0  ;;  %v34580_v3 = vunpack.c.l.bf16 %v34574_v13 }
 0x460   :  { %24951 = vmatpush3.msra.mxu1 %v34573_v58  ;;  %24952 = vmatprep.mubr.msk.f32.mxu1 %vm25438_vm0, %v25437_v0  ;;  %v34581_v58 = vunpack.c.l.bf16 %v34576_v47 }
 0x461   :  { %24942 = vmatmul.mubr.msk.f32.vlgmr.msra.gmra.mxu0 %vm1171_vm1, %v25403_v63  ;;  %24953 = vmatmul.mubr.msk.f32.vlgmr.msra.gmra.mxu1 %vm1171_vm1, %v25404_v35 }
 0x462   :  { %24955 = vmatprep.subr.mxu0 %v25437_v0  ;;  %24966 = vmatprep.subr.mxu1 %v25437_v0 }
 0x463   :  { %24956 = vmatpush3.msra.mxu0 %v34575_v1  ;;  %24967 = vmatpush3.msra.mxu1 %v34577_v15  ;;  %v31859_v27 = vpop.f32.mrf.mxu0  ;;  %v31861_v16 = vpop.f32.mrf.mxu1  ;;  %v34582_v1 = vld [vmem:[#allocation203_spill] sm:$0xff] }
 0x464   :  { %34578 = vst [vmem:[#allocation21_spill] sm:$0xff] %v31859_v27  ;;  %34579 = vst [vmem:[#allocation22_spill] sm:$0xff] %v31861_v16  ;;  %24957 = vmatprep.subr.mxu0 %v25437_v0  ;;  %24968 = vmatprep.subr.mxu1 %v25437_v0  ;;  %v34583_v15 = vunpack.c.h.bf16 %v34582_v1  ;;  %v34584_v16 = vld [vmem:[#allocation204_spill] sm:$0xff]  ;;  %v34586_v13 = vunpack.c.l.bf16 %v34582_v1 }
 0x465   :  { %24958 = vmatpush3.msra.mxu0 %v34580_v3  ;;  %24969 = vmatpush3.msra.mxu1 %v34581_v58  ;;  %v24525_v63 = vpop.f32.mrf.mxu0  ;;  %v24536_v35 = vpop.f32.mrf.mxu1  ;;  %v34585_v27 = vunpack.c.h.bf16 %v34584_v16  ;;  %v34587_v47 = vunpack.c.l.bf16 %v34584_v16  ;;  %v25406_v3 = vld [vmem:[%s32766_s0 + $0x42] sm:$0x3]  ;;  %v34588_v16 = vld [vmem:[#allocation207_spill] sm:$0xff] }
 0x466   :  { %24959 = vmatprep.subr.mxu0 %v25437_v0  ;;  %24970 = vmatprep.subr.mxu1 %v25437_v0  ;;  %v34589_v58 = vunpack.c.h.bf16 %v34588_v16  ;;  %v34590_v63 = vld [vmem:[#allocation208_spill] sm:$0xff] }
 0x467   :  { %24960 = vmatpush3.msra.mxu0 %v34583_v15  ;;  %24971 = vmatpush3.msra.mxu1 %v34585_v27  ;;  %v25405_v27 = vld [vmem:[%s32766_s0 + $0x40] sm:$0x3]  ;;  %v34591_v35 = vunpack.c.h.bf16 %v34590_v63 }
 0x468   :  { %24961 = vmatprep.subr.mxu0 %v25437_v0  ;;  %24972 = vmatprep.subr.mxu1 %v25437_v0 }
 0x469   :  { %24962 = vmatpush3.msra.mxu0 %v34586_v13  ;;  %24963 = vmatprep.mubr.msk.f32.mxu0 %vm25438_vm0, %v25437_v0  ;;  %v34594_v13 = vunpack.c.l.bf16 %v34588_v16 }
 0x46a   :  { %24973 = vmatpush3.msra.mxu1 %v34587_v47  ;;  %24974 = vmatprep.mubr.msk.f32.mxu1 %vm25438_vm0, %v25437_v0  ;;  %v34595_v47 = vunpack.c.l.bf16 %v34590_v63 }
 0x46b   :  { %24964 = vmatmul.mubr.msk.f32.vlgmr.msra.gmra.mxu0 %vm1171_vm1, %v25405_v27  ;;  %24975 = vmatmul.mubr.msk.f32.vlgmr.msra.gmra.mxu1 %vm1171_vm1, %v25406_v3 }
 0x46c   :  { %24977 = vmatprep.subr.mxu0 %v25437_v0  ;;  %24988 = vmatprep.subr.mxu1 %v25437_v0 }
 0x46d   :  { %24978 = vmatpush3.msra.mxu0 %v34589_v58  ;;  %24989 = vmatpush3.msra.mxu1 %v34591_v35  ;;  %v31899_v1 = vpop.f32.mrf.mxu0  ;;  %v31901_v15 = vpop.f32.mrf.mxu1  ;;  %v34596_v58 = vld [vmem:[#allocation209_spill] sm:$0xff] }
 0x46e   :  { %34592 = vst [vmem:[#allocation163_spill] sm:$0xff] %v31899_v1  ;;  %34593 = vst [vmem:[#allocation164_spill] sm:$0xff] %v31901_v15  ;;  %24979 = vmatprep.subr.mxu0 %v25437_v0  ;;  %24990 = vmatprep.subr.mxu1 %v25437_v0  ;;  %v34597_v35 = vunpack.c.h.bf16 %v34596_v58  ;;  %v34598_v15 = vld [vmem:[#allocation210_spill] sm:$0xff]  ;;  %v34600_v16 = vunpack.c.l.bf16 %v34596_v58 }
 0x46f   :  { %24980 = vmatpush3.msra.mxu0 %v34594_v13  ;;  %24991 = vmatpush3.msra.mxu1 %v34595_v47  ;;  %v24547_v27 = vpop.f32.mrf.mxu0  ;;  %v24558_v3 = vpop.f32.mrf.mxu1  ;;  %v34599_v1 = vunpack.c.h.bf16 %v34598_v15  ;;  %v34601_v63 = vunpack.c.l.bf16 %v34598_v15  ;;  %v25408_v13 = vld [vmem:[%s32766_s0 + $0x46] sm:$0x3]  ;;  %v34602_v15 = vld [vmem:[#allocation213_spill] sm:$0xff] }
 0x470   :  { %24981 = vmatprep.subr.mxu0 %v25437_v0  ;;  %24992 = vmatprep.subr.mxu1 %v25437_v0  ;;  %v34603_v47 = vunpack.c.h.bf16 %v34602_v15  ;;  %v34604_v27 = vld [vmem:[#allocation214_spill] sm:$0xff] }
 0x471   :  { %24982 = vmatpush3.msra.mxu0 %v34597_v35  ;;  %24993 = vmatpush3.msra.mxu1 %v34599_v1  ;;  %v25407_v1 = vld [vmem:[%s32766_s0 + $0x44] sm:$0x3]  ;;  %v34605_v3 = vunpack.c.h.bf16 %v34604_v27 }
 0x472   :  { %24983 = vmatprep.subr.mxu0 %v25437_v0  ;;  %24994 = vmatprep.subr.mxu1 %v25437_v0 }
 0x473   :  { %24984 = vmatpush3.msra.mxu0 %v34600_v16  ;;  %24985 = vmatprep.mubr.msk.f32.mxu0 %vm25438_vm0, %v25437_v0  ;;  %v34608_v16 = vunpack.c.l.bf16 %v34602_v15 }
 0x474   :  { %24995 = vmatpush3.msra.mxu1 %v34601_v63  ;;  %24996 = vmatprep.mubr.msk.f32.mxu1 %vm25438_vm0, %v25437_v0  ;;  %v34609_v63 = vunpack.c.l.bf16 %v34604_v27 }
 0x475   :  { %24986 = vmatmul.mubr.msk.f32.vlgmr.msra.gmra.mxu0 %vm1171_vm1, %v25407_v1  ;;  %24997 = vmatmul.mubr.msk.f32.vlgmr.msra.gmra.mxu1 %vm1171_vm1, %v25408_v13 }
 0x476   :  { %24999 = vmatprep.subr.mxu0 %v25437_v0  ;;  %25010 = vmatprep.subr.mxu1 %v25437_v0 }
 0x477   :  { %25000 = vmatpush3.msra.mxu0 %v34603_v47  ;;  %25011 = vmatpush3.msra.mxu1 %v34605_v3  ;;  %v31939_v58 = vpop.f32.mrf.mxu0  ;;  %v31941_v35 = vpop.f32.mrf.mxu1  ;;  %v34610_v47 = vld [vmem:[#allocation215_spill] sm:$0xff] }
 0x478   :  { %34606 = vst [vmem:[#allocation23_spill] sm:$0xff] %v31939_v58  ;;  %34607 = vst [vmem:[#allocation24_spill] sm:$0xff] %v31941_v35  ;;  %25001 = vmatprep.subr.mxu0 %v25437_v0  ;;  %25012 = vmatprep.subr.mxu1 %v25437_v0  ;;  %v34611_v3 = vunpack.c.h.bf16 %v34610_v47  ;;  %v34612_v35 = vld [vmem:[#allocation216_spill] sm:$0xff]  ;;  %v34614_v15 = vunpack.c.l.bf16 %v34610_v47 }
 0x479   :  { %25002 = vmatpush3.msra.mxu0 %v34608_v16  ;;  %25013 = vmatpush3.msra.mxu1 %v34609_v63  ;;  %v24569_v1 = vpop.f32.mrf.mxu0  ;;  %v24580_v13 = vpop.f32.mrf.mxu1  ;;  %v34613_v58 = vunpack.c.h.bf16 %v34612_v35  ;;  %v34615_v27 = vunpack.c.l.bf16 %v34612_v35  ;;  %v25410_v16 = vld [vmem:[%s32766_s0 + $0x4a] sm:$0x3] }
 0x47a   :  { %25003 = vmatprep.subr.mxu0 %v25437_v0  ;;  %25014 = vmatprep.subr.mxu1 %v25437_v0  ;;  %v34616_v35 = vld [vmem:[#allocation219_spill] sm:$0xff]  ;;  %v34618_v1 = vld [vmem:[#allocation220_spill] sm:$0xff] }
 0x47b   :  { %25004 = vmatpush3.msra.mxu0 %v34611_v3  ;;  %25015 = vmatpush3.msra.mxu1 %v34613_v58  ;;  %v25409_v58 = vld [vmem:[%s32766_s0 + $0x48] sm:$0x3]  ;;  %v34617_v63 = vunpack.c.h.bf16 %v34616_v35  ;;  %v34619_v13 = vunpack.c.h.bf16 %v34618_v1 }
 0x47c   :  { %25005 = vmatprep.subr.mxu0 %v25437_v0  ;;  %25016 = vmatprep.subr.mxu1 %v25437_v0 }
 0x47d   :  { %25006 = vmatpush3.msra.mxu0 %v34614_v15  ;;  %25007 = vmatprep.mubr.msk.f32.mxu0 %vm25438_vm0, %v25437_v0  ;;  %v34622_v15 = vunpack.c.l.bf16 %v34616_v35 }
 0x47e   :  { %25017 = vmatpush3.msra.mxu1 %v34615_v27  ;;  %25018 = vmatprep.mubr.msk.f32.mxu1 %vm25438_vm0, %v25437_v0  ;;  %v34623_v27 = vunpack.c.l.bf16 %v34618_v1 }
 0x47f   :  { %25008 = vmatmul.mubr.msk.f32.vlgmr.msra.gmra.mxu0 %vm1171_vm1, %v25409_v58  ;;  %25019 = vmatmul.mubr.msk.f32.vlgmr.msra.gmra.mxu1 %vm1171_vm1, %v25410_v16 }
 0x480   :  { %25021 = vmatprep.subr.mxu0 %v25437_v0  ;;  %25032 = vmatprep.subr.mxu1 %v25437_v0 }
 0x481   :  { %25022 = vmatpush3.msra.mxu0 %v34617_v63  ;;  %25033 = vmatpush3.msra.mxu1 %v34619_v13  ;;  %v31979_v47 = vpop.f32.mrf.mxu0  ;;  %v31981_v3 = vpop.f32.mrf.mxu1  ;;  %v34624_v63 = vld [vmem:[#allocation221_spill] sm:$0xff] }
 0x482   :  { %34620 = vst [vmem:[#allocation25_spill] sm:$0xff] %v31979_v47  ;;  %34621 = vst [vmem:[#allocation26_spill] sm:$0xff] %v31981_v3  ;;  %25023 = vmatprep.subr.mxu0 %v25437_v0  ;;  %25034 = vmatprep.subr.mxu1 %v25437_v0  ;;  %v34625_v13 = vunpack.c.h.bf16 %v34624_v63  ;;  %v34626_v3 = vld [vmem:[#allocation222_spill] sm:$0xff]  ;;  %v34628_v35 = vunpack.c.l.bf16 %v34624_v63 }
 0x483   :  { %25024 = vmatpush3.msra.mxu0 %v34622_v15  ;;  %25035 = vmatpush3.msra.mxu1 %v34623_v27  ;;  %v24591_v58 = vpop.f32.mrf.mxu0  ;;  %v24602_v16 = vpop.f32.mrf.mxu1  ;;  %v34627_v47 = vunpack.c.h.bf16 %v34626_v3  ;;  %v34629_v1 = vunpack.c.l.bf16 %v34626_v3  ;;  %v25412_v15 = vld [vmem:[%s32766_s0 + $0x4e] sm:$0x3]  ;;  %v34630_v3 = vunpack.c.h.bf16 %v28906_v29  ;;  %v34631_v27 = vunpack.c.h.bf16 %v28911_v43 }
 0x484   :  { %25025 = vmatprep.subr.mxu0 %v25437_v0  ;;  %25036 = vmatprep.subr.mxu1 %v25437_v0 }
 0x485   :  { %25026 = vmatpush3.msra.mxu0 %v34625_v13  ;;  %25037 = vmatpush3.msra.mxu1 %v34627_v47  ;;  %v25411_v47 = vld [vmem:[%s32766_s0 + $0x4c] sm:$0x3] }
 0x486   :  { %25027 = vmatprep.subr.mxu0 %v25437_v0  ;;  %25038 = vmatprep.subr.mxu1 %v25437_v0 }
 0x487   :  { %25028 = vmatpush3.msra.mxu0 %v34628_v35  ;;  %25029 = vmatprep.mubr.msk.f32.mxu0 %vm25438_vm0, %v25437_v0  ;;  %v34632_v35 = vunpack.c.l.bf16 %v28906_v29  ;;  %v34634_v29 = vld [vmem:[#allocation225_spill] sm:$0xff] }
 0x488   :  { %25039 = vmatpush3.msra.mxu1 %v34629_v1  ;;  %25040 = vmatprep.mubr.msk.f32.mxu1 %vm25438_vm0, %v25437_v0  ;;  %v34633_v1 = vunpack.c.l.bf16 %v28911_v43  ;;  %v34636_v43 = vld [vmem:[#allocation226_spill] sm:$0xff] }
 0x489   :  { %25030 = vmatmul.mubr.msk.f32.vlgmr.msra.gmra.mxu0 %vm1171_vm1, %v25411_v47  ;;  %25041 = vmatmul.mubr.msk.f32.vlgmr.msra.gmra.mxu1 %vm1171_vm1, %v25412_v15 }
 0x48a   :  { %25043 = vmatprep.subr.mxu0 %v25437_v0  ;;  %25054 = vmatprep.subr.mxu1 %v25437_v0 }
 0x48b   :  { %25044 = vmatpush3.msra.mxu0 %v34630_v3  ;;  %25055 = vmatpush3.msra.mxu1 %v34631_v27  ;;  %v15191_v58 = vpop.f32.mrf.mxu0  ;;  %v15261_v16 = vpop.f32.mrf.mxu1  ;;  %v34638_v3 = vunpack.c.l.bf16 %v34634_v29  ;;  %v34639_v27 = vunpack.c.l.bf16 %v34636_v43 }
 0x48c   :  { %25045 = vmatprep.subr.mxu0 %v25437_v0  ;;  %25056 = vmatprep.subr.mxu1 %v25437_v0  ;;  %v15192_v63 = vadd.f32 %v15191_v58, %v30739_v51  ;;  %v15262_v13 = vadd.f32 %v15261_v16, %v30741_v12  ;;  %v34635_v51 = vunpack.c.h.bf16 %v34634_v29  ;;  %v34637_v12 = vunpack.c.h.bf16 %v34636_v43  ;;  %v25413_v58 = vld [vmem:[%s32766_s0 + $0x50] sm:$0x3]  ;;  %v25414_v16 = vld [vmem:[%s32766_s0 + $0x52] sm:$0x3] }
 0x48d   :  { %25046 = vmatpush3.msra.mxu0 %v34632_v35  ;;  %25057 = vmatpush3.msra.mxu1 %v34633_v1  ;;  %v24613_v47 = vpop.f32.mrf.mxu0  ;;  %v24624_v15 = vpop.f32.mrf.mxu1  ;;  %v34642_v29 = vunpack.c.l.bf16 %v28972_v22 }
 0x48e   :  { %25047 = vmatprep.subr.mxu0 %v25437_v0  ;;  %25058 = vmatprep.subr.mxu1 %v25437_v0  ;;  %19605 = vst.msk [vmem:[%s32770_s5] sm:$0x3] %vm10580_vm2, %v15192_v63  ;;  %19606 = vst.msk [vmem:[%s32770_s5 + $0x2] sm:$0x3] %vm10580_vm2, %v15262_v13  ;;  %v34640_v63 = vunpack.c.h.bf16 %v28972_v22  ;;  %v34641_v13 = vunpack.c.h.bf16 %v28977_v9  ;;  %v34644_v22 = vld [vmem:[#allocation227_spill] sm:$0xff] }
 0x48f   :  { %25048 = vmatpush3.msra.mxu0 %v34635_v51  ;;  %25059 = vmatpush3.msra.mxu1 %v34637_v12  ;;  %v34643_v51 = vunpack.c.l.bf16 %v28977_v9  ;;  %v34646_v9 = vld [vmem:[#allocation228_spill] sm:$0xff] }
 0x490   :  { %25049 = vmatprep.subr.mxu0 %v25437_v0  ;;  %25060 = vmatprep.subr.mxu1 %v25437_v0 }
 0x491   :  { %25050 = vmatpush3.msra.mxu0 %v34638_v3  ;;  %25051 = vmatprep.mubr.msk.f32.mxu0 %vm25438_vm0, %v25437_v0  ;;  %v34648_v3 = vunpack.c.l.bf16 %v34644_v22 }
 0x492   :  { %25061 = vmatpush3.msra.mxu1 %v34639_v27  ;;  %25062 = vmatprep.mubr.msk.f32.mxu1 %vm25438_vm0, %v25437_v0  ;;  %v34649_v27 = vunpack.c.l.bf16 %v34646_v9 }
 0x493   :  { %25052 = vmatmul.mubr.msk.f32.vlgmr.msra.gmra.mxu0 %vm1171_vm1, %v25413_v58  ;;  %25063 = vmatmul.mubr.msk.f32.vlgmr.msra.gmra.mxu1 %vm1171_vm1, %v25414_v16  ;;  %v25415_v58 = vld [vmem:[%s32766_s0 + $0x54] sm:$0x3]  ;;  %v25416_v16 = vld [vmem:[%s32766_s0 + $0x56] sm:$0x3] }
 0x494   :  { %25065 = vmatprep.subr.mxu0 %v25437_v0  ;;  %25076 = vmatprep.subr.mxu1 %v25437_v0 }
 0x495   :  { %25066 = vmatpush3.msra.mxu0 %v34640_v63  ;;  %25077 = vmatpush3.msra.mxu1 %v34641_v13  ;;  %v15331_v35 = vpop.f32.mrf.mxu0  ;;  %v15401_v1 = vpop.f32.mrf.mxu1  ;;  %v34650_v63 = vunpack.c.h.bf16 %v29046_v18  ;;  %v34651_v13 = vunpack.c.h.bf16 %v29051_v31 }
 0x496   :  { %25067 = vmatprep.subr.mxu0 %v25437_v0  ;;  %25078 = vmatprep.subr.mxu1 %v25437_v0  ;;  %v15332_v47 = vadd.f32 %v15331_v35, %v30779_v53  ;;  %v15402_v15 = vadd.f32 %v15401_v1, %v30781_v44  ;;  %v34645_v53 = vunpack.c.h.bf16 %v34644_v22  ;;  %v34647_v44 = vunpack.c.h.bf16 %v34646_v9  ;;  %v25417_v9 = vld [vmem:[%s32766_s0 + $0x58] sm:$0x3] }
 0x497   :  { %25068 = vmatpush3.msra.mxu0 %v34642_v29  ;;  %25079 = vmatpush3.msra.mxu1 %v34643_v51  ;;  %v24635_v43 = vpop.f32.mrf.mxu0  ;;  %v24646_v12 = vpop.f32.mrf.mxu1  ;;  %v34652_v29 = vunpack.c.l.bf16 %v29046_v18  ;;  %v34653_v51 = vunpack.c.l.bf16 %v29051_v31  ;;  %v34654_v18 = vld [vmem:[#allocation229_spill] sm:$0xff]  ;;  %v34656_v31 = vld [vmem:[#allocation230_spill] sm:$0xff] }
 0x498   :  { %25069 = vmatprep.subr.mxu0 %v25437_v0  ;;  %25080 = vmatprep.subr.mxu1 %v25437_v0  ;;  %19607 = vst.msk [vmem:[%s32770_s5 + $0x4] sm:$0x3] %vm10580_vm2, %v15332_v47  ;;  %19608 = vst.msk [vmem:[%s32770_s5 + $0x6] sm:$0x3] %vm10580_vm2, %v15402_v15  ;;  %v34658_v22 = vunpack.c.l.bf16 %v34654_v18 }
 0x499   :  { %25070 = vmatpush3.msra.mxu0 %v34645_v53  ;;  %25081 = vmatpush3.msra.mxu1 %v34647_v44  ;;  %v34659_v53 = vunpack.c.l.bf16 %v34656_v31  ;;  %v25418_v44 = vld [vmem:[%s32766_s0 + $0x5a] sm:$0x3] }
 0x49a   :  { %25071 = vmatprep.subr.mxu0 %v25437_v0  ;;  %25082 = vmatprep.subr.mxu1 %v25437_v0 }
 0x49b   :  { %25072 = vmatpush3.msra.mxu0 %v34648_v3  ;;  %25073 = vmatprep.mubr.msk.f32.mxu0 %vm25438_vm0, %v25437_v0  ;;  %v34660_v3 = vunpack.c.h.bf16 %v29120_v26 }
 0x49c   :  { %25083 = vmatpush3.msra.mxu1 %v34649_v27  ;;  %25084 = vmatprep.mubr.msk.f32.mxu1 %vm25438_vm0, %v25437_v0  ;;  %v34661_v27 = vunpack.c.h.bf16 %v29125_v37 }
 0x49d   :  { %25074 = vmatmul.mubr.msk.f32.vlgmr.msra.gmra.mxu0 %vm1171_vm1, %v25415_v58  ;;  %25085 = vmatmul.mubr.msk.f32.vlgmr.msra.gmra.mxu1 %vm1171_vm1, %v25416_v16 }
 0x49e   :  { %25087 = vmatprep.subr.mxu0 %v25437_v0  ;;  %25098 = vmatprep.subr.mxu1 %v25437_v0 }
 0x49f   :  { %25088 = vmatpush3.msra.mxu0 %v34650_v63  ;;  %25099 = vmatpush3.msra.mxu1 %v34651_v13  ;;  %v15471_v35 = vpop.f32.mrf.mxu0  ;;  %v15541_v1 = vpop.f32.mrf.mxu1 }
 0x4a0   :  { %25089 = vmatprep.subr.mxu0 %v25437_v0  ;;  %25100 = vmatprep.subr.mxu1 %v25437_v0  ;;  %v15472_v47 = vadd.f32 %v15471_v35, %v30819_v8  ;;  %v15542_v15 = vadd.f32 %v15541_v1, %v30821_v62  ;;  %v34655_v8 = vunpack.c.h.bf16 %v34654_v18  ;;  %v34657_v62 = vunpack.c.h.bf16 %v34656_v31 }
 0x4a1   :  { %25090 = vmatpush3.msra.mxu0 %v34652_v29  ;;  %25101 = vmatpush3.msra.mxu1 %v34653_v51  ;;  %v24657_v43 = vpop.f32.mrf.mxu0  ;;  %v24668_v12 = vpop.f32.mrf.mxu1  ;;  %v34662_v35 = vunpack.c.l.bf16 %v29120_v26  ;;  %v34663_v1 = vunpack.c.l.bf16 %v29125_v37  ;;  %v34664_v26 = vld [vmem:[#allocation231_spill] sm:$0xff]  ;;  %v34666_v37 = vld [vmem:[#allocation232_spill] sm:$0xff]  ;;  %v34670_v18 = vunpack.c.h.bf16 %v29194_v24 }
 0x4a2   :  { %25091 = vmatprep.subr.mxu0 %v25437_v0  ;;  %25102 = vmatprep.subr.mxu1 %v25437_v0  ;;  %19609 = vst.msk [vmem:[%s32770_s5 + $0x8] sm:$0x3] %vm10580_vm2, %v15472_v47  ;;  %19610 = vst.msk [vmem:[%s32770_s5 + $0xa] sm:$0x3] %vm10580_vm2, %v15542_v15  ;;  %v34668_v29 = vunpack.c.l.bf16 %v34664_v26  ;;  %v34669_v51 = vunpack.c.l.bf16 %v34666_v37  ;;  %v25419_v43 = vld [vmem:[%s32766_s0 + $0x5c] sm:$0x3] }
 0x4a3   :  { %25092 = vmatpush3.msra.mxu0 %v34655_v8  ;;  %25103 = vmatpush3.msra.mxu1 %v34657_v62  ;;  %v25420_v12 = vld [vmem:[%s32766_s0 + $0x5e] sm:$0x3]  ;;  %v34671_v8 = vunpack.c.h.bf16 %v29199_v23 }
 0x4a4   :  { %25093 = vmatprep.subr.mxu0 %v25437_v0  ;;  %25104 = vmatprep.subr.mxu1 %v25437_v0 }
 0x4a5   :  { %25094 = vmatpush3.msra.mxu0 %v34658_v22  ;;  %25095 = vmatprep.mubr.msk.f32.mxu0 %vm25438_vm0, %v25437_v0 }
 0x4a6   :  { %25105 = vmatpush3.msra.mxu1 %v34659_v53  ;;  %25106 = vmatprep.mubr.msk.f32.mxu1 %vm25438_vm0, %v25437_v0 }
 0x4a7   :  { %25096 = vmatmul.mubr.msk.f32.vlgmr.msra.gmra.mxu0 %vm1171_vm1, %v25417_v9  ;;  %25107 = vmatmul.mubr.msk.f32.vlgmr.msra.gmra.mxu1 %vm1171_vm1, %v25418_v44  ;;  %v34672_v9 = vunpack.c.l.bf16 %v29194_v24  ;;  %v34673_v44 = vunpack.c.l.bf16 %v29199_v23  ;;  %v34674_v24 = vld [vmem:[#allocation233_spill] sm:$0xff]  ;;  %v34676_v23 = vld [vmem:[#allocation234_spill] sm:$0xff] }
 0x4a8   :  { %25109 = vmatprep.subr.mxu0 %v25437_v0  ;;  %25120 = vmatprep.subr.mxu1 %v25437_v0 }
 0x4a9   :  { %25110 = vmatpush3.msra.mxu0 %v34660_v3  ;;  %25121 = vmatpush3.msra.mxu1 %v34661_v27  ;;  %v15611_v58 = vpop.f32.mrf.mxu0  ;;  %v15681_v16 = vpop.f32.mrf.mxu1 }
 0x4aa   :  { %25111 = vmatprep.subr.mxu0 %v25437_v0  ;;  %25122 = vmatprep.subr.mxu1 %v25437_v0  ;;  %v15612_v63 = vadd.f32 %v15611_v58, %v30859_v25  ;;  %v15682_v13 = vadd.f32 %v15681_v16, %v30861_v41  ;;  %v34665_v25 = vunpack.c.h.bf16 %v34664_v26  ;;  %v34667_v41 = vunpack.c.h.bf16 %v34666_v37 }
 0x4ab   :  { %25112 = vmatpush3.msra.mxu0 %v34662_v35  ;;  %25123 = vmatpush3.msra.mxu1 %v34663_v1  ;;  %v24679_v47 = vpop.f32.mrf.mxu0  ;;  %v24690_v15 = vpop.f32.mrf.mxu1  ;;  %v34678_v58 = vunpack.c.l.bf16 %v34674_v24  ;;  %v34679_v16 = vunpack.c.l.bf16 %v34676_v23  ;;  %v34680_v35 = vunpack.c.h.bf16 %v29268_v36  ;;  %v34681_v1 = vunpack.c.h.bf16 %v29273_v17 }
 0x4ac   :  { %25113 = vmatprep.subr.mxu0 %v25437_v0  ;;  %25124 = vmatprep.subr.mxu1 %v25437_v0  ;;  %19611 = vst.msk [vmem:[%s32770_s5 + $0xc] sm:$0x3] %vm10580_vm2, %v15612_v63  ;;  %19612 = vst.msk [vmem:[%s32770_s5 + $0xe] sm:$0x3] %vm10580_vm2, %v15682_v13  ;;  %v25421_v63 = vld [vmem:[%s32766_s0 + $0x60] sm:$0x3]  ;;  %v34682_v37 = vunpack.c.l.bf16 %v29268_v36 }
 0x4ad   :  { %25114 = vmatpush3.msra.mxu0 %v34665_v25  ;;  %25125 = vmatpush3.msra.mxu1 %v34667_v41  ;;  %v25422_v13 = vld [vmem:[%s32766_s0 + $0x62] sm:$0x3]  ;;  %v34683_v41 = vunpack.c.l.bf16 %v29273_v17  ;;  %v34684_v36 = vld [vmem:[#allocation235_spill] sm:$0xff]  ;;  %v34686_v17 = vld [vmem:[#allocation236_spill] sm:$0xff] }
 0x4ae   :  { %25115 = vmatprep.subr.mxu0 %v25437_v0  ;;  %25126 = vmatprep.subr.mxu1 %v25437_v0 }
 0x4af   :  { %25116 = vmatpush3.msra.mxu0 %v34668_v29  ;;  %25117 = vmatprep.mubr.msk.f32.mxu0 %vm25438_vm0, %v25437_v0 }
 0x4b0   :  { %25127 = vmatpush3.msra.mxu1 %v34669_v51  ;;  %25128 = vmatprep.mubr.msk.f32.mxu1 %vm25438_vm0, %v25437_v0 }
 0x4b1   :  { %25118 = vmatmul.mubr.msk.f32.vlgmr.msra.gmra.mxu0 %vm1171_vm1, %v25419_v43  ;;  %25129 = vmatmul.mubr.msk.f32.vlgmr.msra.gmra.mxu1 %vm1171_vm1, %v25420_v12  ;;  %v34688_v43 = vunpack.c.l.bf16 %v34684_v36  ;;  %v34689_v12 = vunpack.c.l.bf16 %v34686_v17 }
 0x4b2   :  { %25131 = vmatprep.subr.mxu0 %v25437_v0  ;;  %25142 = vmatprep.subr.mxu1 %v25437_v0 }
 0x4b3   :  { %25132 = vmatpush3.msra.mxu0 %v34670_v18  ;;  %25143 = vmatpush3.msra.mxu1 %v34671_v8  ;;  %v15751_v31 = vpop.f32.mrf.mxu0  ;;  %v15821_v62 = vpop.f32.mrf.mxu1  ;;  %v25423_v18 = vld [vmem:[%s32766_s0 + $0x64] sm:$0x3]  ;;  %v25424_v8 = vld [vmem:[%s32766_s0 + $0x66] sm:$0x3] }
 0x4b4   :  { %25133 = vmatprep.subr.mxu0 %v25437_v0  ;;  %25144 = vmatprep.subr.mxu1 %v25437_v0  ;;  %v15752_v22 = vadd.f32 %v15751_v31, %v30899_v30  ;;  %v15822_v53 = vadd.f32 %v15821_v62, %v30901_v59  ;;  %v34675_v30 = vunpack.c.h.bf16 %v34674_v24  ;;  %v34677_v59 = vunpack.c.h.bf16 %v34676_v23 }
 0x4b5   :  { %25134 = vmatpush3.msra.mxu0 %v34672_v9  ;;  %25145 = vmatpush3.msra.mxu1 %v34673_v44  ;;  %v24701_v3 = vpop.f32.mrf.mxu0  ;;  %v24712_v27 = vpop.f32.mrf.mxu1  ;;  %v34690_v31 = vunpack.c.h.bf16 %v29342_v32  ;;  %v34691_v62 = vunpack.c.h.bf16 %v29347_v10 }
 0x4b6   :  { %25135 = vmatprep.subr.mxu0 %v25437_v0  ;;  %25146 = vmatprep.subr.mxu1 %v25437_v0  ;;  %19613 = vst.msk [vmem:[%s32770_s5 + $0x10] sm:$0x3] %vm10580_vm2, %v15752_v22  ;;  %19614 = vst.msk [vmem:[%s32770_s5 + $0x12] sm:$0x3] %vm10580_vm2, %v15822_v53  ;;  %v34692_v3 = vunpack.c.l.bf16 %v29342_v32  ;;  %v34693_v27 = vunpack.c.l.bf16 %v29347_v10  ;;  %v34694_v32 = vld [vmem:[#allocation237_spill] sm:$0xff]  ;;  %v34696_v10 = vld [vmem:[#allocation238_spill] sm:$0xff] }
 0x4b7   :  { %25136 = vmatpush3.msra.mxu0 %v34675_v30  ;;  %25147 = vmatpush3.msra.mxu1 %v34677_v59  ;;  %v34698_v23 = vunpack.c.l.bf16 %v34694_v32  ;;  %v34699_v59 = vunpack.c.l.bf16 %v34696_v10 }
 0x4b8   :  { %25137 = vmatprep.subr.mxu0 %v25437_v0  ;;  %25148 = vmatprep.subr.mxu1 %v25437_v0 }
 0x4b9   :  { %25138 = vmatpush3.msra.mxu0 %v34678_v58  ;;  %25139 = vmatprep.mubr.msk.f32.mxu0 %vm25438_vm0, %v25437_v0  ;;  %v25425_v58 = vld [vmem:[%s32766_s0 + $0x68] sm:$0x3] }
 0x4ba   :  { %25149 = vmatpush3.msra.mxu1 %v34679_v16  ;;  %25150 = vmatprep.mubr.msk.f32.mxu1 %vm25438_vm0, %v25437_v0  ;;  %v25426_v16 = vld [vmem:[%s32766_s0 + $0x6a] sm:$0x3] }
 0x4bb   :  { %25140 = vmatmul.mubr.msk.f32.vlgmr.msra.gmra.mxu0 %vm1171_vm1, %v25421_v63  ;;  %25151 = vmatmul.mubr.msk.f32.vlgmr.msra.gmra.mxu1 %vm1171_vm1, %v25422_v13  ;;  %v34700_v63 = vunpack.c.h.bf16 %v29416_v40  ;;  %v34701_v13 = vunpack.c.h.bf16 %v29421_v7 }
 0x4bc   :  { %25153 = vmatprep.subr.mxu0 %v25437_v0  ;;  %25164 = vmatprep.subr.mxu1 %v25437_v0 }
 0x4bd   :  { %25154 = vmatpush3.msra.mxu0 %v34680_v35  ;;  %25165 = vmatpush3.msra.mxu1 %v34681_v1  ;;  %v15891_v47 = vpop.f32.mrf.mxu0  ;;  %v15961_v15 = vpop.f32.mrf.mxu1 }
 0x4be   :  { %25155 = vmatprep.subr.mxu0 %v25437_v0  ;;  %25166 = vmatprep.subr.mxu1 %v25437_v0  ;;  %v15892_v26 = vadd.f32 %v15891_v47, %v30939_v20  ;;  %v15962_v25 = vadd.f32 %v15961_v15, %v30941_v2  ;;  %v34685_v20 = vunpack.c.h.bf16 %v34684_v36  ;;  %v34687_v2 = vunpack.c.h.bf16 %v34686_v17  ;;  %v25427_v36 = vld [vmem:[%s32766_s0 + $0x6c] sm:$0x3] }
 0x4bf   :  { %25156 = vmatpush3.msra.mxu0 %v34682_v37  ;;  %25167 = vmatpush3.msra.mxu1 %v34683_v41  ;;  %v24723_v29 = vpop.f32.mrf.mxu0  ;;  %v24734_v51 = vpop.f32.mrf.mxu1  ;;  %v34710_v17 = vunpack.c.h.bf16 %v29490_v38 }
 0x4c0   :  { %25157 = vmatprep.subr.mxu0 %v25437_v0  ;;  %25168 = vmatprep.subr.mxu1 %v25437_v0  ;;  %19615 = vst.msk [vmem:[%s32770_s5 + $0x14] sm:$0x3] %vm10580_vm2, %v15892_v26  ;;  %19616 = vst.msk [vmem:[%s32770_s5 + $0x16] sm:$0x3] %vm10580_vm2, %v15962_v25  ;;  %v34702_v26 = vunpack.c.l.bf16 %v29416_v40  ;;  %v34703_v25 = vunpack.c.l.bf16 %v29421_v7  ;;  %v34704_v40 = vld [vmem:[#allocation239_spill] sm:$0xff]  ;;  %v34706_v7 = vld [vmem:[#allocation240_spill] sm:$0xff] }
 0x4c1   :  { %25158 = vmatpush3.msra.mxu0 %v34685_v20  ;;  %25169 = vmatpush3.msra.mxu1 %v34687_v2  ;;  %v34708_v29 = vunpack.c.l.bf16 %v34704_v40  ;;  %v34709_v51 = vunpack.c.l.bf16 %v34706_v7  ;;  %v25428_v20 = vld [vmem:[%s32766_s0 + $0x6e] sm:$0x3]  ;;  %v34711_v2 = vunpack.c.h.bf16 %v29495_v5 }
 0x4c2   :  { %25159 = vmatprep.subr.mxu0 %v25437_v0  ;;  %25170 = vmatprep.subr.mxu1 %v25437_v0 }
 0x4c3   :  { %25160 = vmatpush3.msra.mxu0 %v34688_v43  ;;  %25161 = vmatprep.mubr.msk.f32.mxu0 %vm25438_vm0, %v25437_v0 }
 0x4c4   :  { %25171 = vmatpush3.msra.mxu1 %v34689_v12  ;;  %25172 = vmatprep.mubr.msk.f32.mxu1 %vm25438_vm0, %v25437_v0 }
 0x4c5   :  { %25162 = vmatmul.mubr.msk.f32.vlgmr.msra.gmra.mxu0 %vm1171_vm1, %v25423_v18  ;;  %25173 = vmatmul.mubr.msk.f32.vlgmr.msra.gmra.mxu1 %vm1171_vm1, %v25424_v8 }
 0x4c6   :  { %25175 = vmatprep.subr.mxu0 %v25437_v0  ;;  %25186 = vmatprep.subr.mxu1 %v25437_v0 }
 0x4c7   :  { %25176 = vmatpush3.msra.mxu0 %v34690_v31  ;;  %25187 = vmatpush3.msra.mxu1 %v34691_v62  ;;  %v16031_v22 = vpop.f32.mrf.mxu0  ;;  %v16101_v53 = vpop.f32.mrf.mxu1  ;;  %v34712_v31 = vunpack.c.l.bf16 %v29490_v38  ;;  %v34713_v62 = vunpack.c.l.bf16 %v29495_v5  ;;  %v34714_v38 = vld [vmem:[#allocation241_spill] sm:$0xff]  ;;  %v34716_v5 = vld [vmem:[#allocation242_spill] sm:$0xff] }
 0x4c8   :  { %25177 = vmatprep.subr.mxu0 %v25437_v0  ;;  %25188 = vmatprep.subr.mxu1 %v25437_v0  ;;  %v16032_v9 = vadd.f32 %v16031_v22, %v30979_v42  ;;  %v16102_v44 = vadd.f32 %v16101_v53, %v30981_v57  ;;  %v34695_v42 = vunpack.c.h.bf16 %v34694_v32  ;;  %v34697_v57 = vunpack.c.h.bf16 %v34696_v10 }
 0x4c9   :  { %25178 = vmatpush3.msra.mxu0 %v34692_v3  ;;  %25189 = vmatpush3.msra.mxu1 %v34693_v27  ;;  %v24745_v24 = vpop.f32.mrf.mxu0  ;;  %v24756_v30 = vpop.f32.mrf.mxu1  ;;  %v25429_v3 = vld [vmem:[%s32766_s0 + $0x70] sm:$0x3]  ;;  %v25430_v27 = vld [vmem:[%s32766_s0 + $0x72] sm:$0x3] }
 0x4ca   :  { %25179 = vmatprep.subr.mxu0 %v25437_v0  ;;  %25190 = vmatprep.subr.mxu1 %v25437_v0  ;;  %19617 = vst.msk [vmem:[%s32770_s5 + $0x18] sm:$0x3] %vm10580_vm2, %v16032_v9  ;;  %19618 = vst.msk [vmem:[%s32770_s5 + $0x1a] sm:$0x3] %vm10580_vm2, %v16102_v44  ;;  %v34718_v9 = vunpack.c.l.bf16 %v34714_v38  ;;  %v34719_v44 = vunpack.c.l.bf16 %v34716_v5  ;;  %v34720_v24 = vunpack.c.h.bf16 %v29564_v50  ;;  %v34721_v30 = vunpack.c.h.bf16 %v29569_v4 }
 0x4cb   :  { %25180 = vmatpush3.msra.mxu0 %v34695_v42  ;;  %25191 = vmatpush3.msra.mxu1 %v34697_v57 }
 0x4cc   :  { %25181 = vmatprep.subr.mxu0 %v25437_v0  ;;  %25192 = vmatprep.subr.mxu1 %v25437_v0 }
 0x4cd   :  { %25182 = vmatpush3.msra.mxu0 %v34698_v23  ;;  %25183 = vmatprep.mubr.msk.f32.mxu0 %vm25438_vm0, %v25437_v0  ;;  %v34722_v23 = vunpack.c.l.bf16 %v29564_v50  ;;  %v34724_v50 = vld [vmem:[#allocation243_spill] sm:$0xff] }
 0x4ce   :  { %25193 = vmatpush3.msra.mxu1 %v34699_v59  ;;  %25194 = vmatprep.mubr.msk.f32.mxu1 %vm25438_vm0, %v25437_v0  ;;  %v34723_v59 = vunpack.c.l.bf16 %v29569_v4  ;;  %v34726_v4 = vld [vmem:[#allocation244_spill] sm:$0xff] }
 0x4cf   :  { %25184 = vmatmul.mubr.msk.f32.vlgmr.msra.gmra.mxu0 %vm1171_vm1, %v25425_v58  ;;  %25195 = vmatmul.mubr.msk.f32.vlgmr.msra.gmra.mxu1 %vm1171_vm1, %v25426_v16 }
 0x4d0   :  { %25197 = vmatprep.subr.mxu0 %v25437_v0  ;;  %25208 = vmatprep.subr.mxu1 %v25437_v0 }
 0x4d1   :  { %25198 = vmatpush3.msra.mxu0 %v34700_v63  ;;  %25209 = vmatpush3.msra.mxu1 %v34701_v13  ;;  %v16171_v35 = vpop.f32.mrf.mxu0  ;;  %v16241_v1 = vpop.f32.mrf.mxu1  ;;  %v34728_v63 = vunpack.c.l.bf16 %v34724_v50  ;;  %v34729_v13 = vunpack.c.l.bf16 %v34726_v4 }
 0x4d2   :  { %25199 = vmatprep.subr.mxu0 %v25437_v0  ;;  %25210 = vmatprep.subr.mxu1 %v25437_v0  ;;  %v16172_v47 = vadd.f32 %v16171_v35, %v31019_v52  ;;  %v16242_v15 = vadd.f32 %v16241_v1, %v31021_v21  ;;  %v34705_v52 = vunpack.c.h.bf16 %v34704_v40  ;;  %v34707_v21 = vunpack.c.h.bf16 %v34706_v7  ;;  %v25431_v35 = vld [vmem:[%s32766_s0 + $0x74] sm:$0x3]  ;;  %v25432_v1 = vld [vmem:[%s32766_s0 + $0x76] sm:$0x3] }
 0x4d3   :  { %25200 = vmatpush3.msra.mxu0 %v34702_v26  ;;  %25211 = vmatpush3.msra.mxu1 %v34703_v25  ;;  %v24767_v37 = vpop.f32.mrf.mxu0  ;;  %v24778_v41 = vpop.f32.mrf.mxu1  ;;  %v34732_v40 = vunpack.c.l.bf16 %v29638_v46 }
 0x4d4   :  { %25201 = vmatprep.subr.mxu0 %v25437_v0  ;;  %25212 = vmatprep.subr.mxu1 %v25437_v0  ;;  %19619 = vst.msk [vmem:[%s32770_s5 + $0x1c] sm:$0x3] %vm10580_vm2, %v16172_v47  ;;  %19620 = vst.msk [vmem:[%s32770_s5 + $0x1e] sm:$0x3] %vm10580_vm2, %v16242_v15  ;;  %v34730_v47 = vunpack.c.h.bf16 %v29638_v46  ;;  %v34731_v15 = vunpack.c.h.bf16 %v29643_v11  ;;  %v34734_v46 = vld [vmem:[#allocation245_spill] sm:$0xff] }
 0x4d5   :  { %25202 = vmatpush3.msra.mxu0 %v34705_v52  ;;  %25213 = vmatpush3.msra.mxu1 %v34707_v21  ;;  %v34733_v52 = vunpack.c.l.bf16 %v29643_v11  ;;  %v34736_v11 = vld [vmem:[#allocation246_spill] sm:$0xff] }
 0x4d6   :  { %25203 = vmatprep.subr.mxu0 %v25437_v0  ;;  %25214 = vmatprep.subr.mxu1 %v25437_v0 }
 0x4d7   :  { %25204 = vmatpush3.msra.mxu0 %v34708_v29  ;;  %25205 = vmatprep.mubr.msk.f32.mxu0 %vm25438_vm0, %v25437_v0  ;;  %v34738_v29 = vunpack.c.l.bf16 %v34734_v46 }
 0x4d8   :  { %25215 = vmatpush3.msra.mxu1 %v34709_v51  ;;  %25216 = vmatprep.mubr.msk.f32.mxu1 %vm25438_vm0, %v25437_v0  ;;  %v34739_v51 = vunpack.c.l.bf16 %v34736_v11 }
 0x4d9   :  { %25206 = vmatmul.mubr.msk.f32.vlgmr.msra.gmra.mxu0 %vm1171_vm1, %v25427_v36  ;;  %25217 = vmatmul.mubr.msk.f32.vlgmr.msra.gmra.mxu1 %vm1171_vm1, %v25428_v20  ;;  %v25433_v36 = vld [vmem:[%s32766_s0 + $0x78] sm:$0x3]  ;;  %v25434_v20 = vld [vmem:[%s32766_s0 + $0x7a] sm:$0x3] }
 0x4da   :  { %25219 = vmatprep.subr.mxu0 %v25437_v0  ;;  %25230 = vmatprep.subr.mxu1 %v25437_v0 }
 0x4db   :  { %25220 = vmatpush3.msra.mxu0 %v34710_v17  ;;  %25231 = vmatpush3.msra.mxu1 %v34711_v2  ;;  %v16311_v43 = vpop.f32.mrf.mxu0  ;;  %v16381_v12 = vpop.f32.mrf.mxu1  ;;  %v34740_v17 = vunpack.c.h.bf16 %v29712_v54  ;;  %v34741_v2 = vunpack.c.h.bf16 %v29717_v45 }
 0x4dc   :  { %25221 = vmatprep.subr.mxu0 %v25437_v0  ;;  %25232 = vmatprep.subr.mxu1 %v25437_v0  ;;  %v16312_v18 = vadd.f32 %v16311_v43, %v31059_v33  ;;  %v16382_v8 = vadd.f32 %v16381_v12, %v31061_v34  ;;  %v34715_v33 = vunpack.c.h.bf16 %v34714_v38  ;;  %v34717_v34 = vunpack.c.h.bf16 %v34716_v5  ;;  %v25435_v38 = vld [vmem:[%s32766_s0 + $0x7c] sm:$0x3] }
 0x4dd   :  { %25222 = vmatpush3.msra.mxu0 %v34712_v31  ;;  %25233 = vmatpush3.msra.mxu1 %v34713_v62  ;;  %v24789_v22 = vpop.f32.mrf.mxu0  ;;  %v24800_v53 = vpop.f32.mrf.mxu1  ;;  %v34742_v31 = vunpack.c.l.bf16 %v29712_v54  ;;  %v34743_v62 = vunpack.c.l.bf16 %v29717_v45  ;;  %v34744_v54 = vunpack.c.h.bf16 %v29752_v61  ;;  %v34745_v45 = vunpack.c.h.bf16 %v29757_v39 }
 0x4de   :  { %25223 = vmatprep.subr.mxu0 %v25437_v0  ;;  %25234 = vmatprep.subr.mxu1 %v25437_v0  ;;  %19621 = vst.msk [vmem:[%s32770_s5 + $0x20] sm:$0x3] %vm10580_vm2, %v16312_v18  ;;  %19622 = vst.msk [vmem:[%s32770_s5 + $0x22] sm:$0x3] %vm10580_vm2, %v16382_v8 }
 0x4df   :  { %25224 = vmatpush3.msra.mxu0 %v34715_v33  ;;  %25235 = vmatpush3.msra.mxu1 %v34717_v34 }
 0x4e0   :  { %25225 = vmatprep.subr.mxu0 %v25437_v0  ;;  %25236 = vmatprep.subr.mxu1 %v25437_v0 }
 0x4e1   :  { %25226 = vmatpush3.msra.mxu0 %v34718_v9  ;;  %25227 = vmatprep.mubr.msk.f32.mxu0 %vm25438_vm0, %v25437_v0 }
 0x4e2   :  { %25237 = vmatpush3.msra.mxu1 %v34719_v44  ;;  %25238 = vmatprep.mubr.msk.f32.mxu1 %vm25438_vm0, %v25437_v0 }
 0x4e3   :  { %25228 = vmatmul.mubr.msk.f32.vlgmr.msra.gmra.mxu0 %vm1171_vm1, %v25429_v3  ;;  %25239 = vmatmul.mubr.msk.f32.vlgmr.msra.gmra.mxu1 %vm1171_vm1, %v25430_v27 }
 0x4e4   :  { %25241 = vmatprep.subr.mxu0 %v25437_v0  ;;  %25252 = vmatprep.subr.mxu1 %v25437_v0 }
 0x4e5   :  { %25242 = vmatpush3.msra.mxu0 %v34720_v24  ;;  %25253 = vmatpush3.msra.mxu1 %v34721_v30  ;;  %v16451_v32 = vpop.f32.mrf.mxu0  ;;  %v16521_v42 = vpop.f32.mrf.mxu1  ;;  %v34748_v24 = vld [vmem:[#allocation2_spill] sm:$0xff] }
 0x4e6   :  { %25243 = vmatprep.subr.mxu0 %v25437_v0  ;;  %25254 = vmatprep.subr.mxu1 %v25437_v0  ;;  %v16452_v10 = vadd.f32 %v16451_v32, %v31099_v6  ;;  %v16522_v57 = vadd.f32 %v16521_v42, %v31101_v49  ;;  %v34725_v6 = vunpack.c.h.bf16 %v34724_v50  ;;  %v34727_v49 = vunpack.c.h.bf16 %v34726_v4 }
 0x4e7   :  { %25244 = vmatpush3.msra.mxu0 %v34722_v23  ;;  %25255 = vmatpush3.msra.mxu1 %v34723_v59  ;;  %v24811_v58 = vpop.f32.mrf.mxu0  ;;  %v24822_v16 = vpop.f32.mrf.mxu1  ;;  %v34750_v23 = vld [vmem:[#allocation134_spill] sm:$0xff] }
 0x4e8   :  { %25245 = vmatprep.subr.mxu0 %v25437_v0  ;;  %25256 = vmatprep.subr.mxu1 %v25437_v0  ;;  %19623 = vst.msk [vmem:[%s32770_s5 + $0x24] sm:$0x3] %vm10580_vm2, %v16452_v10  ;;  %19624 = vst.msk [vmem:[%s32770_s5 + $0x26] sm:$0x3] %vm10580_vm2, %v16522_v57  ;;  %v34749_v10 = vld [vmem:[#allocation133_spill] sm:$0xff] }
 0x4e9   :  { %25246 = vmatpush3.msra.mxu0 %v34725_v6  ;;  %25257 = vmatpush3.msra.mxu1 %v34727_v49  ;;  %v34751_v6 = vld [vmem:[#allocation3_spill] sm:$0xff]  ;;  %v34752_v49 = vld [vmem:[#allocation4_spill] sm:$0xff] }
 0x4ea   :  { %25247 = vmatprep.subr.mxu0 %v25437_v0  ;;  %25258 = vmatprep.subr.mxu1 %v25437_v0 }
 0x4eb   :  { %25248 = vmatpush3.msra.mxu0 %v34728_v63  ;;  %25249 = vmatprep.mubr.msk.f32.mxu0 %vm25438_vm0, %v25437_v0 }
 0x4ec   :  { %25259 = vmatpush3.msra.mxu1 %v34729_v13  ;;  %25260 = vmatprep.mubr.msk.f32.mxu1 %vm25438_vm0, %v25437_v0 }
 0x4ed   :  { %25250 = vmatmul.mubr.msk.f32.vlgmr.msra.gmra.mxu0 %vm1171_vm1, %v25431_v35  ;;  %25261 = vmatmul.mubr.msk.f32.vlgmr.msra.gmra.mxu1 %vm1171_vm1, %v25432_v1 }
 0x4ee   :  { %25263 = vmatprep.subr.mxu0 %v25437_v0  ;;  %25274 = vmatprep.subr.mxu1 %v25437_v0 }
 0x4ef   :  { %25264 = vmatpush3.msra.mxu0 %v34730_v47  ;;  %25275 = vmatpush3.msra.mxu1 %v34731_v15  ;;  %v16591_v26 = vpop.f32.mrf.mxu0  ;;  %v16661_v25 = vpop.f32.mrf.mxu1  ;;  %v34753_v15 = vld [vmem:[#allocation5_spill] sm:$0xff] }
 0x4f0   :  { %25265 = vmatprep.subr.mxu0 %v25437_v0  ;;  %25276 = vmatprep.subr.mxu1 %v25437_v0  ;;  %v16592_v37 = vadd.f32 %v16591_v26, %v31139_v14  ;;  %v16662_v41 = vadd.f32 %v16661_v25, %v31141_v60  ;;  %v34735_v14 = vunpack.c.h.bf16 %v34734_v46  ;;  %v34737_v60 = vunpack.c.h.bf16 %v34736_v11  ;;  %v34754_v25 = vld [vmem:[#allocation6_spill] sm:$0xff] }
 0x4f1   :  { %25266 = vmatpush3.msra.mxu0 %v34732_v40  ;;  %25277 = vmatpush3.msra.mxu1 %v34733_v52  ;;  %v24833_v7 = vpop.f32.mrf.mxu0  ;;  %v24844_v21 = vpop.f32.mrf.mxu1 }
 0x4f2   :  { %25267 = vmatprep.subr.mxu0 %v25437_v0  ;;  %25278 = vmatprep.subr.mxu1 %v25437_v0  ;;  %19625 = vst.msk [vmem:[%s32770_s5 + $0x28] sm:$0x3] %vm10580_vm2, %v16592_v37  ;;  %19626 = vst.msk [vmem:[%s32770_s5 + $0x2a] sm:$0x3] %vm10580_vm2, %v16662_v41  ;;  %v34755_v21 = vld [vmem:[#allocation139_spill] sm:$0xff] }
 0x4f3   :  { %25268 = vmatpush3.msra.mxu0 %v34735_v14  ;;  %25279 = vmatpush3.msra.mxu1 %v34737_v60  ;;  %v34756_v14 = vld [vmem:[#allocation140_spill] sm:$0xff] }
 0x4f4   :  { %25269 = vmatprep.subr.mxu0 %v25437_v0  ;;  %25280 = vmatprep.subr.mxu1 %v25437_v0 }
 0x4f5   :  { %25270 = vmatpush3.msra.mxu0 %v34738_v29  ;;  %25271 = vmatprep.mubr.msk.f32.mxu0 %vm25438_vm0, %v25437_v0 }
 0x4f6   :  { %25281 = vmatpush3.msra.mxu1 %v34739_v51  ;;  %25282 = vmatprep.mubr.msk.f32.mxu1 %vm25438_vm0, %v25437_v0 }
 0x4f7   :  { %25272 = vmatmul.mubr.msk.f32.vlgmr.msra.gmra.mxu0 %vm1171_vm1, %v25433_v36  ;;  %25283 = vmatmul.mubr.msk.f32.vlgmr.msra.gmra.mxu1 %vm1171_vm1, %v25434_v20  ;;  %v34757_v20 = vld [vmem:[#allocation7_spill] sm:$0xff] }
 0x4f8   :  { %25285 = vmatprep.subr.mxu0 %v25437_v0  ;;  %25296 = vmatprep.subr.mxu1 %v25437_v0 }
 0x4f9   :  { %25286 = vmatpush3.msra.mxu0 %v34740_v17  ;;  %25297 = vmatpush3.msra.mxu1 %v34741_v2  ;;  %v16731_v43 = vpop.f32.mrf.mxu0  ;;  %v16801_v12 = vpop.f32.mrf.mxu1  ;;  %v34758_v2 = vld [vmem:[#allocation8_spill] sm:$0xff] }
 0x4fa   :  { %25287 = vmatprep.subr.mxu0 %v25437_v0  ;;  %25298 = vmatprep.subr.mxu1 %v25437_v0  ;;  %v16732_v18 = vadd.f32 %v16731_v43, %v31179_v48  ;;  %v16802_v8 = vadd.f32 %v16801_v12, %v31181_v19  ;;  %v34746_v48 = vunpack.c.l.bf16 %v29752_v61  ;;  %v34747_v19 = vunpack.c.l.bf16 %v29757_v39  ;;  %v25436_v61 = vld [vmem:[%s32766_s0 + $0x7e] sm:$0x3] }
 0x4fb   :  { %25288 = vmatpush3.msra.mxu0 %v34742_v31  ;;  %25299 = vmatpush3.msra.mxu1 %v34743_v62  ;;  %v24855_v22 = vpop.f32.mrf.mxu0  ;;  %v24866_v53 = vpop.f32.mrf.mxu1  ;;  %v34759_v62 = vld [vmem:[#allocation9_spill] sm:$0xff] }
 0x4fc   :  { %25289 = vmatprep.subr.mxu0 %v25437_v0  ;;  %25300 = vmatprep.subr.mxu1 %v25437_v0  ;;  %19627 = vst.msk [vmem:[%s32770_s5 + $0x2c] sm:$0x3] %vm10580_vm2, %v16732_v18  ;;  %19628 = vst.msk [vmem:[%s32770_s5 + $0x2e] sm:$0x3] %vm10580_vm2, %v16802_v8  ;;  %v34760_v53 = vld [vmem:[#allocation10_spill] sm:$0xff] }
 0x4fd   :  { %25290 = vmatpush3.msra.mxu0 %v34744_v54  ;;  %25301 = vmatpush3.msra.mxu1 %v34745_v45 }
 0x4fe   :  { %25291 = vmatprep.subr.mxu0 %v25437_v0  ;;  %25302 = vmatprep.subr.mxu1 %v25437_v0 }
 0x4ff   :  { %25292 = vmatpush3.msra.mxu0 %v34746_v48  ;;  %25293 = vmatprep.mubr.msk.f32.mxu0 %vm25438_vm0, %v25437_v0 }
 0x500   :  { %25303 = vmatpush3.msra.mxu1 %v34747_v19  ;;  %25304 = vmatprep.mubr.msk.f32.mxu1 %vm25438_vm0, %v25437_v0 }
 0x501   :  { %25294 = vmatmul.mubr.msk.f32.vlgmr.msra.gmra.mxu0 %vm1171_vm1, %v25435_v38  ;;  %25305 = vmatmul.mubr.msk.f32.vlgmr.msra.gmra.mxu1 %vm1171_vm1, %v25436_v61  ;;  %v34761_v61 = vld [vmem:[#allocation145_spill] sm:$0xff] }
 0x503   :  { %v16871_v33 = vpop.f32.mrf.mxu0  ;;  %v16941_v5 = vpop.f32.mrf.mxu1 }
 0x504   :  { %v16872_v39 = vadd.f32 %v16871_v33, %v31219_v55  ;;  %v16942_v34 = vadd.f32 %v16941_v5, %v31221_v28  ;;  %v34762_v5 = vld [vmem:[#allocation146_spill] sm:$0xff] }
 0x505   :  { %v24877_v9 = vpop.f32.mrf.mxu0  ;;  %v24888_v0 = vpop.f32.mrf.mxu1 }
 0x506   :  { %19629 = vst.msk [vmem:[%s32770_s5 + $0x30] sm:$0x3] %vm10580_vm2, %v16872_v39  ;;  %19630 = vst.msk [vmem:[%s32770_s5 + $0x32] sm:$0x3] %vm10580_vm2, %v16942_v34 }
 0x50d   :  { %v17011_v44 = vpop.f32.mrf.mxu0  ;;  %v17081_v3 = vpop.f32.mrf.mxu1 }
 0x50e   :  { %v17012_v27 = vadd.f32 %v17011_v44, %v31259_v56  ;;  %v17082_v55 = vadd.f32 %v17081_v3, %v34748_v24  ;;  %v34763_v3 = vld [vmem:[#allocation11_spill] sm:$0xff]  ;;  %v34764_v24 = vld [vmem:[#allocation12_spill] sm:$0xff] }
 0x50f   :  { %v24899_v30 = vpop.f32.mrf.mxu0  ;;  %v24910_v28 = vpop.f32.mrf.mxu1 }
 0x510   :  { %19631 = vst.msk [vmem:[%s32770_s5 + $0x34] sm:$0x3] %vm10580_vm2, %v17012_v27  ;;  %19632 = vst.msk [vmem:[%s32770_s5 + $0x36] sm:$0x3] %vm10580_vm2, %v17082_v55 }
 0x517   :  { %v17151_v32 = vpop.f32.mrf.mxu0  ;;  %v17221_v42 = vpop.f32.mrf.mxu1 }
 0x518   :  { %v17152_v57 = vadd.f32 %v17151_v32, %v34749_v10  ;;  %v17222_v56 = vadd.f32 %v17221_v42, %v34750_v23  ;;  %v34765_v10 = vld [vmem:[#allocation13_spill] sm:$0xff]  ;;  %v34766_v23 = vld [vmem:[#allocation14_spill] sm:$0xff] }
 0x519   :  { %v24921_v59 = vpop.f32.mrf.mxu0  ;;  %v24932_v58 = vpop.f32.mrf.mxu1 }
 0x51a   :  { %19633 = vst.msk [vmem:[%s32770_s5 + $0x38] sm:$0x3] %vm10580_vm2, %v17152_v57  ;;  %19634 = vst.msk [vmem:[%s32770_s5 + $0x3a] sm:$0x3] %vm10580_vm2, %v17222_v56 }
 0x521   :  { %v17291_v16 = vpop.f32.mrf.mxu0  ;;  %v17361_v50 = vpop.f32.mrf.mxu1 }
 0x522   :  { %v17292_v4 = vadd.f32 %v17291_v16, %v34751_v6  ;;  %v17362_v63 = vadd.f32 %v17361_v50, %v34752_v49  ;;  %v34767_v6 = vld [vmem:[#allocation151_spill] sm:$0xff]  ;;  %v34768_v49 = vld [vmem:[#allocation152_spill] sm:$0xff] }
 0x523   :  { %v24943_v13 = vpop.f32.mrf.mxu0  ;;  %v24954_v35 = vpop.f32.mrf.mxu1 }
 0x524   :  { %19635 = vst.msk [vmem:[%s32770_s5 + $0x3c] sm:$0x3] %vm10580_vm2, %v17292_v4  ;;  %19636 = vst.msk [vmem:[%s32770_s5 + $0x3e] sm:$0x3] %vm10580_vm2, %v17362_v63 }
 0x52b   :  { %v17431_v1 = vpop.f32.mrf.mxu0  ;;  %v17501_v47 = vpop.f32.mrf.mxu1 }
 0x52c   :  { %v17432_v26 = vadd.f32 %v17431_v1, %v34753_v15  ;;  %v17502_v37 = vadd.f32 %v17501_v47, %v34754_v25  ;;  %v34769_v15 = vld [vmem:[#allocation15_spill] sm:$0xff]  ;;  %v34770_v25 = vld [vmem:[#allocation16_spill] sm:$0xff] }
 0x52d   :  { %v24965_v41 = vpop.f32.mrf.mxu0  ;;  %v24976_v40 = vpop.f32.mrf.mxu1 }
 0x52e   :  { %19637 = vst.msk [vmem:[%s32770_s5 + $0x40] sm:$0x3] %vm10580_vm2, %v17432_v26  ;;  %19638 = vst.msk [vmem:[%s32770_s5 + $0x42] sm:$0x3] %vm10580_vm2, %v17502_v37 }
 0x535   :  { %v17571_v52 = vpop.f32.mrf.mxu0  ;;  %v17641_v7 = vpop.f32.mrf.mxu1 }
 0x536   :  { %v17572_v46 = vadd.f32 %v17571_v52, %v34755_v21  ;;  %v17642_v11 = vadd.f32 %v17641_v7, %v34756_v14  ;;  %v34771_v21 = vld [vmem:[#allocation17_spill] sm:$0xff]  ;;  %v34772_v14 = vld [vmem:[#allocation18_spill] sm:$0xff] }
 0x537   :  { %v24987_v60 = vpop.f32.mrf.mxu0  ;;  %v24998_v29 = vpop.f32.mrf.mxu1 }
 0x538   :  { %19639 = vst.msk [vmem:[%s32770_s5 + $0x44] sm:$0x3] %vm10580_vm2, %v17572_v46  ;;  %19640 = vst.msk [vmem:[%s32770_s5 + $0x46] sm:$0x3] %vm10580_vm2, %v17642_v11 }
 0x53f   :  { %v17711_v51 = vpop.f32.mrf.mxu0  ;;  %v17781_v36 = vpop.f32.mrf.mxu1 }
 0x540   :  { %v17712_v17 = vadd.f32 %v17711_v51, %v34757_v20  ;;  %v17782_v43 = vadd.f32 %v17781_v36, %v34758_v2  ;;  %v34773_v20 = vld [vmem:[#allocation157_spill] sm:$0xff]  ;;  %v34774_v2 = vld [vmem:[#allocation158_spill] sm:$0xff] }
 0x541   :  { %v25009_v12 = vpop.f32.mrf.mxu0  ;;  %v25020_v18 = vpop.f32.mrf.mxu1 }
 0x542   :  { %19641 = vst.msk [vmem:[%s32770_s5 + $0x48] sm:$0x3] %vm10580_vm2, %v17712_v17  ;;  %19642 = vst.msk [vmem:[%s32770_s5 + $0x4a] sm:$0x3] %vm10580_vm2, %v17782_v43 }
 0x549   :  { %v17851_v8 = vpop.f32.mrf.mxu0  ;;  %v17921_v31 = vpop.f32.mrf.mxu1 }
 0x54a   :  { %v17852_v22 = vadd.f32 %v17851_v8, %v34759_v62  ;;  %v17922_v54 = vadd.f32 %v17921_v31, %v34760_v53  ;;  %v34775_v62 = vld [vmem:[#allocation19_spill] sm:$0xff]  ;;  %v34776_v53 = vld [vmem:[#allocation20_spill] sm:$0xff] }
 0x54b   :  { %v25031_v45 = vpop.f32.mrf.mxu0  ;;  %v25042_v48 = vpop.f32.mrf.mxu1 }
 0x54c   :  { %19643 = vst.msk [vmem:[%s32770_s5 + $0x4c] sm:$0x3] %vm10580_vm2, %v17852_v22  ;;  %19644 = vst.msk [vmem:[%s32770_s5 + $0x4e] sm:$0x3] %vm10580_vm2, %v17922_v54 }
 0x553   :  { %v17991_v19 = vpop.f32.mrf.mxu0  ;;  %v18061_v38 = vpop.f32.mrf.mxu1 }
 0x554   :  { %v17992_v33 = vadd.f32 %v17991_v19, %v34761_v61  ;;  %v18062_v39 = vadd.f32 %v18061_v38, %v34762_v5  ;;  %v34777_v61 = vld [vmem:[#allocation21_spill] sm:$0xff]  ;;  %v34778_v5 = vld [vmem:[#allocation22_spill] sm:$0xff] }
 0x555   :  { %v25053_v34 = vpop.f32.mrf.mxu0  ;;  %v25064_v9 = vpop.f32.mrf.mxu1 }
 0x556   :  { %19645 = vst.msk [vmem:[%s32770_s5 + $0x50] sm:$0x3] %vm10580_vm2, %v17992_v33  ;;  %19646 = vst.msk [vmem:[%s32770_s5 + $0x52] sm:$0x3] %vm10580_vm2, %v18062_v39 }
 0x55d   :  { %v18131_v0 = vpop.f32.mrf.mxu0  ;;  %v18201_v44 = vpop.f32.mrf.mxu1 }
 0x55e   :  { %v18132_v27 = vadd.f32 %v18131_v0, %v34763_v3  ;;  %v18202_v55 = vadd.f32 %v18201_v44, %v34764_v24  ;;  %v34779_v3 = vld [vmem:[#allocation163_spill] sm:$0xff]  ;;  %v34780_v24 = vld [vmem:[#allocation164_spill] sm:$0xff] }
 0x55f   :  { %v25075_v30 = vpop.f32.mrf.mxu0  ;;  %v25086_v28 = vpop.f32.mrf.mxu1 }
 0x560   :  { %19647 = vst.msk [vmem:[%s32770_s5 + $0x54] sm:$0x3] %vm10580_vm2, %v18132_v27  ;;  %19648 = vst.msk [vmem:[%s32770_s5 + $0x56] sm:$0x3] %vm10580_vm2, %v18202_v55 }
 0x567   :  { %v18271_v32 = vpop.f32.mrf.mxu0  ;;  %v18341_v42 = vpop.f32.mrf.mxu1 }
 0x568   :  { %v18272_v57 = vadd.f32 %v18271_v32, %v34765_v10  ;;  %v18342_v56 = vadd.f32 %v18341_v42, %v34766_v23  ;;  %v34781_v10 = vld [vmem:[#allocation23_spill] sm:$0xff]  ;;  %v34782_v23 = vld [vmem:[#allocation24_spill] sm:$0xff] }
 0x569   :  { %v25097_v59 = vpop.f32.mrf.mxu0  ;;  %v25108_v58 = vpop.f32.mrf.mxu1 }
 0x56a   :  { %19649 = vst.msk [vmem:[%s32770_s5 + $0x58] sm:$0x3] %vm10580_vm2, %v18272_v57  ;;  %19650 = vst.msk [vmem:[%s32770_s5 + $0x5a] sm:$0x3] %vm10580_vm2, %v18342_v56 }
 0x571   :  { %v18411_v16 = vpop.f32.mrf.mxu0  ;;  %v18481_v50 = vpop.f32.mrf.mxu1 }
 0x572   :  { %v18412_v4 = vadd.f32 %v18411_v16, %v34767_v6  ;;  %v18482_v63 = vadd.f32 %v18481_v50, %v34768_v49  ;;  %v34783_v6 = vld [vmem:[#allocation25_spill] sm:$0xff]  ;;  %v34784_v49 = vld [vmem:[#allocation26_spill] sm:$0xff] }
 0x573   :  { %v25119_v13 = vpop.f32.mrf.mxu0  ;;  %v25130_v35 = vpop.f32.mrf.mxu1 }
 0x574   :  { %19651 = vst.msk [vmem:[%s32770_s5 + $0x5c] sm:$0x3] %vm10580_vm2, %v18412_v4  ;;  %19652 = vst.msk [vmem:[%s32770_s5 + $0x5e] sm:$0x3] %vm10580_vm2, %v18482_v63 }
 0x57b   :  { %v18551_v1 = vpop.f32.mrf.mxu0  ;;  %v18621_v47 = vpop.f32.mrf.mxu1 }
 0x57c   :  { %v18552_v26 = vadd.f32 %v18551_v1, %v34769_v15  ;;  %v18622_v37 = vadd.f32 %v18621_v47, %v34770_v25 }
 0x57d   :  { %v25141_v41 = vpop.f32.mrf.mxu0  ;;  %v25152_v40 = vpop.f32.mrf.mxu1 }
 0x57e   :  { %19653 = vst.msk [vmem:[%s32770_s5 + $0x60] sm:$0x3] %vm10580_vm2, %v18552_v26  ;;  %19654 = vst.msk [vmem:[%s32770_s5 + $0x62] sm:$0x3] %vm10580_vm2, %v18622_v37 }
 0x585   :  { %v18691_v52 = vpop.f32.mrf.mxu0  ;;  %v18761_v7 = vpop.f32.mrf.mxu1 }
 0x586   :  { %v18692_v46 = vadd.f32 %v18691_v52, %v34771_v21  ;;  %v18762_v11 = vadd.f32 %v18761_v7, %v34772_v14 }
 0x587   :  { %v25163_v60 = vpop.f32.mrf.mxu0  ;;  %v25174_v29 = vpop.f32.mrf.mxu1 }
 0x588   :  { %19655 = vst.msk [vmem:[%s32770_s5 + $0x64] sm:$0x3] %vm10580_vm2, %v18692_v46  ;;  %19656 = vst.msk [vmem:[%s32770_s5 + $0x66] sm:$0x3] %vm10580_vm2, %v18762_v11 }
 0x58f   :  { %v18831_v51 = vpop.f32.mrf.mxu0  ;;  %v18901_v36 = vpop.f32.mrf.mxu1 }
 0x590   :  { %v18832_v17 = vadd.f32 %v18831_v51, %v34773_v20  ;;  %v18902_v43 = vadd.f32 %v18901_v36, %v34774_v2 }
 0x591   :  { %v25185_v12 = vpop.f32.mrf.mxu0  ;;  %v25196_v18 = vpop.f32.mrf.mxu1 }
 0x592   :  { %19657 = vst.msk [vmem:[%s32770_s5 + $0x68] sm:$0x3] %vm10580_vm2, %v18832_v17  ;;  %19658 = vst.msk [vmem:[%s32770_s5 + $0x6a] sm:$0x3] %vm10580_vm2, %v18902_v43 }
 0x599   :  { %v18971_v8 = vpop.f32.mrf.mxu0  ;;  %v19041_v31 = vpop.f32.mrf.mxu1 }
 0x59a   :  { %v18972_v22 = vadd.f32 %v18971_v8, %v34775_v62  ;;  %v19042_v54 = vadd.f32 %v19041_v31, %v34776_v53 }
 0x59b   :  { %v25207_v45 = vpop.f32.mrf.mxu0  ;;  %v25218_v48 = vpop.f32.mrf.mxu1 }
 0x59c   :  { %19659 = vst.msk [vmem:[%s32770_s5 + $0x6c] sm:$0x3] %vm10580_vm2, %v18972_v22  ;;  %19660 = vst.msk [vmem:[%s32770_s5 + $0x6e] sm:$0x3] %vm10580_vm2, %v19042_v54 }
 0x5a3   :  { %v19111_v19 = vpop.f32.mrf.mxu0  ;;  %v19181_v38 = vpop.f32.mrf.mxu1 }
 0x5a4   :  { %v19112_v33 = vadd.f32 %v19111_v19, %v34777_v61  ;;  %v19182_v39 = vadd.f32 %v19181_v38, %v34778_v5 }
 0x5a5   :  { %v25229_v34 = vpop.f32.mrf.mxu0  ;;  %v25240_v9 = vpop.f32.mrf.mxu1 }
 0x5a6   :  { %19661 = vst.msk [vmem:[%s32770_s5 + $0x70] sm:$0x3] %vm10580_vm2, %v19112_v33  ;;  %19662 = vst.msk [vmem:[%s32770_s5 + $0x72] sm:$0x3] %vm10580_vm2, %v19182_v39 }
 0x5ad   :  { %v19251_v0 = vpop.f32.mrf.mxu0  ;;  %v19321_v44 = vpop.f32.mrf.mxu1 }
 0x5ae   :  { %v19252_v27 = vadd.f32 %v19251_v0, %v34779_v3  ;;  %v19322_v55 = vadd.f32 %v19321_v44, %v34780_v24 }
 0x5af   :  { %v25251_v30 = vpop.f32.mrf.mxu0  ;;  %v25262_v28 = vpop.f32.mrf.mxu1 }
 0x5b0   :  { %19663 = vst.msk [vmem:[%s32770_s5 + $0x74] sm:$0x3] %vm10580_vm2, %v19252_v27  ;;  %19664 = vst.msk [vmem:[%s32770_s5 + $0x76] sm:$0x3] %vm10580_vm2, %v19322_v55 }
 0x5b7   :  { %v19391_v32 = vpop.f32.mrf.mxu0  ;;  %v19461_v42 = vpop.f32.mrf.mxu1 }
 0x5b8   :  { %v19392_v57 = vadd.f32 %v19391_v32, %v34781_v10  ;;  %v19462_v56 = vadd.f32 %v19461_v42, %v34782_v23 }
 0x5b9   :  { %v25273_v59 = vpop.f32.mrf.mxu0  ;;  %v25284_v58 = vpop.f32.mrf.mxu1 }
 0x5ba   :  { %19665 = vst.msk [vmem:[%s32770_s5 + $0x78] sm:$0x3] %vm10580_vm2, %v19392_v57  ;;  %19666 = vst.msk [vmem:[%s32770_s5 + $0x7a] sm:$0x3] %vm10580_vm2, %v19462_v56 }
 0x5c1   :  { %v19531_v16 = vpop.f32.mrf.mxu0  ;;  %v19601_v50 = vpop.f32.mrf.mxu1 }
 0x5c2   :  { %v19532_v4 = vadd.f32 %v19531_v16, %v34783_v6  ;;  %v19602_v63 = vadd.f32 %v19601_v50, %v34784_v49 }
 0x5c3   :  { %v25295_v13 = vpop.f32.mrf.mxu0  ;;  %v25306_v35 = vpop.f32.mrf.mxu1 }
 0x5c4   :  { %19667 = vst.msk [vmem:[%s32770_s5 + $0x7c] sm:$0x3] %vm10580_vm2, %v19532_v4  ;;  %19668 = vst.msk [vmem:[%s32770_s5 + $0x7e] sm:$0x3] %vm10580_vm2, %v19602_v63 }

// kernel: tfno_forward.12
= control target key start
LH: loop header
LB: loop body
LE: loop exit
PB: predicated region body
PF: predicated region fallthrough
CT: control target
= control target key end

     0   :  { %s761_s15 = smov 0   ;;  %s763_s16 = smov 0   ;;  %s951_s0 = inlined_call_operand.vmem [shape: f32[32,1024], index: 0, kind: input, shape index: {}, may-alias: {0,4}]   ;;  %s952_s1 = inlined_call_operand.vmem [shape: f32[32,1024], index: 1, kind: input, shape index: {}]   ;;  %s953_s2 = inlined_call_operand.vmem [shape: f32[32,32], index: 2, kind: input, shape index: {}]   ;;  %s954_s3 = inlined_call_operand.vmem [shape: f32[32,1], index: 3, kind: input, shape index: {}]   ;;  %s955_s4 = inlined_call_operand.vmem [shape: f32[32,1024], index: 4, kind: output, shape index: {}, may-alias: {0,4}]  }
   0x1   :  { %s765_s17 = smov 0  }
   0x2 LB: > { %s632_s18 = sadd.s32 4294967295, %s732_s17   ;;  %s778_s19 = sadd.s32 1, %s732_s17   ;;  %s732_s17 = sphi %s765_s17, %s960_s17   ;;  %s728_s16 = sphi %s763_s16, %s959_s16   ;;  %s724_s15 = sphi %s761_s15, %s958_s15  }
   0x3   : > { %s18_s20 = ssub.s32 %s732_s17, %s778_s19  ;;  %s21_s21 = sadd.s32 1, %s728_s16 }
   0x4   : > { %p19_p0 = scmp.eq.s32.totalorder %s18_s20, 0  ;;  %p28_p1 = scmp.ne.s32.totalorder %s728_s16, %s724_s15 }
   0x5   : > { %p29_p2 = scmp.eq.s32.totalorder %s732_s17, 0  ;;  %p126_p3 = scmp.eq.s32.totalorder %s632_s18, 3 }
   0x6   : > { %s789_s22 = scalar_select %p19_p0, %s728_s16, %s21_s21  }
   0x7   : > { %p791_p4 = por %p29_p2, %p28_p1  ;;  %p795_p5 = por %p126_p3, %p28_p1 }
   0x8   : > { %p635_p6 = scmp.ge.s32.totalorder %s732_s17, 4 }
   0xa   : > { %154 = sbr.rel (%p635_p6) target bundleno = 31 (0x1f), region = 24 }
   0xf   : > { %157 = sbr.rel (!%p791_p4) target bundleno = 23 (0x17), region = 28  ;;  %s159_s25 = sand.u32 (%p791_p4), 1, %s728_s16  }
  0x10   : > { %s655_s26 = sshll.u32 (%p791_p4), %s732_s17, 4  ;;  %s636_s27 = sshll.u32 (%p791_p4), %s159_s25, 6 }
  0x11   : > { %s164_s30 = scalar_lea.vmem (%p791_p4), %s951_s0, %s655_s26  ;;  %s161_s5 = scalar_lea.vmem (%p791_p4), [#allocation2], %s636_s27 }
  0x12   : > { %v177_v0 = vld [vmem:[%s164_s30] sm:$0xff] (%p791_p4)  ;;  %v179_v1 = vld [vmem:[%s164_s30 + $0x8] sm:$0xff] (%p791_p4) }
  0x13   : > { %v181_v2 = vld [vmem:[%s164_s30 + $0x40] sm:$0xff] (%p791_p4)  ;;  %178 = vst [vmem:[%s161_s5] sm:$0xff] (%p791_p4), %v177_v0  ;;  %180 = vst [vmem:[%s161_s5 + $0x8] sm:$0xff] (%p791_p4), %v179_v1  ;;  %v183_v3 = vld [vmem:[%s164_s30 + $0x48] sm:$0xff] (%p791_p4) }
  0x14   : > { %182 = vst [vmem:[%s161_s5 + $0x10] sm:$0xff] %v181_v2  ;;  %v185_v4 = vld [vmem:[%s164_s30 + $0x80] sm:$0xff]  ;;  %v187_v5 = vld [vmem:[%s164_s30 + $0x88] sm:$0xff]  ;;  %184 = vst [vmem:[%s161_s5 + $0x18] sm:$0xff] %v183_v3 }
  0x15   : > { %186 = vst [vmem:[%s161_s5 + $0x20] sm:$0xff] %v185_v4  ;;  %188 = vst [vmem:[%s161_s5 + $0x28] sm:$0xff] %v187_v5  ;;  %v189_v6 = vld [vmem:[%s164_s30 + $0xc0] sm:$0xff]  ;;  %v191_v7 = vld [vmem:[%s164_s30 + $0xc8] sm:$0xff] }
  0x16   : > { %190 = vst [vmem:[%s161_s5 + $0x30] sm:$0xff] %v189_v6  ;;  %192 = vst [vmem:[%s161_s5 + $0x38] sm:$0xff] %v191_v7 }
  0x17 PF: > { %198 = sbr.rel (!%p791_p4) target bundleno = 31 (0x1f), region = 51  ;;  %s200_s6 = sand.u32 (%p791_p4), 1, %s728_s16  }
  0x18   : > { %s656_s7 = sshll.u32 (%p791_p4), %s732_s17, 4  ;;  %s639_s8 = sshll.u32 (%p791_p4), %s200_s6, 6 }
  0x19   : > { %s205_s11 = scalar_lea.vmem (%p791_p4), %s952_s1, %s656_s7  ;;  %s202_s12 = scalar_lea.vmem (%p791_p4), [#allocation3], %s639_s8 }
  0x1a   : > { %v218_v8 = vld [vmem:[%s205_s11] sm:$0xff] (%p791_p4)  ;;  %v220_v9 = vld [vmem:[%s205_s11 + $0x8] sm:$0xff] (%p791_p4) }
  0x1b   : > { %v222_v10 = vld [vmem:[%s205_s11 + $0x40] sm:$0xff] (%p791_p4)  ;;  %219 = vst [vmem:[%s202_s12] sm:$0xff] (%p791_p4), %v218_v8  ;;  %221 = vst [vmem:[%s202_s12 + $0x8] sm:$0xff] (%p791_p4), %v220_v9  ;;  %v224_v11 = vld [vmem:[%s205_s11 + $0x48] sm:$0xff] (%p791_p4) }
  0x1c   : > { %223 = vst [vmem:[%s202_s12 + $0x10] sm:$0xff] %v222_v10  ;;  %v226_v12 = vld [vmem:[%s205_s11 + $0x80] sm:$0xff]  ;;  %v228_v13 = vld [vmem:[%s205_s11 + $0x88] sm:$0xff]  ;;  %225 = vst [vmem:[%s202_s12 + $0x18] sm:$0xff] %v224_v11 }
  0x1d   : > { %227 = vst [vmem:[%s202_s12 + $0x20] sm:$0xff] %v226_v12  ;;  %229 = vst [vmem:[%s202_s12 + $0x28] sm:$0xff] %v228_v13  ;;  %v230_v14 = vld [vmem:[%s205_s11 + $0xc0] sm:$0xff]  ;;  %v232_v15 = vld [vmem:[%s205_s11 + $0xc8] sm:$0xff] }
  0x1e   : > { %231 = vst [vmem:[%s202_s12 + $0x30] sm:$0xff] %v230_v14  ;;  %233 = vst [vmem:[%s202_s12 + $0x38] sm:$0xff] %v232_v15 }
  0x1f PF: > { %p642_p7 = scmp.ge.s32.totalorder %s732_s17, 1  ;;  %p238_p8 = scmp.lt.s32.totalorder %s732_s17, 5 }
  0x21   : > { %p239_p9 = pnand %p642_p7, %p238_p8 }
  0x22   : > { %s245_s13 = sand.u32 (!%p239_p9), 1, %s724_s15  }
  0x23   : > { %242 = sbr.rel (%p239_p9) target bundleno = 296 (0x128), region = 74  ;;  %s817_s14 = sshll.u32 (!%p239_p9), %s245_s13, 6 }
  0x24   : > { %s247_s26 = scalar_lea.vmem (!%p239_p9), [#allocation2], %s817_s14  ;;  %s849_s12 = scalar_lea.vmem (!%p239_p9), [#allocation3], %s817_s14 }
  0x25   : > { %s910_s13 = scalar_lea.vmem (!%p239_p9), [#allocation4], %s817_s14 }
  0x28   : > { %v734_v16 = vmov 0.0   ;;  %v297_v17 = vld [vmem:[%s954_s3 + $0x10] sm:$0xff]  ;;  %v295_v18 = vld [vmem:[%s954_s3] sm:$0xff]  ;;  %v735_v19 = vmov 0   ;;  %v294_v20 = vld [vmem:[%s247_s26 + $0x38] sm:$0xff]  ;;  %vm319_vm0 = vcmask 261120  }
  0x29   : > { %396 = vmatprep.mubr.f32.mxu0 %v734_v16  ;;  %408 = vmatprep.mubr.f32.mxu1 %v734_v16  ;;  %v293_v21 = vld [vmem:[%s247_s26 + $0x30] sm:$0xff]  ;;  %v292_v22 = vld [vmem:[%s247_s26 + $0x28] sm:$0xff]  ;;  %v291_v23 = vld [vmem:[%s247_s26 + $0x20] sm:$0xff]  ;;  %s657_s14 = sshll.u32 (%p795_p5), %s632_s18, 4 }
  0x2a   : > { %693 = vset.pattern.permute.xlu1 %v735_v19  ;;  %692 = vset.pattern.permute.xlu0 %v735_v19  ;;  %v290_v24 = vld [vmem:[%s247_s26 + $0x18] sm:$0xff]  ;;  %v289_v25 = vld [vmem:[%s247_s26 + $0x10] sm:$0xff]  ;;  %v288_v26 = vld [vmem:[%s247_s26 + $0x8] sm:$0xff]  ;;  %s526_s23 = scalar_lea.vmem (%p795_p5), %s955_s4, %s657_s14 }
  0x2b   : > { %311 = vperm.xlu1 %693, %v297_v17   ;;  %301 = vperm.xlu0 %692, %v295_v18   ;;  %v287_v27 = vld [vmem:[%s247_s26] sm:$0xff]  ;;  %v285_v29 = vld [vmem:[%s953_s2 + $0x10] sm:$0xff]  ;;  %v298_v30 = vld [vmem:[%s954_s3 + $0x18] sm:$0xff] }
  0x2c   : > { %356 = vmatprep.subr.mxu0 %v294_v20  ;;  %658 = vmatprep.subr.mxu1 %v294_v20  ;;  %v283_v28 = vld [vmem:[%s953_s2] sm:$0xff]  ;;  %v296_v31 = vld [vmem:[%s954_s3 + $0x8] sm:$0xff]  ;;  %v286_v33 = vld [vmem:[%s953_s2 + $0x18] sm:$0xff] }
  0x2d   : > { %357 = vmatpush1.msra.mxu0 %v293_v21  ;;  %662 = vmatpush1.msra.mxu1 %v293_v21  ;;  %v284_v32 = vld [vmem:[%s953_s2 + $0x8] sm:$0xff]  ;;  %v421_v37 = vld [vmem:[%s849_s12] sm:$0xff]  ;;  %v423_v58 = vld [vmem:[%s849_s12 + $0x10] sm:$0xff] }
  0x2e   : > { %358 = vmatprep.subr.mxu0 %v292_v22  ;;  %659 = vmatprep.subr.mxu1 %v292_v22  ;;  %v425_v39 = vld [vmem:[%s849_s12 + $0x20] sm:$0xff]  ;;  %v422_v43 = vld [vmem:[%s849_s12 + $0x8] sm:$0xff]  ;;  %v427_v59 = vld [vmem:[%s849_s12 + $0x30] sm:$0xff] }
  0x2f   : > { %359 = vmatpush1.msra.mxu0 %v291_v23  ;;  %663 = vmatpush1.msra.mxu1 %v291_v23  ;;  %v426_v45 = vld [vmem:[%s849_s12 + $0x28] sm:$0xff]  ;;  %v424_v4 = vld [vmem:[%s849_s12 + $0x18] sm:$0xff] }
  0x30   : > { %360 = vmatprep.subr.mxu0 %v290_v24  ;;  %660 = vmatprep.subr.mxu1 %v290_v24  ;;  %v428_v5 = vld [vmem:[%s849_s12 + $0x38] sm:$0xff] }
  0x31   : > { %361 = vmatpush1.msra.mxu0 %v289_v25  ;;  %664 = vmatpush1.msra.mxu1 %v289_v25 }
  0x32   : > { %362 = vmatprep.subr.mxu0 %v288_v26  ;;  %661 = vmatprep.subr.mxu1 %v288_v26 }
  0x33   : > { %363 = vmatpush1.msra.mxu0 %v287_v27  ;;  %665 = vmatpush1.msra.mxu1 %v287_v27 }
  0x34   : > { %646 = vmatmul.mubr.msk.f32.vlgmr.msra.gmra.mxu0 %vm319_vm0, %v283_v28  ;;  %648 = vmatmul.mubr.msk.f32.vlgmr.msra.gmra.mxu1 %vm319_vm0, %v285_v29 }
  0x35   : > { %402 = vmatprep.mubr.f32.mxu0 %v734_v16  ;;  %414 = vmatprep.mubr.f32.mxu1 %v734_v16 }
  0x36   : > { %316 = vperm.xlu1 %693, %v298_v30   ;;  %306 = vperm.xlu0 %692, %v296_v31  }
  0x38   : > { %647 = vmatmul.mubr.msk.f32.gmra.mxu0 %vm319_vm0, %v284_v32  ;;  %649 = vmatmul.mubr.msk.f32.gmra.mxu1 %vm319_vm0, %v286_v33 }
  0xa6   : > { %v312_v34 = vpop.permute.xlu1 %311  ;;  %v302_v35 = vpop.permute.xlu0 %301 }
  0xb1   : > { %v317_v54 = vpop.permute.xlu1 %316  ;;  %v307_v55 = vpop.permute.xlu0 %306 }
  0xf4   : > { %v398_v36 = vpop.f32.mrf.mxu0  ;;  %v410_v38 = vpop.f32.mrf.mxu1 }
  0xf5   : > { %v399_v40 = vadd.f32 %v398_v36, %v302_v35  ;;  %v411_v41 = vadd.f32 %v410_v38, %v312_v34 }
  0xf6   : > { %v400_v42 = vpop.f32.mrf.mxu0  ;;  %v412_v44 = vpop.f32.mrf.mxu1 }
  0xf7   : > { %v855_v46 = vadd.f32 %v421_v37, %v399_v40  ;;  %v857_v47 = vadd.f32 %v425_v39, %v411_v41  ;;  %v401_v48 = vadd.f32 %v400_v42, %v302_v35  ;;  %v413_v49 = vadd.f32 %v412_v44, %v312_v34 }
  0xf8   : > { %v404_v50 = vpop.f32.mrf.mxu0  ;;  %v416_v51 = vpop.f32.mrf.mxu1 }
  0xf9   : > { %v437_v52 = vmul.f32 %v855_v46, %v855_v46  ;;  %v441_v53 = vmul.f32 %v857_v47, %v857_v47  ;;  %v863_v56 = vadd.f32 %v422_v43, %v401_v48  ;;  %v865_v57 = vadd.f32 %v426_v45, %v413_v49 }
  0xfa   : > { %v405_v60 = vadd.f32 %v404_v50, %v307_v55  ;;  %v417_v61 = vadd.f32 %v416_v51, %v317_v54  ;;  %v406_v62 = vpop.f32.mrf.mxu0  ;;  %v418_v63 = vpop.f32.mrf.mxu1 }
  0xfb   : > { %v445_v0 = vmul.f32 %v437_v52, %v855_v46  ;;  %v449_v1 = vmul.f32 %v441_v53, %v857_v47  ;;  %v438_v2 = vmul.f32 %v863_v56, %v863_v56  ;;  %v442_v3 = vmul.f32 %v865_v57, %v865_v57 }
  0xfc   : > { %v877_v6 = vadd.f32 %v423_v58, %v405_v60  ;;  %v879_v7 = vadd.f32 %v427_v59, %v417_v61  ;;  %v407_v8 = vadd.f32 %v406_v62, %v307_v55  ;;  %v419_v9 = vadd.f32 %v418_v63, %v317_v54 }
  0xfd   : > { %v453_v10 = vmul.f32 0.044715, %v445_v0  ;;  %v457_v11 = vmul.f32 0.044715, %v449_v1  ;;  %v446_v12 = vmul.f32 %v438_v2, %v863_v56  ;;  %v450_v13 = vmul.f32 %v442_v3, %v865_v57 }
  0xfe   : > { %v439_v14 = vmul.f32 %v877_v6, %v877_v6  ;;  %v443_v15 = vmul.f32 %v879_v7, %v879_v7  ;;  %v887_v16 = vadd.f32 %v424_v4, %v407_v8  ;;  %v889_v17 = vadd.f32 %v428_v5, %v419_v9 }
  0xff   : > { %v461_v18 = vadd.f32 %v453_v10, %v855_v46  ;;  %v465_v19 = vadd.f32 %v457_v11, %v857_v47  ;;  %v454_v20 = vmul.f32 0.044715, %v446_v12  ;;  %v458_v21 = vmul.f32 0.044715, %v450_v13 }
 0x100   : > { %v447_v22 = vmul.f32 %v439_v14, %v877_v6  ;;  %v451_v23 = vmul.f32 %v443_v15, %v879_v7  ;;  %v440_v24 = vmul.f32 %v887_v16, %v887_v16  ;;  %v444_v25 = vmul.f32 %v889_v17, %v889_v17 }
 0x101   : > { %v469_v26 = vmul.f32 0.7978846, %v461_v18  ;;  %v473_v27 = vmul.f32 0.7978846, %v465_v19  ;;  %v462_v28 = vadd.f32 %v454_v20, %v863_v56  ;;  %v466_v29 = vadd.f32 %v458_v21, %v865_v57 }
 0x102   : > { %v455_v30 = vmul.f32 0.044715, %v447_v22  ;;  %v459_v31 = vmul.f32 0.044715, %v451_v23  ;;  %v448_v32 = vmul.f32 %v440_v24, %v887_v16  ;;  %v452_v33 = vmul.f32 %v444_v25, %v889_v17 }
 0x103   : > { %694 = vtanh.f32 %v469_v26  ;;  %v470_v34 = vmul.f32 0.7978846, %v462_v28  ;;  %v474_v35 = vmul.f32 0.7978846, %v466_v29 }
 0x104   : > { %696 = vtanh.f32 %v473_v27  ;;  %v463_v36 = vadd.f32 %v455_v30, %v877_v6  ;;  %v467_v37 = vadd.f32 %v459_v31, %v879_v7  ;;  %v456_v38 = vmul.f32 0.044715, %v448_v32 }
 0x105   : > { %698 = vtanh.f32 %v470_v34  ;;  %v460_v39 = vmul.f32 0.044715, %v452_v33 }
 0x106   : > { %700 = vtanh.f32 %v474_v35  ;;  %v471_v40 = vmul.f32 0.7978846, %v463_v36  ;;  %v475_v41 = vmul.f32 0.7978846, %v467_v37  ;;  %v464_v42 = vadd.f32 %v456_v38, %v887_v16 }
 0x107   : > { %v468_v43 = vadd.f32 %v460_v39, %v889_v17 }
 0x108   : > { %702 = vtanh.f32 %v471_v40  ;;  %v472_v44 = vmul.f32 0.7978846, %v464_v42 }
 0x109   : > { %704 = vtanh.f32 %v475_v41  ;;  %v476_v45 = vmul.f32 0.7978846, %v468_v43 }
 0x10a   : > { %706 = vtanh.f32 %v472_v44 }
 0x10b   : > { %708 = vtanh.f32 %v476_v45 }
 0x110   : > { %v695_v48 = vpop.eup %694 }
 0x111   : > { %v697_v49 = vpop.eup %696  ;;  %v485_v50 = vadd.f32 1.0, %v695_v48 }
 0x112   : > { %v699_v51 = vpop.eup %698  ;;  %v489_v52 = vadd.f32 1.0, %v697_v49 }
 0x113   : > { %v701_v53 = vpop.eup %700  ;;  %v493_v54 = vmul.f32 0.5, %v485_v50  ;;  %v486_v55 = vadd.f32 1.0, %v699_v51 }
 0x114   : > { %v497_v58 = vmul.f32 0.5, %v489_v52  ;;  %v490_v59 = vadd.f32 1.0, %v701_v53 }
 0x115   : > { %v703_v60 = vpop.eup %702  ;;  %v501_v61 = vmul.f32 %v493_v54, %v855_v46  ;;  %v494_v62 = vmul.f32 0.5, %v486_v55 }
 0x116   : > { %v705_v63 = vpop.eup %704  ;;  %v505_v0 = vmul.f32 %v497_v58, %v857_v47  ;;  %v498_v1 = vmul.f32 0.5, %v490_v59  ;;  %v487_v2 = vadd.f32 1.0, %v703_v60 }
 0x117   : > { %v707_v3 = vpop.eup %706  ;;  %509 = vst [vmem:[%s910_s13] sm:$0xff] %v501_v61  ;;  %v502_v4 = vmul.f32 %v494_v62, %v863_v56  ;;  %v491_v5 = vadd.f32 1.0, %v705_v63 }
 0x118   : > { %v709_v46 = vpop.eup %708  ;;  %513 = vst [vmem:[%s910_s13 + $0x20] sm:$0xff] %v505_v0  ;;  %v506_v47 = vmul.f32 %v498_v1, %v865_v57  ;;  %v495_v8 = vmul.f32 0.5, %v487_v2  ;;  %v488_v9 = vadd.f32 1.0, %v707_v3 }
 0x119   : > { %510 = vst [vmem:[%s910_s13 + $0x8] sm:$0xff] %v502_v4  ;;  %v499_v10 = vmul.f32 0.5, %v491_v5  ;;  %v492_v11 = vadd.f32 1.0, %v709_v46 }
 0x11a   : > { %514 = vst [vmem:[%s910_s13 + $0x28] sm:$0xff] %v506_v47  ;;  %v503_v12 = vmul.f32 %v495_v8, %v877_v6  ;;  %v496_v13 = vmul.f32 0.5, %v488_v9 }
 0x11b   : > { %v507_v14 = vmul.f32 %v499_v10, %v879_v7  ;;  %v500_v56 = vmul.f32 0.5, %v492_v11  ;;  %523 = sbr.rel (!%p795_p5) target bundleno = 296 (0x128), region = 86 }
 0x11c   : > { %511 = vst [vmem:[%s910_s13 + $0x10] sm:$0xff] %v503_v12  ;;  %v504_v15 = vmul.f32 %v496_v13, %v887_v16 }
 0x11d   : > { %515 = vst [vmem:[%s910_s13 + $0x30] sm:$0xff] %v507_v14  ;;  %v508_v18 = vmul.f32 %v500_v56, %v889_v17 }
 0x11e   : > { %512 = vst [vmem:[%s910_s13 + $0x18] sm:$0xff] %v504_v15  ;;  %v539_v57 = vld [vmem:[%s910_s13] sm:$0xff] (%p795_p5) }
 0x11f   : > { %516 = vst [vmem:[%s910_s13 + $0x38] sm:$0xff] %v508_v18  ;;  %v547_v17 = vld [vmem:[%s910_s13 + $0x20] sm:$0xff] (%p795_p5)  ;;  %540 = vst [vmem:[%s526_s23] sm:$0xff] (%p795_p5), %v539_v57 }
 0x120   : > { %v541_v6 = vld [vmem:[%s910_s13 + $0x8] sm:$0xff]  ;;  %548 = vst [vmem:[%s526_s23 + $0x80] sm:$0xff] %v547_v17 }
 0x121   : > { %v549_v19 = vld [vmem:[%s910_s13 + $0x28] sm:$0xff]  ;;  %542 = vst [vmem:[%s526_s23 + $0x8] sm:$0xff] %v541_v6 }
 0x122   : > { %550 = vst [vmem:[%s526_s23 + $0x88] sm:$0xff] %v549_v19 }
 0x123   : > { %v543_v7 = vld [vmem:[%s910_s13 + $0x10] sm:$0xff] }
 0x124   : > { %544 = vst [vmem:[%s526_s23 + $0x40] sm:$0xff] %v543_v7  ;;  %v551_v20 = vld [vmem:[%s910_s13 + $0x30] sm:$0xff] }
 0x125   : > { %v545_v16 = vld [vmem:[%s910_s13 + $0x18] sm:$0xff]  ;;  %552 = vst [vmem:[%s526_s23 + $0xc0] sm:$0xff] %v551_v20 }
 0x126   : > { %546 = vst [vmem:[%s526_s23 + $0x48] sm:$0xff] %v545_v16  ;;  %v553_v21 = vld [vmem:[%s910_s13 + $0x38] sm:$0xff] }
 0x127   : > { %554 = vst [vmem:[%s526_s23 + $0xc8] sm:$0xff] %v553_v21 }
 0x128 PF: > { %p11_p10 = scmp.ge.s32.totalorder %s778_s19, 6   ;;  %s958_s15 = smov %s728_s16 }
 0x129   : > { %s959_s16 = smov %s789_s22  ;;  %s960_s17 = smov %s778_s19 }
 0x12a   :  { %13 = sbr.rel (!%p11_p10) target bundleno = 2 (0x2), region = 148 }

// kernel: tfno_forward.18
= control target key start
LH: loop header
LB: loop body
LE: loop exit
PB: predicated region body
PF: predicated region fallthrough
CT: control target
= control target key end

     0   :  { %s673_s15 = smov 0   ;;  %s675_s16 = smov 0   ;;  %s797_s0 = inlined_call_operand.vmem [shape: f32[32,1024], index: 0, kind: input, shape index: {}, may-alias: {0,4}]   ;;  %s798_s1 = inlined_call_operand.vmem [shape: f32[32,1024], index: 1, kind: input, shape index: {}]   ;;  %s799_s2 = inlined_call_operand.vmem [shape: f32[32,32], index: 2, kind: input, shape index: {}]   ;;  %s800_s3 = inlined_call_operand.vmem [shape: f32[32,1], index: 3, kind: input, shape index: {}]   ;;  %s801_s4 = inlined_call_operand.vmem [shape: f32[32,1024], index: 4, kind: output, shape index: {}, may-alias: {0,4}]  }
   0x1   :  { %s677_s17 = smov 0  }
   0x2 LB: > { %s560_s18 = sadd.s32 4294967295, %s644_s17   ;;  %s690_s19 = sadd.s32 1, %s644_s17   ;;  %s644_s17 = sphi %s677_s17, %s806_s17   ;;  %s640_s16 = sphi %s675_s16, %s805_s16   ;;  %s636_s15 = sphi %s673_s15, %s804_s15  }
   0x3   : > { %s18_s20 = ssub.s32 %s644_s17, %s690_s19  ;;  %s21_s21 = sadd.s32 1, %s640_s16 }
   0x4   : > { %p19_p0 = scmp.eq.s32.totalorder %s18_s20, 0  ;;  %p28_p1 = scmp.ne.s32.totalorder %s640_s16, %s636_s15 }
   0x5   : > { %p29_p2 = scmp.eq.s32.totalorder %s644_s17, 0  ;;  %p126_p3 = scmp.eq.s32.totalorder %s560_s18, 3 }
   0x6   : > { %s701_s22 = scalar_select %p19_p0, %s640_s16, %s21_s21  }
   0x7   : > { %p703_p4 = por %p29_p2, %p28_p1  ;;  %p707_p5 = por %p126_p3, %p28_p1 }
   0x8   : > { %p563_p6 = scmp.ge.s32.totalorder %s644_s17, 4 }
   0xa   : > { %154 = sbr.rel (%p563_p6) target bundleno = 31 (0x1f), region = 24 }
   0xf   : > { %157 = sbr.rel (!%p703_p4) target bundleno = 23 (0x17), region = 28  ;;  %s159_s25 = sand.u32 (%p703_p4), 1, %s640_s16  }
  0x10   : > { %s583_s26 = sshll.u32 (%p703_p4), %s644_s17, 4  ;;  %s564_s27 = sshll.u32 (%p703_p4), %s159_s25, 6 }
  0x11   : > { %s164_s30 = scalar_lea.vmem (%p703_p4), %s797_s0, %s583_s26  ;;  %s161_s5 = scalar_lea.vmem (%p703_p4), [#allocation2], %s564_s27 }
  0x12   : > { %v177_v0 = vld [vmem:[%s164_s30] sm:$0xff] (%p703_p4)  ;;  %v179_v1 = vld [vmem:[%s164_s30 + $0x8] sm:$0xff] (%p703_p4) }
  0x13   : > { %v181_v2 = vld [vmem:[%s164_s30 + $0x40] sm:$0xff] (%p703_p4)  ;;  %178 = vst [vmem:[%s161_s5] sm:$0xff] (%p703_p4), %v177_v0  ;;  %180 = vst [vmem:[%s161_s5 + $0x8] sm:$0xff] (%p703_p4), %v179_v1  ;;  %v183_v3 = vld [vmem:[%s164_s30 + $0x48] sm:$0xff] (%p703_p4) }
  0x14   : > { %182 = vst [vmem:[%s161_s5 + $0x10] sm:$0xff] %v181_v2  ;;  %v185_v4 = vld [vmem:[%s164_s30 + $0x80] sm:$0xff]  ;;  %v187_v5 = vld [vmem:[%s164_s30 + $0x88] sm:$0xff]  ;;  %184 = vst [vmem:[%s161_s5 + $0x18] sm:$0xff] %v183_v3 }
  0x15   : > { %186 = vst [vmem:[%s161_s5 + $0x20] sm:$0xff] %v185_v4  ;;  %188 = vst [vmem:[%s161_s5 + $0x28] sm:$0xff] %v187_v5  ;;  %v189_v6 = vld [vmem:[%s164_s30 + $0xc0] sm:$0xff]  ;;  %v191_v7 = vld [vmem:[%s164_s30 + $0xc8] sm:$0xff] }
  0x16   : > { %190 = vst [vmem:[%s161_s5 + $0x30] sm:$0xff] %v189_v6  ;;  %192 = vst [vmem:[%s161_s5 + $0x38] sm:$0xff] %v191_v7 }
  0x17 PF: > { %198 = sbr.rel (!%p703_p4) target bundleno = 31 (0x1f), region = 51  ;;  %s200_s6 = sand.u32 (%p703_p4), 1, %s640_s16  }
  0x18   : > { %s584_s7 = sshll.u32 (%p703_p4), %s644_s17, 4  ;;  %s567_s8 = sshll.u32 (%p703_p4), %s200_s6, 6 }
  0x19   : > { %s205_s11 = scalar_lea.vmem (%p703_p4), %s798_s1, %s584_s7  ;;  %s202_s12 = scalar_lea.vmem (%p703_p4), [#allocation3], %s567_s8 }
  0x1a   : > { %v218_v8 = vld [vmem:[%s205_s11] sm:$0xff] (%p703_p4)  ;;  %v220_v9 = vld [vmem:[%s205_s11 + $0x8] sm:$0xff] (%p703_p4) }
  0x1b   : > { %v222_v10 = vld [vmem:[%s205_s11 + $0x40] sm:$0xff] (%p703_p4)  ;;  %219 = vst [vmem:[%s202_s12] sm:$0xff] (%p703_p4), %v218_v8  ;;  %221 = vst [vmem:[%s202_s12 + $0x8] sm:$0xff] (%p703_p4), %v220_v9  ;;  %v224_v11 = vld [vmem:[%s205_s11 + $0x48] sm:$0xff] (%p703_p4) }
  0x1c   : > { %223 = vst [vmem:[%s202_s12 + $0x10] sm:$0xff] %v222_v10  ;;  %v226_v12 = vld [vmem:[%s205_s11 + $0x80] sm:$0xff]  ;;  %v228_v13 = vld [vmem:[%s205_s11 + $0x88] sm:$0xff]  ;;  %225 = vst [vmem:[%s202_s12 + $0x18] sm:$0xff] %v224_v11 }
  0x1d   : > { %227 = vst [vmem:[%s202_s12 + $0x20] sm:$0xff] %v226_v12  ;;  %229 = vst [vmem:[%s202_s12 + $0x28] sm:$0xff] %v228_v13  ;;  %v230_v14 = vld [vmem:[%s205_s11 + $0xc0] sm:$0xff]  ;;  %v232_v15 = vld [vmem:[%s205_s11 + $0xc8] sm:$0xff] }
  0x1e   : > { %231 = vst [vmem:[%s202_s12 + $0x30] sm:$0xff] %v230_v14  ;;  %233 = vst [vmem:[%s202_s12 + $0x38] sm:$0xff] %v232_v15 }
  0x1f PF: > { %p570_p7 = scmp.ge.s32.totalorder %s644_s17, 1  ;;  %p238_p8 = scmp.lt.s32.totalorder %s644_s17, 5 }
  0x21   : > { %p239_p9 = pnand %p570_p7, %p238_p8 }
  0x22   : > { %s245_s13 = sand.u32 (!%p239_p9), 1, %s636_s15  }
  0x23   : > { %242 = sbr.rel (%p239_p9) target bundleno = 265 (0x109), region = 74  ;;  %s729_s14 = sshll.u32 (!%p239_p9), %s245_s13, 6 }
  0x24   : > { %s247_s26 = scalar_lea.vmem (!%p239_p9), [#allocation2], %s729_s14  ;;  %s254_s12 = scalar_lea.vmem (!%p239_p9), [#allocation3], %s729_s14 }
  0x25   : > { %s762_s13 = scalar_lea.vmem (!%p239_p9), [#allocation4], %s729_s14 }
  0x28   : > { %v646_v16 = vmov 0.0   ;;  %v297_v17 = vld [vmem:[%s800_s3 + $0x10] sm:$0xff]  ;;  %v295_v18 = vld [vmem:[%s800_s3] sm:$0xff]  ;;  %v647_v19 = vmov 0   ;;  %v294_v20 = vld [vmem:[%s247_s26 + $0x38] sm:$0xff]  ;;  %vm319_vm0 = vcmask 261120  }
  0x29   : > { %396 = vmatprep.mubr.f32.mxu0 %v646_v16  ;;  %408 = vmatprep.mubr.f32.mxu1 %v646_v16  ;;  %v293_v21 = vld [vmem:[%s247_s26 + $0x30] sm:$0xff]  ;;  %v292_v22 = vld [vmem:[%s247_s26 + $0x28] sm:$0xff]  ;;  %v291_v23 = vld [vmem:[%s247_s26 + $0x20] sm:$0xff]  ;;  %s585_s14 = sshll.u32 (%p707_p5), %s560_s18, 4 }
  0x2a   : > { %621 = vset.pattern.permute.xlu1 %v647_v19  ;;  %620 = vset.pattern.permute.xlu0 %v647_v19  ;;  %v290_v24 = vld [vmem:[%s247_s26 + $0x18] sm:$0xff]  ;;  %v289_v25 = vld [vmem:[%s247_s26 + $0x10] sm:$0xff]  ;;  %v288_v26 = vld [vmem:[%s247_s26 + $0x8] sm:$0xff]  ;;  %s454_s23 = scalar_lea.vmem (%p707_p5), %s801_s4, %s585_s14 }
  0x2b   : > { %311 = vperm.xlu1 %621, %v297_v17   ;;  %301 = vperm.xlu0 %620, %v295_v18   ;;  %v287_v27 = vld [vmem:[%s247_s26] sm:$0xff]  ;;  %v285_v29 = vld [vmem:[%s799_s2 + $0x10] sm:$0xff]  ;;  %v298_v30 = vld [vmem:[%s800_s3 + $0x18] sm:$0xff] }
  0x2c   : > { %356 = vmatprep.subr.mxu0 %v294_v20  ;;  %586 = vmatprep.subr.mxu1 %v294_v20  ;;  %v283_v28 = vld [vmem:[%s799_s2] sm:$0xff]  ;;  %v296_v31 = vld [vmem:[%s800_s3 + $0x8] sm:$0xff]  ;;  %v286_v33 = vld [vmem:[%s799_s2 + $0x18] sm:$0xff] }
  0x2d   : > { %357 = vmatpush1.msra.mxu0 %v293_v21  ;;  %590 = vmatpush1.msra.mxu1 %v293_v21  ;;  %v284_v32 = vld [vmem:[%s799_s2 + $0x8] sm:$0xff]  ;;  %v421_v37 = vld [vmem:[%s254_s12] sm:$0xff]  ;;  %v423_v53 = vld [vmem:[%s254_s12 + $0x10] sm:$0xff] }
  0x2e   : > { %358 = vmatprep.subr.mxu0 %v292_v22  ;;  %587 = vmatprep.subr.mxu1 %v292_v22  ;;  %v425_v39 = vld [vmem:[%s254_s12 + $0x20] sm:$0xff]  ;;  %v422_v43 = vld [vmem:[%s254_s12 + $0x8] sm:$0xff]  ;;  %v427_v55 = vld [vmem:[%s254_s12 + $0x30] sm:$0xff] }
  0x2f   : > { %359 = vmatpush1.msra.mxu0 %v291_v23  ;;  %591 = vmatpush1.msra.mxu1 %v291_v23  ;;  %v426_v45 = vld [vmem:[%s254_s12 + $0x28] sm:$0xff]  ;;  %v424_v61 = vld [vmem:[%s254_s12 + $0x18] sm:$0xff] }
  0x30   : > { %360 = vmatprep.subr.mxu0 %v290_v24  ;;  %588 = vmatprep.subr.mxu1 %v290_v24  ;;  %v428_v63 = vld [vmem:[%s254_s12 + $0x38] sm:$0xff] }
  0x31   : > { %361 = vmatpush1.msra.mxu0 %v289_v25  ;;  %592 = vmatpush1.msra.mxu1 %v289_v25 }
  0x32   : > { %362 = vmatprep.subr.mxu0 %v288_v26  ;;  %589 = vmatprep.subr.mxu1 %v288_v26 }
  0x33   : > { %363 = vmatpush1.msra.mxu0 %v287_v27  ;;  %593 = vmatpush1.msra.mxu1 %v287_v27 }
  0x34   : > { %574 = vmatmul.mubr.msk.f32.vlgmr.msra.gmra.mxu0 %vm319_vm0, %v283_v28  ;;  %576 = vmatmul.mubr.msk.f32.vlgmr.msra.gmra.mxu1 %vm319_vm0, %v285_v29 }
  0x35   : > { %402 = vmatprep.mubr.f32.mxu0 %v646_v16  ;;  %414 = vmatprep.mubr.f32.mxu1 %v646_v16 }
  0x36   : > { %316 = vperm.xlu1 %621, %v298_v30   ;;  %306 = vperm.xlu0 %620, %v296_v31  }
  0x38   : > { %575 = vmatmul.mubr.msk.f32.gmra.mxu0 %vm319_vm0, %v284_v32  ;;  %577 = vmatmul.mubr.msk.f32.gmra.mxu1 %vm319_vm0, %v286_v33 }
  0xa6   : > { %v312_v34 = vpop.permute.xlu1 %311  ;;  %v302_v35 = vpop.permute.xlu0 %301 }
  0xb1   : > { %v317_v48 = vpop.permute.xlu1 %316  ;;  %v307_v49 = vpop.permute.xlu0 %306 }
  0xf4   : > { %v398_v36 = vpop.f32.mrf.mxu0  ;;  %v410_v38 = vpop.f32.mrf.mxu1 }
  0xf5   : > { %v399_v40 = vadd.f32 %v398_v36, %v302_v35  ;;  %v411_v41 = vadd.f32 %v410_v38, %v312_v34 }
  0xf6   : > { %v400_v42 = vpop.f32.mrf.mxu0  ;;  %v412_v44 = vpop.f32.mrf.mxu1 }
  0xf7   : > { %v429_v46 = vadd.f32 %v421_v37, %v399_v40  ;;  %v433_v47 = vadd.f32 %v425_v39, %v411_v41  ;;  %v401_v50 = vadd.f32 %v400_v42, %v302_v35  ;;  %v413_v51 = vadd.f32 %v412_v44, %v312_v34 }
  0xf8   : > { %v404_v52 = vpop.f32.mrf.mxu0  ;;  %v416_v54 = vpop.f32.mrf.mxu1 }
  0xf9   : > { %437 = vst [vmem:[%s762_s13] sm:$0xff] %v429_v46  ;;  %441 = vst [vmem:[%s762_s13 + $0x20] sm:$0xff] %v433_v47  ;;  %v430_v56 = vadd.f32 %v422_v43, %v401_v50  ;;  %v434_v57 = vadd.f32 %v426_v45, %v413_v51  ;;  %v405_v58 = vadd.f32 %v404_v52, %v307_v49 }
  0xfa   : > { %v417_v59 = vadd.f32 %v416_v54, %v317_v48  ;;  %v406_v60 = vpop.f32.mrf.mxu0  ;;  %v418_v62 = vpop.f32.mrf.mxu1 }
  0xfb   : > { %438 = vst [vmem:[%s762_s13 + $0x8] sm:$0xff] %v430_v56  ;;  %442 = vst [vmem:[%s762_s13 + $0x28] sm:$0xff] %v434_v57  ;;  %v431_v0 = vadd.f32 %v423_v53, %v405_v58  ;;  %v407_v2 = vadd.f32 %v406_v60, %v307_v49  ;;  %v419_v3 = vadd.f32 %v418_v62, %v317_v48  ;;  %451 = sbr.rel (!%p707_p5) target bundleno = 265 (0x109), region = 86 }
  0xfc   : > { %v435_v1 = vadd.f32 %v427_v55, %v417_v59 }
  0xfd   : > { %439 = vst [vmem:[%s762_s13 + $0x10] sm:$0xff] %v431_v0  ;;  %v432_v4 = vadd.f32 %v424_v61, %v407_v2  ;;  %v436_v5 = vadd.f32 %v428_v63, %v419_v3 }
  0xfe   : > { %443 = vst [vmem:[%s762_s13 + $0x30] sm:$0xff] %v435_v1 }
  0xff   : > { %440 = vst [vmem:[%s762_s13 + $0x18] sm:$0xff] %v432_v4  ;;  %444 = vst [vmem:[%s762_s13 + $0x38] sm:$0xff] %v436_v5 }
 0x100   : > { %v467_v6 = vld [vmem:[%s762_s13] sm:$0xff] }
 0x101   : > { %v475_v10 = vld [vmem:[%s762_s13 + $0x20] sm:$0xff]  ;;  %468 = vst [vmem:[%s454_s23] sm:$0xff] %v467_v6 }
 0x102   : > { %v469_v7 = vld [vmem:[%s762_s13 + $0x8] sm:$0xff]  ;;  %476 = vst [vmem:[%s454_s23 + $0x80] sm:$0xff] %v475_v10 }
 0x103   : > { %v477_v11 = vld [vmem:[%s762_s13 + $0x28] sm:$0xff]  ;;  %470 = vst [vmem:[%s454_s23 + $0x8] sm:$0xff] %v469_v7 }
 0x104   : > { %v471_v8 = vld [vmem:[%s762_s13 + $0x10] sm:$0xff]  ;;  %478 = vst [vmem:[%s454_s23 + $0x88] sm:$0xff] %v477_v11 }
 0x105   : > { %472 = vst [vmem:[%s454_s23 + $0x40] sm:$0xff] %v471_v8  ;;  %v479_v12 = vld [vmem:[%s762_s13 + $0x30] sm:$0xff] }
 0x106   : > { %v473_v9 = vld [vmem:[%s762_s13 + $0x18] sm:$0xff]  ;;  %480 = vst [vmem:[%s454_s23 + $0xc0] sm:$0xff] %v479_v12 }
 0x107   : > { %474 = vst [vmem:[%s454_s23 + $0x48] sm:$0xff] %v473_v9  ;;  %v481_v13 = vld [vmem:[%s762_s13 + $0x38] sm:$0xff] }
 0x108   : > { %482 = vst [vmem:[%s454_s23 + $0xc8] sm:$0xff] %v481_v13 }
 0x109 PF: > { %p11_p10 = scmp.ge.s32.totalorder %s690_s19, 6   ;;  %s804_s15 = smov %s640_s16 }
 0x10a   : > { %s805_s16 = smov %s701_s22  ;;  %s806_s17 = smov %s690_s19 }
 0x10b   :  { %13 = sbr.rel (!%p11_p10) target bundleno = 2 (0x2), region = 148 }

// kernel: tfno_forward.19
= control target key start
LH: loop header
LB: loop body
LE: loop exit
PB: predicated region body
PF: predicated region fallthrough
CT: control target
= control target key end

     0   :  { %s1145_s0 = inlined_call_operand.vmem [shape: f32[32,1024], index: 0, kind: input, shape index: {}]   ;;  %s1146_s1 = inlined_call_operand.vmem [shape: f32[64,32], index: 1, kind: input, shape index: {}]   ;;  %s1147_s2 = inlined_call_operand.vmem [shape: f32[64,1], index: 2, kind: input, shape index: {}]   ;;  %s1148_s3 = inlined_call_operand.vmem [shape: f32[1,64], index: 3, kind: input, shape index: {}]   ;;  %s1149_s4 = inlined_call_operand.<no memory space> [shape: f32[1,1], index: 4, kind: input, shape index: {}]   ;;  %s1150_s5 = inlined_call_operand.vmem [shape: f32[1,1024], index: 5, kind: output, shape index: {}]  }
   0x1   :  { %v10_v0 = vstv %s1149_s4 }
   0x2   :  { %11 = vst [vmem:[#allocation2] sm:$0x1] %v10_v0 }
   0x3   :  { %s915_s20 = smov 0   ;;  %s917_s21 = smov 0  }
   0x4   :  { %s919_s22 = smov 0  }
   0x5 LB: > { %s772_s4 = sadd.s32 4294967295, %s877_s22   ;;  %s932_s23 = sadd.s32 1, %s877_s22   ;;  %s877_s22 = sphi %s919_s22, %s1153_s22   ;;  %s873_s21 = sphi %s917_s21, %s1152_s21   ;;  %s869_s20 = sphi %s915_s20, %s1151_s20  }
   0x6   : > { %s21_s24 = ssub.s32 %s877_s22, %s932_s23  ;;  %s24_s25 = sadd.s32 1, %s873_s21 }
   0x7   : > { %p22_p0 = scmp.eq.s32.totalorder %s21_s24, 0  ;;  %p31_p1 = scmp.ne.s32.totalorder %s873_s21, %s869_s20 }
   0x8   : > { %p32_p2 = scmp.eq.s32.totalorder %s877_s22, 0  ;;  %p775_p4 = scmp.ge.s32.totalorder %s877_s22, 4 }
   0x9   : > { %s941_s26 = scalar_select %p22_p0, %s873_s21, %s24_s25  }
   0xa   : > { %p33_p3 = por %p32_p2, %p31_p1  ;;  %179 = sbr.rel (%p775_p4) target bundleno = 23 (0x17), region = 32 }
   0xf   : > { %182 = sbr.rel (!%p33_p3) target bundleno = 23 (0x17), region = 36  ;;  %s184_s27 = sand.u32 (%p33_p3), 1, %s873_s21  }
  0x10   : > { %s793_s28 = sshll.u32 (%p33_p3), %s877_s22, 4  ;;  %s776_s29 = sshll.u32 (%p33_p3), %s184_s27, 6 }
  0x11   : > { %s189_s7 = scalar_lea.vmem (%p33_p3), %s1145_s0, %s793_s28  ;;  %s186_s8 = scalar_lea.vmem (%p33_p3), [#allocation3], %s776_s29 }
  0x12   : > { %v202_v1 = vld [vmem:[%s189_s7] sm:$0xff] (%p33_p3)  ;;  %v204_v2 = vld [vmem:[%s189_s7 + $0x8] sm:$0xff] (%p33_p3) }
  0x13   : > { %v206_v3 = vld [vmem:[%s189_s7 + $0x40] sm:$0xff] (%p33_p3)  ;;  %203 = vst [vmem:[%s186_s8] sm:$0xff] (%p33_p3), %v202_v1  ;;  %205 = vst [vmem:[%s186_s8 + $0x8] sm:$0xff] (%p33_p3), %v204_v2  ;;  %v208_v4 = vld [vmem:[%s189_s7 + $0x48] sm:$0xff] (%p33_p3) }
  0x14   : > { %207 = vst [vmem:[%s186_s8 + $0x10] sm:$0xff] %v206_v3  ;;  %v210_v5 = vld [vmem:[%s189_s7 + $0x80] sm:$0xff]  ;;  %v212_v6 = vld [vmem:[%s189_s7 + $0x88] sm:$0xff]  ;;  %209 = vst [vmem:[%s186_s8 + $0x18] sm:$0xff] %v208_v4 }
  0x15   : > { %211 = vst [vmem:[%s186_s8 + $0x20] sm:$0xff] %v210_v5  ;;  %213 = vst [vmem:[%s186_s8 + $0x28] sm:$0xff] %v212_v6  ;;  %v214_v7 = vld [vmem:[%s189_s7 + $0xc0] sm:$0xff]  ;;  %v216_v8 = vld [vmem:[%s189_s7 + $0xc8] sm:$0xff] }
  0x16   : > { %215 = vst [vmem:[%s186_s8 + $0x30] sm:$0xff] %v214_v7  ;;  %217 = vst [vmem:[%s186_s8 + $0x38] sm:$0xff] %v216_v8 }
  0x17 PF: > { %p779_p5 = scmp.ge.s32.totalorder %s877_s22, 1  ;;  %p222_p6 = scmp.lt.s32.totalorder %s877_s22, 5 }
  0x19   : > { %p223_p7 = pnand %p779_p5, %p222_p6 }
  0x1a   : > { %s229_s9 = sand.u32 (!%p223_p7), 1, %s869_s20   ;;  %s781_s29 = sshll.u32 (!%p223_p7), %s772_s4, 1 }
  0x1b   : > { %226 = sbr.rel (%p223_p7) target bundleno = 518 (0x206), region = 59  ;;  %s780_s10 = sshll.u32 (!%p223_p7), %s229_s9, 6 }
  0x1c   : > { %s231_s13 = scalar_lea.vmem (!%p223_p7), [#allocation3], %s780_s10  ;;  %p257_p8 = scmp.lt.s32.totalorder (!%p223_p7), %s781_s29, 7 }
  0x20   : > { %v879_v9 = vmov 0.0   ;;  %v880_v10 = vmov 0   ;;  %v282_v11 = vld [vmem:[%s1147_s2 + $0x28] sm:$0xff]  ;;  %v276_v12 = vld [vmem:[%s231_s13 + $0x38] sm:$0xff]  ;;  %v275_v13 = vld [vmem:[%s231_s13 + $0x30] sm:$0xff]  ;;  %vm325_vm0 = vcmask 261120  }
  0x21   : > { %414 = vmatprep.mubr.f32.mxu0 %v879_v9  ;;  %686 = vmatprep.mubr.f32.mxu1 %v879_v9  ;;  %v274_v14 = vld [vmem:[%s231_s13 + $0x28] sm:$0xff]  ;;  %v273_v15 = vld [vmem:[%s231_s13 + $0x20] sm:$0xff]  ;;  %v272_v16 = vld [vmem:[%s231_s13 + $0x18] sm:$0xff]  ;;  %vm618_vm1 = vcmask 523264   ;;  %s1155_s29 = smov (!%p257_p8, %s781_s29), 7 }
  0x22   : > { %822 = vset.pattern.permute.xlu1 %v880_v10  ;;  %821 = vset.pattern.permute.xlu0 %v880_v10  ;;  %v284_v17 = vld [vmem:[%s1147_s2 + $0x38] sm:$0xff]  ;;  %v281_v19 = vld [vmem:[%s1147_s2 + $0x20] sm:$0xff]  ;;  %v270_v20 = vld [vmem:[%s231_s13 + $0x8] sm:$0xff]  ;;  %s259_s7 = scalar_lea.vmem %s1150_s5, %s1155_s29 }
  0x23   : > { %312 = vperm.xlu1 %822, %v282_v11   ;;  %374 = vmatprep.subr.mxu0 %v276_v12  ;;  %v271_v18 = vld [vmem:[%s231_s13 + $0x10] sm:$0xff]  ;;  %v269_v22 = vld [vmem:[%s231_s13] sm:$0xff]  ;;  %v608_v30 = vld [vmem:[#allocation2] sm:$0x1] }
  0x24   : > { %375 = vmatpush1.msra.mxu0 %v275_v13  ;;  %322 = vperm.xlu0 %821, %v284_v17   ;;  %v283_v21 = vld [vmem:[%s1147_s2 + $0x30] sm:$0xff]  ;;  %v261_v24 = vld [vmem:[%s1146_s1] sm:$0xff]  ;;  %v280_v25 = vld [vmem:[%s1147_s2 + $0x18] sm:$0xff] }
  0x25   : > { %376 = vmatprep.subr.mxu0 %v274_v14  ;;  %v279_v23 = vld [vmem:[%s1147_s2 + $0x10] sm:$0xff]  ;;  %v277_v26 = vld [vmem:[%s1147_s2] sm:$0xff]  ;;  %v262_v27 = vld [vmem:[%s1146_s1 + $0x8] sm:$0xff] }
  0x26   : > { %377 = vmatpush1.msra.mxu0 %v273_v15  ;;  %v278_v28 = vld [vmem:[%s1147_s2 + $0x8] sm:$0xff]  ;;  %v263_v29 = vld [vmem:[%s1146_s1 + $0x10] sm:$0xff]  ;;  %v264_v31 = vld [vmem:[%s1146_s1 + $0x18] sm:$0xff] }
  0x27   : > { %307 = vperm.xlu1 %822, %v281_v19   ;;  %378 = vmatprep.subr.mxu0 %v272_v16  ;;  %v265_v32 = vld [vmem:[%s1146_s1 + $0x20] sm:$0xff]  ;;  %v266_v33 = vld [vmem:[%s1146_s1 + $0x28] sm:$0xff]  ;;  %v267_v34 = vld [vmem:[%s1146_s1 + $0x30] sm:$0xff] }
  0x28   : > { %379 = vmatpush1.msra.mxu0 %v271_v18  ;;  %317 = vperm.xlu0 %821, %v283_v21   ;;  %v268_v35 = vld [vmem:[%s1146_s1 + $0x38] sm:$0xff] }
  0x29   : > { %380 = vmatprep.subr.mxu0 %v270_v20 }
  0x2a   : > { %381 = vmatpush1.msra.mxu0 %v269_v22 }
  0x2b   : > { %297 = vperm.xlu1 %822, %v279_v23   ;;  %782 = vmatmul.mubr.msk.f32.vlgmr.msra.gmra.mxu0 %vm325_vm0, %v261_v24 }
  0x2c   : > { %420 = vmatprep.mubr.f32.mxu0 %v879_v9  ;;  %302 = vperm.xlu0 %821, %v280_v25  }
  0x2f   : > { %287 = vperm.xlu1 %822, %v277_v26   ;;  %783 = vmatmul.mubr.msk.f32.gmra.mxu0 %vm325_vm0, %v262_v27 }
  0x30   : > { %426 = vmatprep.mubr.f32.mxu0 %v879_v9  ;;  %292 = vperm.xlu0 %821, %v278_v28  }
  0x33   : > { %784 = vmatmul.mubr.msk.f32.gmra.mxu0 %vm325_vm0, %v263_v29 }
  0x34   : > { %432 = vmatprep.mubr.f32.mxu0 %v879_v9  ;;  %611 = vperm.xlu0 %821, %v608_v30  }
  0x37   : > { %785 = vmatmul.mubr.msk.f32.gmra.mxu0 %vm325_vm0, %v264_v31 }
  0x38   : > { %438 = vmatprep.mubr.f32.mxu0 %v879_v9 }
  0x3b   : > { %786 = vmatmul.mubr.msk.f32.gmra.mxu0 %vm325_vm0, %v265_v32 }
  0x3c   : > { %444 = vmatprep.mubr.f32.mxu0 %v879_v9 }
  0x3f   : > { %787 = vmatmul.mubr.msk.f32.gmra.mxu0 %vm325_vm0, %v266_v33 }
  0x40   : > { %450 = vmatprep.mubr.f32.mxu0 %v879_v9 }
  0x43   : > { %788 = vmatmul.mubr.msk.f32.gmra.mxu0 %vm325_vm0, %v267_v34 }
  0x44   : > { %456 = vmatprep.mubr.f32.mxu0 %v879_v9 }
  0x47   : > { %789 = vmatmul.mubr.msk.f32.gmra.mxu0 %vm325_vm0, %v268_v35 }
  0x9e   : > { %v313_v37 = vpop.permute.xlu1 %312 }
  0x9f   : > { %v1008_v36 = vpop.permute.xlu0 %322 }
  0xa2   : > { %v308_v40 = vpop.permute.xlu1 %307 }
  0xa3   : > { %v318_v38 = vpop.permute.xlu0 %317 }
  0xa6   : > { %v298_v45 = vpop.permute.xlu1 %297 }
  0xa7   : > { %v303_v43 = vpop.permute.xlu0 %302 }
  0xaa   : > { %v288_v50 = vpop.permute.xlu1 %287 }
  0xab   : > { %v293_v48 = vpop.permute.xlu0 %292 }
  0xeb   : > { %v416_v39 = vpop.f32.mrf.mxu0 }
  0xec   : > { %v1014_v54 = vadd.f32 %v416_v39, %v288_v50 }
  0xed   : > { %v418_v41 = vpop.f32.mrf.mxu0 }
  0xee   : > { %v1010_v51 = vadd.f32 %v418_v41, %v288_v50  ;;  %v463_v62 = vmul.f32 %v1014_v54, %v1014_v54 }
  0xef   : > { %v422_v42 = vpop.f32.mrf.mxu0 }
  0xf0   : > { %v1012_v52 = vadd.f32 %v422_v42, %v293_v48  ;;  %v464_v56 = vmul.f32 %v1010_v51, %v1010_v51  ;;  %v479_v16 = vmul.f32 %v463_v62, %v1014_v54 }
  0xf1   : > { %v424_v44 = vpop.f32.mrf.mxu0 }
  0xf2   : > { %v465_v57 = vmul.f32 %v1012_v52, %v1012_v52  ;;  %v1020_v58 = vadd.f32 %v424_v44, %v293_v48  ;;  %v480_v5 = vmul.f32 %v464_v56, %v1010_v51 }
  0xf3   : > { %v428_v46 = vpop.f32.mrf.mxu0 }
  0xf4   : > { %v1030_v1 = vadd.f32 %v428_v46, %v298_v45  ;;  %v481_v6 = vmul.f32 %v465_v57, %v1012_v52  ;;  %v466_v7 = vmul.f32 %v1020_v58, %v1020_v58  ;;  %v1058_v20 = vmul.f32 0.044715, %v480_v5 }
  0xf5   : > { %v430_v47 = vpop.f32.mrf.mxu0 }
  0xf6   : > { %v1042_v9 = vadd.f32 %v430_v47, %v298_v45  ;;  %v467_v17 = vmul.f32 %v1030_v1, %v1030_v1  ;;  %v497_v25 = vmul.f32 0.044715, %v481_v6  ;;  %v482_v26 = vmul.f32 %v466_v7, %v1020_v58 }
  0xf7   : > { %v434_v49 = vpop.f32.mrf.mxu0 }
  0xf8   : > { %v1022_v60 = vadd.f32 %v434_v49, %v303_v43  ;;  %v468_v27 = vmul.f32 %v1042_v9, %v1042_v9  ;;  %v483_v34 = vmul.f32 %v467_v17, %v1030_v1  ;;  %v498_v5 = vmul.f32 0.044715, %v482_v26 }
  0xf9   : > { %v436_v53 = vpop.f32.mrf.mxu0 }
  0xfa   : > { %v1032_v2 = vadd.f32 %v436_v53, %v303_v43  ;;  %v469_v10 = vmul.f32 %v1022_v60, %v1022_v60 }
  0xfb   : > { %v440_v55 = vpop.f32.mrf.mxu0 }
  0xfc   : > { %v1028_v63 = vadd.f32 %v440_v55, %v308_v40  ;;  %v470_v18 = vmul.f32 %v1032_v2, %v1032_v2  ;;  %v485_v28 = vmul.f32 %v469_v10, %v1022_v60  ;;  %v499_v10 = vmul.f32 0.044715, %v483_v34 }
  0xfd   : > { %v442_v59 = vpop.f32.mrf.mxu0 }
  0xfe   : > { %v1024_v61 = vadd.f32 %v442_v59, %v308_v40  ;;  %v471_v13 = vmul.f32 %v1028_v63, %v1028_v63  ;;  %v486_v35 = vmul.f32 %v470_v18, %v1032_v2  ;;  %v501_v45 = vmul.f32 0.044715, %v485_v28 }
  0xff   : > { %v446_v0 = vpop.f32.mrf.mxu0  ;;  %v495_v28 = vmul.f32 0.044715, %v479_v16 }
 0x100   : > { %v472_v3 = vmul.f32 %v1024_v61, %v1024_v61  ;;  %v1036_v4 = vadd.f32 %v446_v0, %v313_v37  ;;  %v487_v29 = vmul.f32 %v471_v13, %v1028_v63  ;;  %v502_v55 = vmul.f32 0.044715, %v486_v35 }
 0x101   : > { %v448_v8 = vpop.f32.mrf.mxu0  ;;  %v513_v35 = vadd.f32 %v497_v25, %v1012_v52  ;;  %v511_v16 = vadd.f32 %v495_v28, %v1014_v54 }
 0x102   : > { %v488_v11 = vmul.f32 %v472_v3, %v1024_v61  ;;  %v473_v12 = vmul.f32 %v1036_v4, %v1036_v4  ;;  %v1051_v14 = vadd.f32 %v448_v8, %v313_v37  ;;  %v503_v48 = vmul.f32 0.044715, %v487_v29 }
 0x103   : > { %v452_v15 = vpop.f32.mrf.mxu0  ;;  %v515_v29 = vadd.f32 %v499_v10, %v1030_v1 }
 0x104   : > { %v504_v19 = vmul.f32 0.044715, %v488_v11  ;;  %v489_v21 = vmul.f32 %v473_v12, %v1036_v4  ;;  %v474_v22 = vmul.f32 %v1051_v14, %v1051_v14  ;;  %v1063_v23 = vadd.f32 %v452_v15, %v318_v38 }
 0x105   : > { %v454_v24 = vpop.f32.mrf.mxu0  ;;  %v519_v11 = vadd.f32 %v503_v48, %v1028_v63  ;;  %v518_v15 = vadd.f32 %v502_v55, %v1032_v2 }
 0x106   : > { %v490_v30 = vmul.f32 %v474_v22, %v1051_v14  ;;  %v475_v31 = vmul.f32 %v1063_v23, %v1063_v23  ;;  %v1073_v32 = vadd.f32 %v454_v24, %v318_v38  ;;  %v520_v37 = vadd.f32 %v504_v19, %v1024_v61 }
 0x107   : > { %v458_v33 = vpop.f32.mrf.mxu0  ;;  %v505_v40 = vmul.f32 0.044715, %v489_v21  ;;  %v484_v38 = vmul.f32 %v468_v27, %v1042_v9  ;;  %v517_v19 = vadd.f32 %v501_v45, %v1022_v60  ;;  %v527_v45 = vmul.f32 0.7978846, %v511_v16 }
 0x108   : > { %v1079_v39 = vadd.f32 %v458_v33, %v1008_v36  ;;  %v506_v41 = vmul.f32 0.044715, %v490_v30  ;;  %v491_v42 = vmul.f32 %v475_v31, %v1063_v23  ;;  %v476_v43 = vmul.f32 %v1073_v32, %v1073_v32 }
 0x109   : > { %v460_v44 = vpop.f32.mrf.mxu0  ;;  %v536_v56 = vmul.f32 0.7978846, %v520_v37  ;;  %v521_v62 = vadd.f32 %v505_v40, %v1036_v4  ;;  %v500_v6 = vmul.f32 0.044715, %v484_v38  ;;  %v535_v30 = vmul.f32 0.7978846, %v519_v11 }
 0x10a   : > { %v477_v46 = vmul.f32 %v1079_v39, %v1079_v39  ;;  %v1088_v47 = vadd.f32 %v460_v44, %v1008_v36  ;;  %v522_v49 = vadd.f32 %v506_v41, %v1051_v14  ;;  %v507_v50 = vmul.f32 0.044715, %v491_v42 }
 0x10b   : > { %v492_v53 = vmul.f32 %v476_v43, %v1073_v32  ;;  %823 = vtanh.f32 %v536_v56  ;;  %v537_v21 = vmul.f32 0.7978846, %v521_v62  ;;  %v516_v24 = vadd.f32 %v500_v6, %v1042_v9 }
 0x10c   : > { %v493_v57 = vmul.f32 %v477_v46, %v1079_v39  ;;  %v478_v59 = vmul.f32 %v1088_v47, %v1088_v47  ;;  %v538_v0 = vmul.f32 0.7978846, %v522_v49  ;;  %v523_v3 = vadd.f32 %v507_v50, %v1063_v23 }
 0x10d   : > { %v508_v36 = vmul.f32 0.044715, %v492_v53  ;;  %v514_v31 = vadd.f32 %v498_v5, %v1020_v58  ;;  %v534_v33 = vmul.f32 0.7978846, %v518_v15  ;;  %v533_v37 = vmul.f32 0.7978846, %v517_v19 }
 0x10e   : > { %v509_v7 = vmul.f32 0.044715, %v493_v57  ;;  %v494_v8 = vmul.f32 %v478_v59, %v1088_v47  ;;  %v539_v12 = vmul.f32 0.7978846, %v523_v3  ;;  %825 = vtanh.f32 %v538_v0 }
 0x10f   : > { %v524_v13 = vadd.f32 %v508_v36, %v1073_v32  ;;  %v512_v40 = vadd.f32 %v1058_v20, %v1010_v51  ;;  %v532_v41 = vmul.f32 0.7978846, %v516_v24  ;;  %v531_v42 = vmul.f32 0.7978846, %v515_v29 }
 0x110   : > { %v510_v17 = vmul.f32 0.044715, %v494_v8  ;;  %v525_v18 = vadd.f32 %v509_v7, %v1079_v39  ;;  %827 = vtanh.f32 %v539_v12  ;;  %v530_v43 = vmul.f32 0.7978846, %v514_v31 }
 0x111   : > { %v540_v22 = vmul.f32 0.7978846, %v524_v13  ;;  %v529_v44 = vmul.f32 0.7978846, %v513_v35  ;;  %v528_v38 = vmul.f32 0.7978846, %v512_v40 }
 0x112   : > { %v526_v26 = vadd.f32 %v510_v17, %v1088_v47  ;;  %v541_v27 = vmul.f32 0.7978846, %v525_v18 }
 0x113   : > { %829 = vtanh.f32 %v540_v22 }
 0x114   : > { %v542_v34 = vmul.f32 0.7978846, %v526_v26  ;;  %831 = vtanh.f32 %v541_v27 }
 0x115   : > { %833 = vtanh.f32 %v537_v21 }
 0x116   : > { %835 = vtanh.f32 %v542_v34 }
 0x117   : > { %837 = vtanh.f32 %v535_v30 }
 0x118   : > { %839 = vtanh.f32 %v534_v33  ;;  %v824_v25 = vpop.eup %823 }
 0x119   : > { %841 = vtanh.f32 %v533_v37  ;;  %v568_v10 = vadd.f32 1.0, %v824_v25 }
 0x11a   : > { %843 = vtanh.f32 %v532_v41 }
 0x11b   : > { %845 = vtanh.f32 %v531_v42  ;;  %v826_v46 = vpop.eup %825  ;;  %v584_v29 = vmul.f32 0.5, %v568_v10 }
 0x11c   : > { %847 = vtanh.f32 %v530_v43  ;;  %v570_v0 = vadd.f32 1.0, %v826_v46 }
 0x11d   : > { %849 = vtanh.f32 %v529_v44  ;;  %v828_v20 = vpop.eup %827 }
 0x11e   : > { %851 = vtanh.f32 %v528_v38  ;;  %v571_v57 = vadd.f32 1.0, %v828_v20  ;;  %v586_v18 = vmul.f32 0.5, %v570_v0 }
 0x11f   : > { %853 = vtanh.f32 %v527_v45 }
 0x120   : > { %v830_v48 = vpop.eup %829  ;;  %v587_v12 = vmul.f32 0.5, %v571_v57  ;;  %v602_v37 = vmul.f32 %v586_v18, %v1051_v14 }
 0x121   : > { %v832_v49 = vpop.eup %831  ;;  %v572_v55 = vadd.f32 1.0, %v830_v48 }
 0x122   : > { %v834_v50 = vpop.eup %833  ;;  %v573_v53 = vadd.f32 1.0, %v832_v49  ;;  %v603_v33 = vmul.f32 %v587_v12, %v1063_v23 }
 0x123   : > { %v836_v56 = vpop.eup %835  ;;  %v569_v5 = vadd.f32 1.0, %v834_v50  ;;  %v588_v8 = vmul.f32 0.5, %v572_v55 }
 0x124   : > { %v838_v59 = vpop.eup %837  ;;  %v574_v62 = vadd.f32 1.0, %v836_v56  ;;  %v589_v36 = vmul.f32 0.5, %v573_v53  ;;  %v881_v53 = vmov 1966171168  }
 0x125   : > { %v840_v3 = vpop.eup %839  ;;  %v567_v13 = vadd.f32 1.0, %v838_v59  ;;  %v585_v24 = vmul.f32 0.5, %v569_v5  ;;  %v604_v28 = vmul.f32 %v588_v8, %v1073_v32  ;;  %v600_v32 = vmul.f32 %v584_v29, %v1024_v61 }
 0x126   : > { %v842_v6 = vpop.eup %841  ;;  %v590_v7 = vmul.f32 0.5, %v574_v62  ;;  %v566_v19 = vadd.f32 1.0, %v840_v3  ;;  %v605_v22 = vmul.f32 %v589_v36, %v1079_v39  ;;  %v697_v55 = vunpack.c.l.s4 %v881_v53 }
 0x127   : > { %v844_v11 = vpop.eup %843  ;;  %v565_v26 = vadd.f32 1.0, %v842_v6  ;;  %v583_v34 = vmul.f32 0.5, %v567_v13  ;;  %v601_v41 = vmul.f32 %v585_v24, %v1036_v4 }
 0x128   : > { %v846_v15 = vpop.eup %845  ;;  %v606_v17 = vmul.f32 %v590_v7, %v1088_v47  ;;  %v564_v30 = vadd.f32 1.0, %v844_v11  ;;  %v582_v40 = vmul.f32 0.5, %v566_v19 }
 0x129   : > { %v848_v21 = vpop.eup %847  ;;  %v563_v35 = vadd.f32 1.0, %v846_v15  ;;  %v581_v16 = vmul.f32 0.5, %v565_v26  ;;  %v599_v23 = vmul.f32 %v583_v34, %v1028_v63 }
 0x12a   : > { %v850_v27 = vpop.eup %849  ;;  %638 = vmatprep.subr.mxu1 %v606_v17  ;;  %v562_v39 = vadd.f32 1.0, %v848_v21  ;;  %v580_v43 = vmul.f32 0.5, %v564_v30  ;;  %v598_v14 = vmul.f32 %v582_v40, %v1032_v2 }
 0x12b   : > { %v852_v31 = vpop.eup %851  ;;  %639 = vmatpush1.msra.mxu1 %v605_v22  ;;  %v561_v42 = vadd.f32 1.0, %v850_v27  ;;  %v579_v38 = vmul.f32 0.5, %v563_v35  ;;  %v597_v46 = vmul.f32 %v581_v16, %v1022_v60 }
 0x12c   : > { %v854_v47 = vpop.eup %853  ;;  %640 = vmatprep.subr.mxu1 %v604_v28  ;;  %v560_v44 = vadd.f32 1.0, %v852_v31  ;;  %v578_v25 = vmul.f32 0.5, %v562_v39  ;;  %v596_v20 = vmul.f32 %v580_v43, %v1042_v9  ;;  %v607_v9 = vld [vmem:[%s1148_s3] sm:$0x1] }
 0x12d   : > { %641 = vmatpush1.msra.mxu1 %v603_v33  ;;  %v559_v45 = vadd.f32 1.0, %v854_v47  ;;  %v577_v4 = vmul.f32 0.5, %v561_v42  ;;  %v595_v61 = vmul.f32 %v579_v38, %v1030_v1  ;;  %v614_v1 = vlaneseq }
 0x12e   : > { %642 = vmatprep.subr.mxu1 %v602_v37  ;;  %v576_v48 = vmul.f32 0.5, %v560_v44  ;;  %v594_v63 = vmul.f32 %v578_v25, %v1020_v58 }
 0x12f   : > { %643 = vmatpush1.msra.mxu1 %v601_v41  ;;  %v575_v49 = vmul.f32 0.5, %v559_v45  ;;  %v593_v2 = vmul.f32 %v577_v4, %v1012_v52  ;;  %v615_v58 = vshrl.u32 %v614_v1, 7  ;;  %v612_v52 = vpop.permute.xlu0 %611  ;;  %vm713_vm2 = vcmp.lt.s32.totalorder %v614_v1, 256 }
 0x130   : > { %644 = vmatprep.subr.mxu1 %v600_v32  ;;  %v592_v50 = vmul.f32 %v576_v48, %v1010_v51  ;;  %v698_v51 = vunpack.c.0.s8 %v697_v55 }
 0x131   : > { %645 = vmatpush1.msra.mxu1 %v599_v23  ;;  %v591_v60 = vmul.f32 %v575_v49, %v1014_v54  ;;  %v616_v56 = vsub.s32 0, %v615_v58 }
 0x132   : > { %646 = vmatprep.subr.mxu1 %v598_v14  ;;  %v701_v3 = vsub.s32 %v698_v51, %v615_v58 }
 0x133   : > { %647 = vmatpush1.msra.mxu1 %v597_v46  ;;  %v617_v54 = vrot.slane %v612_v52, %v616_v56 }
 0x134   : > { %648 = vmatprep.subr.mxu1 %v596_v20 }
 0x135   : > { %649 = vmatpush1.msra.mxu1 %v595_v61 }
 0x136   : > { %650 = vmatprep.subr.mxu1 %v594_v63 }
 0x137   : > { %651 = vmatpush1.msra.mxu1 %v593_v2 }
 0x138   : > { %652 = vmatprep.subr.mxu1 %v592_v50 }
 0x139   : > { %653 = vmatpush1.msra.mxu1 %v591_v60 }
 0x13a   : > { %790 = vmatmul.mubr.msk.f32.vlgmr.msra.gmra.mxu1 %vm618_vm1, %v607_v9 }
 0x1fa   : > { %v688_v57 = vpop.f32.mrf.mxu1 }
 0x1fb   : > { %v689_v62 = vadd.f32 %v688_v57, %v617_v54 }
 0x1fc   : > { %v690_v59 = vpop.f32.mrf.mxu1 }
 0x1fd   : > { %v691_v0 = vadd.f32 %v690_v59, %v617_v54 }
 0x1ff   : > { %v695_v36 = vcombine.low %v689_v62, %v691_v0 }
 0x201   : > { %v702_v5 = vrot.slane %v695_v36, %v701_v3 }
 0x203   : > { %v709_v6 = vrot.slane %v702_v5, %v701_v3 }
 0x205   : > { %715 = vst.msk [vmem:[%s259_s7] sm:$0x3] %vm713_vm2, %v709_v6 }
 0x206 PF: > { %p14_p9 = scmp.ge.s32.totalorder %s932_s23, 6   ;;  %s1151_s20 = smov %s873_s21 }
 0x207   : > { %s1152_s21 = smov %s941_s26  ;;  %s1153_s22 = smov %s932_s23 }
 0x208   :  { %16 = sbr.rel (!%p14_p9) target bundleno = 5 (0x5), region = 98 }

</bundles_post_ra>
